<compile_context>
chip_gen: v5e
topology: v5e:2x2
jax: 0.10.0
libtpu: 0.0.40
codegen_flags: <defaults>
</compile_context>

<pallas_src>
import functools

import jax
import jax.numpy as jnp
from jax.experimental import pallas as pl
from jax.experimental.pallas import tpu as pltpu

NEG_SLOPE = 0.01   # nn.LeakyReLU default negative_slope
LN_EPS = 1e-5      # nn.LayerNorm default eps


def _round_up(v, m):
    return (v + m - 1) // m * m


def _leaky_relu(x):
    return jnp.where(x > 0, x, NEG_SLOPE * x)


# ---------------------------------------------------------------------------
# Kernel
# ---------------------------------------------------------------------------
def _deepset_kernel(x_ref, *refs, set_size, set_pad):
    """refs = 10 weight refs, 10 bias refs, output ref.

    x_ref:   (tile_b * set_pad, D_in)  f32 activation tile
    out_ref: (tile_b, OUT_PAD)         f32 output tile (lane-dense)
    LN affines and the 1/set_size pool scale are pre-folded into the
    weights/biases by the wrapper.
    """
    out_ref = refs[-1]
    w = refs[:10]
    b = refs[10:20]

    def linear(h, k):
        wk = w[k][...]
        y = jnp.dot(h.astype(wk.dtype), wk, preferred_element_type=jnp.float32)
        return y + b[k][...]

    def ln_normalize(y):
        # one-pass variance: the two lane reductions are independent
        mu = jnp.mean(y, axis=-1, keepdims=True)
        ex2 = jnp.mean(y * y, axis=-1, keepdims=True)
        var = jnp.maximum(ex2 - mu * mu, 0.0)
        return (y - mu) * jax.lax.rsqrt(var + LN_EPS)

    h = x_ref[...]                                     # (tile_b*set_pad, D_in)

    # ---- encoder: 4 x (Linear -> LeakyReLU -> LN normalize) + Linear ----
    for k in range(4):
        h = ln_normalize(_leaky_relu(linear(h, k)))
    h = linear(h, 4)                                   # (tile_b*set_pad, H)

    # ---- mean over the set: reshape + sublane-group sum (1/N is in W5) ----
    hdim = h.shape[-1]
    tile_b = h.shape[0] // set_pad
    h = h.reshape(tile_b, set_pad, hdim)               # layout-free (set_pad % 8 == 0)
    if set_pad != set_size:
        pos = jax.lax.broadcasted_iota(jnp.int32, h.shape, 1)
        h = jnp.where(pos < set_size, h, 0.0)
    h = jnp.sum(h, axis=1)                             # (tile_b, H)

    # ---- decoder: 4 x (Linear -> LeakyReLU -> LN normalize) + Linear ----
    for k in range(5, 9):
        h = ln_normalize(_leaky_relu(linear(h, k)))
    out_ref[...] = linear(h, 9).astype(out_ref.dtype)


# ---------------------------------------------------------------------------
# Parameters (PyTorch layer order) and wrapper-side folding
# ---------------------------------------------------------------------------
def init_params(key, dim_input, num_outputs, dim_output, dim_hidden):
    """Deterministic synthetic parameters, stored as (in, out) weights.
    LN affines are non-trivial so the wrapper-side folding is exercised."""
    def linear(k, din, dout):
        kw, kb = jax.random.split(k)
        W = jax.random.normal(kw, (din, dout), jnp.float32) / jnp.sqrt(din)
        b = 0.01 * jax.random.normal(kb, (1, dout), jnp.float32)
        return W, b

    def ln(k, dout):
        kg, kt = jax.random.split(k)
        g = 1.0 + 0.1 * jax.random.normal(kg, (1, dout), jnp.float32)
        t = 0.05 * jax.random.normal(kt, (1, dout), jnp.float32)
        return g, t

    keys = jax.random.split(key, 20)
    flat = []
    din = dim_input
    for j in range(4):                                  # encoder LN blocks
        W, b = linear(keys[j], din, dim_hidden)
        g, t = ln(keys[10 + j], dim_hidden)
        flat += [W, b, g, t]
        din = dim_hidden
    W, b = linear(keys[4], dim_hidden, dim_hidden)      # encoder final Linear
    flat += [W, b]
    for j in range(4):                                  # decoder LN blocks
        W, b = linear(keys[5 + j], dim_hidden, dim_hidden)
        g, t = ln(keys[14 + j], dim_hidden)
        flat += [W, b, g, t]
    W, b = linear(keys[9], dim_hidden, num_outputs * dim_output)
    flat += [W, b]
    return tuple(flat)


def _fold_params(params, set_size, out_dim, out_pad, matmul_dtype):
    """Fold LN affines into the following Linear, 1/set_size into the first
    decoder Linear, pad the last Linear's output dim (lane-dense), and cast
    weights to the matmul dtype (biases stay f32)."""
    p = list(params)
    linears, ln_after = [], []
    idx = 0
    for _ in range(4):                                  # encoder LN blocks
        linears.append((p[idx], p[idx + 1]))
        ln_after.append((p[idx + 2], p[idx + 3]))
        idx += 4
    linears.append((p[idx], p[idx + 1])); ln_after.append(None); idx += 2
    for _ in range(4):                                  # decoder LN blocks
        linears.append((p[idx], p[idx + 1]))
        ln_after.append((p[idx + 2], p[idx + 3]))
        idx += 4
    linears.append((p[idx], p[idx + 1])); ln_after.append(None)

    Ws, bs = [], []
    prev_ln = None
    for k, (W, b) in enumerate(linears):
        W = W.astype(jnp.float32)
        b = b.astype(jnp.float32)
        if prev_ln is not None:
            g, t = prev_ln                              # LN out = z*g + t
            b = b + t @ W                               # (1,H) @ (H,out)
            W = g.reshape(-1, 1) * W
        if k == 5:                                      # first decoder Linear
            W = W * (1.0 / set_size)                    # fold mean-pool scale
        prev_ln = ln_after[k]
        Ws.append(W)
        bs.append(b)

    if out_pad != out_dim:                              # lane-dense output
        Wl, bl = Ws[-1], bs[-1]
        Ws[-1] = jnp.concatenate(
            [Wl, jnp.zeros((Wl.shape[0], out_pad - out_dim), Wl.dtype)], axis=1)
        bs[-1] = jnp.concatenate(
            [bl, jnp.zeros((1, out_pad - out_dim), bl.dtype)], axis=1)

    Ws = [w.astype(matmul_dtype) for w in Ws]
    bs = [bb.astype(jnp.float32) for bb in bs]
    return Ws, bs


# ---------------------------------------------------------------------------
# Forward wrapper
# ---------------------------------------------------------------------------
def deepset_original_forward(x, params, num_outputs, dim_output, *,
                             tile_b=None, matmul_dtype=jnp.bfloat16):
    """x: (B, N, dim_input) float32."""
    B, N, D_in = x.shape
    out_dim = num_outputs * dim_output
    out_pad = _round_up(out_dim, 128)
    N_pad = _round_up(N, 8)                 # layout-free in-kernel reshape

    # Batch tile: ~1024 encoder rows per step; keep >= 2 grid steps when the
    # batch allows it (v7x dual-TensorCore sharding via "parallel").
    if tile_b is None:
        tile_b = max(1, 1024 // N_pad)
        if B >= 16:
            tile_b = min(tile_b, -(-B // 2))
        else:
            tile_b = min(tile_b, B)
    tile_b = max(8, _round_up(tile_b, 8))
    if tile_b >= 32:
        tile_b = _round_up(tile_b, 32)      # rows multiple of 256 (v6e/v7x MXU)
    B_pad = _round_up(B, tile_b)

    xp = x.astype(jnp.float32)
    if B_pad != B or N_pad != N:
        xp = jnp.pad(xp, ((0, B_pad - B), (0, N_pad - N), (0, 0)))
    x_flat = xp.reshape(B_pad * N_pad, D_in)

    Ws, bs = _fold_params(params, N, out_dim, out_pad, matmul_dtype)
    flat_params = Ws + bs                   # 10 weights then 10 biases

    grid = (B_pad // tile_b,)
    x_spec = pl.BlockSpec((tile_b * N_pad, D_in), lambda i: (i, 0))
    out_spec = pl.BlockSpec((tile_b, out_pad), lambda i: (i, 0))
    kernel = functools.partial(_deepset_kernel, set_size=N, set_pad=N_pad)
    cparams = pltpu.CompilerParams(
        dimension_semantics=("parallel",),
        vmem_limit_bytes=32 * 1024 * 1024)

    def run(single_buffer_params):
        if single_buffer_params:
            w_specs = [pl.BlockSpec(a.shape, lambda i: (0, 0),
                                    pipeline_mode=pl.Buffered(1))
                       for a in flat_params]
        else:
            w_specs = [pl.BlockSpec(a.shape, lambda i: (0, 0))
                       for a in flat_params]
        return pl.pallas_call(
            kernel,
            out_shape=jax.ShapeDtypeStruct((B_pad, out_pad), jnp.float32),
            grid=grid,
            in_specs=[x_spec] + w_specs,
            out_specs=out_spec,
            compiler_params=cparams,
        )(x_flat, *flat_params)

    try:
        out = run(True)                     # constant-index params: single-buffered
    except Exception:
        out = run(False)                    # fallback if pipeline_mode unsupported

    out = out[:B, :out_dim].reshape(-1, num_outputs, dim_output)
    if num_outputs == 1:                    # matches torch .squeeze(1)
        out = jnp.squeeze(out, axis=1)
    return out


# ---------------------------------------------------------------------------
# Pure-JAX reference (PyTorch semantics, unfolded params)
# ---------------------------------------------------------------------------
def _reference_forward(x, params, num_outputs, dim_output):
    B, N, _ = x.shape
    h = x.reshape(B * N, -1).astype(jnp.float32)

    def ln_block(h, W, b, g, t):
        y = _leaky_relu(h @ W + b)
        mu = jnp.mean(y, axis=-1, keepdims=True)
        var = jnp.mean((y - mu) ** 2, axis=-1, keepdims=True)
        return (y - mu) * jax.lax.rsqrt(var + LN_EPS) * g + t

    i = 0
    for _ in range(4):
        h = ln_block(h, params[i], params[i + 1], params[i + 2], params[i + 3])
        i += 4
    h = h @ params[i] + params[i + 1]; i += 2
    h = h.reshape(B, N, -1).mean(axis=-2)
    for _ in range(4):
        h = ln_block(h, params[i], params[i + 1], params[i + 2], params[i + 3])
        i += 4
    h = h @ params[i] + params[i + 1]
    h = h.reshape(-1, num_outputs, dim_output)
    if num_outputs == 1:
        h = jnp.squeeze(h, axis=1)
    return h


if __name__ == "__main__":
    # Case 1: 32 sets of 8 elements, hidden 128 -> 2 parallel grid steps.
    B, N, dim_input, dim_hidden = 32, 8, 16, 128
    num_outputs, dim_output = 1, 32

    key = jax.random.PRNGKey(0)
    k_x, k_p, k_x2, k_p2 = jax.random.split(key, 4)
    x = jax.random.normal(k_x, (B, N, dim_input), jnp.float32)
    params = init_params(k_p, dim_input, num_outputs, dim_output, dim_hidden)
    ref = _reference_forward(x, params, num_outputs, dim_output)

    # f32 MXU path (tight tolerance).
    out_f32 = jax.block_until_ready(
        deepset_original_forward(x, params, num_outputs, dim_output,
                                 matmul_dtype=jnp.float32))
    assert out_f32.shape == (B, dim_output), out_f32.shape
    assert jnp.allclose(out_f32, ref, rtol=3e-4, atol=3e-4), "f32 mismatch vs reference"

    # Default path: bf16 weights fed straight to the MXU, f32 accumulate/epilogue.
    out_bf16 = jax.block_until_ready(
        deepset_original_forward(x, params, num_outputs, dim_output))
    assert out_bf16.shape == (B, dim_output), out_bf16.shape
    assert jnp.allclose(out_bf16, ref, rtol=1e-1, atol=1e-1), "bf16 mismatch vs reference"

    # Case 2: ragged set size (N=5 -> padded to 8 + masked pool), odd dim_input,
    # num_outputs > 1 (no squeeze).
    B2, N2, D2, H2 = 16, 5, 7, 128
    no2, do2 = 2, 3
    x2 = jax.random.normal(k_x2, (B2, N2, D2), jnp.float32)
    params2 = init_params(k_p2, D2, no2, do2, H2)
    ref2 = _reference_forward(x2, params2, no2, do2)
    out2 = jax.block_until_ready(
        deepset_original_forward(x2, params2, no2, do2, matmul_dtype=jnp.float32))
    assert out2.shape == (B2, no2, do2), out2.shape
    assert jnp.allclose(out2, ref2, rtol=3e-4, atol=3e-4), "ragged-N mismatch vs reference"

    print("KERNEL_OK")
</pallas_src>

<mosaic_0001>
module attributes {stable_mosaic.version = 11 : i64} {
  func.func @_deepset_kernel(%arg0: i32, %arg1: memref<128x16xf32, #tpu.memory_space<vmem>>, %arg2: memref<16x128xf32, #tpu.memory_space<vmem>>, %arg3: memref<128x128xf32, #tpu.memory_space<vmem>>, %arg4: memref<128x128xf32, #tpu.memory_space<vmem>>, %arg5: memref<128x128xf32, #tpu.memory_space<vmem>>, %arg6: memref<128x128xf32, #tpu.memory_space<vmem>>, %arg7: memref<128x128xf32, #tpu.memory_space<vmem>>, %arg8: memref<128x128xf32, #tpu.memory_space<vmem>>, %arg9: memref<128x128xf32, #tpu.memory_space<vmem>>, %arg10: memref<128x128xf32, #tpu.memory_space<vmem>>, %arg11: memref<128x128xf32, #tpu.memory_space<vmem>>, %arg12: memref<1x128xf32, #tpu.memory_space<vmem>>, %arg13: memref<1x128xf32, #tpu.memory_space<vmem>>, %arg14: memref<1x128xf32, #tpu.memory_space<vmem>>, %arg15: memref<1x128xf32, #tpu.memory_space<vmem>>, %arg16: memref<1x128xf32, #tpu.memory_space<vmem>>, %arg17: memref<1x128xf32, #tpu.memory_space<vmem>>, %arg18: memref<1x128xf32, #tpu.memory_space<vmem>>, %arg19: memref<1x128xf32, #tpu.memory_space<vmem>>, %arg20: memref<1x128xf32, #tpu.memory_space<vmem>>, %arg21: memref<1x128xf32, #tpu.memory_space<vmem>>, %arg22: memref<16x128xf32, #tpu.memory_space<vmem>>) attributes {dimension_semantics = [#tpu.dimension_semantics<parallel>], iteration_bounds = array<i64: 2>, scalar_prefetch = 0 : i64, scratch_operands = 0 : i64, tpu.core_type = #tpu.core_type<tc>, window_params = [{transform_indices = @transform_0, window_bounds = array<i64: 128, 16>}, {pipeline_mode = #tpu.pipeline_mode<synchronous>, transform_indices = @transform_1, window_bounds = array<i64: 16, 128>}, {pipeline_mode = #tpu.pipeline_mode<synchronous>, transform_indices = @transform_2, window_bounds = array<i64: 128, 128>}, {pipeline_mode = #tpu.pipeline_mode<synchronous>, transform_indices = @transform_3, window_bounds = array<i64: 128, 128>}, {pipeline_mode = #tpu.pipeline_mode<synchronous>, transform_indices = @transform_4, window_bounds = array<i64: 128, 128>}, {pipeline_mode = #tpu.pipeline_mode<synchronous>, transform_indices = @transform_5, window_bounds = array<i64: 128, 128>}, {pipeline_mode = #tpu.pipeline_mode<synchronous>, transform_indices = @transform_6, window_bounds = array<i64: 128, 128>}, {pipeline_mode = #tpu.pipeline_mode<synchronous>, transform_indices = @transform_7, window_bounds = array<i64: 128, 128>}, {pipeline_mode = #tpu.pipeline_mode<synchronous>, transform_indices = @transform_8, window_bounds = array<i64: 128, 128>}, {pipeline_mode = #tpu.pipeline_mode<synchronous>, transform_indices = @transform_9, window_bounds = array<i64: 128, 128>}, {pipeline_mode = #tpu.pipeline_mode<synchronous>, transform_indices = @transform_10, window_bounds = array<i64: 128, 128>}, {pipeline_mode = #tpu.pipeline_mode<synchronous>, transform_indices = @transform_11, window_bounds = array<i64: 1, 128>}, {pipeline_mode = #tpu.pipeline_mode<synchronous>, transform_indices = @transform_12, window_bounds = array<i64: 1, 128>}, {pipeline_mode = #tpu.pipeline_mode<synchronous>, transform_indices = @transform_13, window_bounds = array<i64: 1, 128>}, {pipeline_mode = #tpu.pipeline_mode<synchronous>, transform_indices = @transform_14, window_bounds = array<i64: 1, 128>}, {pipeline_mode = #tpu.pipeline_mode<synchronous>, transform_indices = @transform_15, window_bounds = array<i64: 1, 128>}, {pipeline_mode = #tpu.pipeline_mode<synchronous>, transform_indices = @transform_16, window_bounds = array<i64: 1, 128>}, {pipeline_mode = #tpu.pipeline_mode<synchronous>, transform_indices = @transform_17, window_bounds = array<i64: 1, 128>}, {pipeline_mode = #tpu.pipeline_mode<synchronous>, transform_indices = @transform_18, window_bounds = array<i64: 1, 128>}, {pipeline_mode = #tpu.pipeline_mode<synchronous>, transform_indices = @transform_19, window_bounds = array<i64: 1, 128>}, {pipeline_mode = #tpu.pipeline_mode<synchronous>, transform_indices = @transform_20, window_bounds = array<i64: 1, 128>}, {transform_indices = @transform_21, window_bounds = array<i64: 16, 128>}]} {
    %c0 = arith.constant 0 : index
    %c0_0 = arith.constant 0 : index
    %0 = vector.load %arg1[%c0, %c0_0] : memref<128x16xf32, #tpu.memory_space<vmem>>, vector<128x16xf32>
    %c0_1 = arith.constant 0 : index
    %c0_2 = arith.constant 0 : index
    %1 = vector.load %arg2[%c0_1, %c0_2] : memref<16x128xf32, #tpu.memory_space<vmem>>, vector<16x128xf32>
    %cst = arith.constant dense<0.000000e+00> : vector<128x128xf32>
    %2 = tpu.matmul %0, %1, %cst {dimension_numbers = #tpu.dot_dimension_numbers<[1], [0], [0], [1], [0, 0, 1, 1], [], []>} : vector<128x16xf32>, vector<16x128xf32>, vector<128x128xf32> -> vector<128x128xf32>
    %c0_3 = arith.constant 0 : index
    %c0_4 = arith.constant 0 : index
    %3 = vector.load %arg12[%c0_3, %c0_4] : memref<1x128xf32, #tpu.memory_space<vmem>>, vector<1x128xf32>
    %4 = vector.broadcast %3 : vector<1x128xf32> to vector<128x128xf32>
    %5 = arith.addf %2, %4 : vector<128x128xf32>
    %cst_5 = arith.constant 0.000000e+00 : f32
    %6 = vector.broadcast %cst_5 : f32 to vector<128x128xf32>
    %7 = arith.cmpf ogt, %5, %6 : vector<128x128xf32>
    %cst_6 = arith.constant 0.00999999977 : f32
    %8 = vector.broadcast %cst_6 : f32 to vector<128x128xf32>
    %9 = arith.mulf %8, %5 : vector<128x128xf32>
    %10 = arith.select %7, %5, %9 : vector<128x128xi1>, vector<128x128xf32>
    %cst_7 = arith.constant dense<0.000000e+00> : vector<128xf32>
    %11 = vector.multi_reduction <add>, %10, %cst_7 [1] : vector<128x128xf32> to vector<128xf32>
    %12 = vector.shape_cast %11 : vector<128xf32> to vector<128x1xf32>
    %cst_8 = arith.constant 1.280000e+02 : f32
    %13 = vector.broadcast %cst_8 : f32 to vector<128x1xf32>
    %14 = arith.divf %12, %13 : vector<128x1xf32>
    %15 = arith.mulf %10, %10 : vector<128x128xf32>
    %cst_9 = arith.constant dense<0.000000e+00> : vector<128xf32>
    %16 = vector.multi_reduction <add>, %15, %cst_9 [1] : vector<128x128xf32> to vector<128xf32>
    %17 = vector.shape_cast %16 : vector<128xf32> to vector<128x1xf32>
    %cst_10 = arith.constant 1.280000e+02 : f32
    %18 = vector.broadcast %cst_10 : f32 to vector<128x1xf32>
    %19 = arith.divf %17, %18 : vector<128x1xf32>
    %20 = arith.mulf %14, %14 : vector<128x1xf32>
    %21 = arith.subf %19, %20 : vector<128x1xf32>
    %cst_11 = arith.constant 0.000000e+00 : f32
    %22 = vector.broadcast %cst_11 : f32 to vector<128x1xf32>
    %23 = arith.maximumf %21, %22 : vector<128x1xf32>
    %24 = vector.broadcast %14 : vector<128x1xf32> to vector<128x128xf32>
    %25 = arith.subf %10, %24 : vector<128x128xf32>
    %cst_12 = arith.constant 9.99999974E-6 : f32
    %26 = vector.broadcast %cst_12 : f32 to vector<128x1xf32>
    %27 = arith.addf %23, %26 : vector<128x1xf32>
    %28 = math.rsqrt %27 : vector<128x1xf32>
    %29 = vector.broadcast %28 : vector<128x1xf32> to vector<128x128xf32>
    %30 = arith.mulf %25, %29 : vector<128x128xf32>
    %c0_13 = arith.constant 0 : index
    %c0_14 = arith.constant 0 : index
    %31 = vector.load %arg3[%c0_13, %c0_14] : memref<128x128xf32, #tpu.memory_space<vmem>>, vector<128x128xf32>
    %cst_15 = arith.constant dense<0.000000e+00> : vector<128x128xf32>
    %32 = tpu.matmul %30, %31, %cst_15 {dimension_numbers = #tpu.dot_dimension_numbers<[1], [0], [0], [1], [0, 0, 1, 1], [], []>} : vector<128x128xf32>, vector<128x128xf32>, vector<128x128xf32> -> vector<128x128xf32>
    %c0_16 = arith.constant 0 : index
    %c0_17 = arith.constant 0 : index
    %33 = vector.load %arg13[%c0_16, %c0_17] : memref<1x128xf32, #tpu.memory_space<vmem>>, vector<1x128xf32>
    %34 = vector.broadcast %33 : vector<1x128xf32> to vector<128x128xf32>
    %35 = arith.addf %32, %34 : vector<128x128xf32>
    %cst_18 = arith.constant 0.000000e+00 : f32
    %36 = vector.broadcast %cst_18 : f32 to vector<128x128xf32>
    %37 = arith.cmpf ogt, %35, %36 : vector<128x128xf32>
    %cst_19 = arith.constant 0.00999999977 : f32
    %38 = vector.broadcast %cst_19 : f32 to vector<128x128xf32>
    %39 = arith.mulf %38, %35 : vector<128x128xf32>
    %40 = arith.select %37, %35, %39 : vector<128x128xi1>, vector<128x128xf32>
    %cst_20 = arith.constant dense<0.000000e+00> : vector<128xf32>
    %41 = vector.multi_reduction <add>, %40, %cst_20 [1] : vector<128x128xf32> to vector<128xf32>
    %42 = vector.shape_cast %41 : vector<128xf32> to vector<128x1xf32>
    %cst_21 = arith.constant 1.280000e+02 : f32
    %43 = vector.broadcast %cst_21 : f32 to vector<128x1xf32>
    %44 = arith.divf %42, %43 : vector<128x1xf32>
    %45 = arith.mulf %40, %40 : vector<128x128xf32>
    %cst_22 = arith.constant dense<0.000000e+00> : vector<128xf32>
    %46 = vector.multi_reduction <add>, %45, %cst_22 [1] : vector<128x128xf32> to vector<128xf32>
    %47 = vector.shape_cast %46 : vector<128xf32> to vector<128x1xf32>
    %cst_23 = arith.constant 1.280000e+02 : f32
    %48 = vector.broadcast %cst_23 : f32 to vector<128x1xf32>
    %49 = arith.divf %47, %48 : vector<128x1xf32>
    %50 = arith.mulf %44, %44 : vector<128x1xf32>
    %51 = arith.subf %49, %50 : vector<128x1xf32>
    %cst_24 = arith.constant 0.000000e+00 : f32
    %52 = vector.broadcast %cst_24 : f32 to vector<128x1xf32>
    %53 = arith.maximumf %51, %52 : vector<128x1xf32>
    %54 = vector.broadcast %44 : vector<128x1xf32> to vector<128x128xf32>
    %55 = arith.subf %40, %54 : vector<128x128xf32>
    %cst_25 = arith.constant 9.99999974E-6 : f32
    %56 = vector.broadcast %cst_25 : f32 to vector<128x1xf32>
    %57 = arith.addf %53, %56 : vector<128x1xf32>
    %58 = math.rsqrt %57 : vector<128x1xf32>
    %59 = vector.broadcast %58 : vector<128x1xf32> to vector<128x128xf32>
    %60 = arith.mulf %55, %59 : vector<128x128xf32>
    %c0_26 = arith.constant 0 : index
    %c0_27 = arith.constant 0 : index
    %61 = vector.load %arg4[%c0_26, %c0_27] : memref<128x128xf32, #tpu.memory_space<vmem>>, vector<128x128xf32>
    %cst_28 = arith.constant dense<0.000000e+00> : vector<128x128xf32>
    %62 = tpu.matmul %60, %61, %cst_28 {dimension_numbers = #tpu.dot_dimension_numbers<[1], [0], [0], [1], [0, 0, 1, 1], [], []>} : vector<128x128xf32>, vector<128x128xf32>, vector<128x128xf32> -> vector<128x128xf32>
    %c0_29 = arith.constant 0 : index
    %c0_30 = arith.constant 0 : index
    %63 = vector.load %arg14[%c0_29, %c0_30] : memref<1x128xf32, #tpu.memory_space<vmem>>, vector<1x128xf32>
    %64 = vector.broadcast %63 : vector<1x128xf32> to vector<128x128xf32>
    %65 = arith.addf %62, %64 : vector<128x128xf32>
    %cst_31 = arith.constant 0.000000e+00 : f32
    %66 = vector.broadcast %cst_31 : f32 to vector<128x128xf32>
    %67 = arith.cmpf ogt, %65, %66 : vector<128x128xf32>
    %cst_32 = arith.constant 0.00999999977 : f32
    %68 = vector.broadcast %cst_32 : f32 to vector<128x128xf32>
    %69 = arith.mulf %68, %65 : vector<128x128xf32>
    %70 = arith.select %67, %65, %69 : vector<128x128xi1>, vector<128x128xf32>
    %cst_33 = arith.constant dense<0.000000e+00> : vector<128xf32>
    %71 = vector.multi_reduction <add>, %70, %cst_33 [1] : vector<128x128xf32> to vector<128xf32>
    %72 = vector.shape_cast %71 : vector<128xf32> to vector<128x1xf32>
    %cst_34 = arith.constant 1.280000e+02 : f32
    %73 = vector.broadcast %cst_34 : f32 to vector<128x1xf32>
    %74 = arith.divf %72, %73 : vector<128x1xf32>
    %75 = arith.mulf %70, %70 : vector<128x128xf32>
    %cst_35 = arith.constant dense<0.000000e+00> : vector<128xf32>
    %76 = vector.multi_reduction <add>, %75, %cst_35 [1] : vector<128x128xf32> to vector<128xf32>
    %77 = vector.shape_cast %76 : vector<128xf32> to vector<128x1xf32>
    %cst_36 = arith.constant 1.280000e+02 : f32
    %78 = vector.broadcast %cst_36 : f32 to vector<128x1xf32>
    %79 = arith.divf %77, %78 : vector<128x1xf32>
    %80 = arith.mulf %74, %74 : vector<128x1xf32>
    %81 = arith.subf %79, %80 : vector<128x1xf32>
    %cst_37 = arith.constant 0.000000e+00 : f32
    %82 = vector.broadcast %cst_37 : f32 to vector<128x1xf32>
    %83 = arith.maximumf %81, %82 : vector<128x1xf32>
    %84 = vector.broadcast %74 : vector<128x1xf32> to vector<128x128xf32>
    %85 = arith.subf %70, %84 : vector<128x128xf32>
    %cst_38 = arith.constant 9.99999974E-6 : f32
    %86 = vector.broadcast %cst_38 : f32 to vector<128x1xf32>
    %87 = arith.addf %83, %86 : vector<128x1xf32>
    %88 = math.rsqrt %87 : vector<128x1xf32>
    %89 = vector.broadcast %88 : vector<128x1xf32> to vector<128x128xf32>
    %90 = arith.mulf %85, %89 : vector<128x128xf32>
    %c0_39 = arith.constant 0 : index
    %c0_40 = arith.constant 0 : index
    %91 = vector.load %arg5[%c0_39, %c0_40] : memref<128x128xf32, #tpu.memory_space<vmem>>, vector<128x128xf32>
    %cst_41 = arith.constant dense<0.000000e+00> : vector<128x128xf32>
    %92 = tpu.matmul %90, %91, %cst_41 {dimension_numbers = #tpu.dot_dimension_numbers<[1], [0], [0], [1], [0, 0, 1, 1], [], []>} : vector<128x128xf32>, vector<128x128xf32>, vector<128x128xf32> -> vector<128x128xf32>
    %c0_42 = arith.constant 0 : index
    %c0_43 = arith.constant 0 : index
    %93 = vector.load %arg15[%c0_42, %c0_43] : memref<1x128xf32, #tpu.memory_space<vmem>>, vector<1x128xf32>
    %94 = vector.broadcast %93 : vector<1x128xf32> to vector<128x128xf32>
    %95 = arith.addf %92, %94 : vector<128x128xf32>
    %cst_44 = arith.constant 0.000000e+00 : f32
    %96 = vector.broadcast %cst_44 : f32 to vector<128x128xf32>
    %97 = arith.cmpf ogt, %95, %96 : vector<128x128xf32>
    %cst_45 = arith.constant 0.00999999977 : f32
    %98 = vector.broadcast %cst_45 : f32 to vector<128x128xf32>
    %99 = arith.mulf %98, %95 : vector<128x128xf32>
    %100 = arith.select %97, %95, %99 : vector<128x128xi1>, vector<128x128xf32>
    %cst_46 = arith.constant dense<0.000000e+00> : vector<128xf32>
    %101 = vector.multi_reduction <add>, %100, %cst_46 [1] : vector<128x128xf32> to vector<128xf32>
    %102 = vector.shape_cast %101 : vector<128xf32> to vector<128x1xf32>
    %cst_47 = arith.constant 1.280000e+02 : f32
    %103 = vector.broadcast %cst_47 : f32 to vector<128x1xf32>
    %104 = arith.divf %102, %103 : vector<128x1xf32>
    %105 = arith.mulf %100, %100 : vector<128x128xf32>
    %cst_48 = arith.constant dense<0.000000e+00> : vector<128xf32>
    %106 = vector.multi_reduction <add>, %105, %cst_48 [1] : vector<128x128xf32> to vector<128xf32>
    %107 = vector.shape_cast %106 : vector<128xf32> to vector<128x1xf32>
    %cst_49 = arith.constant 1.280000e+02 : f32
    %108 = vector.broadcast %cst_49 : f32 to vector<128x1xf32>
    %109 = arith.divf %107, %108 : vector<128x1xf32>
    %110 = arith.mulf %104, %104 : vector<128x1xf32>
    %111 = arith.subf %109, %110 : vector<128x1xf32>
    %cst_50 = arith.constant 0.000000e+00 : f32
    %112 = vector.broadcast %cst_50 : f32 to vector<128x1xf32>
    %113 = arith.maximumf %111, %112 : vector<128x1xf32>
    %114 = vector.broadcast %104 : vector<128x1xf32> to vector<128x128xf32>
    %115 = arith.subf %100, %114 : vector<128x128xf32>
    %cst_51 = arith.constant 9.99999974E-6 : f32
    %116 = vector.broadcast %cst_51 : f32 to vector<128x1xf32>
    %117 = arith.addf %113, %116 : vector<128x1xf32>
    %118 = math.rsqrt %117 : vector<128x1xf32>
    %119 = vector.broadcast %118 : vector<128x1xf32> to vector<128x128xf32>
    %120 = arith.mulf %115, %119 : vector<128x128xf32>
    %c0_52 = arith.constant 0 : index
    %c0_53 = arith.constant 0 : index
    %121 = vector.load %arg6[%c0_52, %c0_53] : memref<128x128xf32, #tpu.memory_space<vmem>>, vector<128x128xf32>
    %cst_54 = arith.constant dense<0.000000e+00> : vector<128x128xf32>
    %122 = tpu.matmul %120, %121, %cst_54 {dimension_numbers = #tpu.dot_dimension_numbers<[1], [0], [0], [1], [0, 0, 1, 1], [], []>} : vector<128x128xf32>, vector<128x128xf32>, vector<128x128xf32> -> vector<128x128xf32>
    %c0_55 = arith.constant 0 : index
    %c0_56 = arith.constant 0 : index
    %123 = vector.load %arg16[%c0_55, %c0_56] : memref<1x128xf32, #tpu.memory_space<vmem>>, vector<1x128xf32>
    %124 = vector.broadcast %123 : vector<1x128xf32> to vector<128x128xf32>
    %125 = arith.addf %122, %124 : vector<128x128xf32>
    %126 = vector.shape_cast %125 : vector<128x128xf32> to vector<16x8x128xf32>
    %cst_57 = arith.constant dense<0.000000e+00> : vector<16x128xf32>
    %127 = vector.multi_reduction <add>, %126, %cst_57 [1] : vector<16x8x128xf32> to vector<16x128xf32>
    %c0_58 = arith.constant 0 : index
    %c0_59 = arith.constant 0 : index
    %128 = vector.load %arg7[%c0_58, %c0_59] : memref<128x128xf32, #tpu.memory_space<vmem>>, vector<128x128xf32>
    %cst_60 = arith.constant dense<0.000000e+00> : vector<16x128xf32>
    %129 = tpu.matmul %127, %128, %cst_60 {dimension_numbers = #tpu.dot_dimension_numbers<[1], [0], [0], [1], [0, 0, 1, 1], [], []>} : vector<16x128xf32>, vector<128x128xf32>, vector<16x128xf32> -> vector<16x128xf32>
    %c0_61 = arith.constant 0 : index
    %c0_62 = arith.constant 0 : index
    %130 = vector.load %arg17[%c0_61, %c0_62] : memref<1x128xf32, #tpu.memory_space<vmem>>, vector<1x128xf32>
    %131 = vector.broadcast %130 : vector<1x128xf32> to vector<16x128xf32>
    %132 = arith.addf %129, %131 : vector<16x128xf32>
    %cst_63 = arith.constant 0.000000e+00 : f32
    %133 = vector.broadcast %cst_63 : f32 to vector<16x128xf32>
    %134 = arith.cmpf ogt, %132, %133 : vector<16x128xf32>
    %cst_64 = arith.constant 0.00999999977 : f32
    %135 = vector.broadcast %cst_64 : f32 to vector<16x128xf32>
    %136 = arith.mulf %135, %132 : vector<16x128xf32>
    %137 = arith.select %134, %132, %136 : vector<16x128xi1>, vector<16x128xf32>
    %cst_65 = arith.constant dense<0.000000e+00> : vector<16xf32>
    %138 = vector.multi_reduction <add>, %137, %cst_65 [1] : vector<16x128xf32> to vector<16xf32>
    %139 = vector.shape_cast %138 : vector<16xf32> to vector<16x1xf32>
    %cst_66 = arith.constant 1.280000e+02 : f32
    %140 = vector.broadcast %cst_66 : f32 to vector<16x1xf32>
    %141 = arith.divf %139, %140 : vector<16x1xf32>
    %142 = arith.mulf %137, %137 : vector<16x128xf32>
    %cst_67 = arith.constant dense<0.000000e+00> : vector<16xf32>
    %143 = vector.multi_reduction <add>, %142, %cst_67 [1] : vector<16x128xf32> to vector<16xf32>
    %144 = vector.shape_cast %143 : vector<16xf32> to vector<16x1xf32>
    %cst_68 = arith.constant 1.280000e+02 : f32
    %145 = vector.broadcast %cst_68 : f32 to vector<16x1xf32>
    %146 = arith.divf %144, %145 : vector<16x1xf32>
    %147 = arith.mulf %141, %141 : vector<16x1xf32>
    %148 = arith.subf %146, %147 : vector<16x1xf32>
    %cst_69 = arith.constant 0.000000e+00 : f32
    %149 = vector.broadcast %cst_69 : f32 to vector<16x1xf32>
    %150 = arith.maximumf %148, %149 : vector<16x1xf32>
    %151 = vector.broadcast %141 : vector<16x1xf32> to vector<16x128xf32>
    %152 = arith.subf %137, %151 : vector<16x128xf32>
    %cst_70 = arith.constant 9.99999974E-6 : f32
    %153 = vector.broadcast %cst_70 : f32 to vector<16x1xf32>
    %154 = arith.addf %150, %153 : vector<16x1xf32>
    %155 = math.rsqrt %154 : vector<16x1xf32>
    %156 = vector.broadcast %155 : vector<16x1xf32> to vector<16x128xf32>
    %157 = arith.mulf %152, %156 : vector<16x128xf32>
    %c0_71 = arith.constant 0 : index
    %c0_72 = arith.constant 0 : index
    %158 = vector.load %arg8[%c0_71, %c0_72] : memref<128x128xf32, #tpu.memory_space<vmem>>, vector<128x128xf32>
    %cst_73 = arith.constant dense<0.000000e+00> : vector<16x128xf32>
    %159 = tpu.matmul %157, %158, %cst_73 {dimension_numbers = #tpu.dot_dimension_numbers<[1], [0], [0], [1], [0, 0, 1, 1], [], []>} : vector<16x128xf32>, vector<128x128xf32>, vector<16x128xf32> -> vector<16x128xf32>
    %c0_74 = arith.constant 0 : index
    %c0_75 = arith.constant 0 : index
    %160 = vector.load %arg18[%c0_74, %c0_75] : memref<1x128xf32, #tpu.memory_space<vmem>>, vector<1x128xf32>
    %161 = vector.broadcast %160 : vector<1x128xf32> to vector<16x128xf32>
    %162 = arith.addf %159, %161 : vector<16x128xf32>
    %cst_76 = arith.constant 0.000000e+00 : f32
    %163 = vector.broadcast %cst_76 : f32 to vector<16x128xf32>
    %164 = arith.cmpf ogt, %162, %163 : vector<16x128xf32>
    %cst_77 = arith.constant 0.00999999977 : f32
    %165 = vector.broadcast %cst_77 : f32 to vector<16x128xf32>
    %166 = arith.mulf %165, %162 : vector<16x128xf32>
    %167 = arith.select %164, %162, %166 : vector<16x128xi1>, vector<16x128xf32>
    %cst_78 = arith.constant dense<0.000000e+00> : vector<16xf32>
    %168 = vector.multi_reduction <add>, %167, %cst_78 [1] : vector<16x128xf32> to vector<16xf32>
    %169 = vector.shape_cast %168 : vector<16xf32> to vector<16x1xf32>
    %cst_79 = arith.constant 1.280000e+02 : f32
    %170 = vector.broadcast %cst_79 : f32 to vector<16x1xf32>
    %171 = arith.divf %169, %170 : vector<16x1xf32>
    %172 = arith.mulf %167, %167 : vector<16x128xf32>
    %cst_80 = arith.constant dense<0.000000e+00> : vector<16xf32>
    %173 = vector.multi_reduction <add>, %172, %cst_80 [1] : vector<16x128xf32> to vector<16xf32>
    %174 = vector.shape_cast %173 : vector<16xf32> to vector<16x1xf32>
    %cst_81 = arith.constant 1.280000e+02 : f32
    %175 = vector.broadcast %cst_81 : f32 to vector<16x1xf32>
    %176 = arith.divf %174, %175 : vector<16x1xf32>
    %177 = arith.mulf %171, %171 : vector<16x1xf32>
    %178 = arith.subf %176, %177 : vector<16x1xf32>
    %cst_82 = arith.constant 0.000000e+00 : f32
    %179 = vector.broadcast %cst_82 : f32 to vector<16x1xf32>
    %180 = arith.maximumf %178, %179 : vector<16x1xf32>
    %181 = vector.broadcast %171 : vector<16x1xf32> to vector<16x128xf32>
    %182 = arith.subf %167, %181 : vector<16x128xf32>
    %cst_83 = arith.constant 9.99999974E-6 : f32
    %183 = vector.broadcast %cst_83 : f32 to vector<16x1xf32>
    %184 = arith.addf %180, %183 : vector<16x1xf32>
    %185 = math.rsqrt %184 : vector<16x1xf32>
    %186 = vector.broadcast %185 : vector<16x1xf32> to vector<16x128xf32>
    %187 = arith.mulf %182, %186 : vector<16x128xf32>
    %c0_84 = arith.constant 0 : index
    %c0_85 = arith.constant 0 : index
    %188 = vector.load %arg9[%c0_84, %c0_85] : memref<128x128xf32, #tpu.memory_space<vmem>>, vector<128x128xf32>
    %cst_86 = arith.constant dense<0.000000e+00> : vector<16x128xf32>
    %189 = tpu.matmul %187, %188, %cst_86 {dimension_numbers = #tpu.dot_dimension_numbers<[1], [0], [0], [1], [0, 0, 1, 1], [], []>} : vector<16x128xf32>, vector<128x128xf32>, vector<16x128xf32> -> vector<16x128xf32>
    %c0_87 = arith.constant 0 : index
    %c0_88 = arith.constant 0 : index
    %190 = vector.load %arg19[%c0_87, %c0_88] : memref<1x128xf32, #tpu.memory_space<vmem>>, vector<1x128xf32>
    %191 = vector.broadcast %190 : vector<1x128xf32> to vector<16x128xf32>
    %192 = arith.addf %189, %191 : vector<16x128xf32>
    %cst_89 = arith.constant 0.000000e+00 : f32
    %193 = vector.broadcast %cst_89 : f32 to vector<16x128xf32>
    %194 = arith.cmpf ogt, %192, %193 : vector<16x128xf32>
    %cst_90 = arith.constant 0.00999999977 : f32
    %195 = vector.broadcast %cst_90 : f32 to vector<16x128xf32>
    %196 = arith.mulf %195, %192 : vector<16x128xf32>
    %197 = arith.select %194, %192, %196 : vector<16x128xi1>, vector<16x128xf32>
    %cst_91 = arith.constant dense<0.000000e+00> : vector<16xf32>
    %198 = vector.multi_reduction <add>, %197, %cst_91 [1] : vector<16x128xf32> to vector<16xf32>
    %199 = vector.shape_cast %198 : vector<16xf32> to vector<16x1xf32>
    %cst_92 = arith.constant 1.280000e+02 : f32
    %200 = vector.broadcast %cst_92 : f32 to vector<16x1xf32>
    %201 = arith.divf %199, %200 : vector<16x1xf32>
    %202 = arith.mulf %197, %197 : vector<16x128xf32>
    %cst_93 = arith.constant dense<0.000000e+00> : vector<16xf32>
    %203 = vector.multi_reduction <add>, %202, %cst_93 [1] : vector<16x128xf32> to vector<16xf32>
    %204 = vector.shape_cast %203 : vector<16xf32> to vector<16x1xf32>
    %cst_94 = arith.constant 1.280000e+02 : f32
    %205 = vector.broadcast %cst_94 : f32 to vector<16x1xf32>
    %206 = arith.divf %204, %205 : vector<16x1xf32>
    %207 = arith.mulf %201, %201 : vector<16x1xf32>
    %208 = arith.subf %206, %207 : vector<16x1xf32>
    %cst_95 = arith.constant 0.000000e+00 : f32
    %209 = vector.broadcast %cst_95 : f32 to vector<16x1xf32>
    %210 = arith.maximumf %208, %209 : vector<16x1xf32>
    %211 = vector.broadcast %201 : vector<16x1xf32> to vector<16x128xf32>
    %212 = arith.subf %197, %211 : vector<16x128xf32>
    %cst_96 = arith.constant 9.99999974E-6 : f32
    %213 = vector.broadcast %cst_96 : f32 to vector<16x1xf32>
    %214 = arith.addf %210, %213 : vector<16x1xf32>
    %215 = math.rsqrt %214 : vector<16x1xf32>
    %216 = vector.broadcast %215 : vector<16x1xf32> to vector<16x128xf32>
    %217 = arith.mulf %212, %216 : vector<16x128xf32>
    %c0_97 = arith.constant 0 : index
    %c0_98 = arith.constant 0 : index
    %218 = vector.load %arg10[%c0_97, %c0_98] : memref<128x128xf32, #tpu.memory_space<vmem>>, vector<128x128xf32>
    %cst_99 = arith.constant dense<0.000000e+00> : vector<16x128xf32>
    %219 = tpu.matmul %217, %218, %cst_99 {dimension_numbers = #tpu.dot_dimension_numbers<[1], [0], [0], [1], [0, 0, 1, 1], [], []>} : vector<16x128xf32>, vector<128x128xf32>, vector<16x128xf32> -> vector<16x128xf32>
    %c0_100 = arith.constant 0 : index
    %c0_101 = arith.constant 0 : index
    %220 = vector.load %arg20[%c0_100, %c0_101] : memref<1x128xf32, #tpu.memory_space<vmem>>, vector<1x128xf32>
    %221 = vector.broadcast %220 : vector<1x128xf32> to vector<16x128xf32>
    %222 = arith.addf %219, %221 : vector<16x128xf32>
    %cst_102 = arith.constant 0.000000e+00 : f32
    %223 = vector.broadcast %cst_102 : f32 to vector<16x128xf32>
    %224 = arith.cmpf ogt, %222, %223 : vector<16x128xf32>
    %cst_103 = arith.constant 0.00999999977 : f32
    %225 = vector.broadcast %cst_103 : f32 to vector<16x128xf32>
    %226 = arith.mulf %225, %222 : vector<16x128xf32>
    %227 = arith.select %224, %222, %226 : vector<16x128xi1>, vector<16x128xf32>
    %cst_104 = arith.constant dense<0.000000e+00> : vector<16xf32>
    %228 = vector.multi_reduction <add>, %227, %cst_104 [1] : vector<16x128xf32> to vector<16xf32>
    %229 = vector.shape_cast %228 : vector<16xf32> to vector<16x1xf32>
    %cst_105 = arith.constant 1.280000e+02 : f32
    %230 = vector.broadcast %cst_105 : f32 to vector<16x1xf32>
    %231 = arith.divf %229, %230 : vector<16x1xf32>
    %232 = arith.mulf %227, %227 : vector<16x128xf32>
    %cst_106 = arith.constant dense<0.000000e+00> : vector<16xf32>
    %233 = vector.multi_reduction <add>, %232, %cst_106 [1] : vector<16x128xf32> to vector<16xf32>
    %234 = vector.shape_cast %233 : vector<16xf32> to vector<16x1xf32>
    %cst_107 = arith.constant 1.280000e+02 : f32
    %235 = vector.broadcast %cst_107 : f32 to vector<16x1xf32>
    %236 = arith.divf %234, %235 : vector<16x1xf32>
    %237 = arith.mulf %231, %231 : vector<16x1xf32>
    %238 = arith.subf %236, %237 : vector<16x1xf32>
    %cst_108 = arith.constant 0.000000e+00 : f32
    %239 = vector.broadcast %cst_108 : f32 to vector<16x1xf32>
    %240 = arith.maximumf %238, %239 : vector<16x1xf32>
    %241 = vector.broadcast %231 : vector<16x1xf32> to vector<16x128xf32>
    %242 = arith.subf %227, %241 : vector<16x128xf32>
    %cst_109 = arith.constant 9.99999974E-6 : f32
    %243 = vector.broadcast %cst_109 : f32 to vector<16x1xf32>
    %244 = arith.addf %240, %243 : vector<16x1xf32>
    %245 = math.rsqrt %244 : vector<16x1xf32>
    %246 = vector.broadcast %245 : vector<16x1xf32> to vector<16x128xf32>
    %247 = arith.mulf %242, %246 : vector<16x128xf32>
    %c0_110 = arith.constant 0 : index
    %c0_111 = arith.constant 0 : index
    %248 = vector.load %arg11[%c0_110, %c0_111] : memref<128x128xf32, #tpu.memory_space<vmem>>, vector<128x128xf32>
    %cst_112 = arith.constant dense<0.000000e+00> : vector<16x128xf32>
    %249 = tpu.matmul %247, %248, %cst_112 {dimension_numbers = #tpu.dot_dimension_numbers<[1], [0], [0], [1], [0, 0, 1, 1], [], []>} : vector<16x128xf32>, vector<128x128xf32>, vector<16x128xf32> -> vector<16x128xf32>
    %c0_113 = arith.constant 0 : index
    %c0_114 = arith.constant 0 : index
    %250 = vector.load %arg21[%c0_113, %c0_114] : memref<1x128xf32, #tpu.memory_space<vmem>>, vector<1x128xf32>
    %251 = vector.broadcast %250 : vector<1x128xf32> to vector<16x128xf32>
    %252 = arith.addf %249, %251 : vector<16x128xf32>
    %c0_115 = arith.constant 0 : index
    %c0_116 = arith.constant 0 : index
    %253 = vector.load %arg22[%c0_115, %c0_116] : memref<16x128xf32, #tpu.memory_space<vmem>>, vector<16x128xf32>
    tpu.vector_store %arg22[%c0_115, %c0_116], %252 {strides = array<i32>} : memref<16x128xf32, #tpu.memory_space<vmem>>, vector<16x128xf32>,
    return
  }
  func.func @transform_0(%arg0: i32) -> (i32, i32) {
    %c0_i32 = arith.constant 0 : i32
    %c0_i32_0 = arith.constant 0 : i32
    return %arg0, %c0_i32 : i32, i32
  }
  func.func @transform_1(%arg0: i32) -> (i32, i32) {
    %c0_i32 = arith.constant 0 : i32
    %c0_i32_0 = arith.constant 0 : i32
    %c0_i32_1 = arith.constant 0 : i32
    return %c0_i32, %c0_i32_0 : i32, i32
  }
  func.func @transform_2(%arg0: i32) -> (i32, i32) {
    %c0_i32 = arith.constant 0 : i32
    %c0_i32_0 = arith.constant 0 : i32
    %c0_i32_1 = arith.constant 0 : i32
    return %c0_i32, %c0_i32_0 : i32, i32
  }
  func.func @transform_3(%arg0: i32) -> (i32, i32) {
    %c0_i32 = arith.constant 0 : i32
    %c0_i32_0 = arith.constant 0 : i32
    %c0_i32_1 = arith.constant 0 : i32
    return %c0_i32, %c0_i32_0 : i32, i32
  }
  func.func @transform_4(%arg0: i32) -> (i32, i32) {
    %c0_i32 = arith.constant 0 : i32
    %c0_i32_0 = arith.constant 0 : i32
    %c0_i32_1 = arith.constant 0 : i32
    return %c0_i32, %c0_i32_0 : i32, i32
  }
  func.func @transform_5(%arg0: i32) -> (i32, i32) {
    %c0_i32 = arith.constant 0 : i32
    %c0_i32_0 = arith.constant 0 : i32
    %c0_i32_1 = arith.constant 0 : i32
    return %c0_i32, %c0_i32_0 : i32, i32
  }
  func.func @transform_6(%arg0: i32) -> (i32, i32) {
    %c0_i32 = arith.constant 0 : i32
    %c0_i32_0 = arith.constant 0 : i32
    %c0_i32_1 = arith.constant 0 : i32
    return %c0_i32, %c0_i32_0 : i32, i32
  }
  func.func @transform_7(%arg0: i32) -> (i32, i32) {
    %c0_i32 = arith.constant 0 : i32
    %c0_i32_0 = arith.constant 0 : i32
    %c0_i32_1 = arith.constant 0 : i32
    return %c0_i32, %c0_i32_0 : i32, i32
  }
  func.func @transform_8(%arg0: i32) -> (i32, i32) {
    %c0_i32 = arith.constant 0 : i32
    %c0_i32_0 = arith.constant 0 : i32
    %c0_i32_1 = arith.constant 0 : i32
    return %c0_i32, %c0_i32_0 : i32, i32
  }
  func.func @transform_9(%arg0: i32) -> (i32, i32) {
    %c0_i32 = arith.constant 0 : i32
    %c0_i32_0 = arith.constant 0 : i32
    %c0_i32_1 = arith.constant 0 : i32
    return %c0_i32, %c0_i32_0 : i32, i32
  }
  func.func @transform_10(%arg0: i32) -> (i32, i32) {
    %c0_i32 = arith.constant 0 : i32
    %c0_i32_0 = arith.constant 0 : i32
    %c0_i32_1 = arith.constant 0 : i32
    return %c0_i32, %c0_i32_0 : i32, i32
  }
  func.func @transform_11(%arg0: i32) -> (i32, i32) {
    %c0_i32 = arith.constant 0 : i32
    %c0_i32_0 = arith.constant 0 : i32
    %c0_i32_1 = arith.constant 0 : i32
    return %c0_i32, %c0_i32_0 : i32, i32
  }
  func.func @transform_12(%arg0: i32) -> (i32, i32) {
    %c0_i32 = arith.constant 0 : i32
    %c0_i32_0 = arith.constant 0 : i32
    %c0_i32_1 = arith.constant 0 : i32
    return %c0_i32, %c0_i32_0 : i32, i32
  }
  func.func @transform_13(%arg0: i32) -> (i32, i32) {
    %c0_i32 = arith.constant 0 : i32
    %c0_i32_0 = arith.constant 0 : i32
    %c0_i32_1 = arith.constant 0 : i32
    return %c0_i32, %c0_i32_0 : i32, i32
  }
  func.func @transform_14(%arg0: i32) -> (i32, i32) {
    %c0_i32 = arith.constant 0 : i32
    %c0_i32_0 = arith.constant 0 : i32
    %c0_i32_1 = arith.constant 0 : i32
    return %c0_i32, %c0_i32_0 : i32, i32
  }
  func.func @transform_15(%arg0: i32) -> (i32, i32) {
    %c0_i32 = arith.constant 0 : i32
    %c0_i32_0 = arith.constant 0 : i32
    %c0_i32_1 = arith.constant 0 : i32
    return %c0_i32, %c0_i32_0 : i32, i32
  }
  func.func @transform_16(%arg0: i32) -> (i32, i32) {
    %c0_i32 = arith.constant 0 : i32
    %c0_i32_0 = arith.constant 0 : i32
    %c0_i32_1 = arith.constant 0 : i32
    return %c0_i32, %c0_i32_0 : i32, i32
  }
  func.func @transform_17(%arg0: i32) -> (i32, i32) {
    %c0_i32 = arith.constant 0 : i32
    %c0_i32_0 = arith.constant 0 : i32
    %c0_i32_1 = arith.constant 0 : i32
    return %c0_i32, %c0_i32_0 : i32, i32
  }
  func.func @transform_18(%arg0: i32) -> (i32, i32) {
    %c0_i32 = arith.constant 0 : i32
    %c0_i32_0 = arith.constant 0 : i32
    %c0_i32_1 = arith.constant 0 : i32
    return %c0_i32, %c0_i32_0 : i32, i32
  }
  func.func @transform_19(%arg0: i32) -> (i32, i32) {
    %c0_i32 = arith.constant 0 : i32
    %c0_i32_0 = arith.constant 0 : i32
    %c0_i32_1 = arith.constant 0 : i32
    return %c0_i32, %c0_i32_0 : i32, i32
  }
  func.func @transform_20(%arg0: i32) -> (i32, i32) {
    %c0_i32 = arith.constant 0 : i32
    %c0_i32_0 = arith.constant 0 : i32
    %c0_i32_1 = arith.constant 0 : i32
    return %c0_i32, %c0_i32_0 : i32, i32
  }
  func.func @transform_21(%arg0: i32) -> (i32, i32) {
    %c0_i32 = arith.constant 0 : i32
    %c0_i32_0 = arith.constant 0 : i32
    return %arg0, %c0_i32 : i32, i32
  }
}

module attributes {stable_mosaic.version = 11 : i64} {
  func.func @_deepset_kernel(%arg0: i32, %arg1: memref<128x16xf32, #tpu.memory_space<vmem>>, %arg2: memref<16x128xf32, #tpu.memory_space<vmem>>, %arg3: memref<128x128xf32, #tpu.memory_space<vmem>>, %arg4: memref<128x128xf32, #tpu.memory_space<vmem>>, %arg5: memref<128x128xf32, #tpu.memory_space<vmem>>, %arg6: memref<128x128xf32, #tpu.memory_space<vmem>>, %arg7: memref<128x128xf32, #tpu.memory_space<vmem>>, %arg8: memref<128x128xf32, #tpu.memory_space<vmem>>, %arg9: memref<128x128xf32, #tpu.memory_space<vmem>>, %arg10: memref<128x128xf32, #tpu.memory_space<vmem>>, %arg11: memref<128x128xf32, #tpu.memory_space<vmem>>, %arg12: memref<1x128xf32, #tpu.memory_space<vmem>>, %arg13: memref<1x128xf32, #tpu.memory_space<vmem>>, %arg14: memref<1x128xf32, #tpu.memory_space<vmem>>, %arg15: memref<1x128xf32, #tpu.memory_space<vmem>>, %arg16: memref<1x128xf32, #tpu.memory_space<vmem>>, %arg17: memref<1x128xf32, #tpu.memory_space<vmem>>, %arg18: memref<1x128xf32, #tpu.memory_space<vmem>>, %arg19: memref<1x128xf32, #tpu.memory_space<vmem>>, %arg20: memref<1x128xf32, #tpu.memory_space<vmem>>, %arg21: memref<1x128xf32, #tpu.memory_space<vmem>>, %arg22: memref<16x128xf32, #tpu.memory_space<vmem>>) attributes {dimension_semantics = [#tpu.dimension_semantics<parallel>], iteration_bounds = array<i64: 2>, scalar_prefetch = 0 : i64, scratch_operands = 0 : i64, tpu.core_type = #tpu.core_type<tc>, window_params = [{transform_indices = @transform_0, window_bounds = array<i64: 128, 16>}, {pipeline_mode = #tpu.pipeline_mode<synchronous>, transform_indices = @transform_1, window_bounds = array<i64: 16, 128>}, {pipeline_mode = #tpu.pipeline_mode<synchronous>, transform_indices = @transform_2, window_bounds = array<i64: 128, 128>}, {pipeline_mode = #tpu.pipeline_mode<synchronous>, transform_indices = @transform_3, window_bounds = array<i64: 128, 128>}, {pipeline_mode = #tpu.pipeline_mode<synchronous>, transform_indices = @transform_4, window_bounds = array<i64: 128, 128>}, {pipeline_mode = #tpu.pipeline_mode<synchronous>, transform_indices = @transform_5, window_bounds = array<i64: 128, 128>}, {pipeline_mode = #tpu.pipeline_mode<synchronous>, transform_indices = @transform_6, window_bounds = array<i64: 128, 128>}, {pipeline_mode = #tpu.pipeline_mode<synchronous>, transform_indices = @transform_7, window_bounds = array<i64: 128, 128>}, {pipeline_mode = #tpu.pipeline_mode<synchronous>, transform_indices = @transform_8, window_bounds = array<i64: 128, 128>}, {pipeline_mode = #tpu.pipeline_mode<synchronous>, transform_indices = @transform_9, window_bounds = array<i64: 128, 128>}, {pipeline_mode = #tpu.pipeline_mode<synchronous>, transform_indices = @transform_10, window_bounds = array<i64: 128, 128>}, {pipeline_mode = #tpu.pipeline_mode<synchronous>, transform_indices = @transform_11, window_bounds = array<i64: 1, 128>}, {pipeline_mode = #tpu.pipeline_mode<synchronous>, transform_indices = @transform_12, window_bounds = array<i64: 1, 128>}, {pipeline_mode = #tpu.pipeline_mode<synchronous>, transform_indices = @transform_13, window_bounds = array<i64: 1, 128>}, {pipeline_mode = #tpu.pipeline_mode<synchronous>, transform_indices = @transform_14, window_bounds = array<i64: 1, 128>}, {pipeline_mode = #tpu.pipeline_mode<synchronous>, transform_indices = @transform_15, window_bounds = array<i64: 1, 128>}, {pipeline_mode = #tpu.pipeline_mode<synchronous>, transform_indices = @transform_16, window_bounds = array<i64: 1, 128>}, {pipeline_mode = #tpu.pipeline_mode<synchronous>, transform_indices = @transform_17, window_bounds = array<i64: 1, 128>}, {pipeline_mode = #tpu.pipeline_mode<synchronous>, transform_indices = @transform_18, window_bounds = array<i64: 1, 128>}, {pipeline_mode = #tpu.pipeline_mode<synchronous>, transform_indices = @transform_19, window_bounds = array<i64: 1, 128>}, {pipeline_mode = #tpu.pipeline_mode<synchronous>, transform_indices = @transform_20, window_bounds = array<i64: 1, 128>}, {transform_indices = @transform_21, window_bounds = array<i64: 16, 128>}]} {
    %c0 = arith.constant 0 : index
    %c0_0 = arith.constant 0 : index
    %0 = vector.load %arg1[%c0, %c0_0] : memref<128x16xf32, #tpu.memory_space<vmem>>, vector<128x16xf32>
    %c0_1 = arith.constant 0 : index
    %c0_2 = arith.constant 0 : index
    %1 = vector.load %arg2[%c0_1, %c0_2] : memref<16x128xf32, #tpu.memory_space<vmem>>, vector<16x128xf32>
    %cst = arith.constant dense<0.000000e+00> : vector<128x128xf32>
    %2 = tpu.matmul %0, %1, %cst {dimension_numbers = #tpu.dot_dimension_numbers<[1], [0], [0], [1], [0, 0, 1, 1], [], []>} : vector<128x16xf32>, vector<16x128xf32>, vector<128x128xf32> -> vector<128x128xf32>
    %c0_3 = arith.constant 0 : index
    %c0_4 = arith.constant 0 : index
    %3 = vector.load %arg12[%c0_3, %c0_4] : memref<1x128xf32, #tpu.memory_space<vmem>>, vector<1x128xf32>
    %4 = vector.broadcast %3 : vector<1x128xf32> to vector<128x128xf32>
    %5 = arith.addf %2, %4 : vector<128x128xf32>
    %cst_5 = arith.constant 0.000000e+00 : f32
    %6 = vector.broadcast %cst_5 : f32 to vector<128x128xf32>
    %7 = arith.cmpf ogt, %5, %6 : vector<128x128xf32>
    %cst_6 = arith.constant 0.00999999977 : f32
    %8 = vector.broadcast %cst_6 : f32 to vector<128x128xf32>
    %9 = arith.mulf %8, %5 : vector<128x128xf32>
    %10 = arith.select %7, %5, %9 : vector<128x128xi1>, vector<128x128xf32>
    %cst_7 = arith.constant dense<0.000000e+00> : vector<128xf32>
    %11 = vector.multi_reduction <add>, %10, %cst_7 [1] : vector<128x128xf32> to vector<128xf32>
    %12 = vector.shape_cast %11 : vector<128xf32> to vector<128x1xf32>
    %cst_8 = arith.constant 1.280000e+02 : f32
    %13 = vector.broadcast %cst_8 : f32 to vector<128x1xf32>
    %14 = arith.divf %12, %13 : vector<128x1xf32>
    %15 = arith.mulf %10, %10 : vector<128x128xf32>
    %cst_9 = arith.constant dense<0.000000e+00> : vector<128xf32>
    %16 = vector.multi_reduction <add>, %15, %cst_9 [1] : vector<128x128xf32> to vector<128xf32>
    %17 = vector.shape_cast %16 : vector<128xf32> to vector<128x1xf32>
    %cst_10 = arith.constant 1.280000e+02 : f32
    %18 = vector.broadcast %cst_10 : f32 to vector<128x1xf32>
    %19 = arith.divf %17, %18 : vector<128x1xf32>
    %20 = arith.mulf %14, %14 : vector<128x1xf32>
    %21 = arith.subf %19, %20 : vector<128x1xf32>
    %cst_11 = arith.constant 0.000000e+00 : f32
    %22 = vector.broadcast %cst_11 : f32 to vector<128x1xf32>
    %23 = arith.maximumf %21, %22 : vector<128x1xf32>
    %24 = vector.broadcast %14 : vector<128x1xf32> to vector<128x128xf32>
    %25 = arith.subf %10, %24 : vector<128x128xf32>
    %cst_12 = arith.constant 9.99999974E-6 : f32
    %26 = vector.broadcast %cst_12 : f32 to vector<128x1xf32>
    %27 = arith.addf %23, %26 : vector<128x1xf32>
    %28 = math.rsqrt %27 : vector<128x1xf32>
    %29 = vector.broadcast %28 : vector<128x1xf32> to vector<128x128xf32>
    %30 = arith.mulf %25, %29 : vector<128x128xf32>
    %c0_13 = arith.constant 0 : index
    %c0_14 = arith.constant 0 : index
    %31 = vector.load %arg3[%c0_13, %c0_14] : memref<128x128xf32, #tpu.memory_space<vmem>>, vector<128x128xf32>
    %cst_15 = arith.constant dense<0.000000e+00> : vector<128x128xf32>
    %32 = tpu.matmul %30, %31, %cst_15 {dimension_numbers = #tpu.dot_dimension_numbers<[1], [0], [0], [1], [0, 0, 1, 1], [], []>} : vector<128x128xf32>, vector<128x128xf32>, vector<128x128xf32> -> vector<128x128xf32>
    %c0_16 = arith.constant 0 : index
    %c0_17 = arith.constant 0 : index
    %33 = vector.load %arg13[%c0_16, %c0_17] : memref<1x128xf32, #tpu.memory_space<vmem>>, vector<1x128xf32>
    %34 = vector.broadcast %33 : vector<1x128xf32> to vector<128x128xf32>
    %35 = arith.addf %32, %34 : vector<128x128xf32>
    %cst_18 = arith.constant 0.000000e+00 : f32
    %36 = vector.broadcast %cst_18 : f32 to vector<128x128xf32>
    %37 = arith.cmpf ogt, %35, %36 : vector<128x128xf32>
    %cst_19 = arith.constant 0.00999999977 : f32
    %38 = vector.broadcast %cst_19 : f32 to vector<128x128xf32>
    %39 = arith.mulf %38, %35 : vector<128x128xf32>
    %40 = arith.select %37, %35, %39 : vector<128x128xi1>, vector<128x128xf32>
    %cst_20 = arith.constant dense<0.000000e+00> : vector<128xf32>
    %41 = vector.multi_reduction <add>, %40, %cst_20 [1] : vector<128x128xf32> to vector<128xf32>
    %42 = vector.shape_cast %41 : vector<128xf32> to vector<128x1xf32>
    %cst_21 = arith.constant 1.280000e+02 : f32
    %43 = vector.broadcast %cst_21 : f32 to vector<128x1xf32>
    %44 = arith.divf %42, %43 : vector<128x1xf32>
    %45 = arith.mulf %40, %40 : vector<128x128xf32>
    %cst_22 = arith.constant dense<0.000000e+00> : vector<128xf32>
    %46 = vector.multi_reduction <add>, %45, %cst_22 [1] : vector<128x128xf32> to vector<128xf32>
    %47 = vector.shape_cast %46 : vector<128xf32> to vector<128x1xf32>
    %cst_23 = arith.constant 1.280000e+02 : f32
    %48 = vector.broadcast %cst_23 : f32 to vector<128x1xf32>
    %49 = arith.divf %47, %48 : vector<128x1xf32>
    %50 = arith.mulf %44, %44 : vector<128x1xf32>
    %51 = arith.subf %49, %50 : vector<128x1xf32>
    %cst_24 = arith.constant 0.000000e+00 : f32
    %52 = vector.broadcast %cst_24 : f32 to vector<128x1xf32>
    %53 = arith.maximumf %51, %52 : vector<128x1xf32>
    %54 = vector.broadcast %44 : vector<128x1xf32> to vector<128x128xf32>
    %55 = arith.subf %40, %54 : vector<128x128xf32>
    %cst_25 = arith.constant 9.99999974E-6 : f32
    %56 = vector.broadcast %cst_25 : f32 to vector<128x1xf32>
    %57 = arith.addf %53, %56 : vector<128x1xf32>
    %58 = math.rsqrt %57 : vector<128x1xf32>
    %59 = vector.broadcast %58 : vector<128x1xf32> to vector<128x128xf32>
    %60 = arith.mulf %55, %59 : vector<128x128xf32>
    %c0_26 = arith.constant 0 : index
    %c0_27 = arith.constant 0 : index
    %61 = vector.load %arg4[%c0_26, %c0_27] : memref<128x128xf32, #tpu.memory_space<vmem>>, vector<128x128xf32>
    %cst_28 = arith.constant dense<0.000000e+00> : vector<128x128xf32>
    %62 = tpu.matmul %60, %61, %cst_28 {dimension_numbers = #tpu.dot_dimension_numbers<[1], [0], [0], [1], [0, 0, 1, 1], [], []>} : vector<128x128xf32>, vector<128x128xf32>, vector<128x128xf32> -> vector<128x128xf32>
    %c0_29 = arith.constant 0 : index
    %c0_30 = arith.constant 0 : index
    %63 = vector.load %arg14[%c0_29, %c0_30] : memref<1x128xf32, #tpu.memory_space<vmem>>, vector<1x128xf32>
    %64 = vector.broadcast %63 : vector<1x128xf32> to vector<128x128xf32>
    %65 = arith.addf %62, %64 : vector<128x128xf32>
    %cst_31 = arith.constant 0.000000e+00 : f32
    %66 = vector.broadcast %cst_31 : f32 to vector<128x128xf32>
    %67 = arith.cmpf ogt, %65, %66 : vector<128x128xf32>
    %cst_32 = arith.constant 0.00999999977 : f32
    %68 = vector.broadcast %cst_32 : f32 to vector<128x128xf32>
    %69 = arith.mulf %68, %65 : vector<128x128xf32>
    %70 = arith.select %67, %65, %69 : vector<128x128xi1>, vector<128x128xf32>
    %cst_33 = arith.constant dense<0.000000e+00> : vector<128xf32>
    %71 = vector.multi_reduction <add>, %70, %cst_33 [1] : vector<128x128xf32> to vector<128xf32>
    %72 = vector.shape_cast %71 : vector<128xf32> to vector<128x1xf32>
    %cst_34 = arith.constant 1.280000e+02 : f32
    %73 = vector.broadcast %cst_34 : f32 to vector<128x1xf32>
    %74 = arith.divf %72, %73 : vector<128x1xf32>
    %75 = arith.mulf %70, %70 : vector<128x128xf32>
    %cst_35 = arith.constant dense<0.000000e+00> : vector<128xf32>
    %76 = vector.multi_reduction <add>, %75, %cst_35 [1] : vector<128x128xf32> to vector<128xf32>
    %77 = vector.shape_cast %76 : vector<128xf32> to vector<128x1xf32>
    %cst_36 = arith.constant 1.280000e+02 : f32
    %78 = vector.broadcast %cst_36 : f32 to vector<128x1xf32>
    %79 = arith.divf %77, %78 : vector<128x1xf32>
    %80 = arith.mulf %74, %74 : vector<128x1xf32>
    %81 = arith.subf %79, %80 : vector<128x1xf32>
    %cst_37 = arith.constant 0.000000e+00 : f32
    %82 = vector.broadcast %cst_37 : f32 to vector<128x1xf32>
    %83 = arith.maximumf %81, %82 : vector<128x1xf32>
    %84 = vector.broadcast %74 : vector<128x1xf32> to vector<128x128xf32>
    %85 = arith.subf %70, %84 : vector<128x128xf32>
    %cst_38 = arith.constant 9.99999974E-6 : f32
    %86 = vector.broadcast %cst_38 : f32 to vector<128x1xf32>
    %87 = arith.addf %83, %86 : vector<128x1xf32>
    %88 = math.rsqrt %87 : vector<128x1xf32>
    %89 = vector.broadcast %88 : vector<128x1xf32> to vector<128x128xf32>
    %90 = arith.mulf %85, %89 : vector<128x128xf32>
    %c0_39 = arith.constant 0 : index
    %c0_40 = arith.constant 0 : index
    %91 = vector.load %arg5[%c0_39, %c0_40] : memref<128x128xf32, #tpu.memory_space<vmem>>, vector<128x128xf32>
    %cst_41 = arith.constant dense<0.000000e+00> : vector<128x128xf32>
    %92 = tpu.matmul %90, %91, %cst_41 {dimension_numbers = #tpu.dot_dimension_numbers<[1], [0], [0], [1], [0, 0, 1, 1], [], []>} : vector<128x128xf32>, vector<128x128xf32>, vector<128x128xf32> -> vector<128x128xf32>
    %c0_42 = arith.constant 0 : index
    %c0_43 = arith.constant 0 : index
    %93 = vector.load %arg15[%c0_42, %c0_43] : memref<1x128xf32, #tpu.memory_space<vmem>>, vector<1x128xf32>
    %94 = vector.broadcast %93 : vector<1x128xf32> to vector<128x128xf32>
    %95 = arith.addf %92, %94 : vector<128x128xf32>
    %cst_44 = arith.constant 0.000000e+00 : f32
    %96 = vector.broadcast %cst_44 : f32 to vector<128x128xf32>
    %97 = arith.cmpf ogt, %95, %96 : vector<128x128xf32>
    %cst_45 = arith.constant 0.00999999977 : f32
    %98 = vector.broadcast %cst_45 : f32 to vector<128x128xf32>
    %99 = arith.mulf %98, %95 : vector<128x128xf32>
    %100 = arith.select %97, %95, %99 : vector<128x128xi1>, vector<128x128xf32>
    %cst_46 = arith.constant dense<0.000000e+00> : vector<128xf32>
    %101 = vector.multi_reduction <add>, %100, %cst_46 [1] : vector<128x128xf32> to vector<128xf32>
    %102 = vector.shape_cast %101 : vector<128xf32> to vector<128x1xf32>
    %cst_47 = arith.constant 1.280000e+02 : f32
    %103 = vector.broadcast %cst_47 : f32 to vector<128x1xf32>
    %104 = arith.divf %102, %103 : vector<128x1xf32>
    %105 = arith.mulf %100, %100 : vector<128x128xf32>
    %cst_48 = arith.constant dense<0.000000e+00> : vector<128xf32>
    %106 = vector.multi_reduction <add>, %105, %cst_48 [1] : vector<128x128xf32> to vector<128xf32>
    %107 = vector.shape_cast %106 : vector<128xf32> to vector<128x1xf32>
    %cst_49 = arith.constant 1.280000e+02 : f32
    %108 = vector.broadcast %cst_49 : f32 to vector<128x1xf32>
    %109 = arith.divf %107, %108 : vector<128x1xf32>
    %110 = arith.mulf %104, %104 : vector<128x1xf32>
    %111 = arith.subf %109, %110 : vector<128x1xf32>
    %cst_50 = arith.constant 0.000000e+00 : f32
    %112 = vector.broadcast %cst_50 : f32 to vector<128x1xf32>
    %113 = arith.maximumf %111, %112 : vector<128x1xf32>
    %114 = vector.broadcast %104 : vector<128x1xf32> to vector<128x128xf32>
    %115 = arith.subf %100, %114 : vector<128x128xf32>
    %cst_51 = arith.constant 9.99999974E-6 : f32
    %116 = vector.broadcast %cst_51 : f32 to vector<128x1xf32>
    %117 = arith.addf %113, %116 : vector<128x1xf32>
    %118 = math.rsqrt %117 : vector<128x1xf32>
    %119 = vector.broadcast %118 : vector<128x1xf32> to vector<128x128xf32>
    %120 = arith.mulf %115, %119 : vector<128x128xf32>
    %c0_52 = arith.constant 0 : index
    %c0_53 = arith.constant 0 : index
    %121 = vector.load %arg6[%c0_52, %c0_53] : memref<128x128xf32, #tpu.memory_space<vmem>>, vector<128x128xf32>
    %cst_54 = arith.constant dense<0.000000e+00> : vector<128x128xf32>
    %122 = tpu.matmul %120, %121, %cst_54 {dimension_numbers = #tpu.dot_dimension_numbers<[1], [0], [0], [1], [0, 0, 1, 1], [], []>} : vector<128x128xf32>, vector<128x128xf32>, vector<128x128xf32> -> vector<128x128xf32>
    %c0_55 = arith.constant 0 : index
    %c0_56 = arith.constant 0 : index
    %123 = vector.load %arg16[%c0_55, %c0_56] : memref<1x128xf32, #tpu.memory_space<vmem>>, vector<1x128xf32>
    %124 = vector.broadcast %123 : vector<1x128xf32> to vector<128x128xf32>
    %125 = arith.addf %122, %124 : vector<128x128xf32>
    %126 = vector.shape_cast %125 : vector<128x128xf32> to vector<16x8x128xf32>
    %cst_57 = arith.constant dense<0.000000e+00> : vector<16x128xf32>
    %127 = vector.multi_reduction <add>, %126, %cst_57 [1] : vector<16x8x128xf32> to vector<16x128xf32>
    %c0_58 = arith.constant 0 : index
    %c0_59 = arith.constant 0 : index
    %128 = vector.load %arg7[%c0_58, %c0_59] : memref<128x128xf32, #tpu.memory_space<vmem>>, vector<128x128xf32>
    %cst_60 = arith.constant dense<0.000000e+00> : vector<16x128xf32>
    %129 = tpu.matmul %127, %128, %cst_60 {dimension_numbers = #tpu.dot_dimension_numbers<[1], [0], [0], [1], [0, 0, 1, 1], [], []>} : vector<16x128xf32>, vector<128x128xf32>, vector<16x128xf32> -> vector<16x128xf32>
    %c0_61 = arith.constant 0 : index
    %c0_62 = arith.constant 0 : index
    %130 = vector.load %arg17[%c0_61, %c0_62] : memref<1x128xf32, #tpu.memory_space<vmem>>, vector<1x128xf32>
    %131 = vector.broadcast %130 : vector<1x128xf32> to vector<16x128xf32>
    %132 = arith.addf %129, %131 : vector<16x128xf32>
    %cst_63 = arith.constant 0.000000e+00 : f32
    %133 = vector.broadcast %cst_63 : f32 to vector<16x128xf32>
    %134 = arith.cmpf ogt, %132, %133 : vector<16x128xf32>
    %cst_64 = arith.constant 0.00999999977 : f32
    %135 = vector.broadcast %cst_64 : f32 to vector<16x128xf32>
    %136 = arith.mulf %135, %132 : vector<16x128xf32>
    %137 = arith.select %134, %132, %136 : vector<16x128xi1>, vector<16x128xf32>
    %cst_65 = arith.constant dense<0.000000e+00> : vector<16xf32>
    %138 = vector.multi_reduction <add>, %137, %cst_65 [1] : vector<16x128xf32> to vector<16xf32>
    %139 = vector.shape_cast %138 : vector<16xf32> to vector<16x1xf32>
    %cst_66 = arith.constant 1.280000e+02 : f32
    %140 = vector.broadcast %cst_66 : f32 to vector<16x1xf32>
    %141 = arith.divf %139, %140 : vector<16x1xf32>
    %142 = arith.mulf %137, %137 : vector<16x128xf32>
    %cst_67 = arith.constant dense<0.000000e+00> : vector<16xf32>
    %143 = vector.multi_reduction <add>, %142, %cst_67 [1] : vector<16x128xf32> to vector<16xf32>
    %144 = vector.shape_cast %143 : vector<16xf32> to vector<16x1xf32>
    %cst_68 = arith.constant 1.280000e+02 : f32
    %145 = vector.broadcast %cst_68 : f32 to vector<16x1xf32>
    %146 = arith.divf %144, %145 : vector<16x1xf32>
    %147 = arith.mulf %141, %141 : vector<16x1xf32>
    %148 = arith.subf %146, %147 : vector<16x1xf32>
    %cst_69 = arith.constant 0.000000e+00 : f32
    %149 = vector.broadcast %cst_69 : f32 to vector<16x1xf32>
    %150 = arith.maximumf %148, %149 : vector<16x1xf32>
    %151 = vector.broadcast %141 : vector<16x1xf32> to vector<16x128xf32>
    %152 = arith.subf %137, %151 : vector<16x128xf32>
    %cst_70 = arith.constant 9.99999974E-6 : f32
    %153 = vector.broadcast %cst_70 : f32 to vector<16x1xf32>
    %154 = arith.addf %150, %153 : vector<16x1xf32>
    %155 = math.rsqrt %154 : vector<16x1xf32>
    %156 = vector.broadcast %155 : vector<16x1xf32> to vector<16x128xf32>
    %157 = arith.mulf %152, %156 : vector<16x128xf32>
    %c0_71 = arith.constant 0 : index
    %c0_72 = arith.constant 0 : index
    %158 = vector.load %arg8[%c0_71, %c0_72] : memref<128x128xf32, #tpu.memory_space<vmem>>, vector<128x128xf32>
    %cst_73 = arith.constant dense<0.000000e+00> : vector<16x128xf32>
    %159 = tpu.matmul %157, %158, %cst_73 {dimension_numbers = #tpu.dot_dimension_numbers<[1], [0], [0], [1], [0, 0, 1, 1], [], []>} : vector<16x128xf32>, vector<128x128xf32>, vector<16x128xf32> -> vector<16x128xf32>
    %c0_74 = arith.constant 0 : index
    %c0_75 = arith.constant 0 : index
    %160 = vector.load %arg18[%c0_74, %c0_75] : memref<1x128xf32, #tpu.memory_space<vmem>>, vector<1x128xf32>
    %161 = vector.broadcast %160 : vector<1x128xf32> to vector<16x128xf32>
    %162 = arith.addf %159, %161 : vector<16x128xf32>
    %cst_76 = arith.constant 0.000000e+00 : f32
    %163 = vector.broadcast %cst_76 : f32 to vector<16x128xf32>
    %164 = arith.cmpf ogt, %162, %163 : vector<16x128xf32>
    %cst_77 = arith.constant 0.00999999977 : f32
    %165 = vector.broadcast %cst_77 : f32 to vector<16x128xf32>
    %166 = arith.mulf %165, %162 : vector<16x128xf32>
    %167 = arith.select %164, %162, %166 : vector<16x128xi1>, vector<16x128xf32>
    %cst_78 = arith.constant dense<0.000000e+00> : vector<16xf32>
    %168 = vector.multi_reduction <add>, %167, %cst_78 [1] : vector<16x128xf32> to vector<16xf32>
    %169 = vector.shape_cast %168 : vector<16xf32> to vector<16x1xf32>
    %cst_79 = arith.constant 1.280000e+02 : f32
    %170 = vector.broadcast %cst_79 : f32 to vector<16x1xf32>
    %171 = arith.divf %169, %170 : vector<16x1xf32>
    %172 = arith.mulf %167, %167 : vector<16x128xf32>
    %cst_80 = arith.constant dense<0.000000e+00> : vector<16xf32>
    %173 = vector.multi_reduction <add>, %172, %cst_80 [1] : vector<16x128xf32> to vector<16xf32>
    %174 = vector.shape_cast %173 : vector<16xf32> to vector<16x1xf32>
    %cst_81 = arith.constant 1.280000e+02 : f32
    %175 = vector.broadcast %cst_81 : f32 to vector<16x1xf32>
    %176 = arith.divf %174, %175 : vector<16x1xf32>
    %177 = arith.mulf %171, %171 : vector<16x1xf32>
    %178 = arith.subf %176, %177 : vector<16x1xf32>
    %cst_82 = arith.constant 0.000000e+00 : f32
    %179 = vector.broadcast %cst_82 : f32 to vector<16x1xf32>
    %180 = arith.maximumf %178, %179 : vector<16x1xf32>
    %181 = vector.broadcast %171 : vector<16x1xf32> to vector<16x128xf32>
    %182 = arith.subf %167, %181 : vector<16x128xf32>
    %cst_83 = arith.constant 9.99999974E-6 : f32
    %183 = vector.broadcast %cst_83 : f32 to vector<16x1xf32>
    %184 = arith.addf %180, %183 : vector<16x1xf32>
    %185 = math.rsqrt %184 : vector<16x1xf32>
    %186 = vector.broadcast %185 : vector<16x1xf32> to vector<16x128xf32>
    %187 = arith.mulf %182, %186 : vector<16x128xf32>
    %c0_84 = arith.constant 0 : index
    %c0_85 = arith.constant 0 : index
    %188 = vector.load %arg9[%c0_84, %c0_85] : memref<128x128xf32, #tpu.memory_space<vmem>>, vector<128x128xf32>
    %cst_86 = arith.constant dense<0.000000e+00> : vector<16x128xf32>
    %189 = tpu.matmul %187, %188, %cst_86 {dimension_numbers = #tpu.dot_dimension_numbers<[1], [0], [0], [1], [0, 0, 1, 1], [], []>} : vector<16x128xf32>, vector<128x128xf32>, vector<16x128xf32> -> vector<16x128xf32>
    %c0_87 = arith.constant 0 : index
    %c0_88 = arith.constant 0 : index
    %190 = vector.load %arg19[%c0_87, %c0_88] : memref<1x128xf32, #tpu.memory_space<vmem>>, vector<1x128xf32>
    %191 = vector.broadcast %190 : vector<1x128xf32> to vector<16x128xf32>
    %192 = arith.addf %189, %191 : vector<16x128xf32>
    %cst_89 = arith.constant 0.000000e+00 : f32
    %193 = vector.broadcast %cst_89 : f32 to vector<16x128xf32>
    %194 = arith.cmpf ogt, %192, %193 : vector<16x128xf32>
    %cst_90 = arith.constant 0.00999999977 : f32
    %195 = vector.broadcast %cst_90 : f32 to vector<16x128xf32>
    %196 = arith.mulf %195, %192 : vector<16x128xf32>
    %197 = arith.select %194, %192, %196 : vector<16x128xi1>, vector<16x128xf32>
    %cst_91 = arith.constant dense<0.000000e+00> : vector<16xf32>
    %198 = vector.multi_reduction <add>, %197, %cst_91 [1] : vector<16x128xf32> to vector<16xf32>
    %199 = vector.shape_cast %198 : vector<16xf32> to vector<16x1xf32>
    %cst_92 = arith.constant 1.280000e+02 : f32
    %200 = vector.broadcast %cst_92 : f32 to vector<16x1xf32>
    %201 = arith.divf %199, %200 : vector<16x1xf32>
    %202 = arith.mulf %197, %197 : vector<16x128xf32>
    %cst_93 = arith.constant dense<0.000000e+00> : vector<16xf32>
    %203 = vector.multi_reduction <add>, %202, %cst_93 [1] : vector<16x128xf32> to vector<16xf32>
    %204 = vector.shape_cast %203 : vector<16xf32> to vector<16x1xf32>
    %cst_94 = arith.constant 1.280000e+02 : f32
    %205 = vector.broadcast %cst_94 : f32 to vector<16x1xf32>
    %206 = arith.divf %204, %205 : vector<16x1xf32>
    %207 = arith.mulf %201, %201 : vector<16x1xf32>
    %208 = arith.subf %206, %207 : vector<16x1xf32>
    %cst_95 = arith.constant 0.000000e+00 : f32
    %209 = vector.broadcast %cst_95 : f32 to vector<16x1xf32>
    %210 = arith.maximumf %208, %209 : vector<16x1xf32>
    %211 = vector.broadcast %201 : vector<16x1xf32> to vector<16x128xf32>
    %212 = arith.subf %197, %211 : vector<16x128xf32>
    %cst_96 = arith.constant 9.99999974E-6 : f32
    %213 = vector.broadcast %cst_96 : f32 to vector<16x1xf32>
    %214 = arith.addf %210, %213 : vector<16x1xf32>
    %215 = math.rsqrt %214 : vector<16x1xf32>
    %216 = vector.broadcast %215 : vector<16x1xf32> to vector<16x128xf32>
    %217 = arith.mulf %212, %216 : vector<16x128xf32>
    %c0_97 = arith.constant 0 : index
    %c0_98 = arith.constant 0 : index
    %218 = vector.load %arg10[%c0_97, %c0_98] : memref<128x128xf32, #tpu.memory_space<vmem>>, vector<128x128xf32>
    %cst_99 = arith.constant dense<0.000000e+00> : vector<16x128xf32>
    %219 = tpu.matmul %217, %218, %cst_99 {dimension_numbers = #tpu.dot_dimension_numbers<[1], [0], [0], [1], [0, 0, 1, 1], [], []>} : vector<16x128xf32>, vector<128x128xf32>, vector<16x128xf32> -> vector<16x128xf32>
    %c0_100 = arith.constant 0 : index
    %c0_101 = arith.constant 0 : index
    %220 = vector.load %arg20[%c0_100, %c0_101] : memref<1x128xf32, #tpu.memory_space<vmem>>, vector<1x128xf32>
    %221 = vector.broadcast %220 : vector<1x128xf32> to vector<16x128xf32>
    %222 = arith.addf %219, %221 : vector<16x128xf32>
    %cst_102 = arith.constant 0.000000e+00 : f32
    %223 = vector.broadcast %cst_102 : f32 to vector<16x128xf32>
    %224 = arith.cmpf ogt, %222, %223 : vector<16x128xf32>
    %cst_103 = arith.constant 0.00999999977 : f32
    %225 = vector.broadcast %cst_103 : f32 to vector<16x128xf32>
    %226 = arith.mulf %225, %222 : vector<16x128xf32>
    %227 = arith.select %224, %222, %226 : vector<16x128xi1>, vector<16x128xf32>
    %cst_104 = arith.constant dense<0.000000e+00> : vector<16xf32>
    %228 = vector.multi_reduction <add>, %227, %cst_104 [1] : vector<16x128xf32> to vector<16xf32>
    %229 = vector.shape_cast %228 : vector<16xf32> to vector<16x1xf32>
    %cst_105 = arith.constant 1.280000e+02 : f32
    %230 = vector.broadcast %cst_105 : f32 to vector<16x1xf32>
    %231 = arith.divf %229, %230 : vector<16x1xf32>
    %232 = arith.mulf %227, %227 : vector<16x128xf32>
    %cst_106 = arith.constant dense<0.000000e+00> : vector<16xf32>
    %233 = vector.multi_reduction <add>, %232, %cst_106 [1] : vector<16x128xf32> to vector<16xf32>
    %234 = vector.shape_cast %233 : vector<16xf32> to vector<16x1xf32>
    %cst_107 = arith.constant 1.280000e+02 : f32
    %235 = vector.broadcast %cst_107 : f32 to vector<16x1xf32>
    %236 = arith.divf %234, %235 : vector<16x1xf32>
    %237 = arith.mulf %231, %231 : vector<16x1xf32>
    %238 = arith.subf %236, %237 : vector<16x1xf32>
    %cst_108 = arith.constant 0.000000e+00 : f32
    %239 = vector.broadcast %cst_108 : f32 to vector<16x1xf32>
    %240 = arith.maximumf %238, %239 : vector<16x1xf32>
    %241 = vector.broadcast %231 : vector<16x1xf32> to vector<16x128xf32>
    %242 = arith.subf %227, %241 : vector<16x128xf32>
    %cst_109 = arith.constant 9.99999974E-6 : f32
    %243 = vector.broadcast %cst_109 : f32 to vector<16x1xf32>
    %244 = arith.addf %240, %243 : vector<16x1xf32>
    %245 = math.rsqrt %244 : vector<16x1xf32>
    %246 = vector.broadcast %245 : vector<16x1xf32> to vector<16x128xf32>
    %247 = arith.mulf %242, %246 : vector<16x128xf32>
    %c0_110 = arith.constant 0 : index
    %c0_111 = arith.constant 0 : index
    %248 = vector.load %arg11[%c0_110, %c0_111] : memref<128x128xf32, #tpu.memory_space<vmem>>, vector<128x128xf32>
    %cst_112 = arith.constant dense<0.000000e+00> : vector<16x128xf32>
    %249 = tpu.matmul %247, %248, %cst_112 {dimension_numbers = #tpu.dot_dimension_numbers<[1], [0], [0], [1], [0, 0, 1, 1], [], []>} : vector<16x128xf32>, vector<128x128xf32>, vector<16x128xf32> -> vector<16x128xf32>
    %c0_113 = arith.constant 0 : index
    %c0_114 = arith.constant 0 : index
    %250 = vector.load %arg21[%c0_113, %c0_114] : memref<1x128xf32, #tpu.memory_space<vmem>>, vector<1x128xf32>
    %251 = vector.broadcast %250 : vector<1x128xf32> to vector<16x128xf32>
    %252 = arith.addf %249, %251 : vector<16x128xf32>
    %c0_115 = arith.constant 0 : index
    %c0_116 = arith.constant 0 : index
    %253 = vector.load %arg22[%c0_115, %c0_116] : memref<16x128xf32, #tpu.memory_space<vmem>>, vector<16x128xf32>
    tpu.vector_store %arg22[%c0_115, %c0_116], %252 {strides = array<i32>} : memref<16x128xf32, #tpu.memory_space<vmem>>, vector<16x128xf32>,
    return
  }
  func.func @transform_0(%arg0: i32) -> (i32, i32) {
    %c0_i32 = arith.constant 0 : i32
    %c0_i32_0 = arith.constant 0 : i32
    return %arg0, %c0_i32 : i32, i32
  }
  func.func @transform_1(%arg0: i32) -> (i32, i32) {
    %c0_i32 = arith.constant 0 : i32
    %c0_i32_0 = arith.constant 0 : i32
    %c0_i32_1 = arith.constant 0 : i32
    return %c0_i32, %c0_i32_0 : i32, i32
  }
  func.func @transform_2(%arg0: i32) -> (i32, i32) {
    %c0_i32 = arith.constant 0 : i32
    %c0_i32_0 = arith.constant 0 : i32
    %c0_i32_1 = arith.constant 0 : i32
    return %c0_i32, %c0_i32_0 : i32, i32
  }
  func.func @transform_3(%arg0: i32) -> (i32, i32) {
    %c0_i32 = arith.constant 0 : i32
    %c0_i32_0 = arith.constant 0 : i32
    %c0_i32_1 = arith.constant 0 : i32
    return %c0_i32, %c0_i32_0 : i32, i32
  }
  func.func @transform_4(%arg0: i32) -> (i32, i32) {
    %c0_i32 = arith.constant 0 : i32
    %c0_i32_0 = arith.constant 0 : i32
    %c0_i32_1 = arith.constant 0 : i32
    return %c0_i32, %c0_i32_0 : i32, i32
  }
  func.func @transform_5(%arg0: i32) -> (i32, i32) {
    %c0_i32 = arith.constant 0 : i32
    %c0_i32_0 = arith.constant 0 : i32
    %c0_i32_1 = arith.constant 0 : i32
    return %c0_i32, %c0_i32_0 : i32, i32
  }
  func.func @transform_6(%arg0: i32) -> (i32, i32) {
    %c0_i32 = arith.constant 0 : i32
    %c0_i32_0 = arith.constant 0 : i32
    %c0_i32_1 = arith.constant 0 : i32
    return %c0_i32, %c0_i32_0 : i32, i32
  }
  func.func @transform_7(%arg0: i32) -> (i32, i32) {
    %c0_i32 = arith.constant 0 : i32
    %c0_i32_0 = arith.constant 0 : i32
    %c0_i32_1 = arith.constant 0 : i32
    return %c0_i32, %c0_i32_0 : i32, i32
  }
  func.func @transform_8(%arg0: i32) -> (i32, i32) {
    %c0_i32 = arith.constant 0 : i32
    %c0_i32_0 = arith.constant 0 : i32
    %c0_i32_1 = arith.constant 0 : i32
    return %c0_i32, %c0_i32_0 : i32, i32
  }
  func.func @transform_9(%arg0: i32) -> (i32, i32) {
    %c0_i32 = arith.constant 0 : i32
    %c0_i32_0 = arith.constant 0 : i32
    %c0_i32_1 = arith.constant 0 : i32
    return %c0_i32, %c0_i32_0 : i32, i32
  }
  func.func @transform_10(%arg0: i32) -> (i32, i32) {
    %c0_i32 = arith.constant 0 : i32
    %c0_i32_0 = arith.constant 0 : i32
    %c0_i32_1 = arith.constant 0 : i32
    return %c0_i32, %c0_i32_0 : i32, i32
  }
  func.func @transform_11(%arg0: i32) -> (i32, i32) {
    %c0_i32 = arith.constant 0 : i32
    %c0_i32_0 = arith.constant 0 : i32
    %c0_i32_1 = arith.constant 0 : i32
    return %c0_i32, %c0_i32_0 : i32, i32
  }
  func.func @transform_12(%arg0: i32) -> (i32, i32) {
    %c0_i32 = arith.constant 0 : i32
    %c0_i32_0 = arith.constant 0 : i32
    %c0_i32_1 = arith.constant 0 : i32
    return %c0_i32, %c0_i32_0 : i32, i32
  }
  func.func @transform_13(%arg0: i32) -> (i32, i32) {
    %c0_i32 = arith.constant 0 : i32
    %c0_i32_0 = arith.constant 0 : i32
    %c0_i32_1 = arith.constant 0 : i32
    return %c0_i32, %c0_i32_0 : i32, i32
  }
  func.func @transform_14(%arg0: i32) -> (i32, i32) {
    %c0_i32 = arith.constant 0 : i32
    %c0_i32_0 = arith.constant 0 : i32
    %c0_i32_1 = arith.constant 0 : i32
    return %c0_i32, %c0_i32_0 : i32, i32
  }
  func.func @transform_15(%arg0: i32) -> (i32, i32) {
    %c0_i32 = arith.constant 0 : i32
    %c0_i32_0 = arith.constant 0 : i32
    %c0_i32_1 = arith.constant 0 : i32
    return %c0_i32, %c0_i32_0 : i32, i32
  }
  func.func @transform_16(%arg0: i32) -> (i32, i32) {
    %c0_i32 = arith.constant 0 : i32
    %c0_i32_0 = arith.constant 0 : i32
    %c0_i32_1 = arith.constant 0 : i32
    return %c0_i32, %c0_i32_0 : i32, i32
  }
  func.func @transform_17(%arg0: i32) -> (i32, i32) {
    %c0_i32 = arith.constant 0 : i32
    %c0_i32_0 = arith.constant 0 : i32
    %c0_i32_1 = arith.constant 0 : i32
    return %c0_i32, %c0_i32_0 : i32, i32
  }
  func.func @transform_18(%arg0: i32) -> (i32, i32) {
    %c0_i32 = arith.constant 0 : i32
    %c0_i32_0 = arith.constant 0 : i32
    %c0_i32_1 = arith.constant 0 : i32
    return %c0_i32, %c0_i32_0 : i32, i32
  }
  func.func @transform_19(%arg0: i32) -> (i32, i32) {
    %c0_i32 = arith.constant 0 : i32
    %c0_i32_0 = arith.constant 0 : i32
    %c0_i32_1 = arith.constant 0 : i32
    return %c0_i32, %c0_i32_0 : i32, i32
  }
  func.func @transform_20(%arg0: i32) -> (i32, i32) {
    %c0_i32 = arith.constant 0 : i32
    %c0_i32_0 = arith.constant 0 : i32
    %c0_i32_1 = arith.constant 0 : i32
    return %c0_i32, %c0_i32_0 : i32, i32
  }
  func.func @transform_21(%arg0: i32) -> (i32, i32) {
    %c0_i32 = arith.constant 0 : i32
    %c0_i32_0 = arith.constant 0 : i32
    return %arg0, %c0_i32 : i32, i32
  }
}

</mosaic_0001>

<bundles_post_ra>
// kernel: tpu_custom_call.1
= control target key start
LH: loop header
LB: loop body
LE: loop exit
PB: predicated region body
PF: predicated region fallthrough
CT: control target
= control target key end

     0   :  { %s5725_s0 = inlined_call_operand.vmem [shape: f32[256,16], index: 0, kind: input, shape index: {}]   ;;  %s5726_s1 = inlined_call_operand.vmem [shape: f32[16,128], index: 1, kind: input, shape index: {}]   ;;  %s5727_s2 = inlined_call_operand.vmem [shape: f32[128,128], index: 2, kind: input, shape index: {}]   ;;  %s5728_s3 = inlined_call_operand.vmem [shape: f32[128,128], index: 3, kind: input, shape index: {}]   ;;  %s5729_s4 = inlined_call_operand.hbm [shape: f32[128,128], index: 4, kind: input, shape index: {}]   ;;  %s5730_s5 = inlined_call_operand.hbm [shape: f32[128,128], index: 5, kind: input, shape index: {}]   ;;  %s5731_s6 = inlined_call_operand.hbm [shape: f32[128,128], index: 6, kind: input, shape index: {}]   ;;  %s5732_s7 = inlined_call_operand.hbm [shape: f32[128,128], index: 7, kind: input, shape index: {}]   ;;  %s5733_s8 = inlined_call_operand.hbm [shape: f32[128,128], index: 8, kind: input, shape index: {}]   ;;  %s5734_s9 = inlined_call_operand.hbm [shape: f32[128,128], index: 9, kind: input, shape index: {}]   ;;  %s5735_s10 = inlined_call_operand.hbm [shape: f32[128,128], index: 10, kind: input, shape index: {}]   ;;  %s5736_s11 = inlined_call_operand.vmem [shape: f32[1,128], index: 11, kind: input, shape index: {}]   ;;  %s5737_s12 = inlined_call_operand.vmem [shape: f32[1,128], index: 12, kind: input, shape index: {}]   ;;  %s5738_s13 = inlined_call_operand.vmem [shape: f32[1,128], index: 13, kind: input, shape index: {}]   ;;  %s5739_s14 = inlined_call_operand.vmem [shape: f32[1,128], index: 14, kind: input, shape index: {}]   ;;  %s5740_s15 = inlined_call_operand.vmem [shape: f32[1,128], index: 15, kind: input, shape index: {}]   ;;  %s5741_s16 = inlined_call_operand.vmem [shape: f32[1,128], index: 16, kind: input, shape index: {}]   ;;  %s5742_s17 = inlined_call_operand.vmem [shape: f32[1,128], index: 17, kind: input, shape index: {}]   ;;  %s5743_s18 = inlined_call_operand.vmem [shape: f32[1,128], index: 18, kind: input, shape index: {}]   ;;  %s5744_s19 = inlined_call_operand.vmem [shape: f32[1,128], index: 19, kind: input, shape index: {}]   ;;  %s5745_s20 = inlined_call_operand.vmem [shape: f32[1,128], index: 20, kind: input, shape index: {}]   ;;  %s5746_s21 = inlined_call_operand.hbm [shape: f32[32,128], index: 21, kind: output, shape index: {}]  }
   0x1   :  { %5761 = sst [smem:[#allocation28_spill]] %s5725_s0 }
   0x2   :  { %5762 = sst [smem:[#allocation29_spill]] %s5726_s1 }
   0x3   :  { %5763 = sst [smem:[#allocation30_spill]] %s5727_s2 }
   0x4   :  { %5764 = sst [smem:[#allocation31_spill]] %s5728_s3 }
   0x5   :  { %5765 = sst [smem:[#allocation32_spill]] %s5729_s4 }
   0x6   :  { %5766 = sst [smem:[#allocation33_spill]] %s5730_s5 }
   0x7   :  { %5767 = sst [smem:[#allocation34_spill]] %s5731_s6 }
   0x8   :  { %5768 = sst [smem:[#allocation35_spill]] %s5732_s7 }
   0x9   :  { %5769 = sst [smem:[#allocation36_spill]] %s5745_s20 }
   0xa   :  { %5770 = sst [smem:[#allocation37_spill]] %s5746_s21 }
   0xb   :  { %26 = vsyncpa [#allocation3], 0 }
   0xc   :  { %27 = vsyncpa [#allocation6], 0 }
   0xd   :  { %28 = vsyncpa [#allocation9], 0 }
   0xe   :  { %29 = vsyncpa [#allocation12], 0 }
   0xf   :  { %30 = vsyncpa [#allocation4], 0 }
  0x10   :  { %32 = vsyncpa [#allocation4 + $0x1], 0  ;;  %s4356_s2 = smov 0   ;;  %s4358_s25 = smov 0  }
  0x11   :  { %s4360_s26 = smov 0   ;;  %s4362_s27 = smov 0  }
  0x12 LB: > { %5771 = sst [smem:[#allocation20_spill]] %s4220_s2  ;;  %s4377_s3 = sadd.s32 4294967295, %s4232_s27   ;;  %s4232_s27 = sphi %s4362_s27, %s5799_s27   ;;  %s4228_s26 = sphi %s4360_s26, %s5802_s26   ;;  %s4224_s25 = sphi %s4358_s25, %s5801_s25   ;;  %s4220_s2 = sphi %s4356_s2, %s5800_s2  }
  0x13   : > { %5772 = sst [smem:[#allocation21_spill]] %s4224_s25  ;;  %s3628_s28 = sadd.s32 4294967294, %s4232_s27  }
  0x14   : > { %5773 = sst [smem:[#allocation22_spill]] %s4228_s26  ;;  %s4381_s29 = sadd.s32 1, %s4232_s27  }
  0x15   : > { %5774 = sst [smem:[#allocation23_spill]] %s4232_s27  ;;  %s491_s0 = sadd.s32 1, %s4228_s26 }
  0x16   : > { %5775 = sst [smem:[#allocation24_spill]] %s4381_s29  ;;  %s488_s4 = ssub.s32 %s4232_s27, %s4381_s29 }
  0x17   : > { %p501_p0 = scmp.ne.s32.totalorder %s4228_s26, %s4224_s25  ;;  %p489_p1 = scmp.eq.s32.totalorder %s488_s4, 0 }
  0x18   : > { %p502_p2 = scmp.eq.s32.totalorder %s4377_s3, 1  ;;  %p507_p3 = scmp.ne.s32.totalorder %s4224_s25, %s4220_s2 }
  0x19   : > { %p508_p4 = scmp.eq.s32.totalorder %s3628_s28, 1  ;;  %p3629_p7 = scmp.ge.s32.totalorder %s4232_s27, 1 }
  0x1a   : > { %s4392_s30 = scalar_select %p489_p1, %s4228_s26, %s491_s0  }
  0x1b   : > { %p4394_p5 = por %p502_p2, %p501_p0  ;;  %p4398_p6 = por %p508_p4, %p507_p3 }
  0x1c   : > { %5776 = sst [smem:[#allocation25_spill]] %s4392_s30  ;;  %p515_p8 = scmp.lt.s32.totalorder %s4232_s27, 3 }
  0x1d   : > { %s5777_s5 = scalar_select %p4394_p5, 1, 0 }
  0x1e   : > { %s5779_s22 = scalar_select %p4398_p6, 1, 0 }
  0x1f   : > { %5778 = sst [smem:[#allocation26_spill]] %s5777_s5  ;;  %p3729_p9 = scmp.eq.s32.totalorder %s4377_s3, 0 }
  0x20   : > { %5780 = sst [smem:[#allocation27_spill]] %s5779_s22  ;;  %p4405_p10 = pnand %p3629_p7, %p515_p8 }
  0x21   : > { %s5782_s28 = sld [smem:[#allocation33_spill]]  ;;  %s4234_s22 = smov [#allocation5]  }
  0x22   : > { %p3703_p11 = pneg %p4405_p10  ;;  %s5783_s7 = sld [smem:[#allocation35_spill]] }
  0x23   : > { %s551_s2 = sshll.u32 %s4234_s22, 4  ;;  %s4235_s1 = smov 128   ;;  %s552_s2 = int_to_ptr.vmem [resolvable:$true] %s551_s2 }
  0x24   : > { %p4419_p12 = pnand %p3729_p9, %p3703_p11  ;;  %s4236_s24 = smov 8  }
  0x25   : > { %s4237_s30 = smov [#allocation8]   ;;  %s605_s27 = sshll.u32 %s5734_s9, 4  ;;  %s606_s27 = int_to_ptr.hbm [resolvable:$true] %s605_s27 }
  0x26   : > { %s5785_s5 = sld [smem:[#allocation32_spill]]  ;;  %s4238_s25 = smov [#allocation11]  }
  0x27   : > { %s549_s0 = sshll.u32 %s5782_s28, 4  ;;  %s579_s28 = sshll.u32 %s4237_s30, 4  ;;  %s550_s0 = int_to_ptr.hbm [resolvable:$true] %s549_s0  ;;  %s580_s28 = int_to_ptr.vmem [resolvable:$true] %s579_s28 }
  0x28   : > { %s577_s26 = sshll.u32 %s5783_s7, 4  ;;  %s4239_s7 = smov [#allocation2]   ;;  %s578_s26 = int_to_ptr.hbm [resolvable:$true] %s577_s26 }
  0x29   : > { %3709 = dma.hbm_to_vmem [thread:$0]  (!%p4419_p12), %s550_s0, 2048, %s552_s2, [#allocation6], %s4235_s1, %s4235_s1, %s4236_s24  }
  0x2a   : > { %3715 = dma.hbm_to_vmem [thread:$0]  (!%p4419_p12), %s578_s26, 2048, %s580_s28, [#allocation9], %s4235_s1, %s4235_s1, %s4236_s24  }
  0x2b   : > { %s607_s2 = sshll.u32 %s4238_s25, 4  ;;  %s537_s0 = sshll.u32 %s4239_s7, 4  ;;  %s608_s2 = int_to_ptr.vmem [resolvable:$true] %s607_s2  ;;  %s538_s0 = int_to_ptr.vmem [resolvable:$true] %s537_s0 }
  0x2c   : > { %s535_s20 = sshll.u32 %s5785_s5, 4  ;;  %s5786_s6 = sld [smem:[#allocation34_spill]]  ;;  %s536_s20 = int_to_ptr.hbm [resolvable:$true] %s535_s20 }
  0x2d   : > { %3721 = dma.hbm_to_vmem [thread:$0]  (!%p4419_p12), %s606_s27, 2048, %s608_s2, [#allocation12], %s4235_s1, %s4235_s1, %s4236_s24  }
  0x2e   : > { %3706 = dma.hbm_to_vmem [thread:$0]  (!%p4419_p12), %s536_s20, 2048, %s538_s0, [#allocation3], %s4235_s1, %s4235_s1, %s4236_s24  }
  0x2f   : > { %s591_s5 = sshll.u32 %s5733_s8, 4  ;;  %s4240_s27 = smov [#allocation7]   ;;  %s592_s5 = int_to_ptr.hbm [resolvable:$true] %s591_s5 }
  0x30   : > { %s565_s28 = sshll.u32 %s4240_s27, 4  ;;  %s4241_s22 = smov [#allocation10]   ;;  %s566_s28 = int_to_ptr.vmem [resolvable:$true] %s565_s28 }
  0x31   : > { %s593_s2 = sshll.u32 %s4241_s22, 4  ;;  %s619_s20 = sshll.u32 %s5735_s10, 4  ;;  %s594_s2 = int_to_ptr.vmem [resolvable:$true] %s593_s2  ;;  %s620_s20 = int_to_ptr.hbm [resolvable:$true] %s619_s20 }
  0x32   : > { %s563_s26 = sshll.u32 %s5786_s6, 4  ;;  %s4242_s0 = smov [#allocation13]   ;;  %s564_s26 = int_to_ptr.hbm [resolvable:$true] %s563_s26 }
  0x33   : > { %3712 = dma.hbm_to_vmem [thread:$0]  (!%p4419_p12), %s564_s26, 2048, %s566_s28, [#allocation6], %s4235_s1, %s4235_s1, %s4236_s24  }
  0x34   : > { %3718 = dma.hbm_to_vmem [thread:$0]  (!%p4419_p12), %s592_s5, 2048, %s594_s2, [#allocation9], %s4235_s1, %s4235_s1, %s4236_s24  }
  0x35   : > { %s621_s4 = sshll.u32 %s4242_s0, 4  ;;  %676 = sbr.rel (%p4405_p10) target bundleno = 2721 (0xaa1), region = 104  ;;  %s622_s4 = int_to_ptr.vmem [resolvable:$true] %s621_s4 }
  0x36   : > { %3724 = dma.hbm_to_vmem [thread:$0]  (!%p4419_p12), %s620_s20, 2048, %s622_s4, [#allocation12], %s4235_s1, %s4235_s1, %s4236_s24  }
  0x3a   : > { %4199 = dma.done.wait (%p3729_p9), [#allocation3], 2048  }
  0x3b   : > { %4201 = vsyncadd (%p3729_p9), [#allocation3], 4294965248 }
  0x3c   : > { %4203 = dma.done.wait (%p3729_p9), [#allocation6], 4096  }
  0x3d   : > { %4205 = vsyncadd (%p3729_p9), [#allocation6], 4294963200 }
  0x3e   : > { %4207 = dma.done.wait (%p3729_p9), [#allocation9], 4096  }
  0x3f   : > { %4209 = vsyncadd (%p3729_p9), [#allocation9], 4294963200 }
  0x40   : > { %4211 = dma.done.wait (%p3729_p9), [#allocation12], 4096  }
  0x41   : > { %4213 = vsyncadd (%p3729_p9), [#allocation12], 4294963200  ;;  %s4492_s29 = sshll.u32 %s4377_s3, 4  ;;  %s5787_s21 = sld [smem:[#allocation28_spill]]  ;;  %vm796_vm0 = vcmask 130048  }
  0x42   : > { %p768_p13 = scmp.lt.s32.totalorder %s4492_s29, 31  ;;  %s5788_s28 = sld [smem:[#allocation29_spill]]  ;;  %v4542_v18 = vld [vmem:[%s5736_s11] ss:$0 sm:$0xff] }
  0x43   : > { %s5789_s0 = sld [smem:[#allocation30_spill]] }
  0x44   : > { %s769_s23 = scalar_select %p768_p13, %s4492_s29, 31 }
  0x45   : > { %s5790_s26 = sld [smem:[#allocation31_spill]] }
  0x46   : > { %s3648_s1 = sshll.u32 %s769_s23, 3  ;;  %s5792_s27 = sld [smem:[#allocation21_spill]] }
  0x47   : > { %s4499_s25 = scalar_lea.vmem %s5787_s21, %s3648_s1  ;;  %s5793_s30 = sld [smem:[#allocation36_spill]] }
  0x48   : > { %v791_v0 = vld [vmem:[%s5788_s28 + $0x8] sm:$0xff]  ;;  %v790_v1 = vld [vmem:[%s5788_s28] sm:$0xff]  ;;  %v776_v4 = vld [vmem:[%s4499_s25 + $0x10] sm:$0xff]  ;;  %s5795_s24 = sld [smem:[#allocation37_spill]] }
  0x49   : > { %859 = vmatpush.msra.mxu0 %v791_v0  ;;  %v774_v2 = vld [vmem:[%s4499_s25] sm:$0xff]  ;;  %3671 = vmatpush.msra.mxu3 %v791_v0  ;;  %v775_v3 = vld [vmem:[%s4499_s25 + $0x8] sm:$0xff]  ;;  %v777_v5 = vld [vmem:[%s4499_s25 + $0x18] sm:$0xff] }
  0x4a   : > { %v784_v6 = vld [vmem:[%s4499_s25 + $0x50] sm:$0xff]  ;;  %v778_v7 = vld [vmem:[%s4499_s25 + $0x20] sm:$0xff]  ;;  %v785_v8 = vld [vmem:[%s4499_s25 + $0x58] sm:$0xff] }
  0x4b   : > { %860 = vmatpush.msra.mxu0 %v790_v1  ;;  %3672 = vmatpush.msra.mxu3 %v790_v1  ;;  %v779_v9 = vld [vmem:[%s4499_s25 + $0x28] sm:$0xff]  ;;  %v786_v10 = vld [vmem:[%s4499_s25 + $0x60] sm:$0xff]  ;;  %v780_v11 = vld [vmem:[%s4499_s25 + $0x30] sm:$0xff]  ;;  %s5791_s21 = smov %s5790_s26 }
  0x4c   : > { %3649 = vmatmul.msk.f32.vlgmr.msra.gmra.mxu0 %vm796_vm0, %v774_v2  ;;  %3659 = vmatmul.msk.f32.vlgmr.msra.gmra.mxu3 %vm796_vm0, %v784_v6  ;;  %v787_v12 = vld [vmem:[%s4499_s25 + $0x68] sm:$0xff]  ;;  %v781_v13 = vld [vmem:[%s4499_s25 + $0x38] sm:$0xff]  ;;  %v788_v14 = vld [vmem:[%s4499_s25 + $0x70] sm:$0xff]  ;;  %s764_s3 = sand.u32 1, %s5792_s27  }
  0x4d   : > { %v782_v15 = vld [vmem:[%s4499_s25 + $0x40] sm:$0xff]  ;;  %v789_v16 = vld [vmem:[%s4499_s25 + $0x78] sm:$0xff]  ;;  %v783_v17 = vld [vmem:[%s4499_s25 + $0x48] sm:$0xff]  ;;  %s3646_s22 = sshll.u32 %s764_s3, 4  ;;  %s3482_s27 = scalar_lea.sflag [#allocation4], %s764_s3 }
  0x4e   : > { %s766_s4 = scalar_lea.vmem [#allocation14], %s3646_s22 }
  0x4f   : > { %s3494_s25 = sshll.u32 %s766_s4, 4  ;;  %s3495_s25 = int_to_ptr.vmem [resolvable:$true] %s3494_s25 }
  0x54   : > { %3650 = vmatmul.msk.f32.gmra.mxu0 %vm796_vm0, %v775_v3  ;;  %3660 = vmatmul.msk.f32.gmra.mxu3 %vm796_vm0, %v785_v8 }
  0x5c   : > { %3651 = vmatmul.msk.f32.gmra.mxu0 %vm796_vm0, %v776_v4  ;;  %3661 = vmatmul.msk.f32.gmra.mxu3 %vm796_vm0, %v786_v10 }
  0x64   : > { %3652 = vmatmul.msk.f32.gmra.mxu0 %vm796_vm0, %v777_v5  ;;  %3662 = vmatmul.msk.f32.gmra.mxu3 %vm796_vm0, %v787_v12 }
  0x6c   : > { %3653 = vmatmul.msk.f32.gmra.mxu0 %vm796_vm0, %v778_v7  ;;  %3663 = vmatmul.msk.f32.gmra.mxu3 %vm796_vm0, %v788_v14 }
  0x74   : > { %3654 = vmatmul.msk.f32.gmra.mxu0 %vm796_vm0, %v779_v9  ;;  %3664 = vmatmul.msk.f32.gmra.mxu3 %vm796_vm0, %v789_v16 }
  0x7c   : > { %3655 = vmatmul.msk.f32.gmra.mxu0 %vm796_vm0, %v780_v11 }
  0x84   : > { %3656 = vmatmul.msk.f32.gmra.mxu0 %vm796_vm0, %v781_v13 }
  0x8c   : > { %3657 = vmatmul.msk.f32.gmra.mxu0 %vm796_vm0, %v782_v15 }
  0x94   : > { %3658 = vmatmul.msk.f32.gmra.mxu0 %vm796_vm0, %v783_v17 }
  0xc9   : > { %v862_v19 = vpop.f32.mrf.mxu0 }
  0xca   : > { %v863_v20 = vadd.f32 %v4542_v18, %v862_v19 }
  0xcc   : > { %vm910_vm1 = vcmp.gt.f32.partialorder %v863_v20, 0.0  ;;  %v926_v21 = vmul.f32 0.01, %v863_v20 }
  0xce   : > { %v4545_v22 = vsel %vm910_vm1, %v863_v20, %v926_v21 }
  0xcf   : > { %958 = vadd.xlane.f32.xlu0 %v4545_v22  ;;  %v1013_v26 = vmul.f32 %v4545_v22, %v4545_v22  ;;  %v892_v47 = vpop.f32.mrf.mxu3 }
  0xd0   : > { %v893_v1 = vadd.f32 %v4542_v18, %v892_v47  ;;  %v1342_v47 = vld [vmem:[%s5789_s0 + $0x48] sm:$0xff] }
  0xd1   : > { %v865_v23 = vpop.f32.mrf.mxu0 }
  0xd2   : > { %v866_v24 = vadd.f32 %v4542_v18, %v865_v23  ;;  %v936_v5 = vmul.f32 0.01, %v893_v1  ;;  %vm920_vm10 = vcmp.gt.f32.partialorder %v893_v1, 0.0 }
  0xd4   : > { %vm911_vm2 = vcmp.gt.f32.partialorder %v866_v24, 0.0  ;;  %v927_v25 = vmul.f32 0.01, %v866_v24  ;;  %v4603_v12 = vsel %vm920_vm10, %v893_v1, %v936_v5 }
  0xd5   : > { %v1023_v16 = vmul.f32 %v4603_v12, %v4603_v12 }
  0xd6   : > { %v4551_v27 = vsel %vm911_vm2, %v866_v24, %v927_v25 }
  0xd7   : > { %960 = vadd.xlane.f32.xlu1 %v4551_v27  ;;  %1029 = vadd.xlane.f32.xlu0 %v1013_v26  ;;  %v1014_v31 = vmul.f32 %v4551_v27, %v4551_v27  ;;  %v895_v55 = vpop.f32.mrf.mxu3 }
  0xd8   : > { %v896_v7 = vadd.f32 %v4542_v18, %v895_v55  ;;  %v1339_v55 = vld [vmem:[%s5789_s0 + $0x30] sm:$0xff] }
  0xd9   : > { %v868_v28 = vpop.f32.mrf.mxu0 }
  0xda   : > { %v869_v29 = vadd.f32 %v4542_v18, %v868_v28  ;;  %v937_v10 = vmul.f32 0.01, %v896_v7  ;;  %vm921_vm12 = vcmp.gt.f32.partialorder %v896_v7, 0.0  ;;  %v1348_v28 = vld [vmem:[%s5789_s0 + $0x78] sm:$0xff] }
  0xdb   : > { %1353 = vmatpush.msra.mxu1 %v1348_v28 }
  0xdc   : > { %v928_v30 = vmul.f32 0.01, %v869_v29  ;;  %vm912_vm3 = vcmp.gt.f32.partialorder %v869_v29, 0.0  ;;  %v4610_v15 = vsel %vm921_vm12, %v896_v7, %v937_v10 }
  0xdd   : > { %v1024_v17 = vmul.f32 %v4610_v15, %v4610_v15 }
  0xde   : > { %v4557_v32 = vsel %vm912_vm3, %v869_v29, %v928_v30  ;;  %v1347_v29 = vld [vmem:[%s5789_s0 + $0x70] sm:$0xff] }
  0xdf   : > { %962 = vadd.xlane.f32.xlu2 %v4557_v32  ;;  %1031 = vadd.xlane.f32.xlu1 %v1014_v31  ;;  %v1015_v36 = vmul.f32 %v4557_v32, %v4557_v32  ;;  %v898_v62 = vpop.f32.mrf.mxu3 }
  0xe0   : > { %v899_v14 = vadd.f32 %v4542_v18, %v898_v62  ;;  %1354 = vmatpush.msra.mxu1 %v1347_v29  ;;  %v1335_v62 = vld [vmem:[%s5789_s0 + $0x10] sm:$0xff] }
  0xe1   : > { %v871_v33 = vpop.f32.mrf.mxu0 }
  0xe2   : > { %v872_v34 = vadd.f32 %v4542_v18, %v871_v33  ;;  %v938_v20 = vmul.f32 0.01, %v899_v14  ;;  %vm922_vm13 = vcmp.gt.f32.partialorder %v899_v14, 0.0 }
  0xe4   : > { %v929_v35 = vmul.f32 0.01, %v872_v34  ;;  %vm913_vm4 = vcmp.gt.f32.partialorder %v872_v34, 0.0  ;;  %v4618_v24 = vsel %vm922_vm13, %v899_v14, %v938_v20 }
  0xe5   : > { %v1025_v26 = vmul.f32 %v4618_v24, %v4618_v24 }
  0xe6   : > { %v4563_v37 = vsel %vm913_vm4, %v872_v34, %v929_v35 }
  0xe7   : > { %1033 = vadd.xlane.f32.xlu2 %v1015_v36  ;;  %964 = vadd.xlane.f32.xlu0 %v4563_v37  ;;  %v1016_v38 = vmul.f32 %v4563_v37, %v4563_v37  ;;  %v901_v8 = vpop.f32.mrf.mxu3 }
  0xe8   : > { %v902_v21 = vadd.f32 %v4542_v18, %v901_v8 }
  0xe9   : > { %v874_v39 = vpop.f32.mrf.mxu0  ;;  %1035 = vadd.xlane.f32.xlu1 %v1016_v38  ;;  %v4243_v38 = vmov 128.0  }
  0xea   : > { %v875_v40 = vadd.f32 %v4542_v18, %v874_v39  ;;  %v939_v23 = vmul.f32 0.01, %v902_v21  ;;  %vm923_vm14 = vcmp.gt.f32.partialorder %v902_v21, 0.0  ;;  %3798 = vrcp.f32 %v4243_v38  ;;  %v1346_v39 = vld [vmem:[%s5789_s0 + $0x68] sm:$0xff] }
  0xeb   : > { %1355 = vmatpush.msra.mxu1 %v1346_v39 }
  0xec   : > { %v930_v41 = vmul.f32 0.01, %v875_v40  ;;  %vm914_vm5 = vcmp.gt.f32.partialorder %v875_v40, 0.0  ;;  %v4629_v31 = vsel %vm923_vm14, %v902_v21, %v939_v23 }
  0xed   : > { %v1026_v36 = vmul.f32 %v4629_v31, %v4629_v31 }
  0xee   : > { %v4569_v42 = vsel %vm914_vm5, %v875_v40, %v930_v41  ;;  %v1345_v41 = vld [vmem:[%s5789_s0 + $0x60] sm:$0xff] }
  0xef   : > { %966 = vadd.xlane.f32.xlu2 %v4569_v42  ;;  %v1017_v43 = vmul.f32 %v4569_v42, %v4569_v42  ;;  %v904_v19 = vpop.f32.mrf.mxu3  ;;  %1356 = vmatpush.msra.mxu1 %v1345_v41 }
  0xf0   : > { %v905_v25 = vadd.f32 %v4542_v18, %v904_v19 }
  0xf1   : > { %v877_v44 = vpop.f32.mrf.mxu0  ;;  %1037 = vadd.xlane.f32.xlu0 %v1017_v43  ;;  %v1344_v43 = vld [vmem:[%s5789_s0 + $0x58] sm:$0xff] }
  0xf2   : > { %v878_v45 = vadd.f32 %v4542_v18, %v877_v44  ;;  %v940_v30 = vmul.f32 0.01, %v905_v25  ;;  %vm924_vm15 = vcmp.gt.f32.partialorder %v905_v25, 0.0  ;;  %1357 = vmatpush.msra.mxu1 %v1344_v43  ;;  %v3799_v44 = vpop.eup %3798 }
  0xf3   : > { %vm995_vm1 = vweird.f32 %v3799_v44 }
  0xf4   : > { %v931_v46 = vmul.f32 0.01, %v878_v45  ;;  %vm915_vm6 = vcmp.gt.f32.partialorder %v878_v45, 0.0  ;;  %v4634_v35 = vsel %vm924_vm15, %v905_v25, %v940_v30 }
  0xf5   : > { %v1027_v40 = vmul.f32 %v4634_v35, %v4634_v35 }
  0xf6   : > { %v4575_v48 = vsel %vm915_vm6, %v878_v45, %v931_v46  ;;  %v1343_v45 = vld [vmem:[%s5789_s0 + $0x50] sm:$0xff] }
  0xf7   : > { %968 = vadd.xlane.f32.xlu1 %v4575_v48  ;;  %v1018_v49 = vmul.f32 %v4575_v48, %v4575_v48  ;;  %v907_v33 = vpop.f32.mrf.mxu3  ;;  %1358 = vmatpush.msra.mxu1 %v1343_v45 }
  0xf8   : > { %v908_v34 = vadd.f32 %v4542_v18, %v907_v33 }
  0xf9   : > { %v880_v50 = vpop.f32.mrf.mxu0  ;;  %1039 = vadd.xlane.f32.xlu2 %v1018_v49  ;;  %v991_v49 = vmul.f32 128.0, %v3799_v44  ;;  %1359 = vmatpush.msra.mxu1 %v1342_v47 }
  0xfa   : > { %v881_v51 = vadd.f32 %v4542_v18, %v880_v50  ;;  %vm925_vm0 = vcmp.gt.f32.partialorder %v908_v34, 0.0 }
  0xfc   : > { %v932_v52 = vmul.f32 0.01, %v881_v51  ;;  %vm916_vm7 = vcmp.gt.f32.partialorder %v881_v51, 0.0 }
  0xfe   : > { %v4581_v53 = vsel %vm916_vm7, %v881_v51, %v932_v52  ;;  %v1341_v51 = vld [vmem:[%s5789_s0 + $0x40] sm:$0xff]  ;;  %v1340_v52 = vld [vmem:[%s5789_s0 + $0x38] sm:$0xff] }
  0xff   : > { %970 = vadd.xlane.f32.xlu0 %v4581_v53  ;;  %v1019_v54 = vmul.f32 %v4581_v53, %v4581_v53  ;;  %1360 = vmatpush.msra.mxu1 %v1341_v51 }
 0x101   : > { %v883_v56 = vpop.f32.mrf.mxu0  ;;  %1041 = vadd.xlane.f32.xlu1 %v1019_v54  ;;  %v992_v54 = vsub.f32 1.0, %v991_v49  ;;  %1361 = vmatpush.msra.mxu1 %v1340_v52 }
 0x102   : > { %v884_v57 = vadd.f32 %v4542_v18, %v883_v56  ;;  %v1338_v56 = vld [vmem:[%s5789_s0 + $0x28] sm:$0xff] }
 0x103   : > { %1362 = vmatpush.msra.mxu1 %v1339_v55 }
 0x104   : > { %v933_v58 = vmul.f32 0.01, %v884_v57  ;;  %vm917_vm8 = vcmp.gt.f32.partialorder %v884_v57, 0.0 }
 0x105   : > { %1363 = vmatpush.msra.mxu1 %v1338_v56 }
 0x106   : > { %v4587_v59 = vsel %vm917_vm8, %v884_v57, %v933_v58  ;;  %v993_v57 = vmul.f32 %v3799_v44, %v992_v54  ;;  %v1337_v58 = vld [vmem:[%s5789_s0 + $0x20] sm:$0xff] }
 0x107   : > { %972 = vadd.xlane.f32.xlu2 %v4587_v59  ;;  %v1020_v60 = vmul.f32 %v4587_v59, %v4587_v59  ;;  %1364 = vmatpush.msra.mxu1 %v1337_v58 }
 0x109   : > { %v886_v61 = vpop.f32.mrf.mxu0  ;;  %1043 = vadd.xlane.f32.xlu0 %v1020_v60  ;;  %v1336_v60 = vld [vmem:[%s5789_s0 + $0x18] sm:$0xff] }
 0x10a   : > { %v887_v63 = vadd.f32 %v4542_v18, %v886_v61  ;;  %v994_v61 = vadd.f32 %v3799_v44, %v993_v57  ;;  %1365 = vmatpush.msra.mxu1 %v1336_v60 }
 0x10c   : > { %v934_v0 = vmul.f32 0.01, %v887_v63  ;;  %vm918_vm9 = vcmp.gt.f32.partialorder %v887_v63, 0.0  ;;  %1366 = vmatpush.msra.mxu1 %v1335_v62  ;;  %v4685_v1 = vsel %vm995_vm1, %v3799_v44, %v994_v61 }
 0x10e   : > { %v4594_v2 = vsel %vm918_vm9, %v887_v63, %v934_v0  ;;  %v1334_v0 = vld [vmem:[%s5789_s0 + $0x8] sm:$0xff] }
 0x10f   : > { %974 = vadd.xlane.f32.xlu1 %v4594_v2  ;;  %v1021_v3 = vmul.f32 %v4594_v2, %v4594_v2  ;;  %1367 = vmatpush.msra.mxu1 %v1334_v0 }
 0x111   : > { %v889_v4 = vpop.f32.mrf.mxu0  ;;  %1045 = vadd.xlane.f32.xlu2 %v1021_v3  ;;  %v1333_v3 = vld [vmem:[%s5789_s0] sm:$0xff] }
 0x112   : > { %v890_v6 = vadd.f32 %v4542_v18, %v889_v4  ;;  %v941_v18 = vmul.f32 0.01, %v908_v34  ;;  %1368 = vmatpush.msra.mxu1 %v1333_v3 }
 0x114   : > { %v935_v9 = vmul.f32 0.01, %v890_v6  ;;  %vm919_vm11 = vcmp.gt.f32.partialorder %v890_v6, 0.0  ;;  %v4653_v46 = vsel %vm925_vm0, %v908_v34, %v941_v18 }
 0x115   : > { %v1028_v50 = vmul.f32 %v4653_v46, %v4653_v46 }
 0x116   : > { %v4601_v11 = vsel %vm919_vm11, %v890_v6, %v935_v9 }
 0x117   : > { %976 = vadd.xlane.f32.xlu0 %v4601_v11  ;;  %v1022_v13 = vmul.f32 %v4601_v11, %v4601_v11 }
 0x119   : > { %978 = vadd.xlane.f32.xlu2 %v4603_v12  ;;  %1047 = vadd.xlane.f32.xlu1 %v1022_v13 }
 0x11f   : > { %1049 = vadd.xlane.f32.xlu0 %v1023_v16 }
 0x121   : > { %1051 = vadd.xlane.f32.xlu2 %v1024_v17  ;;  %980 = vadd.xlane.f32.xlu1 %v4610_v15 }
 0x127   : > { %982 = vadd.xlane.f32.xlu0 %v4618_v24 }
 0x129   : > { %984 = vadd.xlane.f32.xlu2 %v4629_v31  ;;  %1053 = vadd.xlane.f32.xlu1 %v1025_v26 }
 0x12f   : > { %1055 = vadd.xlane.f32.xlu0 %v1026_v36 }
 0x131   : > { %986 = vadd.xlane.f32.xlu1 %v4634_v35  ;;  %1057 = vadd.xlane.f32.xlu2 %v1027_v40 }
 0x137   : > { %988 = vadd.xlane.f32.xlu0 %v4653_v46 }
 0x139   : > { %1059 = vadd.xlane.f32.xlu1 %v1028_v50 }
 0x142   : > { %v959_v63 = vpop.xlane.xlu0 %958 }
 0x143   : > { %v997_v4 = vmul.f32 %v4685_v1, %v959_v63 }
 0x145   : > { %v1077_v7 = vmul.f32 %v997_v4, %v997_v4  ;;  %v1125_v60 = vsub.f32 %v4545_v22, %v997_v4 }
 0x14a   : > { %v961_v5 = vpop.xlane.xlu1 %960  ;;  %v1030_v6 = vpop.xlane.xlu0 %1029 }
 0x14b   : > { %v1061_v8 = vmul.f32 %v1030_v6, %v4685_v1  ;;  %v4693_v10 = vmul.f32 %v4685_v1, %v961_v5 }
 0x14d   : > { %v1093_v9 = vsub.f32 %v1061_v8, %v1077_v7  ;;  %v1078_v19 = vmul.f32 %v4693_v10, %v4693_v10 }
 0x14f   : > { %v1109_v13 = vmax.f32 %v1093_v9, 0.0 }
 0x151   : > { %v1141_v14 = vadd.f32 1e-05, %v1109_v13 }
 0x152   : > { %v963_v16 = vpop.xlane.xlu2 %962  ;;  %v1032_v17 = vpop.xlane.xlu1 %1031 }
 0x153   : > { %3800 = vrsqrt.f32 %v1141_v14  ;;  %v1062_v20 = vmul.f32 %v1032_v17, %v4685_v1  ;;  %v4699_v23 = vmul.f32 %v4685_v1, %v963_v16  ;;  %vm1163_vm3 = vweird.f32 %v1141_v14 }
 0x155   : > { %v1094_v21 = vsub.f32 %v1062_v20, %v1078_v19  ;;  %v1079_v34 = vmul.f32 %v4699_v23, %v4699_v23  ;;  %v1126_v20 = vsub.f32 %v4551_v27, %v4693_v10 }
 0x157   : > { %v1110_v25 = vmax.f32 %v1094_v21, 0.0 }
 0x159   : > { %v3801_v26 = vpop.eup %3800  ;;  %v1142_v28 = vadd.f32 1e-05, %v1110_v25 }
 0x15a   : > { %v1158_v29 = vmul.f32 %v3801_v26, %v1141_v14  ;;  %v1034_v30 = vpop.xlane.xlu2 %1033  ;;  %v965_v33 = vpop.xlane.xlu0 %964  ;;  %vm1164_vm2 = vweird.f32 %v3801_v26 }
 0x15b   : > { %3802 = vrsqrt.f32 %v1142_v28  ;;  %v1063_v36 = vmul.f32 %v1034_v30, %v4685_v1  ;;  %v4705_v38 = vmul.f32 %v4685_v1, %v965_v33  ;;  %vm1165_vm4 = vmor %vm1163_vm3, %vm1164_vm2  ;;  %vm1173_vm6 = vweird.f32 %v1142_v28 }
 0x15c   : > { %v1036_v39 = vpop.xlane.xlu1 %1035  ;;  %v1159_v40 = vmul.f32 %v3801_v26, %v1158_v29 }
 0x15d   : > { %v1095_v41 = vsub.f32 %v1063_v36, %v1079_v34  ;;  %v1080_v18 = vmul.f32 %v4705_v38, %v4705_v38  ;;  %v1064_v43 = vmul.f32 %v1036_v39, %v4685_v1 }
 0x15e   : > { %v1160_v44 = vmul.f32 0.5, %v1159_v40 }
 0x15f   : > { %v1111_v45 = vmax.f32 %v1095_v41, 0.0  ;;  %v1096_v47 = vsub.f32 %v1064_v43, %v1080_v18 }
 0x160   : > { %v1161_v49 = vsub.f32 1.5, %v1160_v44 }
 0x161   : > { %v3803_v50 = vpop.eup %3802  ;;  %v1143_v51 = vadd.f32 1e-05, %v1111_v45  ;;  %v1112_v52 = vmax.f32 %v1096_v47, 0.0 }
 0x162   : > { %v1168_v54 = vmul.f32 %v3803_v50, %v1142_v28  ;;  %v967_v55 = vpop.xlane.xlu2 %966  ;;  %v1162_v56 = vmul.f32 %v3801_v26, %v1161_v49  ;;  %vm1174_vm5 = vweird.f32 %v3803_v50  ;;  %v1127_v49 = vsub.f32 %v4557_v32, %v4699_v23 }
 0x163   : > { %3804 = vrsqrt.f32 %v1143_v51  ;;  %v4710_v57 = vadd.f32 1e-05, %v1112_v52  ;;  %v4713_v58 = vmul.f32 %v4685_v1, %v967_v55  ;;  %vm1175_vm7 = vmor %vm1173_vm6, %vm1174_vm5  ;;  %vm1183_vm9 = vweird.f32 %v1143_v51 }
 0x164   : > { %v1038_v61 = vpop.xlane.xlu0 %1037  ;;  %v1166_v62 = vsel %vm1165_vm4, %v3801_v26, %v1162_v56  ;;  %v1169_v63 = vmul.f32 %v3803_v50, %v1168_v54 }
 0x165   : > { %3806 = vrsqrt.f32 %v4710_v57  ;;  %v1081_v0 = vmul.f32 %v4713_v58, %v4713_v58  ;;  %v1065_v3 = vmul.f32 %v1038_v61, %v4685_v1  ;;  %v1317_v5 = vmul.f32 %v1166_v62, %v1125_v60 }
 0x166   : > { %v1170_v6 = vmul.f32 0.5, %v1169_v63  ;;  %vm1193_vm12 = vweird.f32 %v4710_v57 }
 0x167   : > { %v1097_v7 = vsub.f32 %v1065_v3, %v1081_v0  ;;  %1369 = vmatmul.f32.vlgmr.msra.gmra.mxu1 %v1317_v5 }
 0x168   : > { %v1171_v8 = vsub.f32 1.5, %v1170_v6 }
 0x169   : > { %v3805_v9 = vpop.eup %3804  ;;  %v1113_v13 = vmax.f32 %v1097_v7, 0.0 }
 0x16a   : > { %v1178_v14 = vmul.f32 %v3805_v9, %v1143_v51  ;;  %v969_v22 = vpop.xlane.xlu1 %968  ;;  %v1172_v4 = vmul.f32 %v3803_v50, %v1171_v8  ;;  %vm1184_vm8 = vweird.f32 %v3805_v9  ;;  %v1128_v8 = vsub.f32 %v4563_v37, %v4705_v38 }
 0x16b   : > { %v3807_v16 = vpop.eup %3806  ;;  %v4720_v17 = vadd.f32 1e-05, %v1113_v13  ;;  %v4723_v19 = vmul.f32 %v4685_v1, %v969_v22  ;;  %vm1185_vm10 = vmor %vm1183_vm9, %vm1184_vm8 }
 0x16c   : > { %v1188_v21 = vmul.f32 %v3807_v16, %v4710_v57  ;;  %v1040_v25 = vpop.xlane.xlu2 %1039  ;;  %v1176_v26 = vsel %vm1175_vm7, %v3803_v50, %v1172_v4  ;;  %v1179_v29 = vmul.f32 %v3805_v9, %v1178_v14  ;;  %vm1194_vm11 = vweird.f32 %v3807_v16 }
 0x16d   : > { %3808 = vrsqrt.f32 %v4720_v17  ;;  %v1082_v28 = vmul.f32 %v4723_v19, %v4723_v19  ;;  %v1066_v30 = vmul.f32 %v1040_v25, %v4685_v1  ;;  %v1318_v33 = vmul.f32 %v1176_v26, %v1126_v20  ;;  %vm1195_vm13 = vmor %vm1193_vm12, %vm1194_vm11 }
 0x16e   : > { %v1180_v34 = vmul.f32 0.5, %v1179_v29  ;;  %v1189_v36 = vmul.f32 %v3807_v16, %v1188_v21  ;;  %vm1203_vm15 = vweird.f32 %v4720_v17 }
 0x16f   : > { %v1098_v39 = vsub.f32 %v1066_v30, %v1082_v28  ;;  %1372 = vmatmul.f32.gmra.mxu1 %v1318_v33  ;;  %v1129_v33 = vsub.f32 %v4569_v42, %v4713_v58 }
 0x170   : > { %v1181_v40 = vsub.f32 1.5, %v1180_v34  ;;  %v1190_v27 = vmul.f32 0.5, %v1189_v36 }
 0x171   : > { %v1114_v10 = vmax.f32 %v1098_v39, 0.0 }
 0x172   : > { %v971_v41 = vpop.xlane.xlu0 %970  ;;  %v1182_v18 = vmul.f32 %v3805_v9, %v1181_v40  ;;  %v1191_v47 = vsub.f32 1.5, %v1190_v27 }
 0x173   : > { %v3809_v43 = vpop.eup %3808  ;;  %v4732_v44 = vadd.f32 1e-05, %v1114_v10  ;;  %v4735_v45 = vmul.f32 %v4685_v1, %v971_v41 }
 0x174   : > { %v1198_v50 = vmul.f32 %v3809_v43, %v4720_v17  ;;  %v1042_v52 = vpop.xlane.xlu1 %1041  ;;  %v1186_v54 = vsel %vm1185_vm10, %v3805_v9, %v1182_v18  ;;  %v1192_v62 = vmul.f32 %v3807_v16, %v1191_v47  ;;  %vm1204_vm14 = vweird.f32 %v3809_v43 }
 0x175   : > { %3810 = vrsqrt.f32 %v4732_v44  ;;  %v1083_v51 = vmul.f32 %v4735_v45, %v4735_v45  ;;  %v1067_v55 = vmul.f32 %v1042_v52, %v4685_v1  ;;  %v1319_v56 = vmul.f32 %v1186_v54, %v1127_v49  ;;  %vm1205_vm0 = vmor %vm1203_vm15, %vm1204_vm14 }
 0x176   : > { %v1199_v60 = vmul.f32 %v3809_v43, %v1198_v50  ;;  %v1196_v6 = vsel %vm1195_vm13, %v3807_v16, %v1192_v62  ;;  %vm1213_vm2 = vweird.f32 %v4732_v44  ;;  %v1130_v54 = vsub.f32 %v4575_v48, %v4723_v19 }
 0x177   : > { %v1099_v61 = vsub.f32 %v1067_v55, %v1083_v51  ;;  %1375 = vmatmul.f32.gmra.mxu1 %v1319_v56  ;;  %v1320_v22 = vmul.f32 %v1196_v6, %v1128_v8 }
 0x178   : > { %v1200_v63 = vmul.f32 0.5, %v1199_v60 }
 0x179   : > { %v1115_v0 = vmax.f32 %v1099_v61, 0.0 }
 0x17a   : > { %v973_v32 = vpop.xlane.xlu2 %972  ;;  %v1201_v7 = vsub.f32 1.5, %v1200_v63 }
 0x17b   : > { %v3811_v23 = vpop.eup %3810  ;;  %v4745_v3 = vadd.f32 1e-05, %v1115_v0  ;;  %v4748_v5 = vmul.f32 %v4685_v1, %v973_v32 }
 0x17c   : > { %v1208_v9 = vmul.f32 %v3811_v23, %v4732_v44  ;;  %v1044_v13 = vpop.xlane.xlu0 %1043  ;;  %v1202_v21 = vmul.f32 %v3809_v43, %v1201_v7  ;;  %vm1214_vm1 = vweird.f32 %v3811_v23 }
 0x17d   : > { %3812 = vrsqrt.f32 %v4745_v3  ;;  %v1084_v57 = vmul.f32 %v4748_v5, %v4748_v5  ;;  %v1068_v14 = vmul.f32 %v1044_v13, %v4685_v1  ;;  %vm1215_vm3 = vmor %vm1213_vm2, %vm1214_vm1  ;;  %vm1223_vm5 = vweird.f32 %v4745_v3 }
 0x17e   : > { %v1209_v4 = vmul.f32 %v3811_v23, %v1208_v9  ;;  %v1206_v28 = vsel %vm1205_vm0, %v3809_v43, %v1202_v21 }
 0x17f   : > { %v1100_v20 = vsub.f32 %v1068_v14, %v1084_v57  ;;  %1378 = vmatmul.f32.gmra.mxu1 %v1320_v22  ;;  %v1321_v40 = vmul.f32 %v1206_v28, %v1129_v33  ;;  %v1131_v57 = vsub.f32 %v4581_v53, %v4735_v45 }
 0x180   : > { %v1210_v16 = vmul.f32 0.5, %v1209_v4 }
 0x181   : > { %v1116_v25 = vmax.f32 %v1100_v20, 0.0 }
 0x182   : > { %v975_v37 = vpop.xlane.xlu1 %974  ;;  %v1211_v30 = vsub.f32 1.5, %v1210_v16 }
 0x183   : > { %v3813_v38 = vpop.eup %3812  ;;  %v4758_v26 = vadd.f32 1e-05, %v1116_v25  ;;  %v4761_v29 = vmul.f32 %v4685_v1, %v975_v37 }
 0x184   : > { %v1218_v34 = vmul.f32 %v3813_v38, %v4745_v3  ;;  %v1046_v36 = vpop.xlane.xlu2 %1045  ;;  %v1212_v41 = vmul.f32 %v3811_v23, %v1211_v30  ;;  %vm1224_vm4 = vweird.f32 %v3813_v38 }
 0x185   : > { %3814 = vrsqrt.f32 %v4758_v26  ;;  %v1085_v17 = vmul.f32 %v4761_v29, %v4761_v29  ;;  %v1069_v39 = vmul.f32 %v1046_v36, %v4685_v1  ;;  %vm1225_vm6 = vmor %vm1223_vm5, %vm1224_vm4  ;;  %vm1233_vm8 = vweird.f32 %v4758_v26 }
 0x186   : > { %v1219_v27 = vmul.f32 %v3813_v38, %v1218_v34  ;;  %v1216_v50 = vsel %vm1215_vm3, %v3811_v23, %v1212_v41 }
 0x187   : > { %v1101_v10 = vsub.f32 %v1069_v39, %v1085_v17  ;;  %1381 = vmatmul.f32.gmra.mxu1 %v1321_v40  ;;  %v1322_v61 = vmul.f32 %v1216_v50, %v1130_v54 }
 0x188   : > { %v1220_v18 = vmul.f32 0.5, %v1219_v27 }
 0x189   : > { %v1117_v43 = vmax.f32 %v1101_v10, 0.0  ;;  %v1132_v10 = vsub.f32 %v4587_v59, %v4748_v5 }
 0x18a   : > { %v977_v42 = vpop.xlane.xlu0 %976  ;;  %v1221_v52 = vsub.f32 1.5, %v1220_v18 }
 0x18b   : > { %v4771_v58 = vpop.eup %3814  ;;  %v4773_v47 = vadd.f32 1e-05, %v1117_v43  ;;  %v4776_v49 = vmul.f32 %v4685_v1, %v977_v42 }
 0x18c   : > { %v1228_v51 = vmul.f32 %v4771_v58, %v4758_v26  ;;  %v979_v55 = vpop.xlane.xlu2 %978  ;;  %v1048_v56 = vpop.xlane.xlu1 %1047  ;;  %v1222_v0 = vmul.f32 %v3813_v38, %v1221_v52  ;;  %vm1234_vm7 = vweird.f32 %v4771_v58 }
 0x18d   : > { %3816 = vrsqrt.f32 %v4773_v47  ;;  %v1086_v44 = vmul.f32 %v4776_v49, %v4776_v49  ;;  %v1070_v60 = vmul.f32 %v1048_v56, %v4685_v1  ;;  %v4788_v63 = vmul.f32 %v4685_v1, %v979_v55  ;;  %vm1235_vm9 = vmor %vm1233_vm8, %vm1234_vm7 }
 0x18e   : > { %v1229_v62 = vmul.f32 %v4771_v58, %v1228_v51  ;;  %v1226_v13 = vsel %vm1225_vm6, %v3813_v38, %v1222_v0  ;;  %vm1243_vm11 = vweird.f32 %v4773_v47 }
 0x18f   : > { %v1102_v48 = vsub.f32 %v1070_v60, %v1086_v44  ;;  %1384 = vmatmul.f32.gmra.mxu1 %v1322_v61  ;;  %v1087_v32 = vmul.f32 %v4788_v63, %v4788_v63  ;;  %v1323_v25 = vmul.f32 %v1226_v13, %v1131_v57 }
 0x190   : > { %v1230_v19 = vmul.f32 0.5, %v1229_v62 }
 0x191   : > { %v1118_v23 = vmax.f32 %v1102_v48, 0.0 }
 0x192   : > { %v1050_v6 = vpop.xlane.xlu0 %1049  ;;  %v1231_v7 = vsub.f32 1.5, %v1230_v19  ;;  %v1133_v19 = vsub.f32 %v4594_v2, %v4761_v29 }
 0x193   : > { %v4793_v8 = vpop.eup %3816  ;;  %v1071_v9 = vmul.f32 %v1050_v6, %v4685_v1  ;;  %v4800_v22 = vadd.f32 1e-05, %v1118_v23 }
 0x194   : > { %v1238_v14 = vmul.f32 %v4793_v8, %v4773_v47  ;;  %v1052_v4 = vpop.xlane.xlu2 %1051  ;;  %v981_v20 = vpop.xlane.xlu1 %980  ;;  %v1232_v53 = vmul.f32 %v4771_v58, %v1231_v7  ;;  %vm1244_vm10 = vweird.f32 %v4793_v8 }
 0x195   : > { %v1103_v3 = vsub.f32 %v1071_v9, %v1087_v32  ;;  %v1072_v21 = vmul.f32 %v1052_v4, %v4685_v1  ;;  %v4804_v16 = vmul.f32 %v4685_v1, %v981_v20  ;;  %3818 = vrsqrt.f32 %v4800_v22  ;;  %vm1245_vm12 = vmor %vm1243_vm11, %vm1244_vm10 }
 0x196   : > { %v1239_v45 = vmul.f32 %v4793_v8, %v1238_v14  ;;  %v1236_v36 = vsel %vm1235_vm9, %v4771_v58, %v1232_v53  ;;  %vm1253_vm14 = vweird.f32 %v4800_v22 }
 0x197   : > { %v1119_v37 = vmax.f32 %v1103_v3, 0.0  ;;  %v1088_v38 = vmul.f32 %v4804_v16, %v4804_v16  ;;  %1387 = vmatmul.f32.gmra.mxu1 %v1323_v25  ;;  %v1324_v50 = vmul.f32 %v1236_v36, %v1132_v10 }
 0x198   : > { %v1240_v28 = vmul.f32 0.5, %v1239_v45  ;;  %v1134_v45 = vsub.f32 %v4601_v11, %v4776_v49 }
 0x199   : > { %v4813_v30 = vadd.f32 1e-05, %v1119_v37  ;;  %v1104_v33 = vsub.f32 %v1072_v21, %v1088_v38 }
 0x19a   : > { %v983_v34 = vpop.xlane.xlu0 %982  ;;  %v1241_v40 = vsub.f32 1.5, %v1240_v28 }
 0x19b   : > { %3820 = vrsqrt.f32 %v4813_v30  ;;  %v1120_v17 = vmax.f32 %v1104_v33, 0.0  ;;  %v4818_v39 = vmul.f32 %v4685_v1, %v983_v34  ;;  %v3819_v27 = vpop.eup %3818  ;;  %vm1263_vm0 = vweird.f32 %v4813_v30 }
 0x19c   : > { %v985_v26 = vpop.xlane.xlu2 %984  ;;  %v1054_v41 = vpop.xlane.xlu1 %1053  ;;  %v1248_v18 = vmul.f32 %v3819_v27, %v4800_v22  ;;  %v1242_v59 = vmul.f32 %v4793_v8, %v1241_v40  ;;  %vm1254_vm13 = vweird.f32 %v3819_v27 }
 0x19d   : > { %v4823_v43 = vadd.f32 1e-05, %v1120_v17  ;;  %v1089_v42 = vmul.f32 %v4818_v39, %v4818_v39  ;;  %v1073_v58 = vmul.f32 %v1054_v41, %v4685_v1  ;;  %v4831_v52 = vmul.f32 %v4685_v1, %v985_v26  ;;  %vm1255_vm15 = vmor %vm1253_vm14, %vm1254_vm13 }
 0x19e   : > { %v1249_v5 = vmul.f32 %v3819_v27, %v1248_v18  ;;  %v1246_v0 = vsel %vm1245_vm12, %v4793_v8, %v1242_v59 }
 0x19f   : > { %3822 = vrsqrt.f32 %v4823_v43  ;;  %v1105_v54 = vsub.f32 %v1073_v58, %v1089_v42  ;;  %1390 = vmatmul.f32.gmra.mxu1 %v1324_v50  ;;  %v1090_v55 = vmul.f32 %v4831_v52, %v4831_v52  ;;  %v1325_v57 = vmul.f32 %v1246_v0, %v1133_v19 }
 0x1a0   : > { %v1250_v56 = vmul.f32 0.5, %v1249_v5  ;;  %v1135_v58 = vsub.f32 %v4603_v12, %v4788_v63  ;;  %vm1273_vm3 = vweird.f32 %v4823_v43  ;;  %v1136_v12 = vsub.f32 %v4610_v15, %v4804_v16 }
 0x1a1   : > { %v4834_v51 = vpop.eup %3820  ;;  %v1121_v60 = vmax.f32 %v1105_v54, 0.0 }
 0x1a2   : > { %v1258_v44 = vmul.f32 %v4834_v51, %v4813_v30  ;;  %v1056_v61 = vpop.xlane.xlu0 %1055  ;;  %v1251_v48 = vsub.f32 1.5, %v1250_v56  ;;  %vm1264_vm1 = vweird.f32 %v4834_v51 }
 0x1a3   : > { %v1074_v62 = vmul.f32 %v1056_v61, %v4685_v1  ;;  %v4845_v32 = vadd.f32 1e-05, %v1121_v60  ;;  %vm1265_vm2 = vmor %vm1263_vm0, %vm1264_vm1 }
 0x1a4   : > { %v987_v23 = vpop.xlane.xlu1 %986  ;;  %v1058_v6 = vpop.xlane.xlu2 %1057  ;;  %v1259_v47 = vmul.f32 %v4834_v51, %v1258_v44  ;;  %v1252_v14 = vmul.f32 %v3819_v27, %v1251_v48 }
 0x1a5   : > { %v3823_v7 = vpop.eup %3822  ;;  %v1106_v9 = vsub.f32 %v1074_v62, %v1090_v55  ;;  %v4849_v13 = vmul.f32 %v4685_v1, %v987_v23  ;;  %3824 = vrsqrt.f32 %v4845_v32  ;;  %v1075_v8 = vmul.f32 %v1058_v6, %v4685_v1 }
 0x1a6   : > { %v1268_v2 = vmul.f32 %v3823_v7, %v4823_v43  ;;  %v1260_v20 = vmul.f32 0.5, %v1259_v47  ;;  %v1256_v53 = vsel %vm1255_vm15, %v3819_v27, %v1252_v14  ;;  %vm1274_vm4 = vweird.f32 %v3823_v7 }
 0x1a7   : > { %v1122_v29 = vmax.f32 %v1106_v9, 0.0  ;;  %v1091_v4 = vmul.f32 %v4849_v13, %v4849_v13  ;;  %1393 = vmatmul.f32.gmra.mxu1 %v1325_v57  ;;  %v1326_v36 = vmul.f32 %v1256_v53, %v1134_v45  ;;  %vm1275_vm5 = vmor %vm1273_vm3, %vm1274_vm4  ;;  %vm1283_vm6 = vweird.f32 %v4845_v32  ;;  %v4892_v53 = vld [vmem:[%s5737_s12] ss:$0 sm:$0xff] }
 0x1a8   : > { %v1261_v38 = vsub.f32 1.5, %v1260_v20  ;;  %v1269_v28 = vmul.f32 %v3823_v7, %v1268_v2  ;;  %v1137_v47 = vsub.f32 %v4618_v24, %v4818_v39  ;;  %v1138_v14 = vsub.f32 %v4629_v31, %v4831_v52 }
 0x1a9   : > { %v4857_v3 = vadd.f32 1e-05, %v1122_v29  ;;  %v1107_v21 = vsub.f32 %v1075_v8, %v1091_v4  ;;  %v1139_v20 = vsub.f32 %v4634_v35, %v4849_v13 }
 0x1aa   : > { %v989_v25 = vpop.xlane.xlu0 %988  ;;  %v1262_v49 = vmul.f32 %v4834_v51, %v1261_v38  ;;  %v1270_v27 = vmul.f32 0.5, %v1269_v28 }
 0x1ab   : > { %v4862_v37 = vmul.f32 %v4685_v1, %v989_v25  ;;  %v3825_v33 = vpop.eup %3824  ;;  %3826 = vrsqrt.f32 %v4857_v3  ;;  %v1123_v22 = vmax.f32 %v1107_v21, 0.0  ;;  %vm1293_vm9 = vweird.f32 %v4857_v3 }
 0x1ac   : > { %v1060_v34 = vpop.xlane.xlu1 %1059  ;;  %v1278_v11 = vmul.f32 %v3825_v33, %v4845_v32  ;;  %v1266_v30 = vsel %vm1265_vm2, %v4834_v51, %v1262_v49  ;;  %v1271_v41 = vsub.f32 1.5, %v1270_v27  ;;  %vm1284_vm7 = vweird.f32 %v3825_v33 }
 0x1ad   : > { %v1092_v17 = vmul.f32 %v4862_v37, %v4862_v37  ;;  %v1076_v40 = vmul.f32 %v1060_v34, %v4685_v1  ;;  %v1155_v10 = vadd.f32 1e-05, %v1123_v22  ;;  %v1327_v59 = vmul.f32 %v1266_v30, %v1135_v58  ;;  %vm1285_vm8 = vmor %vm1283_vm6, %vm1284_vm7 }
 0x1ae   : > { %v1279_v18 = vmul.f32 %v3825_v33, %v1278_v11  ;;  %v1272_v54 = vmul.f32 %v3823_v7, %v1271_v41  ;;  %v1140_v31 = vsub.f32 %v4653_v46, %v4862_v37 }
 0x1af   : > { %1396 = vmatmul.f32.gmra.mxu1 %v1326_v36  ;;  %v1108_v26 = vsub.f32 %v1076_v40, %v1092_v17  ;;  %3828 = vrsqrt.f32 %v1155_v10  ;;  %vm1303_vm12 = vweird.f32 %v1155_v10 }
 0x1b0   : > { %v1280_v55 = vmul.f32 0.5, %v1279_v18  ;;  %v1276_v51 = vsel %vm1275_vm5, %v3823_v7, %v1272_v54 }
 0x1b1   : > { %v3827_v42 = vpop.eup %3826  ;;  %v1124_v50 = vmax.f32 %v1108_v26, 0.0  ;;  %v1328_v63 = vmul.f32 %v1276_v51, %v1136_v12 }
 0x1b2   : > { %v1288_v5 = vmul.f32 %v3827_v42, %v4857_v3  ;;  %v1281_v44 = vsub.f32 1.5, %v1280_v55  ;;  %vm1294_vm10 = vweird.f32 %v3827_v42 }
 0x1b3   : > { %v1156_v56 = vadd.f32 1e-05, %v1124_v50  ;;  %vm1295_vm11 = vmor %vm1293_vm9, %vm1294_vm10 }
 0x1b4   : > { %v1289_v60 = vmul.f32 %v3827_v42, %v1288_v5  ;;  %v1282_v62 = vmul.f32 %v3825_v33, %v1281_v44 }
 0x1b5   : > { %v3829_v61 = vpop.eup %3828  ;;  %3830 = vrsqrt.f32 %v1156_v56  ;;  %vm1313_vm15 = vweird.f32 %v1156_v56 }
 0x1b6   : > { %v1298_v43 = vmul.f32 %v3829_v61, %v1155_v10  ;;  %v1290_v0 = vmul.f32 0.5, %v1289_v60  ;;  %v1286_v48 = vsel %vm1285_vm8, %v3825_v33, %v1282_v62  ;;  %vm1304_vm13 = vweird.f32 %v3829_v61 }
 0x1b7   : > { %1399 = vmatmul.f32.gmra.mxu1 %v1327_v59  ;;  %v1329_v15 = vmul.f32 %v1286_v48, %v1137_v47  ;;  %vm1305_vm14 = vmor %vm1303_vm12, %vm1304_vm13 }
 0x1b8   : > { %v1291_v19 = vsub.f32 1.5, %v1290_v0  ;;  %v1299_v23 = vmul.f32 %v3829_v61, %v1298_v43 }
 0x1ba   : > { %v1292_v7 = vmul.f32 %v3827_v42, %v1291_v19  ;;  %v1300_v32 = vmul.f32 0.5, %v1299_v23 }
 0x1bb   : > { %v3831_v6 = vpop.eup %3830 }
 0x1bc   : > { %v1308_v16 = vmul.f32 %v3831_v6, %v1156_v56  ;;  %v1296_v9 = vsel %vm1295_vm11, %v3827_v42, %v1292_v7  ;;  %v1301_v8 = vsub.f32 1.5, %v1300_v32  ;;  %vm1314_vm0 = vweird.f32 %v3831_v6 }
 0x1bd   : > { %v1330_v2 = vmul.f32 %v1296_v9, %v1138_v14  ;;  %vm1315_vm1 = vmor %vm1313_vm15, %vm1314_vm0 }
 0x1be   : > { %v1309_v57 = vmul.f32 %v3831_v6, %v1308_v16  ;;  %v1302_v29 = vmul.f32 %v3829_v61, %v1301_v8 }
 0x1bf   : > { %1402 = vmatmul.f32.gmra.mxu1 %v1328_v63 }
 0x1c0   : > { %v1310_v24 = vmul.f32 0.5, %v1309_v57  ;;  %v1306_v39 = vsel %vm1305_vm14, %v3829_v61, %v1302_v29 }
 0x1c1   : > { %v1331_v3 = vmul.f32 %v1306_v39, %v1139_v20 }
 0x1c2   : > { %v1311_v4 = vsub.f32 1.5, %v1310_v24 }
 0x1c4   : > { %v1312_v21 = vmul.f32 %v3831_v6, %v1311_v4 }
 0x1c6   : > { %v1316_v25 = vsel %vm1315_vm1, %v3831_v6, %v1312_v21 }
 0x1c7   : > { %1405 = vmatmul.f32.gmra.mxu1 %v1329_v15  ;;  %v1332_v52 = vmul.f32 %v1316_v25, %v1140_v31  ;;  %v1848_v25 = vld [vmem:[%s5791_s21 + $0x70] sm:$0xff] }
 0x1cf   : > { %1408 = vmatmul.f32.gmra.mxu1 %v1330_v2 }
 0x1d7   : > { %1411 = vmatmul.f32.gmra.mxu1 %v1331_v3  ;;  %v1849_v3 = vld [vmem:[%s5790_s26 + $0x78] sm:$0xff]  ;;  %s3493_s26 = scalar_lea.hbm %s5795_s24, %s4492_s29 }
 0x1d8   : > { %1854 = vmatpush.msra.mxu2 %v1849_v3  ;;  %s3496_s5 = sshll.u32 %s3493_s26, 4  ;;  %s3497_s5 = int_to_ptr.hbm [resolvable:$true] %s3496_s5 }
 0x1d9   : > { %s4168_s0 = sshra.s32 %s3497_s5, 4  ;;  %s4169_s0 = int_to_ptr.hbm [resolvable:$true] %s4168_s0 }
 0x1da   : > { %1855 = vmatpush.msra.mxu2 %v1848_v25  ;;  %s4170_s2 = scalar_lea.hbm %s4169_s0, 16  ;;  %p4175_p3 = scmp.lt.s32.totalorder %s4169_s0, %s5795_s24 }
 0x1db   : > { %p4171_p0 = scmp.ne.s32.totalorder %s4169_s0, %s4170_s2 }
 0x1dd   : > { %p4172_p1 = pnand %p4171_p0, %p4394_p5 }
 0x1df   : > { %1414 = vmatmul.f32.gmra.mxu1 %v1332_v52  ;;  %v1847_v52 = vld [vmem:[%s5791_s21 + $0x68] sm:$0xff]  ;;  %p4173_p2 = pneg %p4172_p1 }
 0x1e0   : > { %1856 = vmatpush.msra.mxu2 %v1847_v52 }
 0x1e4   : > { %v1370_v45 = vpop.f32.mrf.mxu1 }
 0x1e5   : > { %v1371_v35 = vadd.f32 %v4892_v53, %v1370_v45 }
 0x1e7   : > { %v1434_v13 = vmul.f32 0.01, %v1371_v35  ;;  %vm1418_vm2 = vcmp.gt.f32.partialorder %v1371_v35, 0.0 }
 0x1e9   : > { %v4895_v38 = vsel %vm1418_vm2, %v1371_v35, %v1434_v13  ;;  %v1846_v35 = vld [vmem:[%s5791_s21 + $0x60] sm:$0xff] }
 0x1ea   : > { %1466 = vadd.xlane.f32.xlu2 %v4895_v38  ;;  %v1514_v28 = vmul.f32 %v4895_v38, %v4895_v38  ;;  %1857 = vmatpush.msra.mxu2 %v1846_v35 }
 0x1ec   : > { %v1373_v46 = vpop.f32.mrf.mxu1  ;;  %1530 = vadd.xlane.f32.xlu0 %v1514_v28 }
 0x1ed   : > { %v1374_v37 = vadd.f32 %v4892_v53, %v1373_v46  ;;  %v1845_v46 = vld [vmem:[%s5791_s21 + $0x58] sm:$0xff] }
 0x1ee   : > { %1858 = vmatpush.msra.mxu2 %v1845_v46 }
 0x1ef   : > { %v1435_v33 = vmul.f32 0.01, %v1374_v37  ;;  %vm1419_vm3 = vcmp.gt.f32.partialorder %v1374_v37, 0.0 }
 0x1f1   : > { %v4901_v34 = vsel %vm1419_vm3, %v1374_v37, %v1435_v33  ;;  %v1844_v33 = vld [vmem:[%s5791_s21 + $0x50] sm:$0xff] }
 0x1f2   : > { %1468 = vadd.xlane.f32.xlu1 %v4901_v34  ;;  %v1515_v36 = vmul.f32 %v4901_v34, %v4901_v34  ;;  %1859 = vmatpush.msra.mxu2 %v1844_v33 }
 0x1f4   : > { %v1376_v22 = vpop.f32.mrf.mxu1  ;;  %1532 = vadd.xlane.f32.xlu2 %v1515_v36 }
 0x1f5   : > { %v1377_v17 = vadd.f32 %v4892_v53, %v1376_v22  ;;  %v1843_v22 = vld [vmem:[%s5791_s21 + $0x48] sm:$0xff] }
 0x1f6   : > { %1860 = vmatpush.msra.mxu2 %v1843_v22 }
 0x1f7   : > { %v1436_v40 = vmul.f32 0.01, %v1377_v17  ;;  %vm1420_vm4 = vcmp.gt.f32.partialorder %v1377_v17, 0.0 }
 0x1f9   : > { %v4907_v11 = vsel %vm1420_vm4, %v1377_v17, %v1436_v40  ;;  %v1842_v40 = vld [vmem:[%s5791_s21 + $0x40] sm:$0xff] }
 0x1fa   : > { %1470 = vadd.xlane.f32.xlu0 %v4907_v11  ;;  %v1516_v49 = vmul.f32 %v4907_v11, %v4907_v11  ;;  %1861 = vmatpush.msra.mxu2 %v1842_v40 }
 0x1fc   : > { %1534 = vadd.xlane.f32.xlu1 %v1516_v49  ;;  %v1379_v27 = vpop.f32.mrf.mxu1 }
 0x1fd   : > { %v1380_v10 = vadd.f32 %v4892_v53, %v1379_v27 }
 0x1ff   : > { %v1437_v26 = vmul.f32 0.01, %v1380_v10  ;;  %vm1421_vm5 = vcmp.gt.f32.partialorder %v1380_v10, 0.0 }
 0x201   : > { %v4913_v30 = vsel %vm1421_vm5, %v1380_v10, %v1437_v26  ;;  %v1841_v10 = vld [vmem:[%s5791_s21 + $0x38] sm:$0xff] }
 0x202   : > { %1472 = vadd.xlane.f32.xlu2 %v4913_v30  ;;  %v1517_v41 = vmul.f32 %v4913_v30, %v4913_v30  ;;  %1862 = vmatpush.msra.mxu2 %v1841_v10 }
 0x204   : > { %1536 = vadd.xlane.f32.xlu0 %v1517_v41  ;;  %v1382_v18 = vpop.f32.mrf.mxu1  ;;  %v1840_v41 = vld [vmem:[%s5791_s21 + $0x30] sm:$0xff] }
 0x205   : > { %v1383_v42 = vadd.f32 %v4892_v53, %v1382_v18  ;;  %1863 = vmatpush.msra.mxu2 %v1840_v41 }
 0x207   : > { %v1438_v58 = vmul.f32 0.01, %v1383_v42  ;;  %vm1422_vm6 = vcmp.gt.f32.partialorder %v1383_v42, 0.0 }
 0x209   : > { %v4919_v50 = vsel %vm1422_vm6, %v1383_v42, %v1438_v58  ;;  %v1839_v42 = vld [vmem:[%s5791_s21 + $0x28] sm:$0xff] }
 0x20a   : > { %1474 = vadd.xlane.f32.xlu1 %v4919_v50  ;;  %v1518_v59 = vmul.f32 %v4919_v50, %v4919_v50  ;;  %1864 = vmatpush.msra.mxu2 %v1839_v42 }
 0x20c   : > { %v1385_v5 = vpop.f32.mrf.mxu1  ;;  %1538 = vadd.xlane.f32.xlu2 %v1518_v59  ;;  %v1838_v59 = vld [vmem:[%s5791_s21 + $0x20] sm:$0xff] }
 0x20d   : > { %v1386_v54 = vadd.f32 %v4892_v53, %v1385_v5  ;;  %1865 = vmatpush.msra.mxu2 %v1838_v59 }
 0x20f   : > { %v1439_v55 = vmul.f32 0.01, %v1386_v54  ;;  %vm1423_vm7 = vcmp.gt.f32.partialorder %v1386_v54, 0.0 }
 0x211   : > { %v4925_v56 = vsel %vm1423_vm7, %v1386_v54, %v1439_v55  ;;  %v1837_v55 = vld [vmem:[%s5791_s21 + $0x18] sm:$0xff] }
 0x212   : > { %1476 = vadd.xlane.f32.xlu0 %v4925_v56  ;;  %v1519_v51 = vmul.f32 %v4925_v56, %v4925_v56  ;;  %1866 = vmatpush.msra.mxu2 %v1837_v55 }
 0x214   : > { %1540 = vadd.xlane.f32.xlu1 %v1519_v51  ;;  %v1388_v44 = vpop.f32.mrf.mxu1 }
 0x215   : > { %v1389_v60 = vadd.f32 %v4892_v53, %v1388_v44  ;;  %v1836_v44 = vld [vmem:[%s5791_s21 + $0x10] sm:$0xff] }
 0x216   : > { %1867 = vmatpush.msra.mxu2 %v1836_v44 }
 0x217   : > { %v1440_v61 = vmul.f32 0.01, %v1389_v60  ;;  %vm1424_vm8 = vcmp.gt.f32.partialorder %v1389_v60, 0.0 }
 0x219   : > { %v4931_v12 = vsel %vm1424_vm8, %v1389_v60, %v1440_v61  ;;  %v1835_v61 = vld [vmem:[%s5791_s21 + $0x8] sm:$0xff] }
 0x21a   : > { %1478 = vadd.xlane.f32.xlu2 %v4931_v12  ;;  %v1520_v63 = vmul.f32 %v4931_v12, %v4931_v12  ;;  %1868 = vmatpush.msra.mxu2 %v1835_v61 }
 0x21c   : > { %1542 = vadd.xlane.f32.xlu0 %v1520_v63  ;;  %v1391_v43 = vpop.f32.mrf.mxu1 }
 0x21d   : > { %v1392_v62 = vadd.f32 %v4892_v53, %v1391_v43  ;;  %v1834_v43 = vld [vmem:[%s5791_s21] sm:$0xff] }
 0x21e   : > { %1869 = vmatpush.msra.mxu2 %v1834_v43 }
 0x21f   : > { %v1441_v0 = vmul.f32 0.01, %v1392_v62  ;;  %vm1425_vm9 = vcmp.gt.f32.partialorder %v1392_v62, 0.0 }
 0x221   : > { %v4937_v48 = vsel %vm1425_vm9, %v1392_v62, %v1441_v0 }
 0x222   : > { %1480 = vadd.xlane.f32.xlu1 %v4937_v48  ;;  %v1521_v19 = vmul.f32 %v4937_v48, %v4937_v48 }
 0x224   : > { %v1394_v23 = vpop.f32.mrf.mxu1  ;;  %1544 = vadd.xlane.f32.xlu2 %v1521_v19 }
 0x225   : > { %v1395_v6 = vadd.f32 %v4892_v53, %v1394_v23 }
 0x227   : > { %v1442_v47 = vmul.f32 0.01, %v1395_v6  ;;  %vm1426_vm10 = vcmp.gt.f32.partialorder %v1395_v6, 0.0 }
 0x229   : > { %v4943_v15 = vsel %vm1426_vm10, %v1395_v6, %v1442_v47 }
 0x22a   : > { %1482 = vadd.xlane.f32.xlu0 %v4943_v15  ;;  %v1522_v16 = vmul.f32 %v4943_v15, %v4943_v15 }
 0x22c   : > { %1546 = vadd.xlane.f32.xlu1 %v1522_v16  ;;  %v1397_v7 = vpop.f32.mrf.mxu1 }
 0x22d   : > { %v1398_v32 = vadd.f32 %v4892_v53, %v1397_v7 }
 0x22f   : > { %v1443_v9 = vmul.f32 0.01, %v1398_v32  ;;  %vm1427_vm11 = vcmp.gt.f32.partialorder %v1398_v32, 0.0 }
 0x231   : > { %v4949_v8 = vsel %vm1427_vm11, %v1398_v32, %v1443_v9 }
 0x232   : > { %1484 = vadd.xlane.f32.xlu2 %v4949_v8  ;;  %v1523_v57 = vmul.f32 %v4949_v8, %v4949_v8 }
 0x234   : > { %1548 = vadd.xlane.f32.xlu0 %v1523_v57  ;;  %v1400_v14 = vpop.f32.mrf.mxu1 }
 0x235   : > { %v1401_v2 = vadd.f32 %v4892_v53, %v1400_v14 }
 0x237   : > { %v1444_v29 = vmul.f32 0.01, %v1401_v2  ;;  %vm1428_vm12 = vcmp.gt.f32.partialorder %v1401_v2, 0.0 }
 0x239   : > { %v4955_v24 = vsel %vm1428_vm12, %v1401_v2, %v1444_v29 }
 0x23a   : > { %1486 = vadd.xlane.f32.xlu1 %v4955_v24  ;;  %v1524_v39 = vmul.f32 %v4955_v24, %v4955_v24 }
 0x23c   : > { %v1403_v4 = vpop.f32.mrf.mxu1  ;;  %1550 = vadd.xlane.f32.xlu2 %v1524_v39 }
 0x23d   : > { %v1404_v20 = vadd.f32 %v4892_v53, %v1403_v4 }
 0x23f   : > { %v1445_v21 = vmul.f32 0.01, %v1404_v20  ;;  %vm1429_vm13 = vcmp.gt.f32.partialorder %v1404_v20, 0.0 }
 0x241   : > { %v4967_v31 = vsel %vm1429_vm13, %v1404_v20, %v1445_v21 }
 0x242   : > { %1488 = vadd.xlane.f32.xlu0 %v4967_v31  ;;  %v1525_v45 = vmul.f32 %v4967_v31, %v4967_v31 }
 0x244   : > { %1552 = vadd.xlane.f32.xlu1 %v1525_v45  ;;  %v1406_v13 = vpop.f32.mrf.mxu1 }
 0x245   : > { %v1407_v28 = vadd.f32 %v4892_v53, %v1406_v13 }
 0x247   : > { %v1446_v37 = vmul.f32 0.01, %v1407_v28  ;;  %vm1430_vm14 = vcmp.gt.f32.partialorder %v1407_v28, 0.0 }
 0x249   : > { %v4985_v36 = vsel %vm1430_vm14, %v1407_v28, %v1446_v37 }
 0x24a   : > { %1490 = vadd.xlane.f32.xlu2 %v4985_v36  ;;  %v1526_v17 = vmul.f32 %v4985_v36, %v4985_v36 }
 0x24c   : > { %1554 = vadd.xlane.f32.xlu0 %v1526_v17  ;;  %v1409_v49 = vpop.f32.mrf.mxu1 }
 0x24d   : > { %v1410_v27 = vadd.f32 %v4892_v53, %v1409_v49 }
 0x24f   : > { %v1447_v26 = vmul.f32 0.01, %v1410_v27  ;;  %vm1431_vm15 = vcmp.gt.f32.partialorder %v1410_v27, 0.0 }
 0x251   : > { %v5003_v18 = vsel %vm1431_vm15, %v1410_v27, %v1447_v26 }
 0x252   : > { %1492 = vadd.xlane.f32.xlu1 %v5003_v18  ;;  %v1527_v58 = vmul.f32 %v5003_v18, %v5003_v18 }
 0x254   : > { %v1412_v5 = vpop.f32.mrf.mxu1  ;;  %1556 = vadd.xlane.f32.xlu2 %v1527_v58 }
 0x255   : > { %v1413_v54 = vadd.f32 %v4892_v53, %v1412_v5 }
 0x257   : > { %v1448_v51 = vmul.f32 0.01, %v1413_v54  ;;  %vm1432_vm0 = vcmp.gt.f32.partialorder %v1413_v54, 0.0 }
 0x259   : > { %v5021_v60 = vsel %vm1432_vm0, %v1413_v54, %v1448_v51 }
 0x25a   : > { %1494 = vadd.xlane.f32.xlu0 %v5021_v60  ;;  %v1528_v63 = vmul.f32 %v5021_v60, %v5021_v60 }
 0x25c   : > { %1558 = vadd.xlane.f32.xlu1 %v1528_v63  ;;  %v1415_v62 = vpop.f32.mrf.mxu1 }
 0x25d   : > { %v1416_v0 = vadd.f32 %v4892_v53, %v1415_v62  ;;  %v1467_v19 = vpop.xlane.xlu2 %1466 }
 0x25e   : > { %v1498_v23 = vmul.f32 %v1467_v19, %v4685_v1 }
 0x25f   : > { %v1449_v6 = vmul.f32 0.01, %v1416_v0  ;;  %v1531_v47 = vpop.xlane.xlu0 %1530  ;;  %vm1433_vm1 = vcmp.gt.f32.partialorder %v1416_v0, 0.0 }
 0x260   : > { %v1578_v16 = vmul.f32 %v1498_v23, %v1498_v23  ;;  %v1562_v7 = vmul.f32 %v1531_v47, %v4685_v1  ;;  %v1626_v5 = vsub.f32 %v4895_v38, %v1498_v23 }
 0x261   : > { %v5035_v32 = vsel %vm1433_vm1, %v1416_v0, %v1449_v6 }
 0x262   : > { %v1594_v9 = vsub.f32 %v1562_v7, %v1578_v16  ;;  %1496 = vadd.xlane.f32.xlu2 %v5035_v32  ;;  %v1529_v57 = vmul.f32 %v5035_v32, %v5035_v32 }
 0x264   : > { %v1610_v14 = vmax.f32 %v1594_v9, 0.0  ;;  %1560 = vadd.xlane.f32.xlu0 %v1529_v57 }
 0x265   : > { %v1469_v53 = vpop.xlane.xlu1 %1468 }
 0x266   : > { %v1642_v2 = vadd.f32 1e-05, %v1610_v14  ;;  %v1499_v29 = vmul.f32 %v1469_v53, %v4685_v1 }
 0x267   : > { %v1533_v39 = vpop.xlane.xlu2 %1532 }
 0x268   : > { %3832 = vrsqrt.f32 %v1642_v2  ;;  %v1579_v4 = vmul.f32 %v1499_v29, %v1499_v29  ;;  %v1563_v20 = vmul.f32 %v1533_v39, %v4685_v1  ;;  %vm1664_vm3 = vweird.f32 %v1642_v2 }
 0x269   : > { %v1627_v9 = vsub.f32 %v4901_v34, %v1499_v29 }
 0x26a   : > { %v1595_v3 = vsub.f32 %v1563_v20, %v1579_v4 }
 0x26c   : > { %v1611_v21 = vmax.f32 %v1595_v3, 0.0 }
 0x26d   : > { %v1471_v25 = vpop.xlane.xlu0 %1470 }
 0x26e   : > { %v3833_v52 = vpop.eup %3832  ;;  %v1643_v45 = vadd.f32 1e-05, %v1611_v21  ;;  %v5043_v35 = vmul.f32 %v1471_v25, %v4685_v1 }
 0x26f   : > { %v1659_v13 = vmul.f32 %v3833_v52, %v1642_v2  ;;  %v1535_v28 = vpop.xlane.xlu1 %1534  ;;  %vm1665_vm2 = vweird.f32 %v3833_v52 }
 0x270   : > { %3834 = vrsqrt.f32 %v1643_v45  ;;  %v1580_v46 = vmul.f32 %v5043_v35, %v5043_v35  ;;  %v1564_v37 = vmul.f32 %v1535_v28, %v4685_v1  ;;  %vm1666_vm4 = vmor %vm1664_vm3, %vm1665_vm2  ;;  %vm1674_vm6 = vweird.f32 %v1643_v45 }
 0x271   : > { %v1660_v33 = vmul.f32 %v3833_v52, %v1659_v13 }
 0x272   : > { %v1596_v22 = vsub.f32 %v1564_v37, %v1580_v46  ;;  %v1628_v46 = vsub.f32 %v4907_v11, %v5043_v35 }
 0x273   : > { %v1661_v17 = vmul.f32 0.5, %v1660_v33 }
 0x274   : > { %v1612_v40 = vmax.f32 %v1596_v22, 0.0 }
 0x275   : > { %v1473_v49 = vpop.xlane.xlu2 %1472  ;;  %v1662_v27 = vsub.f32 1.5, %v1661_v17 }
 0x276   : > { %v3835_v10 = vpop.eup %3834  ;;  %v1644_v26 = vadd.f32 1e-05, %v1612_v40  ;;  %v5049_v41 = vmul.f32 %v1473_v49, %v4685_v1 }
 0x277   : > { %v1669_v42 = vmul.f32 %v3835_v10, %v1643_v45  ;;  %v1537_v58 = vpop.xlane.xlu0 %1536  ;;  %v1663_v59 = vmul.f32 %v3833_v52, %v1662_v27  ;;  %vm1675_vm5 = vweird.f32 %v3835_v10 }
 0x278   : > { %3836 = vrsqrt.f32 %v1644_v26  ;;  %v1581_v54 = vmul.f32 %v5049_v41, %v5049_v41  ;;  %v1565_v55 = vmul.f32 %v1537_v58, %v4685_v1  ;;  %vm1676_vm7 = vmor %vm1674_vm6, %vm1675_vm5  ;;  %vm1684_vm9 = vweird.f32 %v1644_v26 }
 0x279   : > { %v1667_v51 = vsel %vm1666_vm4, %v3833_v52, %v1663_v59  ;;  %v1670_v44 = vmul.f32 %v3835_v10, %v1669_v42 }
 0x27a   : > { %v1597_v61 = vsub.f32 %v1565_v55, %v1581_v54  ;;  %v1818_v63 = vmul.f32 %v1667_v51, %v1626_v5  ;;  %v1629_v55 = vsub.f32 %v4913_v30, %v5049_v41 }
 0x27b   : > { %v1671_v43 = vmul.f32 0.5, %v1670_v44 }
 0x27c   : > { %v1613_v62 = vmax.f32 %v1597_v61, 0.0  ;;  %1870 = vmatmul.f32.vlgmr.msra.gmra.mxu2 %v1818_v63 }
 0x27d   : > { %v1475_v0 = vpop.xlane.xlu1 %1474  ;;  %v1672_v19 = vsub.f32 1.5, %v1671_v43 }
 0x27e   : > { %v3837_v6 = vpop.eup %3836  ;;  %v1645_v47 = vadd.f32 1e-05, %v1613_v62  ;;  %v5056_v38 = vmul.f32 %v1475_v0, %v4685_v1 }
 0x27f   : > { %v1679_v23 = vmul.f32 %v3837_v6, %v1644_v26  ;;  %v1539_v16 = vpop.xlane.xlu2 %1538  ;;  %v1673_v7 = vmul.f32 %v3835_v10, %v1672_v19  ;;  %vm1685_vm8 = vweird.f32 %v3837_v6 }
 0x280   : > { %3838 = vrsqrt.f32 %v1645_v47  ;;  %v1582_v57 = vmul.f32 %v5056_v38, %v5056_v38  ;;  %v1566_v14 = vmul.f32 %v1539_v16, %v4685_v1  ;;  %vm1686_vm10 = vmor %vm1684_vm9, %vm1685_vm8  ;;  %vm1694_vm12 = vweird.f32 %v1645_v47 }
 0x281   : > { %v1677_v53 = vsel %vm1676_vm7, %v3835_v10, %v1673_v7  ;;  %v1680_v2 = vmul.f32 %v3837_v6, %v1679_v23 }
 0x282   : > { %v1598_v39 = vsub.f32 %v1566_v14, %v1582_v57  ;;  %v1819_v4 = vmul.f32 %v1677_v53, %v1627_v9  ;;  %v1630_v57 = vsub.f32 %v4919_v50, %v5056_v38 }
 0x283   : > { %v1681_v20 = vmul.f32 0.5, %v1680_v2 }
 0x284   : > { %v1614_v3 = vmax.f32 %v1598_v39, 0.0  ;;  %1873 = vmatmul.f32.gmra.mxu2 %v1819_v4 }
 0x285   : > { %v1477_v21 = vpop.xlane.xlu0 %1476  ;;  %v1682_v25 = vsub.f32 1.5, %v1681_v20 }
 0x286   : > { %v3839_v52 = vpop.eup %3838  ;;  %v1646_v45 = vadd.f32 1e-05, %v1614_v3  ;;  %v5063_v34 = vmul.f32 %v1477_v21, %v4685_v1 }
 0x287   : > { %v1689_v29 = vmul.f32 %v3839_v52, %v1645_v47  ;;  %v1541_v13 = vpop.xlane.xlu1 %1540  ;;  %v1683_v28 = vmul.f32 %v3837_v6, %v1682_v25  ;;  %vm1695_vm11 = vweird.f32 %v3839_v52 }
 0x288   : > { %3840 = vrsqrt.f32 %v1646_v45  ;;  %v1583_v37 = vmul.f32 %v5063_v34, %v5063_v34  ;;  %v1567_v33 = vmul.f32 %v1541_v13, %v4685_v1  ;;  %vm1696_vm13 = vmor %vm1694_vm12, %vm1695_vm11  ;;  %vm1704_vm15 = vweird.f32 %v1646_v45 }
 0x289   : > { %v1687_v22 = vsel %vm1686_vm10, %v3837_v6, %v1683_v28  ;;  %v1690_v17 = vmul.f32 %v3839_v52, %v1689_v29 }
 0x28a   : > { %v1599_v40 = vsub.f32 %v1567_v33, %v1583_v37  ;;  %v1820_v49 = vmul.f32 %v1687_v22, %v1628_v46  ;;  %v1631_v46 = vsub.f32 %v4925_v56, %v5063_v34 }
 0x28b   : > { %v1691_v27 = vmul.f32 0.5, %v1690_v17 }
 0x28c   : > { %v1615_v10 = vmax.f32 %v1599_v40, 0.0  ;;  %1876 = vmatmul.f32.gmra.mxu2 %v1820_v49 }
 0x28d   : > { %v1479_v42 = vpop.xlane.xlu2 %1478  ;;  %v1692_v58 = vsub.f32 1.5, %v1691_v27 }
 0x28e   : > { %v3841_v26 = vpop.eup %3840  ;;  %v1647_v59 = vadd.f32 1e-05, %v1615_v10  ;;  %v5071_v11 = vmul.f32 %v1479_v42, %v4685_v1 }
 0x28f   : > { %v1699_v35 = vmul.f32 %v3841_v26, %v1646_v45  ;;  %v1543_v5 = vpop.xlane.xlu0 %1542  ;;  %v1693_v54 = vmul.f32 %v3839_v52, %v1692_v58  ;;  %vm1705_vm14 = vweird.f32 %v3841_v26 }
 0x290   : > { %3842 = vrsqrt.f32 %v1647_v59  ;;  %v1584_v51 = vmul.f32 %v5071_v11, %v5071_v11  ;;  %v1568_v44 = vmul.f32 %v1543_v5, %v4685_v1  ;;  %vm1706_vm0 = vmor %vm1704_vm15, %vm1705_vm14  ;;  %vm1714_vm2 = vweird.f32 %v1647_v59 }
 0x291   : > { %v1697_v61 = vsel %vm1696_vm13, %v3839_v52, %v1693_v54  ;;  %v1700_v63 = vmul.f32 %v3841_v26, %v1699_v35  ;;  %v1632_v54 = vsub.f32 %v4931_v12, %v5071_v11 }
 0x292   : > { %v1600_v43 = vsub.f32 %v1568_v44, %v1584_v51  ;;  %v1821_v62 = vmul.f32 %v1697_v61, %v1629_v55 }
 0x293   : > { %v1701_v0 = vmul.f32 0.5, %v1700_v63 }
 0x294   : > { %v1616_v19 = vmax.f32 %v1600_v43, 0.0  ;;  %1879 = vmatmul.f32.gmra.mxu2 %v1821_v62 }
 0x295   : > { %v1481_v6 = vpop.xlane.xlu1 %1480  ;;  %v1702_v23 = vsub.f32 1.5, %v1701_v0 }
 0x296   : > { %v3843_v47 = vpop.eup %3842  ;;  %v1648_v16 = vadd.f32 1e-05, %v1616_v19  ;;  %v5079_v30 = vmul.f32 %v1481_v6, %v4685_v1 }
 0x297   : > { %v1709_v41 = vmul.f32 %v3843_v47, %v1647_v59  ;;  %v1545_v7 = vpop.xlane.xlu2 %1544  ;;  %v1703_v9 = vmul.f32 %v3841_v26, %v1702_v23  ;;  %vm1715_vm1 = vweird.f32 %v3843_v47 }
 0x298   : > { %3844 = vrsqrt.f32 %v1648_v16  ;;  %v1585_v14 = vmul.f32 %v5079_v30, %v5079_v30  ;;  %v1569_v53 = vmul.f32 %v1545_v7, %v4685_v1  ;;  %vm1716_vm3 = vmor %vm1714_vm2, %vm1715_vm1  ;;  %vm1724_vm5 = vweird.f32 %v1648_v16 }
 0x299   : > { %v1707_v2 = vsel %vm1706_vm0, %v3841_v26, %v1703_v9  ;;  %v1710_v39 = vmul.f32 %v3843_v47, %v1709_v41  ;;  %v1633_v7 = vsub.f32 %v4937_v48, %v5079_v30 }
 0x29a   : > { %v1601_v4 = vsub.f32 %v1569_v53, %v1585_v14  ;;  %v1822_v20 = vmul.f32 %v1707_v2, %v1630_v57 }
 0x29b   : > { %v1711_v3 = vmul.f32 0.5, %v1710_v39 }
 0x29c   : > { %v1617_v21 = vmax.f32 %v1601_v4, 0.0  ;;  %1882 = vmatmul.f32.gmra.mxu2 %v1822_v20 }
 0x29d   : > { %v1483_v25 = vpop.xlane.xlu0 %1482  ;;  %v1712_v52 = vsub.f32 1.5, %v1711_v3 }
 0x29e   : > { %v3845_v45 = vpop.eup %3844  ;;  %v1649_v29 = vadd.f32 1e-05, %v1617_v21  ;;  %v5087_v50 = vmul.f32 %v1483_v25, %v4685_v1 }
 0x29f   : > { %v1719_v38 = vmul.f32 %v3845_v45, %v1648_v16  ;;  %v1547_v13 = vpop.xlane.xlu1 %1546  ;;  %v1713_v28 = vmul.f32 %v3843_v47, %v1712_v52  ;;  %vm1725_vm4 = vweird.f32 %v3845_v45 }
 0x2a0   : > { %3846 = vrsqrt.f32 %v1649_v29  ;;  %v1586_v37 = vmul.f32 %v5087_v50, %v5087_v50  ;;  %v1570_v33 = vmul.f32 %v1547_v13, %v4685_v1  ;;  %vm1726_vm6 = vmor %vm1724_vm5, %vm1725_vm4  ;;  %vm1734_vm8 = vweird.f32 %v1649_v29 }
 0x2a1   : > { %v1717_v22 = vsel %vm1716_vm3, %v3843_v47, %v1713_v28  ;;  %v1720_v17 = vmul.f32 %v3845_v45, %v1719_v38  ;;  %v1634_v38 = vsub.f32 %v4943_v15, %v5087_v50 }
 0x2a2   : > { %v1602_v40 = vsub.f32 %v1570_v33, %v1586_v37  ;;  %v1823_v49 = vmul.f32 %v1717_v22, %v1631_v46 }
 0x2a3   : > { %v1721_v27 = vmul.f32 0.5, %v1720_v17 }
 0x2a4   : > { %v1618_v10 = vmax.f32 %v1602_v40, 0.0  ;;  %1885 = vmatmul.f32.gmra.mxu2 %v1823_v49 }
 0x2a5   : > { %v1485_v42 = vpop.xlane.xlu2 %1484  ;;  %v1722_v58 = vsub.f32 1.5, %v1721_v27 }
 0x2a6   : > { %v3847_v26 = vpop.eup %3846  ;;  %v1650_v59 = vadd.f32 1e-05, %v1618_v10  ;;  %v5095_v56 = vmul.f32 %v1485_v42, %v4685_v1 }
 0x2a7   : > { %v1729_v34 = vmul.f32 %v3847_v26, %v1649_v29  ;;  %v1549_v35 = vpop.xlane.xlu0 %1548  ;;  %v1723_v5 = vmul.f32 %v3845_v45, %v1722_v58  ;;  %vm1735_vm7 = vweird.f32 %v3847_v26 }
 0x2a8   : > { %3848 = vrsqrt.f32 %v1650_v59  ;;  %v1587_v55 = vmul.f32 %v5095_v56, %v5095_v56  ;;  %v1571_v51 = vmul.f32 %v1549_v35, %v4685_v1  ;;  %vm1736_vm9 = vmor %vm1734_vm8, %vm1735_vm7  ;;  %vm1744_vm11 = vweird.f32 %v1650_v59 }
 0x2a9   : > { %v1727_v44 = vsel %vm1726_vm6, %v3845_v45, %v1723_v5  ;;  %v1730_v61 = vmul.f32 %v3847_v26, %v1729_v34 }
 0x2aa   : > { %v1603_v63 = vsub.f32 %v1571_v51, %v1587_v55  ;;  %v1824_v43 = vmul.f32 %v1727_v44, %v1632_v54 }
 0x2ab   : > { %v1731_v62 = vmul.f32 0.5, %v1730_v61 }
 0x2ac   : > { %v1619_v0 = vmax.f32 %v1603_v63, 0.0  ;;  %1888 = vmatmul.f32.gmra.mxu2 %v1824_v43 }
 0x2ad   : > { %v1487_v19 = vpop.xlane.xlu1 %1486  ;;  %v1732_v6 = vsub.f32 1.5, %v1731_v62 }
 0x2ae   : > { %v3849_v23 = vpop.eup %3848  ;;  %v1651_v47 = vadd.f32 1e-05, %v1619_v0  ;;  %v5103_v12 = vmul.f32 %v1487_v19, %v4685_v1 }
 0x2af   : > { %v1739_v11 = vmul.f32 %v3849_v23, %v1650_v59  ;;  %v1551_v16 = vpop.xlane.xlu2 %1550  ;;  %v1733_v41 = vmul.f32 %v3847_v26, %v1732_v6  ;;  %vm1745_vm10 = vweird.f32 %v3849_v23  ;;  %v1635_v59 = vsub.f32 %v4949_v8, %v5095_v56 }
 0x2b0   : > { %3850 = vrsqrt.f32 %v1651_v47  ;;  %v1588_v9 = vmul.f32 %v5103_v12, %v5103_v12  ;;  %v1572_v57 = vmul.f32 %v1551_v16, %v4685_v1  ;;  %vm1746_vm12 = vmor %vm1744_vm11, %vm1745_vm10  ;;  %vm1754_vm14 = vweird.f32 %v1651_v47 }
 0x2b1   : > { %v1737_v14 = vsel %vm1736_vm9, %v3847_v26, %v1733_v41  ;;  %v1740_v53 = vmul.f32 %v3849_v23, %v1739_v11 }
 0x2b2   : > { %v1604_v2 = vsub.f32 %v1572_v57, %v1588_v9  ;;  %v1825_v39 = vmul.f32 %v1737_v14, %v1633_v7 }
 0x2b3   : > { %v1741_v4 = vmul.f32 0.5, %v1740_v53 }
 0x2b4   : > { %v1620_v20 = vmax.f32 %v1604_v2, 0.0  ;;  %1891 = vmatmul.f32.gmra.mxu2 %v1825_v39 }
 0x2b5   : > { %v1489_v3 = vpop.xlane.xlu0 %1488  ;;  %v1742_v21 = vsub.f32 1.5, %v1741_v4 }
 0x2b6   : > { %v3851_v25 = vpop.eup %3850  ;;  %v1652_v52 = vadd.f32 1e-05, %v1620_v20  ;;  %v5111_v48 = vmul.f32 %v1489_v3, %v4685_v1 }
 0x2b7   : > { %v1749_v30 = vmul.f32 %v3851_v25, %v1651_v47  ;;  %v1553_v45 = vpop.xlane.xlu1 %1552  ;;  %v1743_v29 = vmul.f32 %v3849_v23, %v1742_v21  ;;  %vm1755_vm13 = vweird.f32 %v3851_v25 }
 0x2b8   : > { %3852 = vrsqrt.f32 %v1652_v52  ;;  %v1589_v13 = vmul.f32 %v5111_v48, %v5111_v48  ;;  %v1573_v28 = vmul.f32 %v1553_v45, %v4685_v1  ;;  %vm1756_vm15 = vmor %vm1754_vm14, %vm1755_vm13  ;;  %vm1764_vm1 = vweird.f32 %v1652_v52 }
 0x2b9   : > { %v1747_v46 = vsel %vm1746_vm12, %v3849_v23, %v1743_v29  ;;  %v1750_v37 = vmul.f32 %v3851_v25, %v1749_v30  ;;  %v1636_v23 = vsub.f32 %v4955_v24, %v5103_v12  ;;  %v1637_v21 = vsub.f32 %v4967_v31, %v5111_v48 }
 0x2ba   : > { %v1605_v33 = vsub.f32 %v1573_v28, %v1589_v13  ;;  %v1826_v22 = vmul.f32 %v1747_v46, %v1634_v38 }
 0x2bb   : > { %v1751_v17 = vmul.f32 0.5, %v1750_v37 }
 0x2bc   : > { %v1621_v40 = vmax.f32 %v1605_v33, 0.0  ;;  %1894 = vmatmul.f32.gmra.mxu2 %v1826_v22 }
 0x2bd   : > { %v1491_v49 = vpop.xlane.xlu2 %1490  ;;  %v1752_v27 = vsub.f32 1.5, %v1751_v17 }
 0x2be   : > { %v3853_v10 = vpop.eup %3852  ;;  %v1653_v42 = vadd.f32 1e-05, %v1621_v40  ;;  %v5119_v15 = vmul.f32 %v1491_v49, %v4685_v1 }
 0x2bf   : > { %v1759_v50 = vmul.f32 %v3853_v10, %v1652_v52  ;;  %v1555_v58 = vpop.xlane.xlu0 %1554  ;;  %v1753_v26 = vmul.f32 %v3851_v25, %v1752_v27  ;;  %vm1765_vm0 = vweird.f32 %v3853_v10 }
 0x2c0   : > { %3854 = vrsqrt.f32 %v1653_v42  ;;  %v1590_v34 = vmul.f32 %v5119_v15, %v5119_v15  ;;  %v1574_v35 = vmul.f32 %v1555_v58, %v4685_v1  ;;  %vm1766_vm2 = vmor %vm1764_vm1, %vm1765_vm0  ;;  %vm1774_vm4 = vweird.f32 %v1653_v42 }
 0x2c1   : > { %v1757_v5 = vsel %vm1756_vm15, %v3851_v25, %v1753_v26  ;;  %v1760_v54 = vmul.f32 %v3853_v10, %v1759_v50  ;;  %v1638_v49 = vsub.f32 %v4985_v36, %v5119_v15 }
 0x2c2   : > { %v1606_v55 = vsub.f32 %v1574_v35, %v1590_v34  ;;  %v1827_v51 = vmul.f32 %v1757_v5, %v1635_v59 }
 0x2c3   : > { %v1761_v44 = vmul.f32 0.5, %v1760_v54 }
 0x2c4   : > { %v1622_v61 = vmax.f32 %v1606_v55, 0.0  ;;  %1897 = vmatmul.f32.gmra.mxu2 %v1827_v51 }
 0x2c5   : > { %v1493_v63 = vpop.xlane.xlu1 %1492  ;;  %v1762_v43 = vsub.f32 1.5, %v1761_v44 }
 0x2c6   : > { %v3855_v62 = vpop.eup %3854  ;;  %v1654_v0 = vadd.f32 1e-05, %v1622_v61  ;;  %v5127_v8 = vmul.f32 %v1493_v63, %v4685_v1 }
 0x2c7   : > { %v1769_v56 = vmul.f32 %v3855_v62, %v1653_v42  ;;  %v1557_v19 = vpop.xlane.xlu2 %1556  ;;  %v1763_v6 = vmul.f32 %v3853_v10, %v1762_v43  ;;  %vm1775_vm3 = vweird.f32 %v3855_v62 }
 0x2c8   : > { %3856 = vrsqrt.f32 %v1654_v0  ;;  %v1591_v47 = vmul.f32 %v5127_v8, %v5127_v8  ;;  %v1575_v11 = vmul.f32 %v1557_v19, %v4685_v1  ;;  %vm1776_vm5 = vmor %vm1774_vm4, %vm1775_vm3  ;;  %vm1784_vm7 = vweird.f32 %v1654_v0 }
 0x2c9   : > { %v1767_v16 = vsel %vm1766_vm2, %v3853_v10, %v1763_v6  ;;  %v1770_v41 = vmul.f32 %v3855_v62, %v1769_v56  ;;  %v1639_v36 = vsub.f32 %v5003_v18, %v5127_v8 }
 0x2ca   : > { %v1607_v7 = vsub.f32 %v1575_v11, %v1591_v47  ;;  %v1828_v9 = vmul.f32 %v1767_v16, %v1636_v23 }
 0x2cb   : > { %v1771_v57 = vmul.f32 0.5, %v1770_v41 }
 0x2cc   : > { %v1623_v14 = vmax.f32 %v1607_v7, 0.0  ;;  %1900 = vmatmul.f32.gmra.mxu2 %v1828_v9 }
 0x2cd   : > { %v1495_v53 = vpop.xlane.xlu0 %1494  ;;  %v1772_v2 = vsub.f32 1.5, %v1771_v57 }
 0x2ce   : > { %v3857_v39 = vpop.eup %3856  ;;  %v1655_v4 = vadd.f32 1e-05, %v1623_v14  ;;  %v5135_v24 = vmul.f32 %v1495_v53, %v4685_v1 }
 0x2cf   : > { %v1779_v12 = vmul.f32 %v3857_v39, %v1654_v0  ;;  %v1559_v20 = vpop.xlane.xlu1 %1558  ;;  %v1773_v3 = vmul.f32 %v3855_v62, %v1772_v2  ;;  %vm1785_vm6 = vweird.f32 %v3857_v39 }
 0x2d0   : > { %3858 = vrsqrt.f32 %v1655_v4  ;;  %v1592_v25 = vmul.f32 %v5135_v24, %v5135_v24  ;;  %v1576_v52 = vmul.f32 %v1559_v20, %v4685_v1  ;;  %vm1786_vm8 = vmor %vm1784_vm7, %vm1785_vm6  ;;  %vm1794_vm10 = vweird.f32 %v1655_v4 }
 0x2d1   : > { %v1777_v30 = vsel %vm1776_vm5, %v3855_v62, %v1773_v3  ;;  %v1780_v45 = vmul.f32 %v3857_v39, %v1779_v12  ;;  %v1640_v19 = vsub.f32 %v5021_v60, %v5135_v24  ;;  %v5154_v60 = vld [vmem:[%s5738_s13] ss:$0 sm:$0xff] }
 0x2d2   : > { %v1608_v29 = vsub.f32 %v1576_v52, %v1592_v25  ;;  %v1829_v38 = vmul.f32 %v1777_v30, %v1637_v21 }
 0x2d3   : > { %v1781_v13 = vmul.f32 0.5, %v1780_v45 }
 0x2d4   : > { %v1624_v28 = vmax.f32 %v1608_v29, 0.0  ;;  %1903 = vmatmul.f32.gmra.mxu2 %v1829_v38 }
 0x2d5   : > { %v1497_v46 = vpop.xlane.xlu2 %1496  ;;  %v1782_v37 = vsub.f32 1.5, %v1781_v13 }
 0x2d6   : > { %v3859_v33 = vpop.eup %3858  ;;  %v1656_v22 = vadd.f32 1e-05, %v1624_v28  ;;  %v1513_v31 = vmul.f32 %v1497_v46, %v4685_v1 }
 0x2d7   : > { %v1789_v48 = vmul.f32 %v3859_v33, %v1655_v4  ;;  %v1561_v17 = vpop.xlane.xlu0 %1560  ;;  %v1783_v40 = vmul.f32 %v3857_v39, %v1782_v37  ;;  %vm1795_vm9 = vweird.f32 %v3859_v33 }
 0x2d8   : > { %3860 = vrsqrt.f32 %v1656_v22  ;;  %v1593_v27 = vmul.f32 %v1513_v31, %v1513_v31  ;;  %v1577_v10 = vmul.f32 %v1561_v17, %v4685_v1  ;;  %vm1796_vm11 = vmor %vm1794_vm10, %vm1795_vm9  ;;  %vm1804_vm13 = vweird.f32 %v1656_v22 }
 0x2d9   : > { %v1787_v42 = vsel %vm1786_vm8, %v3857_v39, %v1783_v40  ;;  %v1790_v50 = vmul.f32 %v3859_v33, %v1789_v48  ;;  %v1641_v16 = vsub.f32 %v5035_v32, %v1513_v31 }
 0x2da   : > { %v1609_v58 = vsub.f32 %v1577_v10, %v1593_v27  ;;  %v1830_v26 = vmul.f32 %v1787_v42, %v1638_v49 }
 0x2db   : > { %v1791_v59 = vmul.f32 0.5, %v1790_v50 }
 0x2dc   : > { %v1625_v34 = vmax.f32 %v1609_v58, 0.0  ;;  %1906 = vmatmul.f32.gmra.mxu2 %v1830_v26 }
 0x2dd   : > { %v1792_v35 = vsub.f32 1.5, %v1791_v59 }
 0x2de   : > { %v3861_v5 = vpop.eup %3860  ;;  %v1657_v54 = vadd.f32 1e-05, %v1625_v34 }
 0x2df   : > { %v1799_v55 = vmul.f32 %v3861_v5, %v1656_v22  ;;  %v1793_v51 = vmul.f32 %v3859_v33, %v1792_v35  ;;  %vm1805_vm12 = vweird.f32 %v3861_v5 }
 0x2e0   : > { %3862 = vrsqrt.f32 %v1657_v54  ;;  %vm1806_vm14 = vmor %vm1804_vm13, %vm1805_vm12  ;;  %vm1814_vm0 = vweird.f32 %v1657_v54 }
 0x2e1   : > { %v1797_v15 = vsel %vm1796_vm11, %v3859_v33, %v1793_v51  ;;  %v1800_v44 = vmul.f32 %v3861_v5, %v1799_v55 }
 0x2e2   : > { %v1831_v61 = vmul.f32 %v1797_v15, %v1639_v36 }
 0x2e3   : > { %v1801_v63 = vmul.f32 0.5, %v1800_v44 }
 0x2e4   : > { %1909 = vmatmul.f32.gmra.mxu2 %v1831_v61 }
 0x2e5   : > { %v1802_v43 = vsub.f32 1.5, %v1801_v63 }
 0x2e6   : > { %v3863_v62 = vpop.eup %3862 }
 0x2e7   : > { %v1809_v0 = vmul.f32 %v3863_v62, %v1657_v54  ;;  %v1803_v56 = vmul.f32 %v3861_v5, %v1802_v43  ;;  %vm1815_vm15 = vweird.f32 %v3863_v62  ;;  %v2350_v43 = vld [vmem:[#allocation2 + $0x78] sm:$0xff] }
 0x2e8   : > { %vm1816_vm1 = vmor %vm1814_vm0, %vm1815_vm15  ;;  %2355 = vmatpush.msrb.mxu3 %v2350_v43 }
 0x2e9   : > { %v1807_v6 = vsel %vm1806_vm14, %v3861_v5, %v1803_v56  ;;  %v1810_v23 = vmul.f32 %v3863_v62, %v1809_v0  ;;  %v2348_v56 = vld [vmem:[#allocation2 + $0x68] sm:$0xff] }
 0x2ea   : > { %v1832_v18 = vmul.f32 %v1807_v6, %v1640_v19 }
 0x2eb   : > { %v1811_v8 = vmul.f32 0.5, %v1810_v23 }
 0x2ec   : > { %1912 = vmatmul.f32.gmra.mxu2 %v1832_v18 }
 0x2ed   : > { %v1812_v47 = vsub.f32 1.5, %v1811_v8  ;;  %v2347_v8 = vld [vmem:[#allocation2 + $0x60] sm:$0xff] }
 0x2ef   : > { %v1813_v11 = vmul.f32 %v3863_v62, %v1812_v47  ;;  %v2346_v47 = vld [vmem:[#allocation2 + $0x58] sm:$0xff] }
 0x2f1   : > { %v1817_v41 = vsel %vm1816_vm1, %v3863_v62, %v1813_v11  ;;  %v2349_v62 = vld [vmem:[#allocation2 + $0x70] sm:$0xff] }
 0x2f2   : > { %v1833_v7 = vmul.f32 %v1817_v41, %v1641_v16  ;;  %2356 = vmatpush.msrb.mxu3 %v2349_v62  ;;  %v2345_v41 = vld [vmem:[#allocation2 + $0x50] sm:$0xff] }
 0x2f4   : > { %1915 = vmatmul.f32.gmra.mxu2 %v1833_v7  ;;  %2357 = vmatpush.msrb.mxu3 %v2348_v56 }
 0x2f6   : > { %2358 = vmatpush.msrb.mxu3 %v2347_v8 }
 0x2f8   : > { %2359 = vmatpush.msrb.mxu3 %v2346_v47 }
 0x2fa   : > { %2360 = vmatpush.msrb.mxu3 %v2345_v41 }
 0x2ff   : > { %v1871_v9 = vpop.f32.mrf.mxu2 }
 0x300   : > { %v1872_v57 = vadd.f32 %v5154_v60, %v1871_v9 }
 0x302   : > { %v1935_v14 = vmul.f32 0.01, %v1872_v57  ;;  %vm1919_vm2 = vcmp.gt.f32.partialorder %v1872_v57, 0.0 }
 0x304   : > { %v5157_v53 = vsel %vm1919_vm2, %v1872_v57, %v1935_v14  ;;  %v2344_v14 = vld [vmem:[#allocation2 + $0x48] sm:$0xff] }
 0x305   : > { %1967 = vadd.xlane.f32.xlu1 %v5157_v53  ;;  %v2015_v32 = vmul.f32 %v5157_v53, %v5157_v53  ;;  %2361 = vmatpush.msrb.mxu3 %v2344_v14 }
 0x307   : > { %v1874_v2 = vpop.f32.mrf.mxu2  ;;  %2031 = vadd.xlane.f32.xlu2 %v2015_v32 }
 0x308   : > { %v1875_v39 = vadd.f32 %v5154_v60, %v1874_v2 }
 0x30a   : > { %v1936_v4 = vmul.f32 0.01, %v1875_v39  ;;  %vm1920_vm3 = vcmp.gt.f32.partialorder %v1875_v39, 0.0 }
 0x30c   : > { %v5163_v24 = vsel %vm1920_vm3, %v1875_v39, %v1936_v4 }
 0x30d   : > { %1969 = vadd.xlane.f32.xlu0 %v5163_v24  ;;  %v2016_v12 = vmul.f32 %v5163_v24, %v5163_v24 }
 0x30f   : > { %2033 = vadd.xlane.f32.xlu1 %v2016_v12  ;;  %v1877_v20 = vpop.f32.mrf.mxu2 }
 0x310   : > { %v1878_v3 = vadd.f32 %v5154_v60, %v1877_v20 }
 0x312   : > { %v1937_v21 = vmul.f32 0.01, %v1878_v3  ;;  %vm1921_vm4 = vcmp.gt.f32.partialorder %v1878_v3, 0.0 }
 0x314   : > { %v5169_v25 = vsel %vm1921_vm4, %v1878_v3, %v1937_v21  ;;  %v2343_v21 = vld [vmem:[#allocation2 + $0x40] sm:$0xff] }
 0x315   : > { %1971 = vadd.xlane.f32.xlu2 %v5169_v25  ;;  %v2017_v52 = vmul.f32 %v5169_v25, %v5169_v25  ;;  %2362 = vmatpush.msrb.mxu3 %v2343_v21 }
 0x317   : > { %2035 = vadd.xlane.f32.xlu0 %v2017_v52  ;;  %v1880_v30 = vpop.f32.mrf.mxu2 }
 0x318   : > { %v1881_v45 = vadd.f32 %v5154_v60, %v1880_v30 }
 0x31a   : > { %v1938_v29 = vmul.f32 0.01, %v1881_v45  ;;  %vm1922_vm5 = vcmp.gt.f32.partialorder %v1881_v45, 0.0 }
 0x31c   : > { %v5175_v38 = vsel %vm1922_vm5, %v1881_v45, %v1938_v29  ;;  %v2342_v45 = vld [vmem:[#allocation2 + $0x38] sm:$0xff] }
 0x31d   : > { %1973 = vadd.xlane.f32.xlu1 %v5175_v38  ;;  %v2018_v13 = vmul.f32 %v5175_v38, %v5175_v38  ;;  %2363 = vmatpush.msrb.mxu3 %v2342_v45 }
 0x31f   : > { %v1883_v28 = vpop.f32.mrf.mxu2  ;;  %2037 = vadd.xlane.f32.xlu2 %v2018_v13  ;;  %v2341_v13 = vld [vmem:[#allocation2 + $0x30] sm:$0xff] }
 0x320   : > { %v1884_v46 = vadd.f32 %v5154_v60, %v1883_v28  ;;  %2364 = vmatpush.msrb.mxu3 %v2341_v13 }
 0x322   : > { %v1939_v37 = vmul.f32 0.01, %v1884_v46  ;;  %vm1923_vm6 = vcmp.gt.f32.partialorder %v1884_v46, 0.0 }
 0x324   : > { %v5181_v33 = vsel %vm1923_vm6, %v1884_v46, %v1939_v37  ;;  %v2340_v46 = vld [vmem:[#allocation2 + $0x28] sm:$0xff] }
 0x325   : > { %1975 = vadd.xlane.f32.xlu0 %v5181_v33  ;;  %v2019_v22 = vmul.f32 %v5181_v33, %v5181_v33  ;;  %2365 = vmatpush.msrb.mxu3 %v2340_v46 }
 0x327   : > { %2039 = vadd.xlane.f32.xlu1 %v2019_v22  ;;  %v1886_v31 = vpop.f32.mrf.mxu2  ;;  %v2339_v22 = vld [vmem:[#allocation2 + $0x20] sm:$0xff] }
 0x328   : > { %v1887_v48 = vadd.f32 %v5154_v60, %v1886_v31  ;;  %2366 = vmatpush.msrb.mxu3 %v2339_v22 }
 0x32a   : > { %v1940_v17 = vmul.f32 0.01, %v1887_v48  ;;  %vm1924_vm7 = vcmp.gt.f32.partialorder %v1887_v48, 0.0 }
 0x32c   : > { %v5187_v40 = vsel %vm1924_vm7, %v1887_v48, %v1940_v17  ;;  %v2338_v17 = vld [vmem:[#allocation2 + $0x18] sm:$0xff] }
 0x32d   : > { %1977 = vadd.xlane.f32.xlu2 %v5187_v40  ;;  %v2020_v49 = vmul.f32 %v5187_v40, %v5187_v40  ;;  %2367 = vmatpush.msrb.mxu3 %v2338_v17 }
 0x32f   : > { %2041 = vadd.xlane.f32.xlu0 %v2020_v49  ;;  %v1889_v27 = vpop.f32.mrf.mxu2 }
 0x330   : > { %v1890_v10 = vadd.f32 %v5154_v60, %v1889_v27  ;;  %v2337_v27 = vld [vmem:[#allocation2 + $0x10] sm:$0xff] }
 0x331   : > { %2368 = vmatpush.msrb.mxu3 %v2337_v27 }
 0x332   : > { %v1941_v42 = vmul.f32 0.01, %v1890_v10  ;;  %vm1925_vm8 = vcmp.gt.f32.partialorder %v1890_v10, 0.0 }
 0x334   : > { %v5193_v50 = vsel %vm1925_vm8, %v1890_v10, %v1941_v42  ;;  %v2336_v42 = vld [vmem:[#allocation2 + $0x8] sm:$0xff] }
 0x335   : > { %1979 = vadd.xlane.f32.xlu1 %v5193_v50  ;;  %v2021_v58 = vmul.f32 %v5193_v50, %v5193_v50  ;;  %2369 = vmatpush.msrb.mxu3 %v2336_v42 }
 0x337   : > { %v1892_v26 = vpop.f32.mrf.mxu2  ;;  %2043 = vadd.xlane.f32.xlu2 %v2021_v58 }
 0x338   : > { %v1893_v59 = vadd.f32 %v5154_v60, %v1892_v26  ;;  %v2335_v26 = vld [vmem:[#allocation2] sm:$0xff] }
 0x339   : > { %2370 = vmatpush.msrb.mxu3 %v2335_v26 }
 0x33a   : > { %v1942_v34 = vmul.f32 0.01, %v1893_v59  ;;  %vm1926_vm9 = vcmp.gt.f32.partialorder %v1893_v59, 0.0 }
 0x33c   : > { %v5199_v35 = vsel %vm1926_vm9, %v1893_v59, %v1942_v34 }
 0x33d   : > { %1981 = vadd.xlane.f32.xlu0 %v5199_v35  ;;  %v2022_v5 = vmul.f32 %v5199_v35, %v5199_v35 }
 0x33f   : > { %2045 = vadd.xlane.f32.xlu1 %v2022_v5  ;;  %v1895_v54 = vpop.f32.mrf.mxu2 }
 0x340   : > { %v1896_v55 = vadd.f32 %v5154_v60, %v1895_v54 }
 0x342   : > { %v1943_v51 = vmul.f32 0.01, %v1896_v55  ;;  %vm1927_vm10 = vcmp.gt.f32.partialorder %v1896_v55, 0.0 }
 0x344   : > { %v5205_v36 = vsel %vm1927_vm10, %v1896_v55, %v1943_v51 }
 0x345   : > { %1983 = vadd.xlane.f32.xlu2 %v5205_v36  ;;  %v2023_v15 = vmul.f32 %v5205_v36, %v5205_v36 }
 0x347   : > { %2047 = vadd.xlane.f32.xlu0 %v2023_v15  ;;  %v1898_v44 = vpop.f32.mrf.mxu2 }
 0x348   : > { %v1899_v61 = vadd.f32 %v5154_v60, %v1898_v44 }
 0x34a   : > { %v1944_v63 = vmul.f32 0.01, %v1899_v61  ;;  %vm1928_vm11 = vcmp.gt.f32.partialorder %v1899_v61, 0.0 }
 0x34c   : > { %v5211_v0 = vsel %vm1928_vm11, %v1899_v61, %v1944_v63 }
 0x34d   : > { %1985 = vadd.xlane.f32.xlu1 %v5211_v0  ;;  %v2024_v19 = vmul.f32 %v5211_v0, %v5211_v0 }
 0x34f   : > { %v1901_v6 = vpop.f32.mrf.mxu2  ;;  %2049 = vadd.xlane.f32.xlu2 %v2024_v19 }
 0x350   : > { %v1902_v23 = vadd.f32 %v5154_v60, %v1901_v6 }
 0x352   : > { %v1945_v18 = vmul.f32 0.01, %v1902_v23  ;;  %vm1929_vm12 = vcmp.gt.f32.partialorder %v1902_v23, 0.0 }
 0x354   : > { %v5217_v11 = vsel %vm1929_vm12, %v1902_v23, %v1945_v18 }
 0x355   : > { %1987 = vadd.xlane.f32.xlu0 %v5217_v11  ;;  %v2025_v16 = vmul.f32 %v5217_v11, %v5217_v11 }
 0x357   : > { %2051 = vadd.xlane.f32.xlu1 %v2025_v16  ;;  %v1904_v7 = vpop.f32.mrf.mxu2 }
 0x358   : > { %v1905_v9 = vadd.f32 %v5154_v60, %v1904_v7 }
 0x35a   : > { %v1946_v57 = vmul.f32 0.01, %v1905_v9  ;;  %vm1930_vm13 = vcmp.gt.f32.partialorder %v1905_v9, 0.0 }
 0x35c   : > { %v5223_v32 = vsel %vm1930_vm13, %v1905_v9, %v1946_v57 }
 0x35d   : > { %1989 = vadd.xlane.f32.xlu2 %v5223_v32  ;;  %v2026_v2 = vmul.f32 %v5223_v32, %v5223_v32 }
 0x35f   : > { %2053 = vadd.xlane.f32.xlu0 %v2026_v2  ;;  %v1907_v39 = vpop.f32.mrf.mxu2 }
 0x360   : > { %v1908_v4 = vadd.f32 %v5154_v60, %v1907_v39 }
 0x362   : > { %v1947_v12 = vmul.f32 0.01, %v1908_v4  ;;  %vm1931_vm14 = vcmp.gt.f32.partialorder %v1908_v4, 0.0 }
 0x364   : > { %v5229_v20 = vsel %vm1931_vm14, %v1908_v4, %v1947_v12 }
 0x365   : > { %1991 = vadd.xlane.f32.xlu1 %v5229_v20  ;;  %v2027_v3 = vmul.f32 %v5229_v20, %v5229_v20 }
 0x367   : > { %v1910_v52 = vpop.f32.mrf.mxu2  ;;  %2055 = vadd.xlane.f32.xlu2 %v2027_v3 }
 0x368   : > { %v1911_v30 = vadd.f32 %v5154_v60, %v1910_v52 }
 0x36a   : > { %v1948_v29 = vmul.f32 0.01, %v1911_v30  ;;  %vm1932_vm15 = vcmp.gt.f32.partialorder %v1911_v30, 0.0 }
 0x36c   : > { %v5235_v28 = vsel %vm1932_vm15, %v1911_v30, %v1948_v29 }
 0x36d   : > { %1993 = vadd.xlane.f32.xlu0 %v5235_v28  ;;  %v2028_v37 = vmul.f32 %v5235_v28, %v5235_v28 }
 0x36f   : > { %2057 = vadd.xlane.f32.xlu1 %v2028_v37  ;;  %v1913_v31 = vpop.f32.mrf.mxu2 }
 0x370   : > { %v1914_v48 = vadd.f32 %v5154_v60, %v1913_v31 }
 0x372   : > { %v1949_v49 = vmul.f32 0.01, %v1914_v48  ;;  %vm1933_vm0 = vcmp.gt.f32.partialorder %v1914_v48, 0.0 }
 0x374   : > { %v5241_v10 = vsel %vm1933_vm0, %v1914_v48, %v1949_v49 }
 0x375   : > { %1995 = vadd.xlane.f32.xlu2 %v5241_v10  ;;  %v2029_v58 = vmul.f32 %v5241_v10, %v5241_v10 }
 0x377   : > { %2059 = vadd.xlane.f32.xlu0 %v2029_v58  ;;  %v1916_v59 = vpop.f32.mrf.mxu2 }
 0x378   : > { %v1917_v34 = vadd.f32 %v5154_v60, %v1916_v59  ;;  %v1968_v5 = vpop.xlane.xlu1 %1967 }
 0x379   : > { %v1999_v54 = vmul.f32 %v1968_v5, %v4685_v1 }
 0x37a   : > { %v1950_v55 = vmul.f32 0.01, %v1917_v34  ;;  %v2032_v51 = vpop.xlane.xlu2 %2031  ;;  %vm1934_vm1 = vcmp.gt.f32.partialorder %v1917_v34, 0.0 }
 0x37b   : > { %v2079_v15 = vmul.f32 %v1999_v54, %v1999_v54  ;;  %v2063_v44 = vmul.f32 %v2032_v51, %v4685_v1  ;;  %v2127_v22 = vsub.f32 %v5157_v53, %v1999_v54 }
 0x37c   : > { %v5249_v61 = vsel %vm1934_vm1, %v1917_v34, %v1950_v55 }
 0x37d   : > { %v2095_v63 = vsub.f32 %v2063_v44, %v2079_v15  ;;  %1997 = vadd.xlane.f32.xlu1 %v5249_v61  ;;  %v2030_v43 = vmul.f32 %v5249_v61, %v5249_v61 }
 0x37f   : > { %v2111_v62 = vmax.f32 %v2095_v63, 0.0  ;;  %2061 = vadd.xlane.f32.xlu2 %v2030_v43 }
 0x380   : > { %v1970_v60 = vpop.xlane.xlu0 %1969 }
 0x381   : > { %v2143_v56 = vadd.f32 1e-05, %v2111_v62  ;;  %v2000_v19 = vmul.f32 %v1970_v60, %v4685_v1 }
 0x382   : > { %v2034_v6 = vpop.xlane.xlu1 %2033 }
 0x383   : > { %3864 = vrsqrt.f32 %v2143_v56  ;;  %v2080_v23 = vmul.f32 %v2000_v19, %v2000_v19  ;;  %v2064_v18 = vmul.f32 %v2034_v6, %v4685_v1  ;;  %vm2165_vm3 = vweird.f32 %v2143_v56 }
 0x384   : > { %v2128_v62 = vsub.f32 %v5163_v24, %v2000_v19 }
 0x385   : > { %v2096_v8 = vsub.f32 %v2064_v18, %v2080_v23 }
 0x387   : > { %v2112_v47 = vmax.f32 %v2096_v8, 0.0 }
 0x388   : > { %v1972_v16 = vpop.xlane.xlu2 %1971 }
 0x389   : > { %v3865_v41 = vpop.eup %3864  ;;  %v5257_v7 = vmul.f32 %v1972_v16, %v4685_v1  ;;  %v2144_v57 = vadd.f32 1e-05, %v2112_v47 }
 0x38a   : > { %v2160_v9 = vmul.f32 %v3865_v41, %v2143_v56  ;;  %v2036_v14 = vpop.xlane.xlu0 %2035  ;;  %vm2166_vm2 = vweird.f32 %v3865_v41 }
 0x38b   : > { %v2081_v2 = vmul.f32 %v5257_v7, %v5257_v7  ;;  %v2065_v39 = vmul.f32 %v2036_v14, %v4685_v1  ;;  %3866 = vrsqrt.f32 %v2144_v57  ;;  %vm2167_vm4 = vmor %vm2165_vm3, %vm2166_vm2  ;;  %vm2175_vm6 = vweird.f32 %v2144_v57 }
 0x38c   : > { %v2161_v4 = vmul.f32 %v3865_v41, %v2160_v9  ;;  %v2129_v24 = vsub.f32 %v5169_v25, %v5257_v7 }
 0x38d   : > { %v2097_v12 = vsub.f32 %v2065_v39, %v2081_v2 }
 0x38e   : > { %v2162_v3 = vmul.f32 0.5, %v2161_v4 }
 0x38f   : > { %v2113_v21 = vmax.f32 %v2097_v12, 0.0 }
 0x390   : > { %v2163_v52 = vsub.f32 1.5, %v2162_v3  ;;  %v1974_v30 = vpop.xlane.xlu1 %1973 }
 0x391   : > { %v2145_v45 = vadd.f32 1e-05, %v2113_v21  ;;  %v5263_v29 = vmul.f32 %v1974_v30, %v4685_v1  ;;  %v3867_v13 = vpop.eup %3866 }
 0x392   : > { %v2038_v46 = vpop.xlane.xlu2 %2037  ;;  %v2164_v37 = vmul.f32 %v3865_v41, %v2163_v52  ;;  %v2170_v31 = vmul.f32 %v3867_v13, %v2144_v57  ;;  %vm2176_vm5 = vweird.f32 %v3867_v13 }
 0x393   : > { %3868 = vrsqrt.f32 %v2145_v45  ;;  %v2082_v48 = vmul.f32 %v5263_v29, %v5263_v29  ;;  %v2066_v17 = vmul.f32 %v2038_v46, %v4685_v1  ;;  %vm2177_vm7 = vmor %vm2175_vm6, %vm2176_vm5  ;;  %vm2185_vm9 = vweird.f32 %v2145_v45 }
 0x394   : > { %v2168_v49 = vsel %vm2167_vm4, %v3865_v41, %v2164_v37  ;;  %v2171_v42 = vmul.f32 %v3867_v13, %v2170_v31 }
 0x395   : > { %v2319_v27 = vmul.f32 %v2168_v49, %v2127_v22  ;;  %v2098_v58 = vsub.f32 %v2066_v17, %v2082_v48 }
 0x396   : > { %v2172_v26 = vmul.f32 0.5, %v2171_v42 }
 0x397   : > { %2371 = vmatmul.f32.vlgmr.msrb.gmra.mxu3 %v2319_v27  ;;  %v2114_v59 = vmax.f32 %v2098_v58, 0.0  ;;  %v2130_v27 = vsub.f32 %v5175_v38, %v5263_v29 }
 0x398   : > { %v1976_v34 = vpop.xlane.xlu0 %1975  ;;  %v2173_v53 = vsub.f32 1.5, %v2172_v26 }
 0x399   : > { %v3869_v5 = vpop.eup %3868  ;;  %v5270_v55 = vmul.f32 %v1976_v34, %v4685_v1  ;;  %v2146_v51 = vadd.f32 1e-05, %v2114_v59 }
 0x39a   : > { %v2180_v54 = vmul.f32 %v3869_v5, %v2145_v45  ;;  %v2040_v15 = vpop.xlane.xlu1 %2039  ;;  %v2174_v43 = vmul.f32 %v3867_v13, %v2173_v53  ;;  %vm2186_vm8 = vweird.f32 %v3869_v5 }
 0x39b   : > { %v2083_v44 = vmul.f32 %v5270_v55, %v5270_v55  ;;  %v2067_v63 = vmul.f32 %v2040_v15, %v4685_v1  ;;  %3870 = vrsqrt.f32 %v2146_v51  ;;  %vm2187_vm10 = vmor %vm2185_vm9, %vm2186_vm8  ;;  %vm2195_vm12 = vweird.f32 %v2146_v51 }
 0x39c   : > { %v2181_v60 = vmul.f32 %v3869_v5, %v2180_v54  ;;  %v2178_v6 = vsel %vm2177_vm7, %v3867_v13, %v2174_v43  ;;  %v2131_v38 = vsub.f32 %v5181_v33, %v5270_v55 }
 0x39d   : > { %v2099_v56 = vsub.f32 %v2067_v63, %v2083_v44  ;;  %v2320_v23 = vmul.f32 %v2178_v6, %v2128_v62 }
 0x39e   : > { %v2182_v18 = vmul.f32 0.5, %v2181_v60 }
 0x39f   : > { %v2115_v8 = vmax.f32 %v2099_v56, 0.0  ;;  %2374 = vmatmul.f32.gmra.mxu3 %v2320_v23 }
 0x3a0   : > { %v1978_v47 = vpop.xlane.xlu2 %1977  ;;  %v2183_v16 = vsub.f32 1.5, %v2182_v18 }
 0x3a1   : > { %v2147_v41 = vadd.f32 1e-05, %v2115_v8  ;;  %v5277_v9 = vmul.f32 %v1978_v47, %v4685_v1  ;;  %v3871_v14 = vpop.eup %3870 }
 0x3a2   : > { %v2042_v57 = vpop.xlane.xlu0 %2041  ;;  %v2184_v2 = vmul.f32 %v3869_v5, %v2183_v16  ;;  %v2190_v19 = vmul.f32 %v3871_v14, %v2146_v51  ;;  %vm2196_vm11 = vweird.f32 %v3871_v14 }
 0x3a3   : > { %3872 = vrsqrt.f32 %v2147_v41  ;;  %v2084_v39 = vmul.f32 %v5277_v9, %v5277_v9  ;;  %v2068_v4 = vmul.f32 %v2042_v57, %v4685_v1  ;;  %vm2197_vm13 = vmor %vm2195_vm12, %vm2196_vm11  ;;  %vm2205_vm15 = vweird.f32 %v2147_v41 }
 0x3a4   : > { %v2188_v12 = vsel %vm2187_vm10, %v3869_v5, %v2184_v2  ;;  %v2191_v21 = vmul.f32 %v3871_v14, %v2190_v19 }
 0x3a5   : > { %v2321_v3 = vmul.f32 %v2188_v12, %v2129_v24  ;;  %v2100_v52 = vsub.f32 %v2068_v4, %v2084_v39  ;;  %v2132_v4 = vsub.f32 %v5187_v40, %v5277_v9 }
 0x3a6   : > { %v2192_v30 = vmul.f32 0.5, %v2191_v21 }
 0x3a7   : > { %v2116_v13 = vmax.f32 %v2100_v52, 0.0  ;;  %2377 = vmatmul.f32.gmra.mxu3 %v2321_v3 }
 0x3a8   : > { %v1980_v46 = vpop.xlane.xlu1 %1979  ;;  %v2193_v25 = vsub.f32 1.5, %v2192_v30 }
 0x3a9   : > { %v3873_v45 = vpop.eup %3872  ;;  %v5285_v37 = vmul.f32 %v1980_v46, %v4685_v1  ;;  %v2148_v22 = vadd.f32 1e-05, %v2116_v13 }
 0x3aa   : > { %v2200_v7 = vmul.f32 %v3873_v45, %v2147_v41  ;;  %v2044_v31 = vpop.xlane.xlu2 %2043  ;;  %v2194_v49 = vmul.f32 %v3871_v14, %v2193_v25  ;;  %vm2206_vm14 = vweird.f32 %v3873_v45 }
 0x3ab   : > { %v2085_v48 = vmul.f32 %v5285_v37, %v5285_v37  ;;  %v2069_v17 = vmul.f32 %v2044_v31, %v4685_v1  ;;  %3874 = vrsqrt.f32 %v2148_v22  ;;  %vm2207_vm0 = vmor %vm2205_vm15, %vm2206_vm14  ;;  %vm2215_vm2 = vweird.f32 %v2148_v22 }
 0x3ac   : > { %v2201_v42 = vmul.f32 %v3873_v45, %v2200_v7  ;;  %v2198_v26 = vsel %vm2197_vm13, %v3871_v14, %v2194_v49  ;;  %v2133_v40 = vsub.f32 %v5193_v50, %v5285_v37 }
 0x3ad   : > { %v2101_v58 = vsub.f32 %v2069_v17, %v2085_v48  ;;  %v2322_v59 = vmul.f32 %v2198_v26, %v2130_v27 }
 0x3ae   : > { %v2202_v34 = vmul.f32 0.5, %v2201_v42 }
 0x3af   : > { %v2117_v5 = vmax.f32 %v2101_v58, 0.0  ;;  %2380 = vmatmul.f32.gmra.mxu3 %v2322_v59 }
 0x3b0   : > { %v1982_v53 = vpop.xlane.xlu0 %1981  ;;  %v2203_v54 = vsub.f32 1.5, %v2202_v34 }
 0x3b1   : > { %v2149_v15 = vadd.f32 1e-05, %v2117_v5  ;;  %v5293_v44 = vmul.f32 %v1982_v53, %v4685_v1  ;;  %v3875_v51 = vpop.eup %3874 }
 0x3b2   : > { %v2046_v63 = vpop.xlane.xlu1 %2045  ;;  %v2204_v43 = vmul.f32 %v3873_v45, %v2203_v54  ;;  %v2210_v29 = vmul.f32 %v3875_v51, %v2148_v22  ;;  %vm2216_vm1 = vweird.f32 %v3875_v51 }
 0x3b3   : > { %3876 = vrsqrt.f32 %v2149_v15  ;;  %v2086_v62 = vmul.f32 %v5293_v44, %v5293_v44  ;;  %v2070_v60 = vmul.f32 %v2046_v63, %v4685_v1  ;;  %vm2217_vm3 = vmor %vm2215_vm2, %vm2216_vm1  ;;  %vm2225_vm5 = vweird.f32 %v2149_v15 }
 0x3b4   : > { %v2208_v56 = vsel %vm2207_vm0, %v3873_v45, %v2204_v43  ;;  %v2211_v23 = vmul.f32 %v3875_v51, %v2210_v29  ;;  %v2134_v29 = vsub.f32 %v5199_v35, %v5293_v44 }
 0x3b5   : > { %v2323_v6 = vmul.f32 %v2208_v56, %v2131_v38  ;;  %v2102_v18 = vsub.f32 %v2070_v60, %v2086_v62 }
 0x3b6   : > { %v2212_v8 = vmul.f32 0.5, %v2211_v23 }
 0x3b7   : > { %v2118_v47 = vmax.f32 %v2102_v18, 0.0  ;;  %2383 = vmatmul.f32.gmra.mxu3 %v2323_v6 }
 0x3b8   : > { %v1984_v16 = vpop.xlane.xlu2 %1983  ;;  %v2213_v33 = vsub.f32 1.5, %v2212_v8 }
 0x3b9   : > { %v3877_v41 = vpop.eup %3876  ;;  %v5301_v14 = vmul.f32 %v1984_v16, %v4685_v1  ;;  %v2150_v57 = vadd.f32 1e-05, %v2118_v47 }
 0x3ba   : > { %v2220_v55 = vmul.f32 %v3877_v41, %v2149_v15  ;;  %v2048_v2 = vpop.xlane.xlu0 %2047  ;;  %v2214_v39 = vmul.f32 %v3875_v51, %v2213_v33  ;;  %vm2226_vm4 = vweird.f32 %v3877_v41 }
 0x3bb   : > { %v2087_v24 = vmul.f32 %v5301_v14, %v5301_v14  ;;  %v2071_v19 = vmul.f32 %v2048_v2, %v4685_v1  ;;  %3878 = vrsqrt.f32 %v2150_v57  ;;  %vm2227_vm6 = vmor %vm2225_vm5, %vm2226_vm4  ;;  %vm2235_vm8 = vweird.f32 %v2150_v57 }
 0x3bc   : > { %v2221_v12 = vmul.f32 %v3877_v41, %v2220_v55  ;;  %v2218_v21 = vsel %vm2217_vm3, %v3875_v51, %v2214_v39  ;;  %v2135_v35 = vsub.f32 %v5205_v36, %v5301_v14 }
 0x3bd   : > { %v2103_v3 = vsub.f32 %v2071_v19, %v2087_v24  ;;  %v2324_v52 = vmul.f32 %v2218_v21, %v2132_v4 }
 0x3be   : > { %v2222_v30 = vmul.f32 0.5, %v2221_v12 }
 0x3bf   : > { %v2119_v13 = vmax.f32 %v2103_v3, 0.0  ;;  %2386 = vmatmul.f32.gmra.mxu3 %v2324_v52 }
 0x3c0   : > { %v1986_v46 = vpop.xlane.xlu1 %1985  ;;  %v2223_v45 = vsub.f32 1.5, %v2222_v30 }
 0x3c1   : > { %v2151_v25 = vadd.f32 1e-05, %v2119_v13  ;;  %v5309_v7 = vmul.f32 %v1986_v46, %v4685_v1  ;;  %v3879_v22 = vpop.eup %3878 }
 0x3c2   : > { %v2050_v31 = vpop.xlane.xlu2 %2049  ;;  %v2224_v48 = vmul.f32 %v3877_v41, %v2223_v45  ;;  %v2230_v9 = vmul.f32 %v3879_v22, %v2150_v57  ;;  %vm2236_vm7 = vweird.f32 %v3879_v22 }
 0x3c3   : > { %3880 = vrsqrt.f32 %v2151_v25  ;;  %v2088_v17 = vmul.f32 %v5309_v7, %v5309_v7  ;;  %v2072_v49 = vmul.f32 %v2050_v31, %v4685_v1  ;;  %vm2237_vm9 = vmor %vm2235_vm8, %vm2236_vm7  ;;  %vm2245_vm11 = vweird.f32 %v2151_v25 }
 0x3c4   : > { %v2228_v27 = vsel %vm2227_vm6, %v3877_v41, %v2224_v48  ;;  %v2231_v58 = vmul.f32 %v3879_v22, %v2230_v9  ;;  %v2136_v48 = vsub.f32 %v5211_v0, %v5309_v7 }
 0x3c5   : > { %v2325_v42 = vmul.f32 %v2228_v27, %v2133_v40  ;;  %v2104_v26 = vsub.f32 %v2072_v49, %v2088_v17 }
 0x3c6   : > { %v2232_v59 = vmul.f32 0.5, %v2231_v58 }
 0x3c7   : > { %v2120_v34 = vmax.f32 %v2104_v26, 0.0  ;;  %2389 = vmatmul.f32.gmra.mxu3 %v2325_v42 }
 0x3c8   : > { %v1988_v5 = vpop.xlane.xlu0 %1987  ;;  %v2233_v50 = vsub.f32 1.5, %v2232_v59 }
 0x3c9   : > { %v3881_v53 = vpop.eup %3880  ;;  %v5317_v54 = vmul.f32 %v1988_v5, %v4685_v1  ;;  %v2152_v15 = vadd.f32 1e-05, %v2120_v34 }
 0x3ca   : > { %v2240_v37 = vmul.f32 %v3881_v53, %v2151_v25  ;;  %v2052_v51 = vpop.xlane.xlu1 %2051  ;;  %v2234_v38 = vmul.f32 %v3879_v22, %v2233_v50  ;;  %vm2246_vm10 = vweird.f32 %v3881_v53 }
 0x3cb   : > { %v2089_v63 = vmul.f32 %v5317_v54, %v5317_v54  ;;  %v2073_v43 = vmul.f32 %v2052_v51, %v4685_v1  ;;  %3882 = vrsqrt.f32 %v2152_v15  ;;  %vm2247_vm12 = vmor %vm2245_vm11, %vm2246_vm10  ;;  %vm2255_vm14 = vweird.f32 %v2152_v15 }
 0x3cc   : > { %v2241_v62 = vmul.f32 %v3881_v53, %v2240_v37  ;;  %v2238_v56 = vsel %vm2237_vm9, %v3879_v22, %v2234_v38  ;;  %v2137_v0 = vsub.f32 %v5217_v11, %v5317_v54 }
 0x3cd   : > { %v2105_v60 = vsub.f32 %v2073_v43, %v2089_v63  ;;  %v2326_v6 = vmul.f32 %v2238_v56, %v2134_v29 }
 0x3ce   : > { %v2242_v23 = vmul.f32 0.5, %v2241_v62 }
 0x3cf   : > { %v2121_v18 = vmax.f32 %v2105_v60, 0.0  ;;  %2392 = vmatmul.f32.gmra.mxu3 %v2326_v6 }
 0x3d0   : > { %v1990_v8 = vpop.xlane.xlu2 %1989  ;;  %v2243_v47 = vsub.f32 1.5, %v2242_v23 }
 0x3d1   : > { %v2153_v16 = vadd.f32 1e-05, %v2121_v18  ;;  %v5325_v41 = vmul.f32 %v1990_v8, %v4685_v1  ;;  %v3883_v33 = vpop.eup %3882 }
 0x3d2   : > { %v2054_v55 = vpop.xlane.xlu0 %2053  ;;  %v2244_v57 = vmul.f32 %v3881_v53, %v2243_v47  ;;  %v2250_v44 = vmul.f32 %v3883_v33, %v2152_v15  ;;  %vm2256_vm13 = vweird.f32 %v3883_v33 }
 0x3d3   : > { %3884 = vrsqrt.f32 %v2153_v16  ;;  %v2090_v2 = vmul.f32 %v5325_v41, %v5325_v41  ;;  %v2074_v24 = vmul.f32 %v2054_v55, %v4685_v1  ;;  %vm2257_vm15 = vmor %vm2255_vm14, %vm2256_vm13  ;;  %vm2265_vm1 = vweird.f32 %v2153_v16 }
 0x3d4   : > { %v2248_v19 = vsel %vm2247_vm12, %v3881_v53, %v2244_v57  ;;  %v2251_v4 = vmul.f32 %v3883_v33, %v2250_v44 }
 0x3d5   : > { %v2327_v39 = vmul.f32 %v2248_v19, %v2135_v35  ;;  %v2106_v12 = vsub.f32 %v2074_v24, %v2090_v2 }
 0x3d6   : > { %v2252_v3 = vmul.f32 0.5, %v2251_v4 }
 0x3d7   : > { %v2122_v21 = vmax.f32 %v2106_v12, 0.0  ;;  %2395 = vmatmul.f32.gmra.mxu3 %v2327_v39 }
 0x3d8   : > { %v1992_v52 = vpop.xlane.xlu1 %1991  ;;  %v2253_v36 = vsub.f32 1.5, %v2252_v3 }
 0x3d9   : > { %v3885_v30 = vpop.eup %3884  ;;  %v5333_v13 = vmul.f32 %v1992_v52, %v4685_v1  ;;  %v2154_v46 = vadd.f32 1e-05, %v2122_v21 }
 0x3da   : > { %v2260_v14 = vmul.f32 %v3885_v30, %v2153_v16  ;;  %v2056_v45 = vpop.xlane.xlu2 %2055  ;;  %v2254_v31 = vmul.f32 %v3883_v33, %v2253_v36  ;;  %vm2266_vm0 = vweird.f32 %v3885_v30 }
 0x3db   : > { %v2091_v25 = vmul.f32 %v5333_v13, %v5333_v13  ;;  %v2075_v22 = vmul.f32 %v2056_v45, %v4685_v1  ;;  %3886 = vrsqrt.f32 %v2154_v46  ;;  %vm2267_vm2 = vmor %vm2265_vm1, %vm2266_vm0  ;;  %vm2275_vm4 = vweird.f32 %v2154_v46 }
 0x3dc   : > { %v2261_v40 = vmul.f32 %v3885_v30, %v2260_v14  ;;  %v2258_v17 = vsel %vm2257_vm15, %v3883_v33, %v2254_v31  ;;  %v2138_v33 = vsub.f32 %v5223_v32, %v5325_v41  ;;  %v2139_v32 = vsub.f32 %v5229_v20, %v5333_v13 }
 0x3dd   : > { %v2107_v9 = vsub.f32 %v2075_v22, %v2091_v25  ;;  %v2328_v49 = vmul.f32 %v2258_v17, %v2136_v48 }
 0x3de   : > { %v2262_v27 = vmul.f32 0.5, %v2261_v40 }
 0x3df   : > { %v2123_v42 = vmax.f32 %v2107_v9, 0.0  ;;  %2398 = vmatmul.f32.gmra.mxu3 %v2328_v49 }
 0x3e0   : > { %v1994_v58 = vpop.xlane.xlu0 %1993  ;;  %v2263_v26 = vsub.f32 1.5, %v2262_v27 }
 0x3e1   : > { %v2155_v59 = vadd.f32 1e-05, %v2123_v42  ;;  %v5341_v34 = vmul.f32 %v1994_v58, %v4685_v1  ;;  %v3887_v5 = vpop.eup %3886 }
 0x3e2   : > { %v2058_v53 = vpop.xlane.xlu1 %2057  ;;  %v2264_v50 = vmul.f32 %v3885_v30, %v2263_v26  ;;  %v2270_v7 = vmul.f32 %v3887_v5, %v2154_v46  ;;  %vm2276_vm3 = vweird.f32 %v3887_v5 }
 0x3e3   : > { %3888 = vrsqrt.f32 %v2155_v59  ;;  %v2092_v37 = vmul.f32 %v5341_v34, %v5341_v34  ;;  %v2076_v15 = vmul.f32 %v2058_v53, %v4685_v1  ;;  %vm2277_vm5 = vmor %vm2275_vm4, %vm2276_vm3  ;;  %vm2285_vm7 = vweird.f32 %v2155_v59 }
 0x3e4   : > { %v2268_v51 = vsel %vm2267_vm2, %v3885_v30, %v2264_v50  ;;  %v2271_v43 = vmul.f32 %v3887_v5, %v2270_v7  ;;  %v2140_v20 = vsub.f32 %v5235_v28, %v5341_v34 }
 0x3e5   : > { %v2329_v63 = vmul.f32 %v2268_v51, %v2137_v0  ;;  %v2108_v38 = vsub.f32 %v2076_v15, %v2092_v37 }
 0x3e6   : > { %v2272_v29 = vmul.f32 0.5, %v2271_v43 }
 0x3e7   : > { %v2124_v62 = vmax.f32 %v2108_v38, 0.0  ;;  %2401 = vmatmul.f32.gmra.mxu3 %v2329_v63 }
 0x3e8   : > { %v1996_v60 = vpop.xlane.xlu2 %1995  ;;  %v2273_v11 = vsub.f32 1.5, %v2272_v29 }
 0x3e9   : > { %v3889_v56 = vpop.eup %3888  ;;  %v5349_v6 = vmul.f32 %v1996_v60, %v4685_v1  ;;  %v2156_v23 = vadd.f32 1e-05, %v2124_v62 }
 0x3ea   : > { %v2280_v54 = vmul.f32 %v3889_v56, %v2155_v59  ;;  %v2060_v18 = vpop.xlane.xlu0 %2059  ;;  %v2274_v16 = vmul.f32 %v3887_v5, %v2273_v11  ;;  %vm2286_vm6 = vweird.f32 %v3889_v56 }
 0x3eb   : > { %v2093_v8 = vmul.f32 %v5349_v6, %v5349_v6  ;;  %v2077_v47 = vmul.f32 %v2060_v18, %v4685_v1  ;;  %3890 = vrsqrt.f32 %v2156_v23  ;;  %vm2287_vm8 = vmor %vm2285_vm7, %vm2286_vm6  ;;  %vm2295_vm10 = vweird.f32 %v2156_v23 }
 0x3ec   : > { %v2281_v55 = vmul.f32 %v3889_v56, %v2280_v54  ;;  %v2278_v35 = vsel %vm2277_vm5, %v3887_v5, %v2274_v16  ;;  %v2141_v53 = vsub.f32 %v5241_v10, %v5349_v6  ;;  %v5368_v10 = vld [vmem:[%s5739_s14] ss:$0 sm:$0xff] }
 0x3ed   : > { %v2109_v57 = vsub.f32 %v2077_v47, %v2093_v8  ;;  %v2330_v44 = vmul.f32 %v2278_v35, %v2138_v33 }
 0x3ee   : > { %v2282_v2 = vmul.f32 0.5, %v2281_v55 }
 0x3ef   : > { %v2125_v24 = vmax.f32 %v2109_v57, 0.0  ;;  %2404 = vmatmul.f32.gmra.mxu3 %v2330_v44 }
 0x3f0   : > { %v1998_v19 = vpop.xlane.xlu1 %1997  ;;  %v2283_v39 = vsub.f32 1.5, %v2282_v2 }
 0x3f1   : > { %v2157_v4 = vadd.f32 1e-05, %v2125_v24  ;;  %v2014_v12 = vmul.f32 %v1998_v19, %v4685_v1  ;;  %v3891_v3 = vpop.eup %3890 }
 0x3f2   : > { %v2062_v21 = vpop.xlane.xlu2 %2061  ;;  %v2284_v52 = vmul.f32 %v3889_v56, %v2283_v39  ;;  %v2290_v41 = vmul.f32 %v3891_v3, %v2156_v23  ;;  %vm2296_vm9 = vweird.f32 %v3891_v3 }
 0x3f3   : > { %3892 = vrsqrt.f32 %v2157_v4  ;;  %v2094_v30 = vmul.f32 %v2014_v12, %v2014_v12  ;;  %v2078_v36 = vmul.f32 %v2062_v21, %v4685_v1  ;;  %vm2297_vm11 = vmor %vm2295_vm10, %vm2296_vm9  ;;  %vm2305_vm13 = vweird.f32 %v2157_v4 }
 0x3f4   : > { %v2288_v14 = vsel %vm2287_vm8, %v3889_v56, %v2284_v52  ;;  %v2291_v45 = vmul.f32 %v3891_v3, %v2290_v41  ;;  %v2142_v51 = vsub.f32 %v5249_v61, %v2014_v12  ;;  %v2850_v41 = vld [vmem:[#allocation5 + $0x70] sm:$0xff] }
 0x3f5   : > { %v2331_v46 = vmul.f32 %v2288_v14, %v2139_v32  ;;  %v2110_v25 = vsub.f32 %v2078_v36, %v2094_v30  ;;  %v2851_v32 = vld [vmem:[#allocation5 + $0x78] sm:$0xff] }
 0x3f6   : > { %v2292_v22 = vmul.f32 0.5, %v2291_v45  ;;  %2856 = vmatpush.msrb.mxu0 %v2851_v32 }
 0x3f7   : > { %v2126_v31 = vmax.f32 %v2110_v25, 0.0  ;;  %2407 = vmatmul.f32.gmra.mxu3 %v2331_v46  ;;  %v2849_v25 = vld [vmem:[#allocation5 + $0x68] sm:$0xff] }
 0x3f8   : > { %v2293_v40 = vsub.f32 1.5, %v2292_v22  ;;  %2857 = vmatpush.msrb.mxu0 %v2850_v41  ;;  %v2838_v41 = vld [vmem:[#allocation5 + $0x10] sm:$0xff] }
 0x3f9   : > { %v3893_v48 = vpop.eup %3892  ;;  %v2158_v17 = vadd.f32 1e-05, %v2126_v31 }
 0x3fa   : > { %v2300_v9 = vmul.f32 %v3893_v48, %v2157_v4  ;;  %v2294_v49 = vmul.f32 %v3891_v3, %v2293_v40  ;;  %vm2306_vm12 = vweird.f32 %v3893_v48  ;;  %2858 = vmatpush.msrb.mxu0 %v2849_v25 }
 0x3fb   : > { %3894 = vrsqrt.f32 %v2158_v17  ;;  %vm2307_vm14 = vmor %vm2305_vm13, %vm2306_vm12  ;;  %vm2315_vm0 = vweird.f32 %v2158_v17 }
 0x3fc   : > { %v2301_v13 = vmul.f32 %v3893_v48, %v2300_v9  ;;  %v2298_v27 = vsel %vm2297_vm11, %v3891_v3, %v2294_v49  ;;  %v2847_v49 = vld [vmem:[#allocation5 + $0x58] sm:$0xff] }
 0x3fd   : > { %v2332_v42 = vmul.f32 %v2298_v27, %v2140_v20 }
 0x3fe   : > { %v2302_v58 = vmul.f32 0.5, %v2301_v13 }
 0x3ff   : > { %2410 = vmatmul.f32.gmra.mxu3 %v2332_v42 }
 0x400   : > { %v2303_v26 = vsub.f32 1.5, %v2302_v58 }
 0x401   : > { %v3895_v59 = vpop.eup %3894 }
 0x402   : > { %v2304_v5 = vmul.f32 %v3893_v48, %v2303_v26  ;;  %v2310_v50 = vmul.f32 %v3895_v59, %v2158_v17  ;;  %vm2316_vm15 = vweird.f32 %v3895_v59  ;;  %v2846_v26 = vld [vmem:[#allocation5 + $0x50] sm:$0xff] }
 0x403   : > { %vm2317_vm1 = vmor %vm2315_vm0, %vm2316_vm15 }
 0x404   : > { %v2308_v0 = vsel %vm2307_vm14, %v3893_v48, %v2304_v5  ;;  %v2311_v28 = vmul.f32 %v3895_v59, %v2310_v50  ;;  %v2848_v48 = vld [vmem:[#allocation5 + $0x60] sm:$0xff] }
 0x405   : > { %v2333_v7 = vmul.f32 %v2308_v0, %v2141_v53  ;;  %2859 = vmatpush.msrb.mxu0 %v2848_v48 }
 0x406   : > { %v2312_v34 = vmul.f32 0.5, %v2311_v28  ;;  %v2844_v28 = vld [vmem:[#allocation5 + $0x40] sm:$0xff] }
 0x407   : > { %2413 = vmatmul.f32.gmra.mxu3 %v2333_v7  ;;  %2860 = vmatpush.msrb.mxu0 %v2847_v49 }
 0x408   : > { %v2313_v37 = vsub.f32 1.5, %v2312_v34 }
 0x409   : > { %2861 = vmatpush.msrb.mxu0 %v2846_v26 }
 0x40a   : > { %v2314_v15 = vmul.f32 %v3895_v59, %v2313_v37 }
 0x40c   : > { %v2318_v63 = vsel %vm2317_vm1, %v3895_v59, %v2314_v15  ;;  %v2845_v59 = vld [vmem:[#allocation5 + $0x48] sm:$0xff]  ;;  %v2843_v15 = vld [vmem:[#allocation5 + $0x38] sm:$0xff] }
 0x40d   : > { %v2334_v43 = vmul.f32 %v2318_v63, %v2142_v51  ;;  %2862 = vmatpush.msrb.mxu0 %v2845_v59 }
 0x40f   : > { %2416 = vmatmul.f32.gmra.mxu3 %v2334_v43  ;;  %2863 = vmatpush.msrb.mxu0 %v2844_v28 }
 0x411   : > { %2864 = vmatpush.msrb.mxu0 %v2843_v15 }
 0x41a   : > { %v2372_v38 = vpop.f32.mrf.mxu3 }
 0x41b   : > { %v2373_v29 = vadd.f32 %v5368_v10, %v2372_v38  ;;  %v2842_v38 = vld [vmem:[#allocation5 + $0x30] sm:$0xff] }
 0x41c   : > { %2865 = vmatpush.msrb.mxu0 %v2842_v38 }
 0x41d   : > { %v2436_v62 = vmul.f32 0.01, %v2373_v29  ;;  %vm2420_vm2 = vcmp.gt.f32.partialorder %v2373_v29, 0.0 }
 0x41f   : > { %v5371_v60 = vsel %vm2420_vm2, %v2373_v29, %v2436_v62 }
 0x420   : > { %2468 = vadd.xlane.f32.xlu0 %v5371_v60  ;;  %v2516_v61 = vmul.f32 %v5371_v60, %v5371_v60 }
 0x422   : > { %2532 = vadd.xlane.f32.xlu1 %v2516_v61  ;;  %v2375_v56 = vpop.f32.mrf.mxu3 }
 0x423   : > { %v2376_v6 = vadd.f32 %v5368_v10, %v2375_v56 }
 0x425   : > { %v2437_v11 = vmul.f32 0.01, %v2376_v6  ;;  %vm2421_vm3 = vcmp.gt.f32.partialorder %v2376_v6, 0.0 }
 0x427   : > { %v5377_v54 = vsel %vm2421_vm3, %v2376_v6, %v2437_v11  ;;  %v2841_v11 = vld [vmem:[#allocation5 + $0x28] sm:$0xff] }
 0x428   : > { %2470 = vadd.xlane.f32.xlu2 %v5377_v54  ;;  %v2517_v23 = vmul.f32 %v5377_v54, %v5377_v54  ;;  %2866 = vmatpush.msrb.mxu0 %v2841_v11 }
 0x42a   : > { %2534 = vadd.xlane.f32.xlu0 %v2517_v23  ;;  %v2378_v18 = vpop.f32.mrf.mxu3 }
 0x42b   : > { %v2379_v8 = vadd.f32 %v5368_v10, %v2378_v18 }
 0x42d   : > { %v2438_v47 = vmul.f32 0.01, %v2379_v8  ;;  %vm2422_vm4 = vcmp.gt.f32.partialorder %v2379_v8, 0.0 }
 0x42f   : > { %v5383_v16 = vsel %vm2422_vm4, %v2379_v8, %v2438_v47 }
 0x430   : > { %2472 = vadd.xlane.f32.xlu1 %v5383_v16  ;;  %v2518_v33 = vmul.f32 %v5383_v16, %v5383_v16 }
 0x432   : > { %v2381_v55 = vpop.f32.mrf.mxu3  ;;  %2536 = vadd.xlane.f32.xlu2 %v2518_v33 }
 0x433   : > { %v2382_v57 = vadd.f32 %v5368_v10, %v2381_v55 }
 0x435   : > { %v2439_v35 = vmul.f32 0.01, %v2382_v57  ;;  %vm2423_vm5 = vcmp.gt.f32.partialorder %v2382_v57, 0.0 }
 0x437   : > { %v5389_v44 = vsel %vm2423_vm5, %v2382_v57, %v2439_v35 }
 0x438   : > { %2474 = vadd.xlane.f32.xlu0 %v5389_v44  ;;  %v2519_v2 = vmul.f32 %v5389_v44, %v5389_v44 }
 0x43a   : > { %2538 = vadd.xlane.f32.xlu1 %v2519_v2  ;;  %v2384_v24 = vpop.f32.mrf.mxu3 }
 0x43b   : > { %v2385_v19 = vadd.f32 %v5368_v10, %v2384_v24 }
 0x43d   : > { %v2440_v39 = vmul.f32 0.01, %v2385_v19  ;;  %vm2424_vm6 = vcmp.gt.f32.partialorder %v2385_v19, 0.0 }
 0x43f   : > { %v5395_v4 = vsel %vm2424_vm6, %v2385_v19, %v2440_v39 }
 0x440   : > { %2476 = vadd.xlane.f32.xlu2 %v5395_v4  ;;  %v2520_v12 = vmul.f32 %v5395_v4, %v5395_v4 }
 0x442   : > { %2540 = vadd.xlane.f32.xlu0 %v2520_v12  ;;  %v2387_v3 = vpop.f32.mrf.mxu3  ;;  %v2840_v12 = vld [vmem:[#allocation5 + $0x20] sm:$0xff] }
 0x443   : > { %v2388_v21 = vadd.f32 %v5368_v10, %v2387_v3  ;;  %2867 = vmatpush.msrb.mxu0 %v2840_v12 }
 0x445   : > { %v2441_v52 = vmul.f32 0.01, %v2388_v21  ;;  %vm2425_vm7 = vcmp.gt.f32.partialorder %v2388_v21, 0.0 }
 0x447   : > { %v5401_v30 = vsel %vm2425_vm7, %v2388_v21, %v2441_v52  ;;  %v2839_v52 = vld [vmem:[#allocation5 + $0x18] sm:$0xff] }
 0x448   : > { %2478 = vadd.xlane.f32.xlu1 %v5401_v30  ;;  %v2521_v36 = vmul.f32 %v5401_v30, %v5401_v30  ;;  %2868 = vmatpush.msrb.mxu0 %v2839_v52 }
 0x44a   : > { %v2390_v14 = vpop.f32.mrf.mxu3  ;;  %2542 = vadd.xlane.f32.xlu2 %v2521_v36  ;;  %2869 = vmatpush.msrb.mxu0 %v2838_v41 }
 0x44b   : > { %v2391_v46 = vadd.f32 %v5368_v10, %v2390_v14  ;;  %v2837_v14 = vld [vmem:[#allocation5 + $0x8] sm:$0xff] }
 0x44c   : > { %2870 = vmatpush.msrb.mxu0 %v2837_v14 }
 0x44d   : > { %v2442_v45 = vmul.f32 0.01, %v2391_v46  ;;  %vm2426_vm8 = vcmp.gt.f32.partialorder %v2391_v46, 0.0 }
 0x44f   : > { %v5407_v22 = vsel %vm2426_vm8, %v2391_v46, %v2442_v45  ;;  %v2836_v45 = vld [vmem:[#allocation5] sm:$0xff] }
 0x450   : > { %2480 = vadd.xlane.f32.xlu0 %v5407_v22  ;;  %v2522_v31 = vmul.f32 %v5407_v22, %v5407_v22  ;;  %2871 = vmatpush.msrb.mxu0 %v2836_v45 }
 0x452   : > { %2544 = vadd.xlane.f32.xlu1 %v2522_v31  ;;  %v2393_v40 = vpop.f32.mrf.mxu3 }
 0x453   : > { %v2394_v9 = vadd.f32 %v5368_v10, %v2393_v40 }
 0x455   : > { %v2443_v17 = vmul.f32 0.01, %v2394_v9  ;;  %vm2427_vm9 = vcmp.gt.f32.partialorder %v2394_v9, 0.0 }
 0x457   : > { %v5413_v20 = vsel %vm2427_vm9, %v2394_v9, %v2443_v17 }
 0x458   : > { %2482 = vadd.xlane.f32.xlu2 %v5413_v20  ;;  %v2523_v13 = vmul.f32 %v5413_v20, %v5413_v20 }
 0x45a   : > { %2546 = vadd.xlane.f32.xlu0 %v2523_v13  ;;  %v2396_v27 = vpop.f32.mrf.mxu3 }
 0x45b   : > { %v2397_v42 = vadd.f32 %v5368_v10, %v2396_v27 }
 0x45d   : > { %v2444_v58 = vmul.f32 0.01, %v2397_v42  ;;  %vm2428_vm10 = vcmp.gt.f32.partialorder %v2397_v42, 0.0 }
 0x45f   : > { %v5419_v5 = vsel %vm2428_vm10, %v2397_v42, %v2444_v58 }
 0x460   : > { %2484 = vadd.xlane.f32.xlu1 %v5419_v5  ;;  %v2524_v53 = vmul.f32 %v5419_v5, %v5419_v5 }
 0x462   : > { %v2399_v50 = vpop.f32.mrf.mxu3  ;;  %2548 = vadd.xlane.f32.xlu2 %v2524_v53 }
 0x463   : > { %v2400_v0 = vadd.f32 %v5368_v10, %v2399_v50 }
 0x465   : > { %v2445_v7 = vmul.f32 0.01, %v2400_v0  ;;  %vm2429_vm11 = vcmp.gt.f32.partialorder %v2400_v0, 0.0 }
 0x467   : > { %v5425_v34 = vsel %vm2429_vm11, %v2400_v0, %v2445_v7 }
 0x468   : > { %2486 = vadd.xlane.f32.xlu0 %v5425_v34  ;;  %v2525_v37 = vmul.f32 %v5425_v34, %v5425_v34 }
 0x46a   : > { %2550 = vadd.xlane.f32.xlu1 %v2525_v37  ;;  %v2402_v51 = vpop.f32.mrf.mxu3 }
 0x46b   : > { %v2403_v63 = vadd.f32 %v5368_v10, %v2402_v51 }
 0x46d   : > { %v2446_v43 = vmul.f32 0.01, %v2403_v63  ;;  %vm2430_vm12 = vcmp.gt.f32.partialorder %v2403_v63, 0.0 }
 0x46f   : > { %v5431_v29 = vsel %vm2430_vm12, %v2403_v63, %v2446_v43 }
 0x470   : > { %2488 = vadd.xlane.f32.xlu2 %v5431_v29  ;;  %v2526_v62 = vmul.f32 %v5431_v29, %v5431_v29 }
 0x472   : > { %2552 = vadd.xlane.f32.xlu0 %v2526_v62  ;;  %v2405_v61 = vpop.f32.mrf.mxu3 }
 0x473   : > { %v2406_v56 = vadd.f32 %v5368_v10, %v2405_v61 }
 0x475   : > { %v2447_v6 = vmul.f32 0.01, %v2406_v56  ;;  %vm2431_vm13 = vcmp.gt.f32.partialorder %v2406_v56, 0.0 }
 0x477   : > { %v5437_v23 = vsel %vm2431_vm13, %v2406_v56, %v2447_v6 }
 0x478   : > { %2490 = vadd.xlane.f32.xlu1 %v5437_v23  ;;  %v2527_v18 = vmul.f32 %v5437_v23, %v5437_v23 }
 0x47a   : > { %v2408_v8 = vpop.f32.mrf.mxu3  ;;  %2554 = vadd.xlane.f32.xlu2 %v2527_v18 }
 0x47b   : > { %v2409_v47 = vadd.f32 %v5368_v10, %v2408_v8 }
 0x47d   : > { %v2448_v33 = vmul.f32 0.01, %v2409_v47  ;;  %vm2432_vm14 = vcmp.gt.f32.partialorder %v2409_v47, 0.0 }
 0x47f   : > { %v5443_v55 = vsel %vm2432_vm14, %v2409_v47, %v2448_v33 }
 0x480   : > { %2492 = vadd.xlane.f32.xlu0 %v5443_v55  ;;  %v2528_v57 = vmul.f32 %v5443_v55, %v5443_v55 }
 0x482   : > { %2556 = vadd.xlane.f32.xlu1 %v2528_v57  ;;  %v2411_v35 = vpop.f32.mrf.mxu3 }
 0x483   : > { %v2412_v2 = vadd.f32 %v5368_v10, %v2411_v35 }
 0x485   : > { %v2449_v24 = vmul.f32 0.01, %v2412_v2  ;;  %vm2433_vm15 = vcmp.gt.f32.partialorder %v2412_v2, 0.0 }
 0x487   : > { %v5449_v19 = vsel %vm2433_vm15, %v2412_v2, %v2449_v24 }
 0x488   : > { %2494 = vadd.xlane.f32.xlu2 %v5449_v19  ;;  %v2529_v39 = vmul.f32 %v5449_v19, %v5449_v19 }
 0x48a   : > { %2558 = vadd.xlane.f32.xlu0 %v2529_v39  ;;  %v2414_v3 = vpop.f32.mrf.mxu3 }
 0x48b   : > { %v2415_v21 = vadd.f32 %v5368_v10, %v2414_v3 }
 0x48d   : > { %v2450_v32 = vmul.f32 0.01, %v2415_v21  ;;  %vm2434_vm0 = vcmp.gt.f32.partialorder %v2415_v21, 0.0 }
 0x48f   : > { %v5455_v36 = vsel %vm2434_vm0, %v2415_v21, %v2450_v32 }
 0x490   : > { %2496 = vadd.xlane.f32.xlu1 %v5455_v36  ;;  %v2530_v46 = vmul.f32 %v5455_v36, %v5455_v36 }
 0x492   : > { %v2417_v25 = vpop.f32.mrf.mxu3  ;;  %2560 = vadd.xlane.f32.xlu2 %v2530_v46 }
 0x493   : > { %v2469_v31 = vpop.xlane.xlu0 %2468  ;;  %v2418_v48 = vadd.f32 %v5368_v10, %v2417_v25 }
 0x494   : > { %v2500_v40 = vmul.f32 %v2469_v31, %v4685_v1 }
 0x495   : > { %v2533_v9 = vpop.xlane.xlu1 %2532  ;;  %v2451_v17 = vmul.f32 0.01, %v2418_v48  ;;  %vm2435_vm1 = vcmp.gt.f32.partialorder %v2418_v48, 0.0 }
 0x496   : > { %v2580_v49 = vmul.f32 %v2500_v40, %v2500_v40  ;;  %v2564_v13 = vmul.f32 %v2533_v9, %v4685_v1  ;;  %v2628_v24 = vsub.f32 %v5371_v60, %v2500_v40 }
 0x497   : > { %v5463_v42 = vsel %vm2435_vm1, %v2418_v48, %v2451_v17 }
 0x498   : > { %v2596_v27 = vsub.f32 %v2564_v13, %v2580_v49  ;;  %2498 = vadd.xlane.f32.xlu0 %v5463_v42  ;;  %v2531_v58 = vmul.f32 %v5463_v42, %v5463_v42 }
 0x49a   : > { %v2612_v26 = vmax.f32 %v2596_v27, 0.0  ;;  %2562 = vadd.xlane.f32.xlu1 %v2531_v58 }
 0x49b   : > { %v2471_v10 = vpop.xlane.xlu2 %2470 }
 0x49c   : > { %v2644_v59 = vadd.f32 1e-05, %v2612_v26  ;;  %v2501_v53 = vmul.f32 %v2471_v10, %v4685_v1 }
 0x49d   : > { %v2535_v50 = vpop.xlane.xlu0 %2534 }
 0x49e   : > { %3896 = vrsqrt.f32 %v2644_v59  ;;  %v2581_v0 = vmul.f32 %v2501_v53, %v2501_v53  ;;  %v2565_v7 = vmul.f32 %v2535_v50, %v4685_v1  ;;  %vm2666_vm3 = vweird.f32 %v2644_v59 }
 0x49f   : > { %v2629_v13 = vsub.f32 %v5377_v54, %v2501_v53 }
 0x4a0   : > { %v2597_v28 = vsub.f32 %v2565_v7, %v2581_v0 }
 0x4a2   : > { %v2613_v37 = vmax.f32 %v2597_v28, 0.0 }
 0x4a3   : > { %v2473_v51 = vpop.xlane.xlu1 %2472 }
 0x4a4   : > { %v3897_v15 = vpop.eup %3896  ;;  %v2645_v43 = vadd.f32 1e-05, %v2613_v37  ;;  %v5471_v38 = vmul.f32 %v2473_v51, %v4685_v1 }
 0x4a5   : > { %v2661_v63 = vmul.f32 %v3897_v15, %v2644_v59  ;;  %v2537_v62 = vpop.xlane.xlu2 %2536  ;;  %vm2667_vm2 = vweird.f32 %v3897_v15 }
 0x4a6   : > { %3898 = vrsqrt.f32 %v2645_v43  ;;  %v2582_v56 = vmul.f32 %v5471_v38, %v5471_v38  ;;  %v2566_v6 = vmul.f32 %v2537_v62, %v4685_v1  ;;  %vm2668_vm4 = vmor %vm2666_vm3, %vm2667_vm2  ;;  %vm2676_vm6 = vweird.f32 %v2645_v43 }
 0x4a7   : > { %v2662_v61 = vmul.f32 %v3897_v15, %v2661_v63 }
 0x4a8   : > { %v2598_v18 = vsub.f32 %v2566_v6, %v2582_v56  ;;  %v2630_v6 = vsub.f32 %v5383_v16, %v5471_v38 }
 0x4a9   : > { %v2663_v11 = vmul.f32 0.5, %v2662_v61 }
 0x4aa   : > { %v2614_v47 = vmax.f32 %v2598_v18, 0.0 }
 0x4ab   : > { %v2664_v8 = vsub.f32 1.5, %v2663_v11  ;;  %v2475_v33 = vpop.xlane.xlu0 %2474 }
 0x4ac   : > { %v3899_v57 = vpop.eup %3898  ;;  %v5477_v35 = vmul.f32 %v2475_v33, %v4685_v1  ;;  %v2646_v12 = vadd.f32 1e-05, %v2614_v47 }
 0x4ad   : > { %v2665_v2 = vmul.f32 %v3897_v15, %v2664_v8  ;;  %v2671_v39 = vmul.f32 %v3899_v57, %v2645_v43  ;;  %v2539_v3 = vpop.xlane.xlu1 %2538  ;;  %vm2677_vm5 = vweird.f32 %v3899_v57 }
 0x4ae   : > { %v2583_v21 = vmul.f32 %v5477_v35, %v5477_v35  ;;  %v2567_v52 = vmul.f32 %v2539_v3, %v4685_v1  ;;  %3900 = vrsqrt.f32 %v2646_v12  ;;  %vm2678_vm7 = vmor %vm2676_vm6, %vm2677_vm5  ;;  %vm2686_vm9 = vweird.f32 %v2646_v12 }
 0x4af   : > { %v2669_v32 = vsel %vm2668_vm4, %v3897_v15, %v2665_v2  ;;  %v2672_v14 = vmul.f32 %v3899_v57, %v2671_v39  ;;  %v2631_v16 = vsub.f32 %v5389_v44, %v5477_v35 }
 0x4b0   : > { %v2820_v41 = vmul.f32 %v2669_v32, %v2628_v24  ;;  %v2599_v46 = vsub.f32 %v2567_v52, %v2583_v21 }
 0x4b1   : > { %v2673_v45 = vmul.f32 0.5, %v2672_v14 }
 0x4b2   : > { %2872 = vmatmul.f32.vlgmr.msrb.gmra.mxu0 %v2820_v41  ;;  %v2615_v25 = vmax.f32 %v2599_v46, 0.0 }
 0x4b3   : > { %v2477_v31 = vpop.xlane.xlu2 %2476  ;;  %v2674_v48 = vsub.f32 1.5, %v2673_v45 }
 0x4b4   : > { %v2647_v60 = vadd.f32 1e-05, %v2615_v25  ;;  %v5484_v40 = vmul.f32 %v2477_v31, %v4685_v1  ;;  %v3901_v9 = vpop.eup %3900 }
 0x4b5   : > { %v2541_v17 = vpop.xlane.xlu0 %2540  ;;  %v2675_v49 = vmul.f32 %v3899_v57, %v2674_v48  ;;  %v2681_v27 = vmul.f32 %v3901_v9, %v2646_v12  ;;  %vm2687_vm8 = vweird.f32 %v3901_v9 }
 0x4b6   : > { %3902 = vrsqrt.f32 %v2647_v60  ;;  %v2584_v58 = vmul.f32 %v5484_v40, %v5484_v40  ;;  %v2568_v26 = vmul.f32 %v2541_v17, %v4685_v1  ;;  %vm2688_vm10 = vmor %vm2686_vm9, %vm2687_vm8  ;;  %vm2696_vm12 = vweird.f32 %v2647_v60 }
 0x4b7   : > { %v2679_v59 = vsel %vm2678_vm7, %v3899_v57, %v2675_v49  ;;  %v2682_v50 = vmul.f32 %v3901_v9, %v2681_v27 }
 0x4b8   : > { %v2821_v10 = vmul.f32 %v2679_v59, %v2629_v13  ;;  %v2600_v0 = vsub.f32 %v2568_v26, %v2584_v58  ;;  %v2632_v59 = vsub.f32 %v5395_v4, %v5484_v40 }
 0x4b9   : > { %v2683_v7 = vmul.f32 0.5, %v2682_v50 }
 0x4ba   : > { %2875 = vmatmul.f32.gmra.mxu0 %v2821_v10  ;;  %v2616_v28 = vmax.f32 %v2600_v0, 0.0 }
 0x4bb   : > { %v2479_v37 = vpop.xlane.xlu1 %2478  ;;  %v2684_v54 = vsub.f32 1.5, %v2683_v7 }
 0x4bc   : > { %v3903_v15 = vpop.eup %3902  ;;  %v5491_v51 = vmul.f32 %v2479_v37, %v4685_v1  ;;  %v2648_v63 = vadd.f32 1e-05, %v2616_v28 }
 0x4bd   : > { %v2691_v53 = vmul.f32 %v3903_v15, %v2647_v60  ;;  %v2543_v43 = vpop.xlane.xlu2 %2542  ;;  %v2685_v56 = vmul.f32 %v3901_v9, %v2684_v54  ;;  %vm2697_vm11 = vweird.f32 %v3903_v15 }
 0x4be   : > { %v2585_v62 = vmul.f32 %v5491_v51, %v5491_v51  ;;  %v2569_v61 = vmul.f32 %v2543_v43, %v4685_v1  ;;  %3904 = vrsqrt.f32 %v2648_v63  ;;  %vm2698_vm13 = vmor %vm2696_vm12, %vm2697_vm11  ;;  %vm2706_vm15 = vweird.f32 %v2648_v63 }
 0x4bf   : > { %v2692_v11 = vmul.f32 %v3903_v15, %v2691_v53  ;;  %v2689_v8 = vsel %vm2688_vm10, %v3901_v9, %v2685_v56  ;;  %v2633_v4 = vsub.f32 %v5401_v30, %v5491_v51 }
 0x4c0   : > { %v2601_v18 = vsub.f32 %v2569_v61, %v2585_v62  ;;  %v2822_v47 = vmul.f32 %v2689_v8, %v2630_v6 }
 0x4c1   : > { %v2693_v33 = vmul.f32 0.5, %v2692_v11 }
 0x4c2   : > { %v2617_v57 = vmax.f32 %v2601_v18, 0.0  ;;  %2878 = vmatmul.f32.gmra.mxu0 %v2822_v47 }
 0x4c3   : > { %v2481_v2 = vpop.xlane.xlu0 %2480  ;;  %v2694_v24 = vsub.f32 1.5, %v2693_v33 }
 0x4c4   : > { %v2649_v39 = vadd.f32 1e-05, %v2617_v57  ;;  %v5499_v3 = vmul.f32 %v2481_v2, %v4685_v1  ;;  %v3905_v12 = vpop.eup %3904 }
 0x4c5   : > { %v2545_v21 = vpop.xlane.xlu1 %2544  ;;  %v2695_v52 = vmul.f32 %v3903_v15, %v2694_v24  ;;  %v2701_v38 = vmul.f32 %v3905_v12, %v2648_v63  ;;  %vm2707_vm14 = vweird.f32 %v3905_v12 }
 0x4c6   : > { %3906 = vrsqrt.f32 %v2649_v39  ;;  %v2586_v32 = vmul.f32 %v5499_v3, %v5499_v3  ;;  %v2570_v41 = vmul.f32 %v2545_v21, %v4685_v1  ;;  %vm2708_vm0 = vmor %vm2706_vm15, %vm2707_vm14  ;;  %vm2716_vm2 = vweird.f32 %v2649_v39 }
 0x4c7   : > { %v2699_v14 = vsel %vm2698_vm13, %v3903_v15, %v2695_v52  ;;  %v2702_v45 = vmul.f32 %v3905_v12, %v2701_v38 }
 0x4c8   : > { %v2823_v46 = vmul.f32 %v2699_v14, %v2631_v16  ;;  %v2602_v25 = vsub.f32 %v2570_v41, %v2586_v32  ;;  %v2634_v32 = vsub.f32 %v5407_v22, %v5499_v3 }
 0x4c9   : > { %v2703_v31 = vmul.f32 0.5, %v2702_v45 }
 0x4ca   : > { %v2618_v48 = vmax.f32 %v2602_v25, 0.0  ;;  %2881 = vmatmul.f32.gmra.mxu0 %v2823_v46 }
 0x4cb   : > { %v2483_v9 = vpop.xlane.xlu2 %2482  ;;  %v2704_v44 = vsub.f32 1.5, %v2703_v31 }
 0x4cc   : > { %v3907_v60 = vpop.eup %3906  ;;  %v5507_v17 = vmul.f32 %v2483_v9, %v4685_v1  ;;  %v2650_v49 = vadd.f32 1e-05, %v2618_v48 }
 0x4cd   : > { %v2711_v35 = vmul.f32 %v3907_v60, %v2649_v39  ;;  %v2547_v13 = vpop.xlane.xlu0 %2546  ;;  %v2705_v26 = vmul.f32 %v3905_v12, %v2704_v44  ;;  %vm2717_vm1 = vweird.f32 %v3907_v60 }
 0x4ce   : > { %v2587_v27 = vmul.f32 %v5507_v17, %v5507_v17  ;;  %v2571_v58 = vmul.f32 %v2547_v13, %v4685_v1  ;;  %3908 = vrsqrt.f32 %v2650_v49  ;;  %vm2718_vm3 = vmor %vm2716_vm2, %vm2717_vm1  ;;  %vm2726_vm5 = vweird.f32 %v2650_v49 }
 0x4cf   : > { %v2712_v10 = vmul.f32 %v3907_v60, %v2711_v35  ;;  %v2709_v0 = vsel %vm2708_vm0, %v3905_v12, %v2705_v26  ;;  %v2635_v22 = vsub.f32 %v5413_v20, %v5507_v17 }
 0x4d0   : > { %v2603_v50 = vsub.f32 %v2571_v58, %v2587_v27  ;;  %v2824_v7 = vmul.f32 %v2709_v0, %v2632_v59 }
 0x4d1   : > { %v2713_v28 = vmul.f32 0.5, %v2712_v10 }
 0x4d2   : > { %v2619_v37 = vmax.f32 %v2603_v50, 0.0  ;;  %2884 = vmatmul.f32.gmra.mxu0 %v2824_v7 }
 0x4d3   : > { %v2485_v15 = vpop.xlane.xlu1 %2484  ;;  %v2714_v54 = vsub.f32 1.5, %v2713_v28 }
 0x4d4   : > { %v2651_v53 = vadd.f32 1e-05, %v2619_v37  ;;  %v5515_v43 = vmul.f32 %v2485_v15, %v4685_v1  ;;  %v3909_v63 = vpop.eup %3908 }
 0x4d5   : > { %v2549_v62 = vpop.xlane.xlu2 %2548  ;;  %v2715_v61 = vmul.f32 %v3907_v60, %v2714_v54  ;;  %v2721_v40 = vmul.f32 %v3909_v63, %v2650_v49  ;;  %vm2727_vm4 = vweird.f32 %v3909_v63 }
 0x4d6   : > { %3910 = vrsqrt.f32 %v2651_v53  ;;  %v2588_v56 = vmul.f32 %v5515_v43, %v5515_v43  ;;  %v2572_v6 = vmul.f32 %v2549_v62, %v4685_v1  ;;  %vm2728_vm6 = vmor %vm2726_vm5, %vm2727_vm4  ;;  %vm2736_vm8 = vweird.f32 %v2651_v53 }
 0x4d7   : > { %v2719_v11 = vsel %vm2718_vm3, %v3907_v60, %v2715_v61  ;;  %v2722_v8 = vmul.f32 %v3909_v63, %v2721_v40 }
 0x4d8   : > { %v2825_v18 = vmul.f32 %v2719_v11, %v2633_v4  ;;  %v2604_v47 = vsub.f32 %v2572_v6, %v2588_v56  ;;  %v2636_v4 = vsub.f32 %v5419_v5, %v5515_v43 }
 0x4d9   : > { %v2723_v33 = vmul.f32 0.5, %v2722_v8 }
 0x4da   : > { %v2620_v57 = vmax.f32 %v2604_v47, 0.0  ;;  %2887 = vmatmul.f32.gmra.mxu0 %v2825_v18 }
 0x4db   : > { %v2487_v2 = vpop.xlane.xlu0 %2486  ;;  %v2724_v30 = vsub.f32 1.5, %v2723_v33 }
 0x4dc   : > { %v3911_v24 = vpop.eup %3910  ;;  %v5523_v39 = vmul.f32 %v2487_v2, %v4685_v1  ;;  %v2652_v12 = vadd.f32 1e-05, %v2620_v57 }
 0x4dd   : > { %v2731_v51 = vmul.f32 %v3911_v24, %v2651_v53  ;;  %v2551_v21 = vpop.xlane.xlu1 %2550  ;;  %v2725_v38 = vmul.f32 %v3909_v63, %v2724_v30  ;;  %vm2737_vm7 = vweird.f32 %v3911_v24 }
 0x4de   : > { %v2589_v52 = vmul.f32 %v5523_v39, %v5523_v39  ;;  %v2573_v16 = vmul.f32 %v2551_v21, %v4685_v1  ;;  %3912 = vrsqrt.f32 %v2652_v12  ;;  %vm2738_vm9 = vmor %vm2736_vm8, %vm2737_vm7  ;;  %vm2746_vm11 = vweird.f32 %v2652_v12 }
 0x4df   : > { %v2732_v41 = vmul.f32 %v3911_v24, %v2731_v51  ;;  %v2729_v46 = vsel %vm2728_vm6, %v3909_v63, %v2725_v38  ;;  %v2637_v5 = vsub.f32 %v5425_v34, %v5523_v39 }
 0x4e0   : > { %v2605_v14 = vsub.f32 %v2573_v16, %v2589_v52  ;;  %v2826_v45 = vmul.f32 %v2729_v46, %v2634_v32 }
 0x4e1   : > { %v2733_v25 = vmul.f32 0.5, %v2732_v41 }
 0x4e2   : > { %v2621_v31 = vmax.f32 %v2605_v14, 0.0  ;;  %2890 = vmatmul.f32.gmra.mxu0 %v2826_v45 }
 0x4e3   : > { %v2489_v48 = vpop.xlane.xlu2 %2488  ;;  %v2734_v9 = vsub.f32 1.5, %v2733_v25 }
 0x4e4   : > { %v2653_v60 = vadd.f32 1e-05, %v2621_v31  ;;  %v5531_v44 = vmul.f32 %v2489_v48, %v4685_v1  ;;  %v3913_v35 = vpop.eup %3912 }
 0x4e5   : > { %v2553_v49 = vpop.xlane.xlu0 %2552  ;;  %v2735_v13 = vmul.f32 %v3911_v24, %v2734_v9  ;;  %v2741_v3 = vmul.f32 %v3913_v35, %v2652_v12  ;;  %vm2747_vm10 = vweird.f32 %v3913_v35 }
 0x4e6   : > { %3914 = vrsqrt.f32 %v2653_v60  ;;  %v2590_v27 = vmul.f32 %v5531_v44, %v5531_v44  ;;  %v2574_v58 = vmul.f32 %v2553_v49, %v4685_v1  ;;  %vm2748_vm12 = vmor %vm2746_vm11, %vm2747_vm10  ;;  %vm2756_vm14 = vweird.f32 %v2653_v60 }
 0x4e7   : > { %v2739_v26 = vsel %vm2738_vm9, %v3911_v24, %v2735_v13  ;;  %v2742_v10 = vmul.f32 %v3913_v35, %v2741_v3  ;;  %v2638_v49 = vsub.f32 %v5431_v29, %v5531_v44 }
 0x4e8   : > { %v2827_v59 = vmul.f32 %v2739_v26, %v2635_v22  ;;  %v2606_v50 = vsub.f32 %v2574_v58, %v2590_v27 }
 0x4e9   : > { %v2743_v0 = vmul.f32 0.5, %v2742_v10 }
 0x4ea   : > { %v2622_v7 = vmax.f32 %v2606_v50, 0.0  ;;  %2893 = vmatmul.f32.gmra.mxu0 %v2827_v59 }
 0x4eb   : > { %v2491_v28 = vpop.xlane.xlu1 %2490  ;;  %v2744_v20 = vsub.f32 1.5, %v2743_v0 }
 0x4ec   : > { %v3915_v37 = vpop.eup %3914  ;;  %v5539_v15 = vmul.f32 %v2491_v28, %v4685_v1  ;;  %v2654_v54 = vadd.f32 1e-05, %v2622_v7 }
 0x4ed   : > { %v2751_v17 = vmul.f32 %v3915_v37, %v2653_v60  ;;  %v2555_v53 = vpop.xlane.xlu2 %2554  ;;  %v2745_v61 = vmul.f32 %v3913_v35, %v2744_v20  ;;  %vm2757_vm13 = vweird.f32 %v3915_v37 }
 0x4ee   : > { %v2591_v63 = vmul.f32 %v5539_v15, %v5539_v15  ;;  %v2575_v62 = vmul.f32 %v2555_v53, %v4685_v1  ;;  %3916 = vrsqrt.f32 %v2654_v54  ;;  %vm2758_vm15 = vmor %vm2756_vm14, %vm2757_vm13  ;;  %vm2766_vm1 = vweird.f32 %v2654_v54 }
 0x4ef   : > { %v2752_v40 = vmul.f32 %v3915_v37, %v2751_v17  ;;  %v2749_v6 = vsel %vm2748_vm12, %v3913_v35, %v2745_v61  ;;  %v2639_v29 = vsub.f32 %v5437_v23, %v5539_v15 }
 0x4f0   : > { %v2607_v56 = vsub.f32 %v2575_v62, %v2591_v63  ;;  %v2828_v11 = vmul.f32 %v2749_v6, %v2636_v4 }
 0x4f1   : > { %v2753_v18 = vmul.f32 0.5, %v2752_v40 }
 0x4f2   : > { %v2623_v8 = vmax.f32 %v2607_v56, 0.0  ;;  %2896 = vmatmul.f32.gmra.mxu0 %v2828_v11 }
 0x4f3   : > { %v2493_v47 = vpop.xlane.xlu0 %2492  ;;  %v2754_v33 = vsub.f32 1.5, %v2753_v18 }
 0x4f4   : > { %v2655_v57 = vadd.f32 1e-05, %v2623_v8  ;;  %v5547_v2 = vmul.f32 %v2493_v47, %v4685_v1  ;;  %v3917_v24 = vpop.eup %3916 }
 0x4f5   : > { %v2557_v30 = vpop.xlane.xlu1 %2556  ;;  %v2755_v51 = vmul.f32 %v3915_v37, %v2754_v33  ;;  %v2761_v43 = vmul.f32 %v3917_v24, %v2654_v54  ;;  %vm2767_vm0 = vweird.f32 %v3917_v24 }
 0x4f6   : > { %3918 = vrsqrt.f32 %v2655_v57  ;;  %v2592_v12 = vmul.f32 %v5547_v2, %v5547_v2  ;;  %v2576_v21 = vmul.f32 %v2557_v30, %v4685_v1  ;;  %vm2768_vm2 = vmor %vm2766_vm1, %vm2767_vm0  ;;  %vm2776_vm4 = vweird.f32 %v2655_v57 }
 0x4f7   : > { %v2759_v52 = vsel %vm2758_vm15, %v3915_v37, %v2755_v51  ;;  %v2762_v38 = vmul.f32 %v3917_v24, %v2761_v43 }
 0x4f8   : > { %v2829_v16 = vmul.f32 %v2759_v52, %v2637_v5  ;;  %v2608_v32 = vsub.f32 %v2576_v21, %v2592_v12 }
 0x4f9   : > { %v2763_v41 = vmul.f32 0.5, %v2762_v38 }
 0x4fa   : > { %v2624_v14 = vmax.f32 %v2608_v32, 0.0  ;;  %2899 = vmatmul.f32.gmra.mxu0 %v2829_v16 }
 0x4fb   : > { %v2495_v46 = vpop.xlane.xlu2 %2494  ;;  %v2764_v34 = vsub.f32 1.5, %v2763_v41 }
 0x4fc   : > { %v3919_v45 = vpop.eup %3918  ;;  %v5555_v25 = vmul.f32 %v2495_v46, %v4685_v1  ;;  %v2656_v31 = vadd.f32 1e-05, %v2624_v14 }
 0x4fd   : > { %v2771_v39 = vmul.f32 %v3919_v45, %v2655_v57  ;;  %v2559_v48 = vpop.xlane.xlu0 %2558  ;;  %v2765_v35 = vmul.f32 %v3917_v24, %v2764_v34  ;;  %vm2777_vm3 = vweird.f32 %v3919_v45  ;;  %v2640_v57 = vsub.f32 %v5443_v55, %v5547_v2 }
 0x4fe   : > { %v2593_v9 = vmul.f32 %v5555_v25, %v5555_v25  ;;  %v2577_v60 = vmul.f32 %v2559_v48, %v4685_v1  ;;  %3920 = vrsqrt.f32 %v2656_v31  ;;  %vm2778_vm5 = vmor %vm2776_vm4, %vm2777_vm3  ;;  %vm2786_vm7 = vweird.f32 %v2656_v31 }
 0x4ff   : > { %v2772_v13 = vmul.f32 %v3919_v45, %v2771_v39  ;;  %v2769_v3 = vsel %vm2768_vm2, %v3917_v24, %v2765_v35  ;;  %v2641_v32 = vsub.f32 %v5449_v19, %v5555_v25  ;;  %vm3053_vm2 = vcmask 1041409  }
 0x500   : > { %v2609_v22 = vsub.f32 %v2577_v60, %v2593_v9  ;;  %v2830_v27 = vmul.f32 %v2769_v3, %v2638_v49  ;;  %v3031_v3 = vld [vmem:[#allocation7 + $0x70] sm:$0xff]  ;;  %vm3055_vm3 = vcmask 1042434   ;;  %vm3057_vm4 = vcmask 1043459  }
 0x501   : > { %v2773_v58 = vmul.f32 0.5, %v2772_v13 }
 0x502   : > { %v2625_v26 = vmax.f32 %v2609_v22, 0.0  ;;  %2902 = vmatmul.f32.gmra.mxu0 %v2830_v27 }
 0x503   : > { %v2497_v59 = vpop.xlane.xlu1 %2496  ;;  %v2774_v10 = vsub.f32 1.5, %v2773_v58 }
 0x504   : > { %v2657_v50 = vadd.f32 1e-05, %v2625_v26  ;;  %v5563_v0 = vmul.f32 %v2497_v59, %v4685_v1  ;;  %v3921_v7 = vpop.eup %3920  ;;  %v3029_v59 = vld [vmem:[#allocation7 + $0x60] sm:$0xff] }
 0x505   : > { %v2561_v28 = vpop.xlane.xlu2 %2560  ;;  %v2775_v37 = vmul.f32 %v3919_v45, %v2774_v10  ;;  %v2781_v44 = vmul.f32 %v3921_v7, %v2656_v31  ;;  %vm2787_vm6 = vweird.f32 %v3921_v7 }
 0x506   : > { %3922 = vrsqrt.f32 %v2657_v50  ;;  %v2594_v20 = vmul.f32 %v5563_v0, %v5563_v0  ;;  %v2578_v17 = vmul.f32 %v2561_v28, %v4685_v1  ;;  %vm2788_vm8 = vmor %vm2786_vm7, %vm2787_vm6  ;;  %vm2796_vm10 = vweird.f32 %v2657_v50  ;;  %v3026_v28 = vld [vmem:[#allocation7 + $0x48] sm:$0xff] }
 0x507   : > { %v2779_v54 = vsel %vm2778_vm5, %v3919_v45, %v2775_v37  ;;  %v2782_v63 = vmul.f32 %v3921_v7, %v2781_v44  ;;  %v3032_v45 = vld [vmem:[#allocation7 + $0x78] sm:$0xff]  ;;  %v2642_v9 = vsub.f32 %v5455_v36, %v5563_v0  ;;  %v3030_v36 = vld [vmem:[#allocation7 + $0x68] sm:$0xff]  ;;  %v3023_v44 = vld [vmem:[#allocation7 + $0x30] sm:$0xff]  ;;  %vm3059_vm5 = vcmask 1044484  }
 0x508   : > { %v2831_v53 = vmul.f32 %v2779_v54, %v2639_v29  ;;  %v2610_v62 = vsub.f32 %v2578_v17, %v2594_v20  ;;  %3076 = vmatpush.msrb.mxu1 %v3032_v45  ;;  %v3024_v29 = vld [vmem:[#allocation7 + $0x38] sm:$0xff]  ;;  %v3022_v20 = vld [vmem:[#allocation7 + $0x28] sm:$0xff]  ;;  %v3021_v17 = vld [vmem:[#allocation7 + $0x20] sm:$0xff]  ;;  %vm3061_vm6 = vcmask 1045509   ;;  %vm3063_vm7 = vcmask 1046534  }
 0x509   : > { %v2783_v61 = vmul.f32 0.5, %v2782_v63  ;;  %v5582_v63 = vld [vmem:[%s5740_s15] ss:$0 sm:$0xff] }
 0x50a   : > { %v2626_v4 = vmax.f32 %v2610_v62, 0.0  ;;  %2905 = vmatmul.f32.gmra.mxu0 %v2831_v53  ;;  %3077 = vmatpush.msrb.mxu1 %v3031_v3  ;;  %v3020_v53 = vld [vmem:[#allocation7 + $0x18] sm:$0xff]  ;;  %v3019_v62 = vld [vmem:[#allocation7 + $0x10] sm:$0xff] }
 0x50b   : > { %v2499_v40 = vpop.xlane.xlu0 %2498  ;;  %v2784_v23 = vsub.f32 1.5, %v2783_v61 }
 0x50c   : > { %v3923_v56 = vpop.eup %3922  ;;  %v2515_v6 = vmul.f32 %v2499_v40, %v4685_v1  ;;  %v2658_v11 = vadd.f32 1e-05, %v2626_v4  ;;  %3078 = vmatpush.msrb.mxu1 %v3030_v36  ;;  %v3018_v4 = vld [vmem:[#allocation7 + $0x8] sm:$0xff] }
 0x50d   : > { %v2791_v15 = vmul.f32 %v3923_v56, %v2657_v50  ;;  %v2563_v18 = vpop.xlane.xlu1 %2562  ;;  %v2785_v33 = vmul.f32 %v3921_v7, %v2784_v23  ;;  %vm2797_vm9 = vweird.f32 %v3923_v56  ;;  %v3028_v50 = vld [vmem:[#allocation7 + $0x58] sm:$0xff]  ;;  %v3017_v23 = vld [vmem:[#allocation7] sm:$0xff] }
 0x50e   : > { %v2595_v8 = vmul.f32 %v2515_v6, %v2515_v6  ;;  %v2579_v47 = vmul.f32 %v2563_v18, %v4685_v1  ;;  %3924 = vrsqrt.f32 %v2658_v11  ;;  %vm2798_vm11 = vmor %vm2796_vm10, %vm2797_vm9  ;;  %vm2806_vm13 = vweird.f32 %v2658_v11  ;;  %3079 = vmatpush.msrb.mxu1 %v3029_v59 }
 0x50f   : > { %v2792_v24 = vmul.f32 %v3923_v56, %v2791_v15  ;;  %v2789_v51 = vsel %vm2788_vm8, %v3921_v7, %v2785_v33  ;;  %v2643_v22 = vsub.f32 %v5463_v42, %v2515_v6  ;;  %v3027_v7 = vld [vmem:[#allocation7 + $0x50] sm:$0xff]  ;;  %v3025_v42 = vld [vmem:[#allocation7 + $0x40] sm:$0xff]  ;;  %vm3065_vm8 = vcmask 1047559  }
 0x510   : > { %v2611_v30 = vsub.f32 %v2579_v47, %v2595_v8  ;;  %v2832_v5 = vmul.f32 %v2789_v51, %v2640_v57  ;;  %3080 = vmatpush.msrb.mxu1 %v3028_v50 }
 0x511   : > { %v2793_v43 = vmul.f32 0.5, %v2792_v24 }
 0x512   : > { %v2627_v12 = vmax.f32 %v2611_v30, 0.0  ;;  %2908 = vmatmul.f32.gmra.mxu0 %v2832_v5  ;;  %3081 = vmatpush.msrb.mxu1 %v3027_v7 }
 0x513   : > { %v2794_v21 = vsub.f32 1.5, %v2793_v43 }
 0x514   : > { %v2659_v52 = vadd.f32 1e-05, %v2627_v12  ;;  %v3925_v16 = vpop.eup %3924  ;;  %3082 = vmatpush.msrb.mxu1 %v3026_v28 }
 0x515   : > { %v2795_v38 = vmul.f32 %v3923_v56, %v2794_v21  ;;  %v2801_v41 = vmul.f32 %v3925_v16, %v2658_v11  ;;  %vm2807_vm12 = vweird.f32 %v3925_v16 }
 0x516   : > { %3926 = vrsqrt.f32 %v2659_v52  ;;  %vm2808_vm14 = vmor %vm2806_vm13, %vm2807_vm12  ;;  %vm2816_vm0 = vweird.f32 %v2659_v52  ;;  %3083 = vmatpush.msrb.mxu1 %v3025_v42 }
 0x517   : > { %v2799_v55 = vsel %vm2798_vm11, %v3923_v56, %v2795_v38  ;;  %v2802_v2 = vmul.f32 %v3925_v16, %v2801_v41 }
 0x518   : > { %v2833_v14 = vmul.f32 %v2799_v55, %v2641_v32  ;;  %3084 = vmatpush.msrb.mxu1 %v3024_v29 }
 0x519   : > { %v2803_v46 = vmul.f32 0.5, %v2802_v2 }
 0x51a   : > { %2911 = vmatmul.f32.gmra.mxu0 %v2833_v14  ;;  %3085 = vmatpush.msrb.mxu1 %v3023_v44 }
 0x51b   : > { %v2804_v39 = vsub.f32 1.5, %v2803_v46 }
 0x51c   : > { %v3927_v34 = vpop.eup %3926  ;;  %3086 = vmatpush.msrb.mxu1 %v3022_v20 }
 0x51d   : > { %v2811_v31 = vmul.f32 %v3927_v34, %v2659_v52  ;;  %v2805_v48 = vmul.f32 %v3925_v16, %v2804_v39  ;;  %vm2817_vm15 = vweird.f32 %v3927_v34 }
 0x51e   : > { %vm2818_vm1 = vmor %vm2816_vm0, %vm2817_vm15  ;;  %3087 = vmatpush.msrb.mxu1 %v3021_v17 }
 0x51f   : > { %v2812_v19 = vmul.f32 %v3927_v34, %v2811_v31  ;;  %v2809_v25 = vsel %vm2808_vm14, %v3925_v16, %v2805_v48 }
 0x520   : > { %v2834_v35 = vmul.f32 %v2809_v25, %v2642_v9  ;;  %3088 = vmatpush.msrb.mxu1 %v3020_v53 }
 0x521   : > { %v2813_v60 = vmul.f32 0.5, %v2812_v19 }
 0x522   : > { %2914 = vmatmul.f32.gmra.mxu0 %v2834_v35  ;;  %3089 = vmatpush.msrb.mxu1 %v3019_v62 }
 0x523   : > { %v2814_v49 = vsub.f32 1.5, %v2813_v60 }
 0x524   : > { %3090 = vmatpush.msrb.mxu1 %v3018_v4 }
 0x525   : > { %v2815_v13 = vmul.f32 %v3927_v34, %v2814_v49 }
 0x526   : > { %3091 = vmatpush.msrb.mxu1 %v3017_v23 }
 0x527   : > { %v2819_v27 = vsel %vm2818_vm1, %v3927_v34, %v2815_v13 }
 0x528   : > { %v2835_v58 = vmul.f32 %v2819_v27, %v2643_v22 }
 0x52a   : > { %2917 = vmatmul.f32.gmra.mxu0 %v2835_v58 }
 0x52f   : > { %v2873_v26 = vpop.f32.mrf.mxu0 }
 0x530   : > { %v2874_v56 = vadd.f32 %v5582_v63, %v2873_v26 }
 0x532   : > { %v2921_v33 = vrot.slane %v2874_v56, 4 }
 0x534   : > { %v2922_v43 = vadd.f32 %v2921_v33, %v2874_v56 }
 0x536   : > { %v2923_v55 = vrot.slane %v2922_v43, 2 }
 0x537   : > { %v2876_v10 = vpop.f32.mrf.mxu0 }
 0x538   : > { %v2877_v61 = vadd.f32 %v5582_v63, %v2876_v10  ;;  %v2924_v48 = vadd.f32 %v2923_v55, %v2922_v43 }
 0x53a   : > { %v2927_v18 = vrot.slane %v2877_v61, 4  ;;  %v2925_v27 = vrot.slane %v2924_v48, 1 }
 0x53c   : > { %v2928_v30 = vadd.f32 %v2927_v18, %v2877_v61  ;;  %v2926_v28 = vadd.f32 %v2925_v27, %v2924_v48 }
 0x53e   : > { %v2929_v16 = vrot.slane %v2928_v30, 2 }
 0x53f   : > { %v2879_v0 = vpop.f32.mrf.mxu0 }
 0x540   : > { %v2880_v40 = vadd.f32 %v5582_v63, %v2879_v0  ;;  %v2930_v45 = vadd.f32 %v2929_v16, %v2928_v30 }
 0x542   : > { %v2933_v47 = vrot.slane %v2880_v40, 4  ;;  %v2931_v35 = vrot.slane %v2930_v45, 1 }
 0x544   : > { %v2934_v5 = vadd.f32 %v2933_v47, %v2880_v40  ;;  %v2932_v59 = vadd.f32 %v2931_v35, %v2930_v45 }
 0x546   : > { %v2935_v41 = vrot.slane %v2934_v5, 2  ;;  %v3054_v20 = vsel %vm3053_vm2, %v2932_v59, %v2926_v28 }
 0x547   : > { %v2882_v37 = vpop.f32.mrf.mxu0 }
 0x548   : > { %v2883_v6 = vadd.f32 %v5582_v63, %v2882_v37  ;;  %v2936_v31 = vadd.f32 %v2935_v41, %v2934_v5 }
 0x54a   : > { %v2939_v57 = vrot.slane %v2883_v6, 4  ;;  %v2937_v22 = vrot.slane %v2936_v31, 1 }
 0x54c   : > { %v2940_v12 = vadd.f32 %v2939_v57, %v2883_v6  ;;  %v2938_v0 = vadd.f32 %v2937_v22, %v2936_v31 }
 0x54e   : > { %v2941_v2 = vrot.slane %v2940_v12, 2  ;;  %v3056_v53 = vsel %vm3055_vm3, %v2938_v0, %v3054_v20 }
 0x54f   : > { %v2885_v54 = vpop.f32.mrf.mxu0 }
 0x550   : > { %v2886_v15 = vadd.f32 %v5582_v63, %v2885_v54  ;;  %v2942_v9 = vadd.f32 %v2941_v2, %v2940_v12 }
 0x552   : > { %v2945_v24 = vrot.slane %v2886_v15, 4  ;;  %v2943_v58 = vrot.slane %v2942_v9, 1 }
 0x554   : > { %v2946_v21 = vadd.f32 %v2945_v24, %v2886_v15  ;;  %v2944_v42 = vadd.f32 %v2943_v58, %v2942_v9 }
 0x556   : > { %v2947_v46 = vrot.slane %v2946_v21, 2  ;;  %v3058_v4 = vsel %vm3057_vm4, %v2944_v42, %v3056_v53 }
 0x557   : > { %v2888_v11 = vpop.f32.mrf.mxu0 }
 0x558   : > { %v2889_v8 = vadd.f32 %v5582_v63, %v2888_v11  ;;  %v2948_v25 = vadd.f32 %v2947_v46, %v2946_v21 }
 0x55a   : > { %v2951_v51 = vrot.slane %v2889_v8, 4  ;;  %v2949_v36 = vrot.slane %v2948_v25, 1 }
 0x55c   : > { %v2952_v38 = vadd.f32 %v2951_v51, %v2889_v8  ;;  %v2950_v29 = vadd.f32 %v2949_v36, %v2948_v25 }
 0x55e   : > { %v2953_v34 = vrot.slane %v2952_v38, 2  ;;  %v3060_v56 = vsel %vm3059_vm5, %v2950_v29, %v3058_v4 }
 0x55f   : > { %v2891_v52 = vpop.f32.mrf.mxu0 }
 0x560   : > { %v2892_v32 = vadd.f32 %v5582_v63, %v2891_v52  ;;  %v2954_v49 = vadd.f32 %v2953_v34, %v2952_v38 }
 0x562   : > { %v2957_v14 = vrot.slane %v2892_v32, 4  ;;  %v2955_v10 = vrot.slane %v2954_v49, 1 }
 0x564   : > { %v2958_v39 = vadd.f32 %v2957_v14, %v2892_v32  ;;  %v2956_v17 = vadd.f32 %v2955_v10, %v2954_v49 }
 0x566   : > { %v2959_v19 = vrot.slane %v2958_v39, 2  ;;  %v3062_v23 = vsel %vm3061_vm6, %v2956_v17, %v3060_v56 }
 0x567   : > { %v2894_v60 = vpop.f32.mrf.mxu0 }
 0x568   : > { %v2895_v13 = vadd.f32 %v5582_v63, %v2894_v60  ;;  %v2960_v3 = vadd.f32 %v2959_v19, %v2958_v39 }
 0x56a   : > { %v2963_v26 = vrot.slane %v2895_v13, 4  ;;  %v2961_v7 = vrot.slane %v2960_v3, 1 }
 0x56c   : > { %v2964_v50 = vadd.f32 %v2963_v26, %v2895_v13  ;;  %v2962_v62 = vadd.f32 %v2961_v7, %v2960_v3 }
 0x56e   : > { %v2965_v37 = vrot.slane %v2964_v50, 2  ;;  %v3064_v15 = vsel %vm3063_vm7, %v2962_v62, %v3062_v23 }
 0x56f   : > { %v2897_v44 = vpop.f32.mrf.mxu0 }
 0x570   : > { %v2966_v54 = vadd.f32 %v2965_v37, %v2964_v50  ;;  %v2898_v40 = vadd.f32 %v5582_v63, %v2897_v44 }
 0x572   : > { %v2967_v61 = vrot.slane %v2966_v54, 1  ;;  %v2969_v18 = vrot.slane %v2898_v40, 4 }
 0x574   : > { %v2968_v6 = vadd.f32 %v2967_v61, %v2966_v54  ;;  %v2970_v57 = vadd.f32 %v2969_v18, %v2898_v40 }
 0x576   : > { %v3066_v11 = vsel %vm3065_vm8, %v2968_v6, %v3064_v15  ;;  %v2971_v51 = vrot.slane %v2970_v57, 2 }
 0x577   : > { %v2900_v8 = vpop.f32.mrf.mxu0  ;;  %3092 = vmatmul.f32.vlgmr.msrb.gmra.mxu1 %v3066_v11 }
 0x578   : > { %v2901_v47 = vadd.f32 %v5582_v63, %v2900_v8  ;;  %v2972_v52 = vadd.f32 %v2971_v51, %v2970_v57  ;;  %v3793_v51 = vld [vmem:[%s5741_s16] ss:$0 sm:$0xff] }
 0x57a   : > { %v2975_v33 = vrot.slane %v2901_v47, 4  ;;  %v2973_v41 = vrot.slane %v2972_v52, 1 }
 0x57c   : > { %v2976_v24 = vadd.f32 %v2975_v33, %v2901_v47  ;;  %v2974_v39 = vadd.f32 %v2973_v41, %v2972_v52  ;;  %v3166_v52 = vld [vmem:[#allocation8 + $0x78] sm:$0xff] }
 0x57d   : > { %3171 = vmatpush.msrb.mxu2 %v3166_v52  ;;  %v3162_v41 = vld [vmem:[#allocation8 + $0x58] sm:$0xff]  ;;  %v3259_v52 = vld [vmem:[#allocation10 + $0x68] sm:$0xff] }
 0x57e   : > { %v2977_v30 = vrot.slane %v2976_v24, 2 }
 0x57f   : > { %v2903_v5 = vpop.f32.mrf.mxu0 }
 0x580   : > { %v2904_v43 = vadd.f32 %v5582_v63, %v2903_v5  ;;  %v2978_v12 = vadd.f32 %v2977_v30, %v2976_v24 }
 0x582   : > { %v2981_v21 = vrot.slane %v2904_v43, 4  ;;  %v2979_v38 = vrot.slane %v2978_v12, 1 }
 0x584   : > { %v2982_v16 = vadd.f32 %v2981_v21, %v2904_v43  ;;  %v2980_v46 = vadd.f32 %v2979_v38, %v2978_v12  ;;  %v3164_v38 = vld [vmem:[#allocation8 + $0x68] sm:$0xff] }
 0x586   : > { %v2983_v32 = vrot.slane %v2982_v16, 2  ;;  %v3067_v9 = vsel %vm3053_vm2, %v2980_v46, %v2974_v39  ;;  %v3160_v39 = vld [vmem:[#allocation8 + $0x48] sm:$0xff] }
 0x587   : > { %v2906_v55 = vpop.f32.mrf.mxu0 }
 0x588   : > { %v2984_v2 = vadd.f32 %v2983_v32, %v2982_v16  ;;  %v2907_v14 = vadd.f32 %v5582_v63, %v2906_v55  ;;  %v3165_v16 = vld [vmem:[#allocation8 + $0x70] sm:$0xff]  ;;  %v3163_v32 = vld [vmem:[#allocation8 + $0x60] sm:$0xff] }
 0x589   : > { %3172 = vmatpush.msrb.mxu2 %v3165_v16  ;;  %v3161_v55 = vld [vmem:[#allocation8 + $0x50] sm:$0xff]  ;;  %v3258_v16 = vld [vmem:[#allocation10 + $0x60] sm:$0xff] }
 0x58a   : > { %v2985_v45 = vrot.slane %v2984_v2, 1  ;;  %v2987_v34 = vrot.slane %v2907_v14, 4 }
 0x58b   : > { %3173 = vmatpush.msrb.mxu2 %v3164_v38  ;;  %v3257_v38 = vld [vmem:[#allocation10 + $0x58] sm:$0xff] }
 0x58c   : > { %v2986_v31 = vadd.f32 %v2985_v45, %v2984_v2  ;;  %v2988_v48 = vadd.f32 %v2987_v34, %v2907_v14 }
 0x58d   : > { %3174 = vmatpush.msrb.mxu2 %v3163_v32  ;;  %v3256_v32 = vld [vmem:[#allocation10 + $0x50] sm:$0xff] }
 0x58e   : > { %v3068_v19 = vsel %vm3055_vm3, %v2986_v31, %v3067_v9  ;;  %v2989_v25 = vrot.slane %v2988_v48, 2  ;;  %v3159_v31 = vld [vmem:[#allocation8 + $0x40] sm:$0xff]  ;;  %v3157_v9 = vld [vmem:[#allocation8 + $0x30] sm:$0xff] }
 0x58f   : > { %v2909_v60 = vpop.f32.mrf.mxu0  ;;  %3175 = vmatpush.msrb.mxu2 %v3162_v41 }
 0x590   : > { %v2990_v35 = vadd.f32 %v2989_v25, %v2988_v48  ;;  %v2910_v49 = vadd.f32 %v5582_v63, %v2909_v60  ;;  %v3158_v48 = vld [vmem:[#allocation8 + $0x38] sm:$0xff]  ;;  %v3155_v25 = vld [vmem:[#allocation8 + $0x20] sm:$0xff] }
 0x591   : > { %3176 = vmatpush.msrb.mxu2 %v3161_v55  ;;  %v3154_v60 = vld [vmem:[#allocation8 + $0x18] sm:$0xff] }
 0x592   : > { %v2991_v13 = vrot.slane %v2990_v35, 1  ;;  %v2993_v22 = vrot.slane %v2910_v49, 4 }
 0x593   : > { %3177 = vmatpush.msrb.mxu2 %v3160_v39  ;;  %v3253_v39 = vld [vmem:[#allocation10 + $0x38] sm:$0xff] }
 0x594   : > { %v2992_v3 = vadd.f32 %v2991_v13, %v2990_v35  ;;  %v2994_v27 = vadd.f32 %v2993_v22, %v2910_v49  ;;  %v3153_v35 = vld [vmem:[#allocation8 + $0x10] sm:$0xff]  ;;  %v3152_v49 = vld [vmem:[#allocation8 + $0x8] sm:$0xff]  ;;  %v3151_v13 = vld [vmem:[#allocation8] sm:$0xff] }
 0x595   : > { %3178 = vmatpush.msrb.mxu2 %v3159_v31  ;;  %v3252_v31 = vld [vmem:[#allocation10 + $0x30] sm:$0xff] }
 0x596   : > { %v2995_v58 = vrot.slane %v2994_v27, 2  ;;  %v3069_v26 = vsel %vm3057_vm4, %v2992_v3, %v3068_v19  ;;  %v3156_v19 = vld [vmem:[#allocation8 + $0x28] sm:$0xff] }
 0x597   : > { %v2912_v36 = vpop.f32.mrf.mxu0  ;;  %3179 = vmatpush.msrb.mxu2 %v3158_v48  ;;  %v3251_v48 = vld [vmem:[#allocation10 + $0x28] sm:$0xff] }
 0x598   : > { %v2996_v59 = vadd.f32 %v2995_v58, %v2994_v27  ;;  %v2913_v10 = vadd.f32 %v5582_v63, %v2912_v36 }
 0x599   : > { %3180 = vmatpush.msrb.mxu2 %v3157_v9  ;;  %v3250_v9 = vld [vmem:[#allocation10 + $0x20] sm:$0xff] }
 0x59a   : > { %v2997_v50 = vrot.slane %v2996_v59, 1  ;;  %v2999_v0 = vrot.slane %v2913_v10, 4 }
 0x59b   : > { %3181 = vmatpush.msrb.mxu2 %v3156_v19  ;;  %v3249_v19 = vld [vmem:[#allocation10 + $0x18] sm:$0xff] }
 0x59c   : > { %v2998_v7 = vadd.f32 %v2997_v50, %v2996_v59  ;;  %v3000_v28 = vadd.f32 %v2999_v0, %v2913_v10 }
 0x59d   : > { %3182 = vmatpush.msrb.mxu2 %v3155_v25  ;;  %v3248_v25 = vld [vmem:[#allocation10 + $0x10] sm:$0xff] }
 0x59e   : > { %v3001_v42 = vrot.slane %v3000_v28, 2  ;;  %v3070_v37 = vsel %vm3059_vm5, %v2998_v7, %v3069_v26 }
 0x59f   : > { %v2915_v29 = vpop.f32.mrf.mxu0  ;;  %3183 = vmatpush.msrb.mxu2 %v3154_v60  ;;  %v3247_v60 = vld [vmem:[#allocation10 + $0x8] sm:$0xff] }
 0x5a0   : > { %v3002_v44 = vadd.f32 %v3001_v42, %v3000_v28  ;;  %v2916_v20 = vadd.f32 %v5582_v63, %v2915_v29 }
 0x5a1   : > { %3184 = vmatpush.msrb.mxu2 %v3153_v35  ;;  %v3246_v35 = vld [vmem:[#allocation10] sm:$0xff] }
 0x5a2   : > { %v3003_v17 = vrot.slane %v3002_v44, 1  ;;  %v3005_v54 = vrot.slane %v2916_v20, 4 }
 0x5a3   : > { %3185 = vmatpush.msrb.mxu2 %v3152_v49 }
 0x5a4   : > { %v3004_v53 = vadd.f32 %v3003_v17, %v3002_v44  ;;  %v3006_v62 = vadd.f32 %v3005_v54, %v2916_v20 }
 0x5a5   : > { %3186 = vmatpush.msrb.mxu2 %v3151_v13 }
 0x5a6   : > { %v3007_v61 = vrot.slane %v3006_v62, 2  ;;  %v3071_v4 = vsel %vm3061_vm6, %v3004_v53, %v3070_v37 }
 0x5a7   : > { %v2918_v40 = vpop.f32.mrf.mxu0 }
 0x5a8   : > { %v3008_v56 = vadd.f32 %v3007_v61, %v3006_v62  ;;  %v2919_v6 = vadd.f32 %v5582_v63, %v2918_v40 }
 0x5aa   : > { %v3009_v23 = vrot.slane %v3008_v56, 1  ;;  %v3011_v15 = vrot.slane %v2919_v6, 4 }
 0x5ac   : > { %v3010_v11 = vadd.f32 %v3009_v23, %v3008_v56  ;;  %v3012_v18 = vadd.f32 %v3011_v15, %v2919_v6 }
 0x5ae   : > { %v3013_v8 = vrot.slane %v3012_v18, 2  ;;  %v3072_v47 = vsel %vm3063_vm7, %v3010_v11, %v3071_v4 }
 0x5b0   : > { %v3014_v33 = vadd.f32 %v3013_v8, %v3012_v18 }
 0x5b2   : > { %v3015_v57 = vrot.slane %v3014_v33, 1 }
 0x5b4   : > { %v3016_v24 = vadd.f32 %v3015_v57, %v3014_v33 }
 0x5b6   : > { %v3073_v30 = vsel %vm3065_vm8, %v3016_v24, %v3072_v47  ;;  %v3794_v24 = vld [vmem:[%s5742_s17] ss:$0 sm:$0xff] }
 0x5b7   : > { %3095 = vmatmul.f32.gmra.mxu1 %v3073_v30 }
 0x5f4   : > { %v3093_v5 = vpop.f32.mrf.mxu1 }
 0x5f5   : > { %v3094_v43 = vadd.f32 %v3793_v51, %v3093_v5 }
 0x5f7   : > { %v3101_v63 = vmul.f32 0.01, %v3094_v43  ;;  %vm3099_vm9 = vcmp.gt.f32.partialorder %v3094_v43, 0.0 }
 0x5f9   : > { %v5617_v12 = vsel %vm3099_vm9, %v3094_v43, %v3101_v63 }
 0x5fa   : > { %3105 = vadd.xlane.f32.xlu2 %v5617_v12  ;;  %v3111_v21 = vmul.f32 %v5617_v12, %v5617_v12 }
 0x5fc   : > { %3113 = vadd.xlane.f32.xlu0 %v3111_v21  ;;  %v3260_v21 = vld [vmem:[#allocation10 + $0x70] sm:$0xff] }
 0x634   : > { %v3096_v2 = vpop.f32.mrf.mxu1 }
 0x635   : > { %v3097_v14 = vadd.f32 %v3793_v51, %v3096_v2 }
 0x637   : > { %v3102_v46 = vmul.f32 0.01, %v3097_v14  ;;  %vm3100_vm10 = vcmp.gt.f32.partialorder %v3097_v14, 0.0 }
 0x639   : > { %v5622_v45 = vsel %vm3100_vm10, %v3097_v14, %v3102_v46 }
 0x63a   : > { %3107 = vadd.xlane.f32.xlu1 %v5622_v45  ;;  %v3112_v34 = vmul.f32 %v5622_v45, %v5622_v45 }
 0x63c   : > { %3115 = vadd.xlane.f32.xlu2 %v3112_v34  ;;  %v3254_v34 = vld [vmem:[#allocation10 + $0x40] sm:$0xff] }
 0x66d   : > { %v3106_v22 = vpop.xlane.xlu2 %3105 }
 0x66e   : > { %v3109_v3 = vmul.f32 %v3106_v22, %v4685_v1 }
 0x66f   : > { %v3114_v27 = vpop.xlane.xlu0 %3113 }
 0x670   : > { %v3119_v58 = vmul.f32 %v3109_v3, %v3109_v3  ;;  %v3117_v26 = vmul.f32 %v3114_v27, %v4685_v1  ;;  %v3125_v29 = vsub.f32 %v5617_v12, %v3109_v3  ;;  %v3261_v12 = vld [vmem:[#allocation10 + $0x78] sm:$0xff] }
 0x671   : > { %3266 = vmatpush.msra.mxu3 %v3261_v12 }
 0x672   : > { %v3121_v36 = vsub.f32 %v3117_v26, %v3119_v58 }
 0x673   : > { %3267 = vmatpush.msra.mxu3 %v3260_v21 }
 0x674   : > { %v3123_v59 = vmax.f32 %v3121_v36, 0.0 }
 0x675   : > { %3268 = vmatpush.msra.mxu3 %v3259_v52 }
 0x676   : > { %v3127_v10 = vadd.f32 1e-05, %v3123_v59 }
 0x677   : > { %3269 = vmatpush.msra.mxu3 %v3258_v16 }
 0x678   : > { %3928 = vrsqrt.f32 %v3127_v10  ;;  %vm3135_vm12 = vweird.f32 %v3127_v10 }
 0x679   : > { %3270 = vmatpush.msra.mxu3 %v3257_v38  ;;  %v3355_v38 = vld [vmem:[#allocation11 + $0x70] sm:$0xff] }
 0x67b   : > { %3271 = vmatpush.msra.mxu3 %v3256_v32  ;;  %v3354_v32 = vld [vmem:[#allocation11 + $0x68] sm:$0xff] }
 0x67e   : > { %v3929_v50 = vpop.eup %3928 }
 0x67f   : > { %v3130_v0 = vmul.f32 %v3929_v50, %v3127_v10  ;;  %vm3136_vm11 = vweird.f32 %v3929_v50 }
 0x680   : > { %vm3137_vm13 = vmor %vm3135_vm12, %vm3136_vm11 }
 0x681   : > { %v3131_v7 = vmul.f32 %v3929_v50, %v3130_v0 }
 0x683   : > { %v3132_v28 = vmul.f32 0.5, %v3131_v7 }
 0x685   : > { %v3133_v42 = vsub.f32 1.5, %v3132_v28 }
 0x687   : > { %v3134_v37 = vmul.f32 %v3929_v50, %v3133_v42 }
 0x689   : > { %v3138_v44 = vsel %vm3137_vm13, %v3929_v50, %v3134_v37 }
 0x68a   : > { %v3149_v20 = vmul.f32 %v3138_v44, %v3125_v29 }
 0x68c   : > { %3187 = vmatmul.f32.vlgmr.msrb.gmra.mxu2 %v3149_v20 }
 0x6ad   : > { %v3108_v17 = vpop.xlane.xlu1 %3107 }
 0x6ae   : > { %v3110_v54 = vmul.f32 %v3108_v17, %v4685_v1 }
 0x6af   : > { %v3116_v53 = vpop.xlane.xlu2 %3115 }
 0x6b0   : > { %v3120_v62 = vmul.f32 %v3110_v54, %v3110_v54  ;;  %v3118_v61 = vmul.f32 %v3116_v53, %v4685_v1  ;;  %v3126_v47 = vsub.f32 %v5622_v45, %v3110_v54  ;;  %v3255_v45 = vld [vmem:[#allocation10 + $0x48] sm:$0xff] }
 0x6b1   : > { %3272 = vmatpush.msra.mxu3 %v3255_v45  ;;  %v3348_v45 = vld [vmem:[#allocation11 + $0x38] sm:$0xff] }
 0x6b2   : > { %v3122_v4 = vsub.f32 %v3118_v61, %v3120_v62 }
 0x6b3   : > { %3273 = vmatpush.msra.mxu3 %v3254_v34  ;;  %v3347_v34 = vld [vmem:[#allocation11 + $0x30] sm:$0xff] }
 0x6b4   : > { %v3124_v40 = vmax.f32 %v3122_v4, 0.0 }
 0x6b5   : > { %3274 = vmatpush.msra.mxu3 %v3253_v39  ;;  %v3346_v39 = vld [vmem:[#allocation11 + $0x28] sm:$0xff] }
 0x6b6   : > { %v3128_v56 = vadd.f32 1e-05, %v3124_v40 }
 0x6b7   : > { %3275 = vmatpush.msra.mxu3 %v3252_v31  ;;  %v3345_v31 = vld [vmem:[#allocation11 + $0x20] sm:$0xff] }
 0x6b8   : > { %3930 = vrsqrt.f32 %v3128_v56  ;;  %vm3145_vm15 = vweird.f32 %v3128_v56 }
 0x6b9   : > { %3276 = vmatpush.msra.mxu3 %v3251_v48  ;;  %v3344_v48 = vld [vmem:[#allocation11 + $0x18] sm:$0xff] }
 0x6bb   : > { %3277 = vmatpush.msra.mxu3 %v3250_v9  ;;  %v3343_v9 = vld [vmem:[#allocation11 + $0x10] sm:$0xff] }
 0x6bd   : > { %3278 = vmatpush.msra.mxu3 %v3249_v19  ;;  %v3342_v19 = vld [vmem:[#allocation11 + $0x8] sm:$0xff] }
 0x6be   : > { %v3931_v6 = vpop.eup %3930 }
 0x6bf   : > { %v3140_v23 = vmul.f32 %v3931_v6, %v3128_v56  ;;  %vm3146_vm14 = vweird.f32 %v3931_v6  ;;  %3279 = vmatpush.msra.mxu3 %v3248_v25  ;;  %v3341_v25 = vld [vmem:[#allocation11] sm:$0xff] }
 0x6c0   : > { %vm3147_vm0 = vmor %vm3145_vm15, %vm3146_vm14 }
 0x6c1   : > { %v3141_v15 = vmul.f32 %v3931_v6, %v3140_v23  ;;  %3280 = vmatpush.msra.mxu3 %v3247_v60 }
 0x6c3   : > { %v3142_v11 = vmul.f32 0.5, %v3141_v15  ;;  %3281 = vmatpush.msra.mxu3 %v3246_v35 }
 0x6c5   : > { %v3143_v18 = vsub.f32 1.5, %v3142_v11 }
 0x6c7   : > { %v3144_v8 = vmul.f32 %v3931_v6, %v3143_v18 }
 0x6c9   : > { %v3148_v33 = vsel %vm3147_vm0, %v3931_v6, %v3144_v8 }
 0x6ca   : > { %v3150_v57 = vmul.f32 %v3148_v33, %v3126_v47  ;;  %v3795_v33 = vld [vmem:[%s5743_s18] ss:$0 sm:$0xff] }
 0x6cc   : > { %3190 = vmatmul.f32.gmra.mxu2 %v3150_v57 }
 0x70f   : > { %v3188_v30 = vpop.f32.mrf.mxu2 }
 0x710   : > { %v3189_v51 = vadd.f32 %v3794_v24, %v3188_v30 }
 0x712   : > { %v3196_v5 = vmul.f32 0.01, %v3189_v51  ;;  %vm3194_vm1 = vcmp.gt.f32.partialorder %v3189_v51, 0.0 }
 0x714   : > { %v5636_v43 = vsel %vm3194_vm1, %v3189_v51, %v3196_v5 }
 0x715   : > { %3200 = vadd.xlane.f32.xlu0 %v5636_v43  ;;  %v3206_v63 = vmul.f32 %v5636_v43, %v5636_v43 }
 0x717   : > { %3208 = vadd.xlane.f32.xlu1 %v3206_v63 }
 0x74f   : > { %v3191_v41 = vpop.f32.mrf.mxu2 }
 0x750   : > { %v3192_v55 = vadd.f32 %v3794_v24, %v3191_v41  ;;  %v3353_v41 = vld [vmem:[#allocation11 + $0x60] sm:$0xff] }
 0x752   : > { %v3197_v2 = vmul.f32 0.01, %v3192_v55  ;;  %vm3195_vm2 = vcmp.gt.f32.partialorder %v3192_v55, 0.0 }
 0x754   : > { %v5641_v14 = vsel %vm3195_vm2, %v3192_v55, %v3197_v2  ;;  %v3352_v55 = vld [vmem:[#allocation11 + $0x58] sm:$0xff]  ;;  %v3351_v2 = vld [vmem:[#allocation11 + $0x50] sm:$0xff] }
 0x755   : > { %3202 = vadd.xlane.f32.xlu2 %v5641_v14  ;;  %v3207_v46 = vmul.f32 %v5641_v14, %v5641_v14 }
 0x757   : > { %3210 = vadd.xlane.f32.xlu0 %v3207_v46  ;;  %v3349_v46 = vld [vmem:[#allocation11 + $0x40] sm:$0xff] }
 0x788   : > { %v3201_v49 = vpop.xlane.xlu0 %3200 }
 0x789   : > { %v3204_v13 = vmul.f32 %v3201_v49, %v4685_v1 }
 0x78a   : > { %v3209_v22 = vpop.xlane.xlu1 %3208 }
 0x78b   : > { %v3214_v3 = vmul.f32 %v3204_v13, %v3204_v13  ;;  %v3212_v27 = vmul.f32 %v3209_v22, %v4685_v1  ;;  %v3220_v42 = vsub.f32 %v5636_v43, %v3204_v13  ;;  %v3356_v43 = vld [vmem:[#allocation11 + $0x78] sm:$0xff] }
 0x78c   : > { %3361 = vmatpush.msra.mxu1 %v3356_v43 }
 0x78d   : > { %v3216_v58 = vsub.f32 %v3212_v27, %v3214_v3 }
 0x78e   : > { %3362 = vmatpush.msra.mxu1 %v3355_v38  ;;  %v3448_v38 = vld [vmem:[#allocation13 + $0x60] sm:$0xff] }
 0x78f   : > { %v3218_v26 = vmax.f32 %v3216_v58, 0.0 }
 0x790   : > { %3363 = vmatpush.msra.mxu1 %v3354_v32  ;;  %v3447_v32 = vld [vmem:[#allocation13 + $0x58] sm:$0xff] }
 0x791   : > { %v3222_v36 = vadd.f32 1e-05, %v3218_v26 }
 0x792   : > { %3364 = vmatpush.msra.mxu1 %v3353_v41  ;;  %v3446_v41 = vld [vmem:[#allocation13 + $0x50] sm:$0xff] }
 0x793   : > { %3932 = vrsqrt.f32 %v3222_v36  ;;  %vm3230_vm4 = vweird.f32 %v3222_v36 }
 0x794   : > { %3365 = vmatpush.msra.mxu1 %v3352_v55  ;;  %v3445_v55 = vld [vmem:[#allocation13 + $0x48] sm:$0xff] }
 0x796   : > { %3366 = vmatpush.msra.mxu1 %v3351_v2  ;;  %v3444_v2 = vld [vmem:[#allocation13 + $0x40] sm:$0xff] }
 0x799   : > { %v3933_v59 = vpop.eup %3932 }
 0x79a   : > { %v3225_v10 = vmul.f32 %v3933_v59, %v3222_v36  ;;  %vm3231_vm3 = vweird.f32 %v3933_v59 }
 0x79b   : > { %vm3232_vm5 = vmor %vm3230_vm4, %vm3231_vm3 }
 0x79c   : > { %v3226_v50 = vmul.f32 %v3933_v59, %v3225_v10 }
 0x79e   : > { %v3227_v0 = vmul.f32 0.5, %v3226_v50 }
 0x7a0   : > { %v3228_v7 = vsub.f32 1.5, %v3227_v0 }
 0x7a2   : > { %v3229_v28 = vmul.f32 %v3933_v59, %v3228_v7 }
 0x7a4   : > { %v3233_v37 = vsel %vm3232_vm5, %v3933_v59, %v3229_v28 }
 0x7a5   : > { %v3244_v29 = vmul.f32 %v3233_v37, %v3220_v42 }
 0x7a7   : > { %3282 = vmatmul.f32.vlgmr.msra.gmra.mxu3 %v3244_v29 }
 0x7c8   : > { %v3203_v44 = vpop.xlane.xlu2 %3202 }
 0x7c9   : > { %v3205_v20 = vmul.f32 %v3203_v44, %v4685_v1 }
 0x7ca   : > { %v3211_v17 = vpop.xlane.xlu0 %3210 }
 0x7cb   : > { %v3215_v54 = vmul.f32 %v3205_v20, %v3205_v20  ;;  %v3213_v53 = vmul.f32 %v3211_v17, %v4685_v1  ;;  %v3221_v18 = vsub.f32 %v5641_v14, %v3205_v20  ;;  %v3350_v14 = vld [vmem:[#allocation11 + $0x48] sm:$0xff] }
 0x7cc   : > { %3367 = vmatpush.msra.mxu1 %v3350_v14  ;;  %v3443_v14 = vld [vmem:[#allocation13 + $0x38] sm:$0xff] }
 0x7cd   : > { %v3217_v62 = vsub.f32 %v3213_v53, %v3215_v54 }
 0x7ce   : > { %3368 = vmatpush.msra.mxu1 %v3349_v46  ;;  %v3442_v46 = vld [vmem:[#allocation13 + $0x30] sm:$0xff] }
 0x7cf   : > { %v3219_v61 = vmax.f32 %v3217_v62, 0.0 }
 0x7d0   : > { %3369 = vmatpush.msra.mxu1 %v3348_v45  ;;  %v3441_v45 = vld [vmem:[#allocation13 + $0x28] sm:$0xff] }
 0x7d1   : > { %v3223_v4 = vadd.f32 1e-05, %v3219_v61 }
 0x7d2   : > { %3370 = vmatpush.msra.mxu1 %v3347_v34  ;;  %v3440_v34 = vld [vmem:[#allocation13 + $0x20] sm:$0xff] }
 0x7d3   : > { %3934 = vrsqrt.f32 %v3223_v4  ;;  %vm3240_vm7 = vweird.f32 %v3223_v4 }
 0x7d4   : > { %3371 = vmatpush.msra.mxu1 %v3346_v39  ;;  %v3439_v39 = vld [vmem:[#allocation13 + $0x18] sm:$0xff] }
 0x7d6   : > { %3372 = vmatpush.msra.mxu1 %v3345_v31  ;;  %v3438_v31 = vld [vmem:[#allocation13 + $0x10] sm:$0xff] }
 0x7d8   : > { %3373 = vmatpush.msra.mxu1 %v3344_v48  ;;  %v3437_v48 = vld [vmem:[#allocation13 + $0x8] sm:$0xff] }
 0x7d9   : > { %v3935_v40 = vpop.eup %3934 }
 0x7da   : > { %v3235_v56 = vmul.f32 %v3935_v40, %v3223_v4  ;;  %vm3241_vm6 = vweird.f32 %v3935_v40  ;;  %3374 = vmatpush.msra.mxu1 %v3343_v9  ;;  %v3436_v9 = vld [vmem:[#allocation13] sm:$0xff] }
 0x7db   : > { %vm3242_vm8 = vmor %vm3240_vm7, %vm3241_vm6 }
 0x7dc   : > { %v3236_v6 = vmul.f32 %v3935_v40, %v3235_v56  ;;  %3375 = vmatpush.msra.mxu1 %v3342_v19 }
 0x7de   : > { %v3237_v23 = vmul.f32 0.5, %v3236_v6  ;;  %3376 = vmatpush.msra.mxu1 %v3341_v25 }
 0x7e0   : > { %v3238_v15 = vsub.f32 1.5, %v3237_v23 }
 0x7e2   : > { %v3239_v11 = vmul.f32 %v3935_v40, %v3238_v15 }
 0x7e4   : > { %v3243_v8 = vsel %vm3242_vm8, %v3935_v40, %v3239_v11 }
 0x7e5   : > { %v3245_v47 = vmul.f32 %v3243_v8, %v3221_v18  ;;  %v3796_v8 = vld [vmem:[%s5744_s19] ss:$0 sm:$0xff] }
 0x7e7   : > { %3285 = vmatmul.f32.gmra.mxu3 %v3245_v47 }
 0x82a   : > { %v3283_v57 = vpop.f32.mrf.mxu3 }
 0x82b   : > { %v3284_v24 = vadd.f32 %v3795_v33, %v3283_v57 }
 0x82d   : > { %v3291_v30 = vmul.f32 0.01, %v3284_v24  ;;  %vm3289_vm9 = vcmp.gt.f32.partialorder %v3284_v24, 0.0 }
 0x82f   : > { %v5655_v51 = vsel %vm3289_vm9, %v3284_v24, %v3291_v30 }
 0x830   : > { %3295 = vadd.xlane.f32.xlu1 %v5655_v51  ;;  %v3301_v5 = vmul.f32 %v5655_v51, %v5655_v51 }
 0x832   : > { %3303 = vadd.xlane.f32.xlu2 %v3301_v5 }
 0x86a   : > { %v3286_v63 = vpop.f32.mrf.mxu3 }
 0x86b   : > { %v3287_v12 = vadd.f32 %v3795_v33, %v3286_v63 }
 0x86d   : > { %v3292_v21 = vmul.f32 0.01, %v3287_v12  ;;  %vm3290_vm10 = vcmp.gt.f32.partialorder %v3287_v12, 0.0 }
 0x86f   : > { %v5660_v52 = vsel %vm3290_vm10, %v3287_v12, %v3292_v21 }
 0x870   : > { %3297 = vadd.xlane.f32.xlu0 %v5660_v52  ;;  %v3302_v16 = vmul.f32 %v5660_v52, %v5660_v52 }
 0x872   : > { %3305 = vadd.xlane.f32.xlu1 %v3302_v16  ;;  %v3449_v16 = vld [vmem:[#allocation13 + $0x68] sm:$0xff] }
 0x8a3   : > { %v3296_v60 = vpop.xlane.xlu1 %3295 }
 0x8a4   : > { %v3299_v35 = vmul.f32 %v3296_v60, %v4685_v1 }
 0x8a5   : > { %v3304_v49 = vpop.xlane.xlu2 %3303 }
 0x8a6   : > { %v3309_v13 = vmul.f32 %v3299_v35, %v3299_v35  ;;  %v3307_v22 = vmul.f32 %v3304_v49, %v4685_v1  ;;  %v3315_v7 = vsub.f32 %v5655_v51, %v3299_v35  ;;  %v3451_v51 = vld [vmem:[#allocation13 + $0x78] sm:$0xff] }
 0x8a7   : > { %3456 = vmatpush.msra.mxu2 %v3451_v51 }
 0x8a8   : > { %v3311_v3 = vsub.f32 %v3307_v22, %v3309_v13 }
 0x8aa   : > { %v3313_v27 = vmax.f32 %v3311_v3, 0.0 }
 0x8ac   : > { %v3317_v58 = vadd.f32 1e-05, %v3313_v27 }
 0x8ae   : > { %3936 = vrsqrt.f32 %v3317_v58  ;;  %vm3325_vm12 = vweird.f32 %v3317_v58 }
 0x8b4   : > { %v3937_v26 = vpop.eup %3936 }
 0x8b5   : > { %v3320_v36 = vmul.f32 %v3937_v26, %v3317_v58  ;;  %vm3326_vm11 = vweird.f32 %v3937_v26 }
 0x8b6   : > { %vm3327_vm13 = vmor %vm3325_vm12, %vm3326_vm11 }
 0x8b7   : > { %v3321_v59 = vmul.f32 %v3937_v26, %v3320_v36 }
 0x8b9   : > { %v3322_v10 = vmul.f32 0.5, %v3321_v59 }
 0x8bb   : > { %v3323_v50 = vsub.f32 1.5, %v3322_v10 }
 0x8bd   : > { %v3324_v0 = vmul.f32 %v3937_v26, %v3323_v50 }
 0x8bf   : > { %v3328_v28 = vsel %vm3327_vm13, %v3937_v26, %v3324_v0 }
 0x8c0   : > { %v3339_v42 = vmul.f32 %v3328_v28, %v3315_v7 }
 0x8c2   : > { %3377 = vmatmul.f32.vlgmr.msra.gmra.mxu1 %v3339_v42 }
 0x8e3   : > { %v3298_v37 = vpop.xlane.xlu0 %3297 }
 0x8e4   : > { %v3300_v29 = vmul.f32 %v3298_v37, %v4685_v1 }
 0x8e5   : > { %v3306_v44 = vpop.xlane.xlu1 %3305 }
 0x8e6   : > { %v3310_v20 = vmul.f32 %v3300_v29, %v3300_v29  ;;  %v3308_v17 = vmul.f32 %v3306_v44, %v4685_v1  ;;  %v3316_v15 = vsub.f32 %v5660_v52, %v3300_v29  ;;  %v3450_v52 = vld [vmem:[#allocation13 + $0x70] sm:$0xff] }
 0x8e7   : > { %3457 = vmatpush.msra.mxu2 %v3450_v52 }
 0x8e8   : > { %v3312_v54 = vsub.f32 %v3308_v17, %v3310_v20 }
 0x8e9   : > { %3458 = vmatpush.msra.mxu2 %v3449_v16 }
 0x8ea   : > { %v3314_v53 = vmax.f32 %v3312_v54, 0.0 }
 0x8eb   : > { %3459 = vmatpush.msra.mxu2 %v3448_v38 }
 0x8ec   : > { %v3318_v62 = vadd.f32 1e-05, %v3314_v53 }
 0x8ed   : > { %3460 = vmatpush.msra.mxu2 %v3447_v32 }
 0x8ee   : > { %3938 = vrsqrt.f32 %v3318_v62  ;;  %vm3335_vm15 = vweird.f32 %v3318_v62 }
 0x8ef   : > { %3461 = vmatpush.msra.mxu2 %v3446_v41 }
 0x8f1   : > { %3462 = vmatpush.msra.mxu2 %v3445_v55 }
 0x8f3   : > { %3463 = vmatpush.msra.mxu2 %v3444_v2 }
 0x8f4   : > { %v3939_v61 = vpop.eup %3938 }
 0x8f5   : > { %v3330_v4 = vmul.f32 %v3939_v61, %v3318_v62  ;;  %vm3336_vm14 = vweird.f32 %v3939_v61  ;;  %3464 = vmatpush.msra.mxu2 %v3443_v14 }
 0x8f6   : > { %vm3337_vm0 = vmor %vm3335_vm15, %vm3336_vm14 }
 0x8f7   : > { %v3331_v40 = vmul.f32 %v3939_v61, %v3330_v4  ;;  %3465 = vmatpush.msra.mxu2 %v3442_v46 }
 0x8f9   : > { %v3332_v56 = vmul.f32 0.5, %v3331_v40  ;;  %3466 = vmatpush.msra.mxu2 %v3441_v45 }
 0x8fb   : > { %v3333_v6 = vsub.f32 1.5, %v3332_v56  ;;  %3467 = vmatpush.msra.mxu2 %v3440_v34 }
 0x8fd   : > { %v3334_v23 = vmul.f32 %v3939_v61, %v3333_v6  ;;  %3468 = vmatpush.msra.mxu2 %v3439_v39 }
 0x8ff   : > { %v3338_v11 = vsel %vm3337_vm0, %v3939_v61, %v3334_v23  ;;  %3469 = vmatpush.msra.mxu2 %v3438_v31 }
 0x900   : > { %v3340_v18 = vmul.f32 %v3338_v11, %v3316_v15 }
 0x901   : > { %3470 = vmatpush.msra.mxu2 %v3437_v48 }
 0x902   : > { %3380 = vmatmul.f32.gmra.mxu1 %v3340_v18 }
 0x903   : > { %3471 = vmatpush.msra.mxu2 %v3436_v9 }
 0x93f   : > { %v3378_v47 = vpop.f32.mrf.mxu1 }
 0x940   : > { %v3379_v33 = vadd.f32 %v3796_v8, %v3378_v47 }
 0x942   : > { %v3386_v57 = vmul.f32 0.01, %v3379_v33  ;;  %vm3384_vm1 = vcmp.gt.f32.partialorder %v3379_v33, 0.0 }
 0x944   : > { %v5674_v24 = vsel %vm3384_vm1, %v3379_v33, %v3386_v57 }
 0x945   : > { %3390 = vadd.xlane.f32.xlu2 %v5674_v24  ;;  %v3396_v30 = vmul.f32 %v5674_v24, %v5674_v24 }
 0x947   : > { %3398 = vadd.xlane.f32.xlu0 %v3396_v30 }
 0x97f   : > { %v3381_v5 = vpop.f32.mrf.mxu1 }
 0x980   : > { %v3382_v43 = vadd.f32 %v3796_v8, %v3381_v5 }
 0x982   : > { %v3387_v63 = vmul.f32 0.01, %v3382_v43  ;;  %vm3385_vm2 = vcmp.gt.f32.partialorder %v3382_v43, 0.0 }
 0x984   : > { %v5679_v12 = vsel %vm3385_vm2, %v3382_v43, %v3387_v63 }
 0x985   : > { %3392 = vadd.xlane.f32.xlu1 %v5679_v12  ;;  %v3397_v21 = vmul.f32 %v5679_v12, %v5679_v12 }
 0x987   : > { %3400 = vadd.xlane.f32.xlu2 %v3397_v21 }
 0x9b8   : > { %v3391_v19 = vpop.xlane.xlu2 %3390 }
 0x9b9   : > { %v3394_v25 = vmul.f32 %v3391_v19, %v4685_v1 }
 0x9ba   : > { %v3399_v60 = vpop.xlane.xlu0 %3398 }
 0x9bb   : > { %v3404_v35 = vmul.f32 %v3394_v25, %v3394_v25  ;;  %v3402_v49 = vmul.f32 %v3399_v60, %v4685_v1  ;;  %v3410_v50 = vsub.f32 %v5674_v24, %v3394_v25 }
 0x9bd   : > { %v3406_v13 = vsub.f32 %v3402_v49, %v3404_v35 }
 0x9bf   : > { %v3408_v22 = vmax.f32 %v3406_v13, 0.0 }
 0x9c1   : > { %v3412_v3 = vadd.f32 1e-05, %v3408_v22 }
 0x9c3   : > { %3940 = vrsqrt.f32 %v3412_v3  ;;  %vm3420_vm4 = vweird.f32 %v3412_v3 }
 0x9c9   : > { %v3941_v27 = vpop.eup %3940 }
 0x9ca   : > { %v3415_v58 = vmul.f32 %v3941_v27, %v3412_v3  ;;  %vm3421_vm3 = vweird.f32 %v3941_v27 }
 0x9cb   : > { %vm3422_vm5 = vmor %vm3420_vm4, %vm3421_vm3 }
 0x9cc   : > { %v3416_v26 = vmul.f32 %v3941_v27, %v3415_v58 }
 0x9ce   : > { %v3417_v36 = vmul.f32 0.5, %v3416_v26 }
 0x9d0   : > { %v3418_v59 = vsub.f32 1.5, %v3417_v36 }
 0x9d2   : > { %v3419_v10 = vmul.f32 %v3941_v27, %v3418_v59 }
 0x9d4   : > { %v3423_v0 = vsel %vm3422_vm5, %v3941_v27, %v3419_v10 }
 0x9d5   : > { %v3434_v7 = vmul.f32 %v3423_v0, %v3410_v50 }
 0x9d7   : > { %3472 = vmatmul.f32.vlgmr.msra.gmra.mxu2 %v3434_v7 }
 0x9f8   : > { %v3393_v28 = vpop.xlane.xlu1 %3392 }
 0x9f9   : > { %v3395_v42 = vmul.f32 %v3393_v28, %v4685_v1 }
 0x9fa   : > { %v3401_v37 = vpop.xlane.xlu2 %3400 }
 0x9fb   : > { %v3405_v29 = vmul.f32 %v3395_v42, %v3395_v42  ;;  %v3403_v44 = vmul.f32 %v3401_v37, %v4685_v1  ;;  %v3411_v6 = vsub.f32 %v5679_v12, %v3395_v42  ;;  %v3797_v1 = vld [vmem:[%s5793_s30] ss:$0 sm:$0xff]  ;;  %s4174_s30 = scalar_lea.hbm %s5795_s24, 32 }
 0x9fc   : > { %p4176_p4 = scmp.lt.s32.totalorder %s4174_s30, %s4170_s2 }
 0x9fd   : > { %v3407_v20 = vsub.f32 %v3403_v44, %v3405_v29 }
 0x9fe   : > { %p4177_p7 = por %p4176_p4, %p4175_p3 }
 0x9ff   : > { %v3409_v17 = vmax.f32 %v3407_v20, 0.0 }
 0xa00   : > { %p4178_p8 = pnand %p4177_p7, %p4173_p2 }
 0xa01   : > { %v3413_v54 = vadd.f32 1e-05, %v3409_v17 }
 0xa03   : > { %3942 = vrsqrt.f32 %v3413_v54  ;;  %vm3430_vm7 = vweird.f32 %v3413_v54 }
 0xa09   : > { %v3943_v53 = vpop.eup %3942 }
 0xa0a   : > { %v3425_v62 = vmul.f32 %v3943_v53, %v3413_v54  ;;  %vm3431_vm6 = vweird.f32 %v3943_v53 }
 0xa0b   : > { %vm3432_vm8 = vmor %vm3430_vm7, %vm3431_vm6 }
 0xa0c   : > { %v3426_v61 = vmul.f32 %v3943_v53, %v3425_v62 }
 0xa0e   : > { %v3427_v4 = vmul.f32 0.5, %v3426_v61 }
 0xa10   : > { %v3428_v40 = vsub.f32 1.5, %v3427_v4 }
 0xa12   : > { %v3429_v56 = vmul.f32 %v3943_v53, %v3428_v40 }
 0xa14   : > { %v3433_v23 = vsel %vm3432_vm8, %v3943_v53, %v3429_v56 }
 0xa15   : > { %v3435_v15 = vmul.f32 %v3433_v23, %v3411_v6 }
 0xa17   : > { %3475 = vmatmul.f32.gmra.mxu2 %v3435_v15 }
 0xa5a   : > { %v3473_v11 = vpop.f32.mrf.mxu2 }
 0xa5b   : > { %v3474_v18 = vadd.f32 %v3797_v1, %v3473_v11 }
 0xa5d   : > { %3479 = vst [vmem:[%s766_s4] sm:$0xff] %v3474_v18 }
 0xa9a   : > { %v3476_v8 = vpop.f32.mrf.mxu2 }
 0xa9b   : > { %v3477_v47 = vadd.f32 %v3797_v1, %v3476_v8 }
 0xa9d   : > { %3480 = vst [vmem:[%s766_s4 + $0x8] sm:$0xff] %v3477_v47 }
 0xa9e   : > { %4181 = shalt.err (!%p4178_p8)
}
 0xa9f   : > { %s4244_s3 = smov 128   ;;  %s4245_s4 = smov 8  }
 0xaa0   : > { %3701 = dma.vmem_to_hbm [thread:$0]  (%p4394_p5), %s3495_s25, 256, %s3497_s5, %s3482_s27, %s4244_s3, %s4244_s3, %s4245_s4  }
 0xaa1 PF: > { %s5796_s1 = sld [smem:[#allocation23_spill]] }
 0xaa2   : > { %s5797_s26 = sld [smem:[#allocation20_spill]] }
 0xaa7   : > { %p3743_p9 = scmp.ge.s32.totalorder %s5796_s1, 2 }
 0xaa8   : > { %s3511_s22 = sand.u32 1, %s5797_s26  }
 0xaa9   : > { %p3726_p10 = pnand %p3743_p9, %p4398_p6  ;;  %s3512_s7 = scalar_lea.sflag [#allocation4], %s3511_s22 }
 0xaab   : > { %p3727_p11 = pneg %p3726_p10 }
 0xaad   : > { %4215 = dma.done.wait (%p3727_p11), %s3512_s7, 256  }
 0xaae   : > { %4217 = vsyncadd (%p3727_p11), %s3512_s7, 4294967040  ;;  %s5799_s27 = sld [smem:[#allocation24_spill]] }
 0xaaf   : > { %s5800_s2 = sld [smem:[#allocation21_spill]] }
 0xab0   : > { %s5801_s25 = sld [smem:[#allocation22_spill]] }
 0xab1   : > { %s5802_s26 = sld [smem:[#allocation25_spill]] }
 0xab4   : > { %p35_p12 = scmp.ge.s32.totalorder %s5799_s27, 4  }
 0xab6   :  { %37 = sbr.rel (!%p35_p12) target bundleno = 18 (0x12), region = 168 }
 0xabb   :  { %3518 = vsyncpa [#allocation3], 1 }
 0xabc   :  { %3520 = vsyncpa [#allocation3 + $0x1], 1 }
 0xabd   :  { %3521 = vsyncpa [#allocation6], 1 }
 0xabe   :  { %3522 = vsyncpa [#allocation9], 1 }
 0xabf   :  { %3523 = vsyncpa [#allocation12], 1 }
 0xac0   :  { %3524 = vsyncpa [#allocation4], 1 }
 0xac1   :  { %3526 = vsyncpa [#allocation4 + $0x1], 1 }

// kernel: tpu_custom_call.1
= control target key start
LH: loop header
LB: loop body
LE: loop exit
PB: predicated region body
PF: predicated region fallthrough
CT: control target
= control target key end

     0   :  { %s5725_s0 = inlined_call_operand.vmem [shape: f32[256,16], index: 0, kind: input, shape index: {}]   ;;  %s5726_s1 = inlined_call_operand.vmem [shape: f32[16,128], index: 1, kind: input, shape index: {}]   ;;  %s5727_s2 = inlined_call_operand.vmem [shape: f32[128,128], index: 2, kind: input, shape index: {}]   ;;  %s5728_s3 = inlined_call_operand.vmem [shape: f32[128,128], index: 3, kind: input, shape index: {}]   ;;  %s5729_s4 = inlined_call_operand.hbm [shape: f32[128,128], index: 4, kind: input, shape index: {}]   ;;  %s5730_s5 = inlined_call_operand.hbm [shape: f32[128,128], index: 5, kind: input, shape index: {}]   ;;  %s5731_s6 = inlined_call_operand.hbm [shape: f32[128,128], index: 6, kind: input, shape index: {}]   ;;  %s5732_s7 = inlined_call_operand.hbm [shape: f32[128,128], index: 7, kind: input, shape index: {}]   ;;  %s5733_s8 = inlined_call_operand.hbm [shape: f32[128,128], index: 8, kind: input, shape index: {}]   ;;  %s5734_s9 = inlined_call_operand.hbm [shape: f32[128,128], index: 9, kind: input, shape index: {}]   ;;  %s5735_s10 = inlined_call_operand.hbm [shape: f32[128,128], index: 10, kind: input, shape index: {}]   ;;  %s5736_s11 = inlined_call_operand.vmem [shape: f32[1,128], index: 11, kind: input, shape index: {}]   ;;  %s5737_s12 = inlined_call_operand.vmem [shape: f32[1,128], index: 12, kind: input, shape index: {}]   ;;  %s5738_s13 = inlined_call_operand.vmem [shape: f32[1,128], index: 13, kind: input, shape index: {}]   ;;  %s5739_s14 = inlined_call_operand.vmem [shape: f32[1,128], index: 14, kind: input, shape index: {}]   ;;  %s5740_s15 = inlined_call_operand.vmem [shape: f32[1,128], index: 15, kind: input, shape index: {}]   ;;  %s5741_s16 = inlined_call_operand.vmem [shape: f32[1,128], index: 16, kind: input, shape index: {}]   ;;  %s5742_s17 = inlined_call_operand.vmem [shape: f32[1,128], index: 17, kind: input, shape index: {}]   ;;  %s5743_s18 = inlined_call_operand.vmem [shape: f32[1,128], index: 18, kind: input, shape index: {}]   ;;  %s5744_s19 = inlined_call_operand.vmem [shape: f32[1,128], index: 19, kind: input, shape index: {}]   ;;  %s5745_s20 = inlined_call_operand.vmem [shape: f32[1,128], index: 20, kind: input, shape index: {}]   ;;  %s5746_s21 = inlined_call_operand.hbm [shape: f32[32,128], index: 21, kind: output, shape index: {}]  }
   0x1   :  { %5761 = sst [smem:[#allocation28_spill]] %s5725_s0 }
   0x2   :  { %5762 = sst [smem:[#allocation29_spill]] %s5726_s1 }
   0x3   :  { %5763 = sst [smem:[#allocation30_spill]] %s5727_s2 }
   0x4   :  { %5764 = sst [smem:[#allocation31_spill]] %s5728_s3 }
   0x5   :  { %5765 = sst [smem:[#allocation32_spill]] %s5729_s4 }
   0x6   :  { %5766 = sst [smem:[#allocation33_spill]] %s5730_s5 }
   0x7   :  { %5767 = sst [smem:[#allocation34_spill]] %s5731_s6 }
   0x8   :  { %5768 = sst [smem:[#allocation35_spill]] %s5732_s7 }
   0x9   :  { %5769 = sst [smem:[#allocation36_spill]] %s5745_s20 }
   0xa   :  { %5770 = sst [smem:[#allocation37_spill]] %s5746_s21 }
   0xb   :  { %26 = vsyncpa [#allocation3], 0 }
   0xc   :  { %27 = vsyncpa [#allocation6], 0 }
   0xd   :  { %28 = vsyncpa [#allocation9], 0 }
   0xe   :  { %29 = vsyncpa [#allocation12], 0 }
   0xf   :  { %30 = vsyncpa [#allocation4], 0 }
  0x10   :  { %32 = vsyncpa [#allocation4 + $0x1], 0  ;;  %s4356_s2 = smov 0   ;;  %s4358_s25 = smov 0  }
  0x11   :  { %s4360_s26 = smov 0   ;;  %s4362_s27 = smov 0  }
  0x12 LB: > { %5771 = sst [smem:[#allocation20_spill]] %s4220_s2  ;;  %s4377_s3 = sadd.s32 4294967295, %s4232_s27   ;;  %s4232_s27 = sphi %s4362_s27, %s5799_s27   ;;  %s4228_s26 = sphi %s4360_s26, %s5802_s26   ;;  %s4224_s25 = sphi %s4358_s25, %s5801_s25   ;;  %s4220_s2 = sphi %s4356_s2, %s5800_s2  }
  0x13   : > { %5772 = sst [smem:[#allocation21_spill]] %s4224_s25  ;;  %s3628_s28 = sadd.s32 4294967294, %s4232_s27  }
  0x14   : > { %5773 = sst [smem:[#allocation22_spill]] %s4228_s26  ;;  %s4381_s29 = sadd.s32 1, %s4232_s27  }
  0x15   : > { %5774 = sst [smem:[#allocation23_spill]] %s4232_s27  ;;  %s491_s0 = sadd.s32 1, %s4228_s26 }
  0x16   : > { %5775 = sst [smem:[#allocation24_spill]] %s4381_s29  ;;  %s488_s4 = ssub.s32 %s4232_s27, %s4381_s29 }
  0x17   : > { %p501_p0 = scmp.ne.s32.totalorder %s4228_s26, %s4224_s25  ;;  %p489_p1 = scmp.eq.s32.totalorder %s488_s4, 0 }
  0x18   : > { %p502_p2 = scmp.eq.s32.totalorder %s4377_s3, 1  ;;  %p507_p3 = scmp.ne.s32.totalorder %s4224_s25, %s4220_s2 }
  0x19   : > { %p508_p4 = scmp.eq.s32.totalorder %s3628_s28, 1  ;;  %p3629_p7 = scmp.ge.s32.totalorder %s4232_s27, 1 }
  0x1a   : > { %s4392_s30 = scalar_select %p489_p1, %s4228_s26, %s491_s0  }
  0x1b   : > { %p4394_p5 = por %p502_p2, %p501_p0  ;;  %p4398_p6 = por %p508_p4, %p507_p3 }
  0x1c   : > { %5776 = sst [smem:[#allocation25_spill]] %s4392_s30  ;;  %p515_p8 = scmp.lt.s32.totalorder %s4232_s27, 3 }
  0x1d   : > { %s5777_s5 = scalar_select %p4394_p5, 1, 0 }
  0x1e   : > { %s5779_s22 = scalar_select %p4398_p6, 1, 0 }
  0x1f   : > { %5778 = sst [smem:[#allocation26_spill]] %s5777_s5  ;;  %p3729_p9 = scmp.eq.s32.totalorder %s4377_s3, 0 }
  0x20   : > { %5780 = sst [smem:[#allocation27_spill]] %s5779_s22  ;;  %p4405_p10 = pnand %p3629_p7, %p515_p8 }
  0x21   : > { %s5782_s28 = sld [smem:[#allocation33_spill]]  ;;  %s4234_s22 = smov [#allocation5]  }
  0x22   : > { %p3703_p11 = pneg %p4405_p10  ;;  %s5783_s7 = sld [smem:[#allocation35_spill]] }
  0x23   : > { %s551_s2 = sshll.u32 %s4234_s22, 4  ;;  %s4235_s1 = smov 128   ;;  %s552_s2 = int_to_ptr.vmem [resolvable:$true] %s551_s2 }
  0x24   : > { %p4419_p12 = pnand %p3729_p9, %p3703_p11  ;;  %s4236_s24 = smov 8  }
  0x25   : > { %s4237_s30 = smov [#allocation8]   ;;  %s605_s27 = sshll.u32 %s5734_s9, 4  ;;  %s606_s27 = int_to_ptr.hbm [resolvable:$true] %s605_s27 }
  0x26   : > { %s5785_s5 = sld [smem:[#allocation32_spill]]  ;;  %s4238_s25 = smov [#allocation11]  }
  0x27   : > { %s549_s0 = sshll.u32 %s5782_s28, 4  ;;  %s579_s28 = sshll.u32 %s4237_s30, 4  ;;  %s550_s0 = int_to_ptr.hbm [resolvable:$true] %s549_s0  ;;  %s580_s28 = int_to_ptr.vmem [resolvable:$true] %s579_s28 }
  0x28   : > { %s577_s26 = sshll.u32 %s5783_s7, 4  ;;  %s4239_s7 = smov [#allocation2]   ;;  %s578_s26 = int_to_ptr.hbm [resolvable:$true] %s577_s26 }
  0x29   : > { %3709 = dma.hbm_to_vmem [thread:$0]  (!%p4419_p12), %s550_s0, 2048, %s552_s2, [#allocation6], %s4235_s1, %s4235_s1, %s4236_s24  }
  0x2a   : > { %3715 = dma.hbm_to_vmem [thread:$0]  (!%p4419_p12), %s578_s26, 2048, %s580_s28, [#allocation9], %s4235_s1, %s4235_s1, %s4236_s24  }
  0x2b   : > { %s607_s2 = sshll.u32 %s4238_s25, 4  ;;  %s537_s0 = sshll.u32 %s4239_s7, 4  ;;  %s608_s2 = int_to_ptr.vmem [resolvable:$true] %s607_s2  ;;  %s538_s0 = int_to_ptr.vmem [resolvable:$true] %s537_s0 }
  0x2c   : > { %s535_s20 = sshll.u32 %s5785_s5, 4  ;;  %s5786_s6 = sld [smem:[#allocation34_spill]]  ;;  %s536_s20 = int_to_ptr.hbm [resolvable:$true] %s535_s20 }
  0x2d   : > { %3721 = dma.hbm_to_vmem [thread:$0]  (!%p4419_p12), %s606_s27, 2048, %s608_s2, [#allocation12], %s4235_s1, %s4235_s1, %s4236_s24  }
  0x2e   : > { %3706 = dma.hbm_to_vmem [thread:$0]  (!%p4419_p12), %s536_s20, 2048, %s538_s0, [#allocation3], %s4235_s1, %s4235_s1, %s4236_s24  }
  0x2f   : > { %s591_s5 = sshll.u32 %s5733_s8, 4  ;;  %s4240_s27 = smov [#allocation7]   ;;  %s592_s5 = int_to_ptr.hbm [resolvable:$true] %s591_s5 }
  0x30   : > { %s565_s28 = sshll.u32 %s4240_s27, 4  ;;  %s4241_s22 = smov [#allocation10]   ;;  %s566_s28 = int_to_ptr.vmem [resolvable:$true] %s565_s28 }
  0x31   : > { %s593_s2 = sshll.u32 %s4241_s22, 4  ;;  %s619_s20 = sshll.u32 %s5735_s10, 4  ;;  %s594_s2 = int_to_ptr.vmem [resolvable:$true] %s593_s2  ;;  %s620_s20 = int_to_ptr.hbm [resolvable:$true] %s619_s20 }
  0x32   : > { %s563_s26 = sshll.u32 %s5786_s6, 4  ;;  %s4242_s0 = smov [#allocation13]   ;;  %s564_s26 = int_to_ptr.hbm [resolvable:$true] %s563_s26 }
  0x33   : > { %3712 = dma.hbm_to_vmem [thread:$0]  (!%p4419_p12), %s564_s26, 2048, %s566_s28, [#allocation6], %s4235_s1, %s4235_s1, %s4236_s24  }
  0x34   : > { %3718 = dma.hbm_to_vmem [thread:$0]  (!%p4419_p12), %s592_s5, 2048, %s594_s2, [#allocation9], %s4235_s1, %s4235_s1, %s4236_s24  }
  0x35   : > { %s621_s4 = sshll.u32 %s4242_s0, 4  ;;  %676 = sbr.rel (%p4405_p10) target bundleno = 2721 (0xaa1), region = 104  ;;  %s622_s4 = int_to_ptr.vmem [resolvable:$true] %s621_s4 }
  0x36   : > { %3724 = dma.hbm_to_vmem [thread:$0]  (!%p4419_p12), %s620_s20, 2048, %s622_s4, [#allocation12], %s4235_s1, %s4235_s1, %s4236_s24  }
  0x3a   : > { %4199 = dma.done.wait (%p3729_p9), [#allocation3], 2048  }
  0x3b   : > { %4201 = vsyncadd (%p3729_p9), [#allocation3], 4294965248 }
  0x3c   : > { %4203 = dma.done.wait (%p3729_p9), [#allocation6], 4096  }
  0x3d   : > { %4205 = vsyncadd (%p3729_p9), [#allocation6], 4294963200 }
  0x3e   : > { %4207 = dma.done.wait (%p3729_p9), [#allocation9], 4096  }
  0x3f   : > { %4209 = vsyncadd (%p3729_p9), [#allocation9], 4294963200 }
  0x40   : > { %4211 = dma.done.wait (%p3729_p9), [#allocation12], 4096  }
  0x41   : > { %4213 = vsyncadd (%p3729_p9), [#allocation12], 4294963200  ;;  %s4492_s29 = sshll.u32 %s4377_s3, 4  ;;  %s5787_s21 = sld [smem:[#allocation28_spill]]  ;;  %vm796_vm0 = vcmask 130048  }
  0x42   : > { %p768_p13 = scmp.lt.s32.totalorder %s4492_s29, 31  ;;  %s5788_s28 = sld [smem:[#allocation29_spill]]  ;;  %v4542_v18 = vld [vmem:[%s5736_s11] ss:$0 sm:$0xff] }
  0x43   : > { %s5789_s0 = sld [smem:[#allocation30_spill]] }
  0x44   : > { %s769_s23 = scalar_select %p768_p13, %s4492_s29, 31 }
  0x45   : > { %s5790_s26 = sld [smem:[#allocation31_spill]] }
  0x46   : > { %s3648_s1 = sshll.u32 %s769_s23, 3  ;;  %s5792_s27 = sld [smem:[#allocation21_spill]] }
  0x47   : > { %s4499_s25 = scalar_lea.vmem %s5787_s21, %s3648_s1  ;;  %s5793_s30 = sld [smem:[#allocation36_spill]] }
  0x48   : > { %v791_v0 = vld [vmem:[%s5788_s28 + $0x8] sm:$0xff]  ;;  %v790_v1 = vld [vmem:[%s5788_s28] sm:$0xff]  ;;  %v776_v4 = vld [vmem:[%s4499_s25 + $0x10] sm:$0xff]  ;;  %s5795_s24 = sld [smem:[#allocation37_spill]] }
  0x49   : > { %859 = vmatpush.msra.mxu0 %v791_v0  ;;  %v774_v2 = vld [vmem:[%s4499_s25] sm:$0xff]  ;;  %3671 = vmatpush.msra.mxu3 %v791_v0  ;;  %v775_v3 = vld [vmem:[%s4499_s25 + $0x8] sm:$0xff]  ;;  %v777_v5 = vld [vmem:[%s4499_s25 + $0x18] sm:$0xff] }
  0x4a   : > { %v784_v6 = vld [vmem:[%s4499_s25 + $0x50] sm:$0xff]  ;;  %v778_v7 = vld [vmem:[%s4499_s25 + $0x20] sm:$0xff]  ;;  %v785_v8 = vld [vmem:[%s4499_s25 + $0x58] sm:$0xff] }
  0x4b   : > { %860 = vmatpush.msra.mxu0 %v790_v1  ;;  %3672 = vmatpush.msra.mxu3 %v790_v1  ;;  %v779_v9 = vld [vmem:[%s4499_s25 + $0x28] sm:$0xff]  ;;  %v786_v10 = vld [vmem:[%s4499_s25 + $0x60] sm:$0xff]  ;;  %v780_v11 = vld [vmem:[%s4499_s25 + $0x30] sm:$0xff]  ;;  %s5791_s21 = smov %s5790_s26 }
  0x4c   : > { %3649 = vmatmul.msk.f32.vlgmr.msra.gmra.mxu0 %vm796_vm0, %v774_v2  ;;  %3659 = vmatmul.msk.f32.vlgmr.msra.gmra.mxu3 %vm796_vm0, %v784_v6  ;;  %v787_v12 = vld [vmem:[%s4499_s25 + $0x68] sm:$0xff]  ;;  %v781_v13 = vld [vmem:[%s4499_s25 + $0x38] sm:$0xff]  ;;  %v788_v14 = vld [vmem:[%s4499_s25 + $0x70] sm:$0xff]  ;;  %s764_s3 = sand.u32 1, %s5792_s27  }
  0x4d   : > { %v782_v15 = vld [vmem:[%s4499_s25 + $0x40] sm:$0xff]  ;;  %v789_v16 = vld [vmem:[%s4499_s25 + $0x78] sm:$0xff]  ;;  %v783_v17 = vld [vmem:[%s4499_s25 + $0x48] sm:$0xff]  ;;  %s3646_s22 = sshll.u32 %s764_s3, 4  ;;  %s3482_s27 = scalar_lea.sflag [#allocation4], %s764_s3 }
  0x4e   : > { %s766_s4 = scalar_lea.vmem [#allocation14], %s3646_s22 }
  0x4f   : > { %s3494_s25 = sshll.u32 %s766_s4, 4  ;;  %s3495_s25 = int_to_ptr.vmem [resolvable:$true] %s3494_s25 }
  0x54   : > { %3650 = vmatmul.msk.f32.gmra.mxu0 %vm796_vm0, %v775_v3  ;;  %3660 = vmatmul.msk.f32.gmra.mxu3 %vm796_vm0, %v785_v8 }
  0x5c   : > { %3651 = vmatmul.msk.f32.gmra.mxu0 %vm796_vm0, %v776_v4  ;;  %3661 = vmatmul.msk.f32.gmra.mxu3 %vm796_vm0, %v786_v10 }
  0x64   : > { %3652 = vmatmul.msk.f32.gmra.mxu0 %vm796_vm0, %v777_v5  ;;  %3662 = vmatmul.msk.f32.gmra.mxu3 %vm796_vm0, %v787_v12 }
  0x6c   : > { %3653 = vmatmul.msk.f32.gmra.mxu0 %vm796_vm0, %v778_v7  ;;  %3663 = vmatmul.msk.f32.gmra.mxu3 %vm796_vm0, %v788_v14 }
  0x74   : > { %3654 = vmatmul.msk.f32.gmra.mxu0 %vm796_vm0, %v779_v9  ;;  %3664 = vmatmul.msk.f32.gmra.mxu3 %vm796_vm0, %v789_v16 }
  0x7c   : > { %3655 = vmatmul.msk.f32.gmra.mxu0 %vm796_vm0, %v780_v11 }
  0x84   : > { %3656 = vmatmul.msk.f32.gmra.mxu0 %vm796_vm0, %v781_v13 }
  0x8c   : > { %3657 = vmatmul.msk.f32.gmra.mxu0 %vm796_vm0, %v782_v15 }
  0x94   : > { %3658 = vmatmul.msk.f32.gmra.mxu0 %vm796_vm0, %v783_v17 }
  0xc9   : > { %v862_v19 = vpop.f32.mrf.mxu0 }
  0xca   : > { %v863_v20 = vadd.f32 %v4542_v18, %v862_v19 }
  0xcc   : > { %vm910_vm1 = vcmp.gt.f32.partialorder %v863_v20, 0.0  ;;  %v926_v21 = vmul.f32 0.01, %v863_v20 }
  0xce   : > { %v4545_v22 = vsel %vm910_vm1, %v863_v20, %v926_v21 }
  0xcf   : > { %958 = vadd.xlane.f32.xlu0 %v4545_v22  ;;  %v1013_v26 = vmul.f32 %v4545_v22, %v4545_v22  ;;  %v892_v47 = vpop.f32.mrf.mxu3 }
  0xd0   : > { %v893_v1 = vadd.f32 %v4542_v18, %v892_v47  ;;  %v1342_v47 = vld [vmem:[%s5789_s0 + $0x48] sm:$0xff] }
  0xd1   : > { %v865_v23 = vpop.f32.mrf.mxu0 }
  0xd2   : > { %v866_v24 = vadd.f32 %v4542_v18, %v865_v23  ;;  %v936_v5 = vmul.f32 0.01, %v893_v1  ;;  %vm920_vm10 = vcmp.gt.f32.partialorder %v893_v1, 0.0 }
  0xd4   : > { %vm911_vm2 = vcmp.gt.f32.partialorder %v866_v24, 0.0  ;;  %v927_v25 = vmul.f32 0.01, %v866_v24  ;;  %v4603_v12 = vsel %vm920_vm10, %v893_v1, %v936_v5 }
  0xd5   : > { %v1023_v16 = vmul.f32 %v4603_v12, %v4603_v12 }
  0xd6   : > { %v4551_v27 = vsel %vm911_vm2, %v866_v24, %v927_v25 }
  0xd7   : > { %960 = vadd.xlane.f32.xlu1 %v4551_v27  ;;  %1029 = vadd.xlane.f32.xlu0 %v1013_v26  ;;  %v1014_v31 = vmul.f32 %v4551_v27, %v4551_v27  ;;  %v895_v55 = vpop.f32.mrf.mxu3 }
  0xd8   : > { %v896_v7 = vadd.f32 %v4542_v18, %v895_v55  ;;  %v1339_v55 = vld [vmem:[%s5789_s0 + $0x30] sm:$0xff] }
  0xd9   : > { %v868_v28 = vpop.f32.mrf.mxu0 }
  0xda   : > { %v869_v29 = vadd.f32 %v4542_v18, %v868_v28  ;;  %v937_v10 = vmul.f32 0.01, %v896_v7  ;;  %vm921_vm12 = vcmp.gt.f32.partialorder %v896_v7, 0.0  ;;  %v1348_v28 = vld [vmem:[%s5789_s0 + $0x78] sm:$0xff] }
  0xdb   : > { %1353 = vmatpush.msra.mxu1 %v1348_v28 }
  0xdc   : > { %v928_v30 = vmul.f32 0.01, %v869_v29  ;;  %vm912_vm3 = vcmp.gt.f32.partialorder %v869_v29, 0.0  ;;  %v4610_v15 = vsel %vm921_vm12, %v896_v7, %v937_v10 }
  0xdd   : > { %v1024_v17 = vmul.f32 %v4610_v15, %v4610_v15 }
  0xde   : > { %v4557_v32 = vsel %vm912_vm3, %v869_v29, %v928_v30  ;;  %v1347_v29 = vld [vmem:[%s5789_s0 + $0x70] sm:$0xff] }
  0xdf   : > { %962 = vadd.xlane.f32.xlu2 %v4557_v32  ;;  %1031 = vadd.xlane.f32.xlu1 %v1014_v31  ;;  %v1015_v36 = vmul.f32 %v4557_v32, %v4557_v32  ;;  %v898_v62 = vpop.f32.mrf.mxu3 }
  0xe0   : > { %v899_v14 = vadd.f32 %v4542_v18, %v898_v62  ;;  %1354 = vmatpush.msra.mxu1 %v1347_v29  ;;  %v1335_v62 = vld [vmem:[%s5789_s0 + $0x10] sm:$0xff] }
  0xe1   : > { %v871_v33 = vpop.f32.mrf.mxu0 }
  0xe2   : > { %v872_v34 = vadd.f32 %v4542_v18, %v871_v33  ;;  %v938_v20 = vmul.f32 0.01, %v899_v14  ;;  %vm922_vm13 = vcmp.gt.f32.partialorder %v899_v14, 0.0 }
  0xe4   : > { %v929_v35 = vmul.f32 0.01, %v872_v34  ;;  %vm913_vm4 = vcmp.gt.f32.partialorder %v872_v34, 0.0  ;;  %v4618_v24 = vsel %vm922_vm13, %v899_v14, %v938_v20 }
  0xe5   : > { %v1025_v26 = vmul.f32 %v4618_v24, %v4618_v24 }
  0xe6   : > { %v4563_v37 = vsel %vm913_vm4, %v872_v34, %v929_v35 }
  0xe7   : > { %1033 = vadd.xlane.f32.xlu2 %v1015_v36  ;;  %964 = vadd.xlane.f32.xlu0 %v4563_v37  ;;  %v1016_v38 = vmul.f32 %v4563_v37, %v4563_v37  ;;  %v901_v8 = vpop.f32.mrf.mxu3 }
  0xe8   : > { %v902_v21 = vadd.f32 %v4542_v18, %v901_v8 }
  0xe9   : > { %v874_v39 = vpop.f32.mrf.mxu0  ;;  %1035 = vadd.xlane.f32.xlu1 %v1016_v38  ;;  %v4243_v38 = vmov 128.0  }
  0xea   : > { %v875_v40 = vadd.f32 %v4542_v18, %v874_v39  ;;  %v939_v23 = vmul.f32 0.01, %v902_v21  ;;  %vm923_vm14 = vcmp.gt.f32.partialorder %v902_v21, 0.0  ;;  %3798 = vrcp.f32 %v4243_v38  ;;  %v1346_v39 = vld [vmem:[%s5789_s0 + $0x68] sm:$0xff] }
  0xeb   : > { %1355 = vmatpush.msra.mxu1 %v1346_v39 }
  0xec   : > { %v930_v41 = vmul.f32 0.01, %v875_v40  ;;  %vm914_vm5 = vcmp.gt.f32.partialorder %v875_v40, 0.0  ;;  %v4629_v31 = vsel %vm923_vm14, %v902_v21, %v939_v23 }
  0xed   : > { %v1026_v36 = vmul.f32 %v4629_v31, %v4629_v31 }
  0xee   : > { %v4569_v42 = vsel %vm914_vm5, %v875_v40, %v930_v41  ;;  %v1345_v41 = vld [vmem:[%s5789_s0 + $0x60] sm:$0xff] }
  0xef   : > { %966 = vadd.xlane.f32.xlu2 %v4569_v42  ;;  %v1017_v43 = vmul.f32 %v4569_v42, %v4569_v42  ;;  %v904_v19 = vpop.f32.mrf.mxu3  ;;  %1356 = vmatpush.msra.mxu1 %v1345_v41 }
  0xf0   : > { %v905_v25 = vadd.f32 %v4542_v18, %v904_v19 }
  0xf1   : > { %v877_v44 = vpop.f32.mrf.mxu0  ;;  %1037 = vadd.xlane.f32.xlu0 %v1017_v43  ;;  %v1344_v43 = vld [vmem:[%s5789_s0 + $0x58] sm:$0xff] }
  0xf2   : > { %v878_v45 = vadd.f32 %v4542_v18, %v877_v44  ;;  %v940_v30 = vmul.f32 0.01, %v905_v25  ;;  %vm924_vm15 = vcmp.gt.f32.partialorder %v905_v25, 0.0  ;;  %1357 = vmatpush.msra.mxu1 %v1344_v43  ;;  %v3799_v44 = vpop.eup %3798 }
  0xf3   : > { %vm995_vm1 = vweird.f32 %v3799_v44 }
  0xf4   : > { %v931_v46 = vmul.f32 0.01, %v878_v45  ;;  %vm915_vm6 = vcmp.gt.f32.partialorder %v878_v45, 0.0  ;;  %v4634_v35 = vsel %vm924_vm15, %v905_v25, %v940_v30 }
  0xf5   : > { %v1027_v40 = vmul.f32 %v4634_v35, %v4634_v35 }
  0xf6   : > { %v4575_v48 = vsel %vm915_vm6, %v878_v45, %v931_v46  ;;  %v1343_v45 = vld [vmem:[%s5789_s0 + $0x50] sm:$0xff] }
  0xf7   : > { %968 = vadd.xlane.f32.xlu1 %v4575_v48  ;;  %v1018_v49 = vmul.f32 %v4575_v48, %v4575_v48  ;;  %v907_v33 = vpop.f32.mrf.mxu3  ;;  %1358 = vmatpush.msra.mxu1 %v1343_v45 }
  0xf8   : > { %v908_v34 = vadd.f32 %v4542_v18, %v907_v33 }
  0xf9   : > { %v880_v50 = vpop.f32.mrf.mxu0  ;;  %1039 = vadd.xlane.f32.xlu2 %v1018_v49  ;;  %v991_v49 = vmul.f32 128.0, %v3799_v44  ;;  %1359 = vmatpush.msra.mxu1 %v1342_v47 }
  0xfa   : > { %v881_v51 = vadd.f32 %v4542_v18, %v880_v50  ;;  %vm925_vm0 = vcmp.gt.f32.partialorder %v908_v34, 0.0 }
  0xfc   : > { %v932_v52 = vmul.f32 0.01, %v881_v51  ;;  %vm916_vm7 = vcmp.gt.f32.partialorder %v881_v51, 0.0 }
  0xfe   : > { %v4581_v53 = vsel %vm916_vm7, %v881_v51, %v932_v52  ;;  %v1341_v51 = vld [vmem:[%s5789_s0 + $0x40] sm:$0xff]  ;;  %v1340_v52 = vld [vmem:[%s5789_s0 + $0x38] sm:$0xff] }
  0xff   : > { %970 = vadd.xlane.f32.xlu0 %v4581_v53  ;;  %v1019_v54 = vmul.f32 %v4581_v53, %v4581_v53  ;;  %1360 = vmatpush.msra.mxu1 %v1341_v51 }
 0x101   : > { %v883_v56 = vpop.f32.mrf.mxu0  ;;  %1041 = vadd.xlane.f32.xlu1 %v1019_v54  ;;  %v992_v54 = vsub.f32 1.0, %v991_v49  ;;  %1361 = vmatpush.msra.mxu1 %v1340_v52 }
 0x102   : > { %v884_v57 = vadd.f32 %v4542_v18, %v883_v56  ;;  %v1338_v56 = vld [vmem:[%s5789_s0 + $0x28] sm:$0xff] }
 0x103   : > { %1362 = vmatpush.msra.mxu1 %v1339_v55 }
 0x104   : > { %v933_v58 = vmul.f32 0.01, %v884_v57  ;;  %vm917_vm8 = vcmp.gt.f32.partialorder %v884_v57, 0.0 }
 0x105   : > { %1363 = vmatpush.msra.mxu1 %v1338_v56 }
 0x106   : > { %v4587_v59 = vsel %vm917_vm8, %v884_v57, %v933_v58  ;;  %v993_v57 = vmul.f32 %v3799_v44, %v992_v54  ;;  %v1337_v58 = vld [vmem:[%s5789_s0 + $0x20] sm:$0xff] }
 0x107   : > { %972 = vadd.xlane.f32.xlu2 %v4587_v59  ;;  %v1020_v60 = vmul.f32 %v4587_v59, %v4587_v59  ;;  %1364 = vmatpush.msra.mxu1 %v1337_v58 }
 0x109   : > { %v886_v61 = vpop.f32.mrf.mxu0  ;;  %1043 = vadd.xlane.f32.xlu0 %v1020_v60  ;;  %v1336_v60 = vld [vmem:[%s5789_s0 + $0x18] sm:$0xff] }
 0x10a   : > { %v887_v63 = vadd.f32 %v4542_v18, %v886_v61  ;;  %v994_v61 = vadd.f32 %v3799_v44, %v993_v57  ;;  %1365 = vmatpush.msra.mxu1 %v1336_v60 }
 0x10c   : > { %v934_v0 = vmul.f32 0.01, %v887_v63  ;;  %vm918_vm9 = vcmp.gt.f32.partialorder %v887_v63, 0.0  ;;  %1366 = vmatpush.msra.mxu1 %v1335_v62  ;;  %v4685_v1 = vsel %vm995_vm1, %v3799_v44, %v994_v61 }
 0x10e   : > { %v4594_v2 = vsel %vm918_vm9, %v887_v63, %v934_v0  ;;  %v1334_v0 = vld [vmem:[%s5789_s0 + $0x8] sm:$0xff] }
 0x10f   : > { %974 = vadd.xlane.f32.xlu1 %v4594_v2  ;;  %v1021_v3 = vmul.f32 %v4594_v2, %v4594_v2  ;;  %1367 = vmatpush.msra.mxu1 %v1334_v0 }
 0x111   : > { %v889_v4 = vpop.f32.mrf.mxu0  ;;  %1045 = vadd.xlane.f32.xlu2 %v1021_v3  ;;  %v1333_v3 = vld [vmem:[%s5789_s0] sm:$0xff] }
 0x112   : > { %v890_v6 = vadd.f32 %v4542_v18, %v889_v4  ;;  %v941_v18 = vmul.f32 0.01, %v908_v34  ;;  %1368 = vmatpush.msra.mxu1 %v1333_v3 }
 0x114   : > { %v935_v9 = vmul.f32 0.01, %v890_v6  ;;  %vm919_vm11 = vcmp.gt.f32.partialorder %v890_v6, 0.0  ;;  %v4653_v46 = vsel %vm925_vm0, %v908_v34, %v941_v18 }
 0x115   : > { %v1028_v50 = vmul.f32 %v4653_v46, %v4653_v46 }
 0x116   : > { %v4601_v11 = vsel %vm919_vm11, %v890_v6, %v935_v9 }
 0x117   : > { %976 = vadd.xlane.f32.xlu0 %v4601_v11  ;;  %v1022_v13 = vmul.f32 %v4601_v11, %v4601_v11 }
 0x119   : > { %978 = vadd.xlane.f32.xlu2 %v4603_v12  ;;  %1047 = vadd.xlane.f32.xlu1 %v1022_v13 }
 0x11f   : > { %1049 = vadd.xlane.f32.xlu0 %v1023_v16 }
 0x121   : > { %1051 = vadd.xlane.f32.xlu2 %v1024_v17  ;;  %980 = vadd.xlane.f32.xlu1 %v4610_v15 }
 0x127   : > { %982 = vadd.xlane.f32.xlu0 %v4618_v24 }
 0x129   : > { %984 = vadd.xlane.f32.xlu2 %v4629_v31  ;;  %1053 = vadd.xlane.f32.xlu1 %v1025_v26 }
 0x12f   : > { %1055 = vadd.xlane.f32.xlu0 %v1026_v36 }
 0x131   : > { %986 = vadd.xlane.f32.xlu1 %v4634_v35  ;;  %1057 = vadd.xlane.f32.xlu2 %v1027_v40 }
 0x137   : > { %988 = vadd.xlane.f32.xlu0 %v4653_v46 }
 0x139   : > { %1059 = vadd.xlane.f32.xlu1 %v1028_v50 }
 0x142   : > { %v959_v63 = vpop.xlane.xlu0 %958 }
 0x143   : > { %v997_v4 = vmul.f32 %v4685_v1, %v959_v63 }
 0x145   : > { %v1077_v7 = vmul.f32 %v997_v4, %v997_v4  ;;  %v1125_v60 = vsub.f32 %v4545_v22, %v997_v4 }
 0x14a   : > { %v961_v5 = vpop.xlane.xlu1 %960  ;;  %v1030_v6 = vpop.xlane.xlu0 %1029 }
 0x14b   : > { %v1061_v8 = vmul.f32 %v1030_v6, %v4685_v1  ;;  %v4693_v10 = vmul.f32 %v4685_v1, %v961_v5 }
 0x14d   : > { %v1093_v9 = vsub.f32 %v1061_v8, %v1077_v7  ;;  %v1078_v19 = vmul.f32 %v4693_v10, %v4693_v10 }
 0x14f   : > { %v1109_v13 = vmax.f32 %v1093_v9, 0.0 }
 0x151   : > { %v1141_v14 = vadd.f32 1e-05, %v1109_v13 }
 0x152   : > { %v963_v16 = vpop.xlane.xlu2 %962  ;;  %v1032_v17 = vpop.xlane.xlu1 %1031 }
 0x153   : > { %3800 = vrsqrt.f32 %v1141_v14  ;;  %v1062_v20 = vmul.f32 %v1032_v17, %v4685_v1  ;;  %v4699_v23 = vmul.f32 %v4685_v1, %v963_v16  ;;  %vm1163_vm3 = vweird.f32 %v1141_v14 }
 0x155   : > { %v1094_v21 = vsub.f32 %v1062_v20, %v1078_v19  ;;  %v1079_v34 = vmul.f32 %v4699_v23, %v4699_v23  ;;  %v1126_v20 = vsub.f32 %v4551_v27, %v4693_v10 }
 0x157   : > { %v1110_v25 = vmax.f32 %v1094_v21, 0.0 }
 0x159   : > { %v3801_v26 = vpop.eup %3800  ;;  %v1142_v28 = vadd.f32 1e-05, %v1110_v25 }
 0x15a   : > { %v1158_v29 = vmul.f32 %v3801_v26, %v1141_v14  ;;  %v1034_v30 = vpop.xlane.xlu2 %1033  ;;  %v965_v33 = vpop.xlane.xlu0 %964  ;;  %vm1164_vm2 = vweird.f32 %v3801_v26 }
 0x15b   : > { %3802 = vrsqrt.f32 %v1142_v28  ;;  %v1063_v36 = vmul.f32 %v1034_v30, %v4685_v1  ;;  %v4705_v38 = vmul.f32 %v4685_v1, %v965_v33  ;;  %vm1165_vm4 = vmor %vm1163_vm3, %vm1164_vm2  ;;  %vm1173_vm6 = vweird.f32 %v1142_v28 }
 0x15c   : > { %v1036_v39 = vpop.xlane.xlu1 %1035  ;;  %v1159_v40 = vmul.f32 %v3801_v26, %v1158_v29 }
 0x15d   : > { %v1095_v41 = vsub.f32 %v1063_v36, %v1079_v34  ;;  %v1080_v18 = vmul.f32 %v4705_v38, %v4705_v38  ;;  %v1064_v43 = vmul.f32 %v1036_v39, %v4685_v1 }
 0x15e   : > { %v1160_v44 = vmul.f32 0.5, %v1159_v40 }
 0x15f   : > { %v1111_v45 = vmax.f32 %v1095_v41, 0.0  ;;  %v1096_v47 = vsub.f32 %v1064_v43, %v1080_v18 }
 0x160   : > { %v1161_v49 = vsub.f32 1.5, %v1160_v44 }
 0x161   : > { %v3803_v50 = vpop.eup %3802  ;;  %v1143_v51 = vadd.f32 1e-05, %v1111_v45  ;;  %v1112_v52 = vmax.f32 %v1096_v47, 0.0 }
 0x162   : > { %v1168_v54 = vmul.f32 %v3803_v50, %v1142_v28  ;;  %v967_v55 = vpop.xlane.xlu2 %966  ;;  %v1162_v56 = vmul.f32 %v3801_v26, %v1161_v49  ;;  %vm1174_vm5 = vweird.f32 %v3803_v50  ;;  %v1127_v49 = vsub.f32 %v4557_v32, %v4699_v23 }
 0x163   : > { %3804 = vrsqrt.f32 %v1143_v51  ;;  %v4710_v57 = vadd.f32 1e-05, %v1112_v52  ;;  %v4713_v58 = vmul.f32 %v4685_v1, %v967_v55  ;;  %vm1175_vm7 = vmor %vm1173_vm6, %vm1174_vm5  ;;  %vm1183_vm9 = vweird.f32 %v1143_v51 }
 0x164   : > { %v1038_v61 = vpop.xlane.xlu0 %1037  ;;  %v1166_v62 = vsel %vm1165_vm4, %v3801_v26, %v1162_v56  ;;  %v1169_v63 = vmul.f32 %v3803_v50, %v1168_v54 }
 0x165   : > { %3806 = vrsqrt.f32 %v4710_v57  ;;  %v1081_v0 = vmul.f32 %v4713_v58, %v4713_v58  ;;  %v1065_v3 = vmul.f32 %v1038_v61, %v4685_v1  ;;  %v1317_v5 = vmul.f32 %v1166_v62, %v1125_v60 }
 0x166   : > { %v1170_v6 = vmul.f32 0.5, %v1169_v63  ;;  %vm1193_vm12 = vweird.f32 %v4710_v57 }
 0x167   : > { %v1097_v7 = vsub.f32 %v1065_v3, %v1081_v0  ;;  %1369 = vmatmul.f32.vlgmr.msra.gmra.mxu1 %v1317_v5 }
 0x168   : > { %v1171_v8 = vsub.f32 1.5, %v1170_v6 }
 0x169   : > { %v3805_v9 = vpop.eup %3804  ;;  %v1113_v13 = vmax.f32 %v1097_v7, 0.0 }
 0x16a   : > { %v1178_v14 = vmul.f32 %v3805_v9, %v1143_v51  ;;  %v969_v22 = vpop.xlane.xlu1 %968  ;;  %v1172_v4 = vmul.f32 %v3803_v50, %v1171_v8  ;;  %vm1184_vm8 = vweird.f32 %v3805_v9  ;;  %v1128_v8 = vsub.f32 %v4563_v37, %v4705_v38 }
 0x16b   : > { %v3807_v16 = vpop.eup %3806  ;;  %v4720_v17 = vadd.f32 1e-05, %v1113_v13  ;;  %v4723_v19 = vmul.f32 %v4685_v1, %v969_v22  ;;  %vm1185_vm10 = vmor %vm1183_vm9, %vm1184_vm8 }
 0x16c   : > { %v1188_v21 = vmul.f32 %v3807_v16, %v4710_v57  ;;  %v1040_v25 = vpop.xlane.xlu2 %1039  ;;  %v1176_v26 = vsel %vm1175_vm7, %v3803_v50, %v1172_v4  ;;  %v1179_v29 = vmul.f32 %v3805_v9, %v1178_v14  ;;  %vm1194_vm11 = vweird.f32 %v3807_v16 }
 0x16d   : > { %3808 = vrsqrt.f32 %v4720_v17  ;;  %v1082_v28 = vmul.f32 %v4723_v19, %v4723_v19  ;;  %v1066_v30 = vmul.f32 %v1040_v25, %v4685_v1  ;;  %v1318_v33 = vmul.f32 %v1176_v26, %v1126_v20  ;;  %vm1195_vm13 = vmor %vm1193_vm12, %vm1194_vm11 }
 0x16e   : > { %v1180_v34 = vmul.f32 0.5, %v1179_v29  ;;  %v1189_v36 = vmul.f32 %v3807_v16, %v1188_v21  ;;  %vm1203_vm15 = vweird.f32 %v4720_v17 }
 0x16f   : > { %v1098_v39 = vsub.f32 %v1066_v30, %v1082_v28  ;;  %1372 = vmatmul.f32.gmra.mxu1 %v1318_v33  ;;  %v1129_v33 = vsub.f32 %v4569_v42, %v4713_v58 }
 0x170   : > { %v1181_v40 = vsub.f32 1.5, %v1180_v34  ;;  %v1190_v27 = vmul.f32 0.5, %v1189_v36 }
 0x171   : > { %v1114_v10 = vmax.f32 %v1098_v39, 0.0 }
 0x172   : > { %v971_v41 = vpop.xlane.xlu0 %970  ;;  %v1182_v18 = vmul.f32 %v3805_v9, %v1181_v40  ;;  %v1191_v47 = vsub.f32 1.5, %v1190_v27 }
 0x173   : > { %v3809_v43 = vpop.eup %3808  ;;  %v4732_v44 = vadd.f32 1e-05, %v1114_v10  ;;  %v4735_v45 = vmul.f32 %v4685_v1, %v971_v41 }
 0x174   : > { %v1198_v50 = vmul.f32 %v3809_v43, %v4720_v17  ;;  %v1042_v52 = vpop.xlane.xlu1 %1041  ;;  %v1186_v54 = vsel %vm1185_vm10, %v3805_v9, %v1182_v18  ;;  %v1192_v62 = vmul.f32 %v3807_v16, %v1191_v47  ;;  %vm1204_vm14 = vweird.f32 %v3809_v43 }
 0x175   : > { %3810 = vrsqrt.f32 %v4732_v44  ;;  %v1083_v51 = vmul.f32 %v4735_v45, %v4735_v45  ;;  %v1067_v55 = vmul.f32 %v1042_v52, %v4685_v1  ;;  %v1319_v56 = vmul.f32 %v1186_v54, %v1127_v49  ;;  %vm1205_vm0 = vmor %vm1203_vm15, %vm1204_vm14 }
 0x176   : > { %v1199_v60 = vmul.f32 %v3809_v43, %v1198_v50  ;;  %v1196_v6 = vsel %vm1195_vm13, %v3807_v16, %v1192_v62  ;;  %vm1213_vm2 = vweird.f32 %v4732_v44  ;;  %v1130_v54 = vsub.f32 %v4575_v48, %v4723_v19 }
 0x177   : > { %v1099_v61 = vsub.f32 %v1067_v55, %v1083_v51  ;;  %1375 = vmatmul.f32.gmra.mxu1 %v1319_v56  ;;  %v1320_v22 = vmul.f32 %v1196_v6, %v1128_v8 }
 0x178   : > { %v1200_v63 = vmul.f32 0.5, %v1199_v60 }
 0x179   : > { %v1115_v0 = vmax.f32 %v1099_v61, 0.0 }
 0x17a   : > { %v973_v32 = vpop.xlane.xlu2 %972  ;;  %v1201_v7 = vsub.f32 1.5, %v1200_v63 }
 0x17b   : > { %v3811_v23 = vpop.eup %3810  ;;  %v4745_v3 = vadd.f32 1e-05, %v1115_v0  ;;  %v4748_v5 = vmul.f32 %v4685_v1, %v973_v32 }
 0x17c   : > { %v1208_v9 = vmul.f32 %v3811_v23, %v4732_v44  ;;  %v1044_v13 = vpop.xlane.xlu0 %1043  ;;  %v1202_v21 = vmul.f32 %v3809_v43, %v1201_v7  ;;  %vm1214_vm1 = vweird.f32 %v3811_v23 }
 0x17d   : > { %3812 = vrsqrt.f32 %v4745_v3  ;;  %v1084_v57 = vmul.f32 %v4748_v5, %v4748_v5  ;;  %v1068_v14 = vmul.f32 %v1044_v13, %v4685_v1  ;;  %vm1215_vm3 = vmor %vm1213_vm2, %vm1214_vm1  ;;  %vm1223_vm5 = vweird.f32 %v4745_v3 }
 0x17e   : > { %v1209_v4 = vmul.f32 %v3811_v23, %v1208_v9  ;;  %v1206_v28 = vsel %vm1205_vm0, %v3809_v43, %v1202_v21 }
 0x17f   : > { %v1100_v20 = vsub.f32 %v1068_v14, %v1084_v57  ;;  %1378 = vmatmul.f32.gmra.mxu1 %v1320_v22  ;;  %v1321_v40 = vmul.f32 %v1206_v28, %v1129_v33  ;;  %v1131_v57 = vsub.f32 %v4581_v53, %v4735_v45 }
 0x180   : > { %v1210_v16 = vmul.f32 0.5, %v1209_v4 }
 0x181   : > { %v1116_v25 = vmax.f32 %v1100_v20, 0.0 }
 0x182   : > { %v975_v37 = vpop.xlane.xlu1 %974  ;;  %v1211_v30 = vsub.f32 1.5, %v1210_v16 }
 0x183   : > { %v3813_v38 = vpop.eup %3812  ;;  %v4758_v26 = vadd.f32 1e-05, %v1116_v25  ;;  %v4761_v29 = vmul.f32 %v4685_v1, %v975_v37 }
 0x184   : > { %v1218_v34 = vmul.f32 %v3813_v38, %v4745_v3  ;;  %v1046_v36 = vpop.xlane.xlu2 %1045  ;;  %v1212_v41 = vmul.f32 %v3811_v23, %v1211_v30  ;;  %vm1224_vm4 = vweird.f32 %v3813_v38 }
 0x185   : > { %3814 = vrsqrt.f32 %v4758_v26  ;;  %v1085_v17 = vmul.f32 %v4761_v29, %v4761_v29  ;;  %v1069_v39 = vmul.f32 %v1046_v36, %v4685_v1  ;;  %vm1225_vm6 = vmor %vm1223_vm5, %vm1224_vm4  ;;  %vm1233_vm8 = vweird.f32 %v4758_v26 }
 0x186   : > { %v1219_v27 = vmul.f32 %v3813_v38, %v1218_v34  ;;  %v1216_v50 = vsel %vm1215_vm3, %v3811_v23, %v1212_v41 }
 0x187   : > { %v1101_v10 = vsub.f32 %v1069_v39, %v1085_v17  ;;  %1381 = vmatmul.f32.gmra.mxu1 %v1321_v40  ;;  %v1322_v61 = vmul.f32 %v1216_v50, %v1130_v54 }
 0x188   : > { %v1220_v18 = vmul.f32 0.5, %v1219_v27 }
 0x189   : > { %v1117_v43 = vmax.f32 %v1101_v10, 0.0  ;;  %v1132_v10 = vsub.f32 %v4587_v59, %v4748_v5 }
 0x18a   : > { %v977_v42 = vpop.xlane.xlu0 %976  ;;  %v1221_v52 = vsub.f32 1.5, %v1220_v18 }
 0x18b   : > { %v4771_v58 = vpop.eup %3814  ;;  %v4773_v47 = vadd.f32 1e-05, %v1117_v43  ;;  %v4776_v49 = vmul.f32 %v4685_v1, %v977_v42 }
 0x18c   : > { %v1228_v51 = vmul.f32 %v4771_v58, %v4758_v26  ;;  %v979_v55 = vpop.xlane.xlu2 %978  ;;  %v1048_v56 = vpop.xlane.xlu1 %1047  ;;  %v1222_v0 = vmul.f32 %v3813_v38, %v1221_v52  ;;  %vm1234_vm7 = vweird.f32 %v4771_v58 }
 0x18d   : > { %3816 = vrsqrt.f32 %v4773_v47  ;;  %v1086_v44 = vmul.f32 %v4776_v49, %v4776_v49  ;;  %v1070_v60 = vmul.f32 %v1048_v56, %v4685_v1  ;;  %v4788_v63 = vmul.f32 %v4685_v1, %v979_v55  ;;  %vm1235_vm9 = vmor %vm1233_vm8, %vm1234_vm7 }
 0x18e   : > { %v1229_v62 = vmul.f32 %v4771_v58, %v1228_v51  ;;  %v1226_v13 = vsel %vm1225_vm6, %v3813_v38, %v1222_v0  ;;  %vm1243_vm11 = vweird.f32 %v4773_v47 }
 0x18f   : > { %v1102_v48 = vsub.f32 %v1070_v60, %v1086_v44  ;;  %1384 = vmatmul.f32.gmra.mxu1 %v1322_v61  ;;  %v1087_v32 = vmul.f32 %v4788_v63, %v4788_v63  ;;  %v1323_v25 = vmul.f32 %v1226_v13, %v1131_v57 }
 0x190   : > { %v1230_v19 = vmul.f32 0.5, %v1229_v62 }
 0x191   : > { %v1118_v23 = vmax.f32 %v1102_v48, 0.0 }
 0x192   : > { %v1050_v6 = vpop.xlane.xlu0 %1049  ;;  %v1231_v7 = vsub.f32 1.5, %v1230_v19  ;;  %v1133_v19 = vsub.f32 %v4594_v2, %v4761_v29 }
 0x193   : > { %v4793_v8 = vpop.eup %3816  ;;  %v1071_v9 = vmul.f32 %v1050_v6, %v4685_v1  ;;  %v4800_v22 = vadd.f32 1e-05, %v1118_v23 }
 0x194   : > { %v1238_v14 = vmul.f32 %v4793_v8, %v4773_v47  ;;  %v1052_v4 = vpop.xlane.xlu2 %1051  ;;  %v981_v20 = vpop.xlane.xlu1 %980  ;;  %v1232_v53 = vmul.f32 %v4771_v58, %v1231_v7  ;;  %vm1244_vm10 = vweird.f32 %v4793_v8 }
 0x195   : > { %v1103_v3 = vsub.f32 %v1071_v9, %v1087_v32  ;;  %v1072_v21 = vmul.f32 %v1052_v4, %v4685_v1  ;;  %v4804_v16 = vmul.f32 %v4685_v1, %v981_v20  ;;  %3818 = vrsqrt.f32 %v4800_v22  ;;  %vm1245_vm12 = vmor %vm1243_vm11, %vm1244_vm10 }
 0x196   : > { %v1239_v45 = vmul.f32 %v4793_v8, %v1238_v14  ;;  %v1236_v36 = vsel %vm1235_vm9, %v4771_v58, %v1232_v53  ;;  %vm1253_vm14 = vweird.f32 %v4800_v22 }
 0x197   : > { %v1119_v37 = vmax.f32 %v1103_v3, 0.0  ;;  %v1088_v38 = vmul.f32 %v4804_v16, %v4804_v16  ;;  %1387 = vmatmul.f32.gmra.mxu1 %v1323_v25  ;;  %v1324_v50 = vmul.f32 %v1236_v36, %v1132_v10 }
 0x198   : > { %v1240_v28 = vmul.f32 0.5, %v1239_v45  ;;  %v1134_v45 = vsub.f32 %v4601_v11, %v4776_v49 }
 0x199   : > { %v4813_v30 = vadd.f32 1e-05, %v1119_v37  ;;  %v1104_v33 = vsub.f32 %v1072_v21, %v1088_v38 }
 0x19a   : > { %v983_v34 = vpop.xlane.xlu0 %982  ;;  %v1241_v40 = vsub.f32 1.5, %v1240_v28 }
 0x19b   : > { %3820 = vrsqrt.f32 %v4813_v30  ;;  %v1120_v17 = vmax.f32 %v1104_v33, 0.0  ;;  %v4818_v39 = vmul.f32 %v4685_v1, %v983_v34  ;;  %v3819_v27 = vpop.eup %3818  ;;  %vm1263_vm0 = vweird.f32 %v4813_v30 }
 0x19c   : > { %v985_v26 = vpop.xlane.xlu2 %984  ;;  %v1054_v41 = vpop.xlane.xlu1 %1053  ;;  %v1248_v18 = vmul.f32 %v3819_v27, %v4800_v22  ;;  %v1242_v59 = vmul.f32 %v4793_v8, %v1241_v40  ;;  %vm1254_vm13 = vweird.f32 %v3819_v27 }
 0x19d   : > { %v4823_v43 = vadd.f32 1e-05, %v1120_v17  ;;  %v1089_v42 = vmul.f32 %v4818_v39, %v4818_v39  ;;  %v1073_v58 = vmul.f32 %v1054_v41, %v4685_v1  ;;  %v4831_v52 = vmul.f32 %v4685_v1, %v985_v26  ;;  %vm1255_vm15 = vmor %vm1253_vm14, %vm1254_vm13 }
 0x19e   : > { %v1249_v5 = vmul.f32 %v3819_v27, %v1248_v18  ;;  %v1246_v0 = vsel %vm1245_vm12, %v4793_v8, %v1242_v59 }
 0x19f   : > { %3822 = vrsqrt.f32 %v4823_v43  ;;  %v1105_v54 = vsub.f32 %v1073_v58, %v1089_v42  ;;  %1390 = vmatmul.f32.gmra.mxu1 %v1324_v50  ;;  %v1090_v55 = vmul.f32 %v4831_v52, %v4831_v52  ;;  %v1325_v57 = vmul.f32 %v1246_v0, %v1133_v19 }
 0x1a0   : > { %v1250_v56 = vmul.f32 0.5, %v1249_v5  ;;  %v1135_v58 = vsub.f32 %v4603_v12, %v4788_v63  ;;  %vm1273_vm3 = vweird.f32 %v4823_v43  ;;  %v1136_v12 = vsub.f32 %v4610_v15, %v4804_v16 }
 0x1a1   : > { %v4834_v51 = vpop.eup %3820  ;;  %v1121_v60 = vmax.f32 %v1105_v54, 0.0 }
 0x1a2   : > { %v1258_v44 = vmul.f32 %v4834_v51, %v4813_v30  ;;  %v1056_v61 = vpop.xlane.xlu0 %1055  ;;  %v1251_v48 = vsub.f32 1.5, %v1250_v56  ;;  %vm1264_vm1 = vweird.f32 %v4834_v51 }
 0x1a3   : > { %v1074_v62 = vmul.f32 %v1056_v61, %v4685_v1  ;;  %v4845_v32 = vadd.f32 1e-05, %v1121_v60  ;;  %vm1265_vm2 = vmor %vm1263_vm0, %vm1264_vm1 }
 0x1a4   : > { %v987_v23 = vpop.xlane.xlu1 %986  ;;  %v1058_v6 = vpop.xlane.xlu2 %1057  ;;  %v1259_v47 = vmul.f32 %v4834_v51, %v1258_v44  ;;  %v1252_v14 = vmul.f32 %v3819_v27, %v1251_v48 }
 0x1a5   : > { %v3823_v7 = vpop.eup %3822  ;;  %v1106_v9 = vsub.f32 %v1074_v62, %v1090_v55  ;;  %v4849_v13 = vmul.f32 %v4685_v1, %v987_v23  ;;  %3824 = vrsqrt.f32 %v4845_v32  ;;  %v1075_v8 = vmul.f32 %v1058_v6, %v4685_v1 }
 0x1a6   : > { %v1268_v2 = vmul.f32 %v3823_v7, %v4823_v43  ;;  %v1260_v20 = vmul.f32 0.5, %v1259_v47  ;;  %v1256_v53 = vsel %vm1255_vm15, %v3819_v27, %v1252_v14  ;;  %vm1274_vm4 = vweird.f32 %v3823_v7 }
 0x1a7   : > { %v1122_v29 = vmax.f32 %v1106_v9, 0.0  ;;  %v1091_v4 = vmul.f32 %v4849_v13, %v4849_v13  ;;  %1393 = vmatmul.f32.gmra.mxu1 %v1325_v57  ;;  %v1326_v36 = vmul.f32 %v1256_v53, %v1134_v45  ;;  %vm1275_vm5 = vmor %vm1273_vm3, %vm1274_vm4  ;;  %vm1283_vm6 = vweird.f32 %v4845_v32  ;;  %v4892_v53 = vld [vmem:[%s5737_s12] ss:$0 sm:$0xff] }
 0x1a8   : > { %v1261_v38 = vsub.f32 1.5, %v1260_v20  ;;  %v1269_v28 = vmul.f32 %v3823_v7, %v1268_v2  ;;  %v1137_v47 = vsub.f32 %v4618_v24, %v4818_v39  ;;  %v1138_v14 = vsub.f32 %v4629_v31, %v4831_v52 }
 0x1a9   : > { %v4857_v3 = vadd.f32 1e-05, %v1122_v29  ;;  %v1107_v21 = vsub.f32 %v1075_v8, %v1091_v4  ;;  %v1139_v20 = vsub.f32 %v4634_v35, %v4849_v13 }
 0x1aa   : > { %v989_v25 = vpop.xlane.xlu0 %988  ;;  %v1262_v49 = vmul.f32 %v4834_v51, %v1261_v38  ;;  %v1270_v27 = vmul.f32 0.5, %v1269_v28 }
 0x1ab   : > { %v4862_v37 = vmul.f32 %v4685_v1, %v989_v25  ;;  %v3825_v33 = vpop.eup %3824  ;;  %3826 = vrsqrt.f32 %v4857_v3  ;;  %v1123_v22 = vmax.f32 %v1107_v21, 0.0  ;;  %vm1293_vm9 = vweird.f32 %v4857_v3 }
 0x1ac   : > { %v1060_v34 = vpop.xlane.xlu1 %1059  ;;  %v1278_v11 = vmul.f32 %v3825_v33, %v4845_v32  ;;  %v1266_v30 = vsel %vm1265_vm2, %v4834_v51, %v1262_v49  ;;  %v1271_v41 = vsub.f32 1.5, %v1270_v27  ;;  %vm1284_vm7 = vweird.f32 %v3825_v33 }
 0x1ad   : > { %v1092_v17 = vmul.f32 %v4862_v37, %v4862_v37  ;;  %v1076_v40 = vmul.f32 %v1060_v34, %v4685_v1  ;;  %v1155_v10 = vadd.f32 1e-05, %v1123_v22  ;;  %v1327_v59 = vmul.f32 %v1266_v30, %v1135_v58  ;;  %vm1285_vm8 = vmor %vm1283_vm6, %vm1284_vm7 }
 0x1ae   : > { %v1279_v18 = vmul.f32 %v3825_v33, %v1278_v11  ;;  %v1272_v54 = vmul.f32 %v3823_v7, %v1271_v41  ;;  %v1140_v31 = vsub.f32 %v4653_v46, %v4862_v37 }
 0x1af   : > { %1396 = vmatmul.f32.gmra.mxu1 %v1326_v36  ;;  %v1108_v26 = vsub.f32 %v1076_v40, %v1092_v17  ;;  %3828 = vrsqrt.f32 %v1155_v10  ;;  %vm1303_vm12 = vweird.f32 %v1155_v10 }
 0x1b0   : > { %v1280_v55 = vmul.f32 0.5, %v1279_v18  ;;  %v1276_v51 = vsel %vm1275_vm5, %v3823_v7, %v1272_v54 }
 0x1b1   : > { %v3827_v42 = vpop.eup %3826  ;;  %v1124_v50 = vmax.f32 %v1108_v26, 0.0  ;;  %v1328_v63 = vmul.f32 %v1276_v51, %v1136_v12 }
 0x1b2   : > { %v1288_v5 = vmul.f32 %v3827_v42, %v4857_v3  ;;  %v1281_v44 = vsub.f32 1.5, %v1280_v55  ;;  %vm1294_vm10 = vweird.f32 %v3827_v42 }
 0x1b3   : > { %v1156_v56 = vadd.f32 1e-05, %v1124_v50  ;;  %vm1295_vm11 = vmor %vm1293_vm9, %vm1294_vm10 }
 0x1b4   : > { %v1289_v60 = vmul.f32 %v3827_v42, %v1288_v5  ;;  %v1282_v62 = vmul.f32 %v3825_v33, %v1281_v44 }
 0x1b5   : > { %v3829_v61 = vpop.eup %3828  ;;  %3830 = vrsqrt.f32 %v1156_v56  ;;  %vm1313_vm15 = vweird.f32 %v1156_v56 }
 0x1b6   : > { %v1298_v43 = vmul.f32 %v3829_v61, %v1155_v10  ;;  %v1290_v0 = vmul.f32 0.5, %v1289_v60  ;;  %v1286_v48 = vsel %vm1285_vm8, %v3825_v33, %v1282_v62  ;;  %vm1304_vm13 = vweird.f32 %v3829_v61 }
 0x1b7   : > { %1399 = vmatmul.f32.gmra.mxu1 %v1327_v59  ;;  %v1329_v15 = vmul.f32 %v1286_v48, %v1137_v47  ;;  %vm1305_vm14 = vmor %vm1303_vm12, %vm1304_vm13 }
 0x1b8   : > { %v1291_v19 = vsub.f32 1.5, %v1290_v0  ;;  %v1299_v23 = vmul.f32 %v3829_v61, %v1298_v43 }
 0x1ba   : > { %v1292_v7 = vmul.f32 %v3827_v42, %v1291_v19  ;;  %v1300_v32 = vmul.f32 0.5, %v1299_v23 }
 0x1bb   : > { %v3831_v6 = vpop.eup %3830 }
 0x1bc   : > { %v1308_v16 = vmul.f32 %v3831_v6, %v1156_v56  ;;  %v1296_v9 = vsel %vm1295_vm11, %v3827_v42, %v1292_v7  ;;  %v1301_v8 = vsub.f32 1.5, %v1300_v32  ;;  %vm1314_vm0 = vweird.f32 %v3831_v6 }
 0x1bd   : > { %v1330_v2 = vmul.f32 %v1296_v9, %v1138_v14  ;;  %vm1315_vm1 = vmor %vm1313_vm15, %vm1314_vm0 }
 0x1be   : > { %v1309_v57 = vmul.f32 %v3831_v6, %v1308_v16  ;;  %v1302_v29 = vmul.f32 %v3829_v61, %v1301_v8 }
 0x1bf   : > { %1402 = vmatmul.f32.gmra.mxu1 %v1328_v63 }
 0x1c0   : > { %v1310_v24 = vmul.f32 0.5, %v1309_v57  ;;  %v1306_v39 = vsel %vm1305_vm14, %v3829_v61, %v1302_v29 }
 0x1c1   : > { %v1331_v3 = vmul.f32 %v1306_v39, %v1139_v20 }
 0x1c2   : > { %v1311_v4 = vsub.f32 1.5, %v1310_v24 }
 0x1c4   : > { %v1312_v21 = vmul.f32 %v3831_v6, %v1311_v4 }
 0x1c6   : > { %v1316_v25 = vsel %vm1315_vm1, %v3831_v6, %v1312_v21 }
 0x1c7   : > { %1405 = vmatmul.f32.gmra.mxu1 %v1329_v15  ;;  %v1332_v52 = vmul.f32 %v1316_v25, %v1140_v31  ;;  %v1848_v25 = vld [vmem:[%s5791_s21 + $0x70] sm:$0xff] }
 0x1cf   : > { %1408 = vmatmul.f32.gmra.mxu1 %v1330_v2 }
 0x1d7   : > { %1411 = vmatmul.f32.gmra.mxu1 %v1331_v3  ;;  %v1849_v3 = vld [vmem:[%s5790_s26 + $0x78] sm:$0xff]  ;;  %s3493_s26 = scalar_lea.hbm %s5795_s24, %s4492_s29 }
 0x1d8   : > { %1854 = vmatpush.msra.mxu2 %v1849_v3  ;;  %s3496_s5 = sshll.u32 %s3493_s26, 4  ;;  %s3497_s5 = int_to_ptr.hbm [resolvable:$true] %s3496_s5 }
 0x1d9   : > { %s4168_s0 = sshra.s32 %s3497_s5, 4  ;;  %s4169_s0 = int_to_ptr.hbm [resolvable:$true] %s4168_s0 }
 0x1da   : > { %1855 = vmatpush.msra.mxu2 %v1848_v25  ;;  %s4170_s2 = scalar_lea.hbm %s4169_s0, 16  ;;  %p4175_p3 = scmp.lt.s32.totalorder %s4169_s0, %s5795_s24 }
 0x1db   : > { %p4171_p0 = scmp.ne.s32.totalorder %s4169_s0, %s4170_s2 }
 0x1dd   : > { %p4172_p1 = pnand %p4171_p0, %p4394_p5 }
 0x1df   : > { %1414 = vmatmul.f32.gmra.mxu1 %v1332_v52  ;;  %v1847_v52 = vld [vmem:[%s5791_s21 + $0x68] sm:$0xff]  ;;  %p4173_p2 = pneg %p4172_p1 }
 0x1e0   : > { %1856 = vmatpush.msra.mxu2 %v1847_v52 }
 0x1e4   : > { %v1370_v45 = vpop.f32.mrf.mxu1 }
 0x1e5   : > { %v1371_v35 = vadd.f32 %v4892_v53, %v1370_v45 }
 0x1e7   : > { %v1434_v13 = vmul.f32 0.01, %v1371_v35  ;;  %vm1418_vm2 = vcmp.gt.f32.partialorder %v1371_v35, 0.0 }
 0x1e9   : > { %v4895_v38 = vsel %vm1418_vm2, %v1371_v35, %v1434_v13  ;;  %v1846_v35 = vld [vmem:[%s5791_s21 + $0x60] sm:$0xff] }
 0x1ea   : > { %1466 = vadd.xlane.f32.xlu2 %v4895_v38  ;;  %v1514_v28 = vmul.f32 %v4895_v38, %v4895_v38  ;;  %1857 = vmatpush.msra.mxu2 %v1846_v35 }
 0x1ec   : > { %v1373_v46 = vpop.f32.mrf.mxu1  ;;  %1530 = vadd.xlane.f32.xlu0 %v1514_v28 }
 0x1ed   : > { %v1374_v37 = vadd.f32 %v4892_v53, %v1373_v46  ;;  %v1845_v46 = vld [vmem:[%s5791_s21 + $0x58] sm:$0xff] }
 0x1ee   : > { %1858 = vmatpush.msra.mxu2 %v1845_v46 }
 0x1ef   : > { %v1435_v33 = vmul.f32 0.01, %v1374_v37  ;;  %vm1419_vm3 = vcmp.gt.f32.partialorder %v1374_v37, 0.0 }
 0x1f1   : > { %v4901_v34 = vsel %vm1419_vm3, %v1374_v37, %v1435_v33  ;;  %v1844_v33 = vld [vmem:[%s5791_s21 + $0x50] sm:$0xff] }
 0x1f2   : > { %1468 = vadd.xlane.f32.xlu1 %v4901_v34  ;;  %v1515_v36 = vmul.f32 %v4901_v34, %v4901_v34  ;;  %1859 = vmatpush.msra.mxu2 %v1844_v33 }
 0x1f4   : > { %v1376_v22 = vpop.f32.mrf.mxu1  ;;  %1532 = vadd.xlane.f32.xlu2 %v1515_v36 }
 0x1f5   : > { %v1377_v17 = vadd.f32 %v4892_v53, %v1376_v22  ;;  %v1843_v22 = vld [vmem:[%s5791_s21 + $0x48] sm:$0xff] }
 0x1f6   : > { %1860 = vmatpush.msra.mxu2 %v1843_v22 }
 0x1f7   : > { %v1436_v40 = vmul.f32 0.01, %v1377_v17  ;;  %vm1420_vm4 = vcmp.gt.f32.partialorder %v1377_v17, 0.0 }
 0x1f9   : > { %v4907_v11 = vsel %vm1420_vm4, %v1377_v17, %v1436_v40  ;;  %v1842_v40 = vld [vmem:[%s5791_s21 + $0x40] sm:$0xff] }
 0x1fa   : > { %1470 = vadd.xlane.f32.xlu0 %v4907_v11  ;;  %v1516_v49 = vmul.f32 %v4907_v11, %v4907_v11  ;;  %1861 = vmatpush.msra.mxu2 %v1842_v40 }
 0x1fc   : > { %1534 = vadd.xlane.f32.xlu1 %v1516_v49  ;;  %v1379_v27 = vpop.f32.mrf.mxu1 }
 0x1fd   : > { %v1380_v10 = vadd.f32 %v4892_v53, %v1379_v27 }
 0x1ff   : > { %v1437_v26 = vmul.f32 0.01, %v1380_v10  ;;  %vm1421_vm5 = vcmp.gt.f32.partialorder %v1380_v10, 0.0 }
 0x201   : > { %v4913_v30 = vsel %vm1421_vm5, %v1380_v10, %v1437_v26  ;;  %v1841_v10 = vld [vmem:[%s5791_s21 + $0x38] sm:$0xff] }
 0x202   : > { %1472 = vadd.xlane.f32.xlu2 %v4913_v30  ;;  %v1517_v41 = vmul.f32 %v4913_v30, %v4913_v30  ;;  %1862 = vmatpush.msra.mxu2 %v1841_v10 }
 0x204   : > { %1536 = vadd.xlane.f32.xlu0 %v1517_v41  ;;  %v1382_v18 = vpop.f32.mrf.mxu1  ;;  %v1840_v41 = vld [vmem:[%s5791_s21 + $0x30] sm:$0xff] }
 0x205   : > { %v1383_v42 = vadd.f32 %v4892_v53, %v1382_v18  ;;  %1863 = vmatpush.msra.mxu2 %v1840_v41 }
 0x207   : > { %v1438_v58 = vmul.f32 0.01, %v1383_v42  ;;  %vm1422_vm6 = vcmp.gt.f32.partialorder %v1383_v42, 0.0 }
 0x209   : > { %v4919_v50 = vsel %vm1422_vm6, %v1383_v42, %v1438_v58  ;;  %v1839_v42 = vld [vmem:[%s5791_s21 + $0x28] sm:$0xff] }
 0x20a   : > { %1474 = vadd.xlane.f32.xlu1 %v4919_v50  ;;  %v1518_v59 = vmul.f32 %v4919_v50, %v4919_v50  ;;  %1864 = vmatpush.msra.mxu2 %v1839_v42 }
 0x20c   : > { %v1385_v5 = vpop.f32.mrf.mxu1  ;;  %1538 = vadd.xlane.f32.xlu2 %v1518_v59  ;;  %v1838_v59 = vld [vmem:[%s5791_s21 + $0x20] sm:$0xff] }
 0x20d   : > { %v1386_v54 = vadd.f32 %v4892_v53, %v1385_v5  ;;  %1865 = vmatpush.msra.mxu2 %v1838_v59 }
 0x20f   : > { %v1439_v55 = vmul.f32 0.01, %v1386_v54  ;;  %vm1423_vm7 = vcmp.gt.f32.partialorder %v1386_v54, 0.0 }
 0x211   : > { %v4925_v56 = vsel %vm1423_vm7, %v1386_v54, %v1439_v55  ;;  %v1837_v55 = vld [vmem:[%s5791_s21 + $0x18] sm:$0xff] }
 0x212   : > { %1476 = vadd.xlane.f32.xlu0 %v4925_v56  ;;  %v1519_v51 = vmul.f32 %v4925_v56, %v4925_v56  ;;  %1866 = vmatpush.msra.mxu2 %v1837_v55 }
 0x214   : > { %1540 = vadd.xlane.f32.xlu1 %v1519_v51  ;;  %v1388_v44 = vpop.f32.mrf.mxu1 }
 0x215   : > { %v1389_v60 = vadd.f32 %v4892_v53, %v1388_v44  ;;  %v1836_v44 = vld [vmem:[%s5791_s21 + $0x10] sm:$0xff] }
 0x216   : > { %1867 = vmatpush.msra.mxu2 %v1836_v44 }
 0x217   : > { %v1440_v61 = vmul.f32 0.01, %v1389_v60  ;;  %vm1424_vm8 = vcmp.gt.f32.partialorder %v1389_v60, 0.0 }
 0x219   : > { %v4931_v12 = vsel %vm1424_vm8, %v1389_v60, %v1440_v61  ;;  %v1835_v61 = vld [vmem:[%s5791_s21 + $0x8] sm:$0xff] }
 0x21a   : > { %1478 = vadd.xlane.f32.xlu2 %v4931_v12  ;;  %v1520_v63 = vmul.f32 %v4931_v12, %v4931_v12  ;;  %1868 = vmatpush.msra.mxu2 %v1835_v61 }
 0x21c   : > { %1542 = vadd.xlane.f32.xlu0 %v1520_v63  ;;  %v1391_v43 = vpop.f32.mrf.mxu1 }
 0x21d   : > { %v1392_v62 = vadd.f32 %v4892_v53, %v1391_v43  ;;  %v1834_v43 = vld [vmem:[%s5791_s21] sm:$0xff] }
 0x21e   : > { %1869 = vmatpush.msra.mxu2 %v1834_v43 }
 0x21f   : > { %v1441_v0 = vmul.f32 0.01, %v1392_v62  ;;  %vm1425_vm9 = vcmp.gt.f32.partialorder %v1392_v62, 0.0 }
 0x221   : > { %v4937_v48 = vsel %vm1425_vm9, %v1392_v62, %v1441_v0 }
 0x222   : > { %1480 = vadd.xlane.f32.xlu1 %v4937_v48  ;;  %v1521_v19 = vmul.f32 %v4937_v48, %v4937_v48 }
 0x224   : > { %v1394_v23 = vpop.f32.mrf.mxu1  ;;  %1544 = vadd.xlane.f32.xlu2 %v1521_v19 }
 0x225   : > { %v1395_v6 = vadd.f32 %v4892_v53, %v1394_v23 }
 0x227   : > { %v1442_v47 = vmul.f32 0.01, %v1395_v6  ;;  %vm1426_vm10 = vcmp.gt.f32.partialorder %v1395_v6, 0.0 }
 0x229   : > { %v4943_v15 = vsel %vm1426_vm10, %v1395_v6, %v1442_v47 }
 0x22a   : > { %1482 = vadd.xlane.f32.xlu0 %v4943_v15  ;;  %v1522_v16 = vmul.f32 %v4943_v15, %v4943_v15 }
 0x22c   : > { %1546 = vadd.xlane.f32.xlu1 %v1522_v16  ;;  %v1397_v7 = vpop.f32.mrf.mxu1 }
 0x22d   : > { %v1398_v32 = vadd.f32 %v4892_v53, %v1397_v7 }
 0x22f   : > { %v1443_v9 = vmul.f32 0.01, %v1398_v32  ;;  %vm1427_vm11 = vcmp.gt.f32.partialorder %v1398_v32, 0.0 }
 0x231   : > { %v4949_v8 = vsel %vm1427_vm11, %v1398_v32, %v1443_v9 }
 0x232   : > { %1484 = vadd.xlane.f32.xlu2 %v4949_v8  ;;  %v1523_v57 = vmul.f32 %v4949_v8, %v4949_v8 }
 0x234   : > { %1548 = vadd.xlane.f32.xlu0 %v1523_v57  ;;  %v1400_v14 = vpop.f32.mrf.mxu1 }
 0x235   : > { %v1401_v2 = vadd.f32 %v4892_v53, %v1400_v14 }
 0x237   : > { %v1444_v29 = vmul.f32 0.01, %v1401_v2  ;;  %vm1428_vm12 = vcmp.gt.f32.partialorder %v1401_v2, 0.0 }
 0x239   : > { %v4955_v24 = vsel %vm1428_vm12, %v1401_v2, %v1444_v29 }
 0x23a   : > { %1486 = vadd.xlane.f32.xlu1 %v4955_v24  ;;  %v1524_v39 = vmul.f32 %v4955_v24, %v4955_v24 }
 0x23c   : > { %v1403_v4 = vpop.f32.mrf.mxu1  ;;  %1550 = vadd.xlane.f32.xlu2 %v1524_v39 }
 0x23d   : > { %v1404_v20 = vadd.f32 %v4892_v53, %v1403_v4 }
 0x23f   : > { %v1445_v21 = vmul.f32 0.01, %v1404_v20  ;;  %vm1429_vm13 = vcmp.gt.f32.partialorder %v1404_v20, 0.0 }
 0x241   : > { %v4967_v31 = vsel %vm1429_vm13, %v1404_v20, %v1445_v21 }
 0x242   : > { %1488 = vadd.xlane.f32.xlu0 %v4967_v31  ;;  %v1525_v45 = vmul.f32 %v4967_v31, %v4967_v31 }
 0x244   : > { %1552 = vadd.xlane.f32.xlu1 %v1525_v45  ;;  %v1406_v13 = vpop.f32.mrf.mxu1 }
 0x245   : > { %v1407_v28 = vadd.f32 %v4892_v53, %v1406_v13 }
 0x247   : > { %v1446_v37 = vmul.f32 0.01, %v1407_v28  ;;  %vm1430_vm14 = vcmp.gt.f32.partialorder %v1407_v28, 0.0 }
 0x249   : > { %v4985_v36 = vsel %vm1430_vm14, %v1407_v28, %v1446_v37 }
 0x24a   : > { %1490 = vadd.xlane.f32.xlu2 %v4985_v36  ;;  %v1526_v17 = vmul.f32 %v4985_v36, %v4985_v36 }
 0x24c   : > { %1554 = vadd.xlane.f32.xlu0 %v1526_v17  ;;  %v1409_v49 = vpop.f32.mrf.mxu1 }
 0x24d   : > { %v1410_v27 = vadd.f32 %v4892_v53, %v1409_v49 }
 0x24f   : > { %v1447_v26 = vmul.f32 0.01, %v1410_v27  ;;  %vm1431_vm15 = vcmp.gt.f32.partialorder %v1410_v27, 0.0 }
 0x251   : > { %v5003_v18 = vsel %vm1431_vm15, %v1410_v27, %v1447_v26 }
 0x252   : > { %1492 = vadd.xlane.f32.xlu1 %v5003_v18  ;;  %v1527_v58 = vmul.f32 %v5003_v18, %v5003_v18 }
 0x254   : > { %v1412_v5 = vpop.f32.mrf.mxu1  ;;  %1556 = vadd.xlane.f32.xlu2 %v1527_v58 }
 0x255   : > { %v1413_v54 = vadd.f32 %v4892_v53, %v1412_v5 }
 0x257   : > { %v1448_v51 = vmul.f32 0.01, %v1413_v54  ;;  %vm1432_vm0 = vcmp.gt.f32.partialorder %v1413_v54, 0.0 }
 0x259   : > { %v5021_v60 = vsel %vm1432_vm0, %v1413_v54, %v1448_v51 }
 0x25a   : > { %1494 = vadd.xlane.f32.xlu0 %v5021_v60  ;;  %v1528_v63 = vmul.f32 %v5021_v60, %v5021_v60 }
 0x25c   : > { %1558 = vadd.xlane.f32.xlu1 %v1528_v63  ;;  %v1415_v62 = vpop.f32.mrf.mxu1 }
 0x25d   : > { %v1416_v0 = vadd.f32 %v4892_v53, %v1415_v62  ;;  %v1467_v19 = vpop.xlane.xlu2 %1466 }
 0x25e   : > { %v1498_v23 = vmul.f32 %v1467_v19, %v4685_v1 }
 0x25f   : > { %v1449_v6 = vmul.f32 0.01, %v1416_v0  ;;  %v1531_v47 = vpop.xlane.xlu0 %1530  ;;  %vm1433_vm1 = vcmp.gt.f32.partialorder %v1416_v0, 0.0 }
 0x260   : > { %v1578_v16 = vmul.f32 %v1498_v23, %v1498_v23  ;;  %v1562_v7 = vmul.f32 %v1531_v47, %v4685_v1  ;;  %v1626_v5 = vsub.f32 %v4895_v38, %v1498_v23 }
 0x261   : > { %v5035_v32 = vsel %vm1433_vm1, %v1416_v0, %v1449_v6 }
 0x262   : > { %v1594_v9 = vsub.f32 %v1562_v7, %v1578_v16  ;;  %1496 = vadd.xlane.f32.xlu2 %v5035_v32  ;;  %v1529_v57 = vmul.f32 %v5035_v32, %v5035_v32 }
 0x264   : > { %v1610_v14 = vmax.f32 %v1594_v9, 0.0  ;;  %1560 = vadd.xlane.f32.xlu0 %v1529_v57 }
 0x265   : > { %v1469_v53 = vpop.xlane.xlu1 %1468 }
 0x266   : > { %v1642_v2 = vadd.f32 1e-05, %v1610_v14  ;;  %v1499_v29 = vmul.f32 %v1469_v53, %v4685_v1 }
 0x267   : > { %v1533_v39 = vpop.xlane.xlu2 %1532 }
 0x268   : > { %3832 = vrsqrt.f32 %v1642_v2  ;;  %v1579_v4 = vmul.f32 %v1499_v29, %v1499_v29  ;;  %v1563_v20 = vmul.f32 %v1533_v39, %v4685_v1  ;;  %vm1664_vm3 = vweird.f32 %v1642_v2 }
 0x269   : > { %v1627_v9 = vsub.f32 %v4901_v34, %v1499_v29 }
 0x26a   : > { %v1595_v3 = vsub.f32 %v1563_v20, %v1579_v4 }
 0x26c   : > { %v1611_v21 = vmax.f32 %v1595_v3, 0.0 }
 0x26d   : > { %v1471_v25 = vpop.xlane.xlu0 %1470 }
 0x26e   : > { %v3833_v52 = vpop.eup %3832  ;;  %v1643_v45 = vadd.f32 1e-05, %v1611_v21  ;;  %v5043_v35 = vmul.f32 %v1471_v25, %v4685_v1 }
 0x26f   : > { %v1659_v13 = vmul.f32 %v3833_v52, %v1642_v2  ;;  %v1535_v28 = vpop.xlane.xlu1 %1534  ;;  %vm1665_vm2 = vweird.f32 %v3833_v52 }
 0x270   : > { %3834 = vrsqrt.f32 %v1643_v45  ;;  %v1580_v46 = vmul.f32 %v5043_v35, %v5043_v35  ;;  %v1564_v37 = vmul.f32 %v1535_v28, %v4685_v1  ;;  %vm1666_vm4 = vmor %vm1664_vm3, %vm1665_vm2  ;;  %vm1674_vm6 = vweird.f32 %v1643_v45 }
 0x271   : > { %v1660_v33 = vmul.f32 %v3833_v52, %v1659_v13 }
 0x272   : > { %v1596_v22 = vsub.f32 %v1564_v37, %v1580_v46  ;;  %v1628_v46 = vsub.f32 %v4907_v11, %v5043_v35 }
 0x273   : > { %v1661_v17 = vmul.f32 0.5, %v1660_v33 }
 0x274   : > { %v1612_v40 = vmax.f32 %v1596_v22, 0.0 }
 0x275   : > { %v1473_v49 = vpop.xlane.xlu2 %1472  ;;  %v1662_v27 = vsub.f32 1.5, %v1661_v17 }
 0x276   : > { %v3835_v10 = vpop.eup %3834  ;;  %v1644_v26 = vadd.f32 1e-05, %v1612_v40  ;;  %v5049_v41 = vmul.f32 %v1473_v49, %v4685_v1 }
 0x277   : > { %v1669_v42 = vmul.f32 %v3835_v10, %v1643_v45  ;;  %v1537_v58 = vpop.xlane.xlu0 %1536  ;;  %v1663_v59 = vmul.f32 %v3833_v52, %v1662_v27  ;;  %vm1675_vm5 = vweird.f32 %v3835_v10 }
 0x278   : > { %3836 = vrsqrt.f32 %v1644_v26  ;;  %v1581_v54 = vmul.f32 %v5049_v41, %v5049_v41  ;;  %v1565_v55 = vmul.f32 %v1537_v58, %v4685_v1  ;;  %vm1676_vm7 = vmor %vm1674_vm6, %vm1675_vm5  ;;  %vm1684_vm9 = vweird.f32 %v1644_v26 }
 0x279   : > { %v1667_v51 = vsel %vm1666_vm4, %v3833_v52, %v1663_v59  ;;  %v1670_v44 = vmul.f32 %v3835_v10, %v1669_v42 }
 0x27a   : > { %v1597_v61 = vsub.f32 %v1565_v55, %v1581_v54  ;;  %v1818_v63 = vmul.f32 %v1667_v51, %v1626_v5  ;;  %v1629_v55 = vsub.f32 %v4913_v30, %v5049_v41 }
 0x27b   : > { %v1671_v43 = vmul.f32 0.5, %v1670_v44 }
 0x27c   : > { %v1613_v62 = vmax.f32 %v1597_v61, 0.0  ;;  %1870 = vmatmul.f32.vlgmr.msra.gmra.mxu2 %v1818_v63 }
 0x27d   : > { %v1475_v0 = vpop.xlane.xlu1 %1474  ;;  %v1672_v19 = vsub.f32 1.5, %v1671_v43 }
 0x27e   : > { %v3837_v6 = vpop.eup %3836  ;;  %v1645_v47 = vadd.f32 1e-05, %v1613_v62  ;;  %v5056_v38 = vmul.f32 %v1475_v0, %v4685_v1 }
 0x27f   : > { %v1679_v23 = vmul.f32 %v3837_v6, %v1644_v26  ;;  %v1539_v16 = vpop.xlane.xlu2 %1538  ;;  %v1673_v7 = vmul.f32 %v3835_v10, %v1672_v19  ;;  %vm1685_vm8 = vweird.f32 %v3837_v6 }
 0x280   : > { %3838 = vrsqrt.f32 %v1645_v47  ;;  %v1582_v57 = vmul.f32 %v5056_v38, %v5056_v38  ;;  %v1566_v14 = vmul.f32 %v1539_v16, %v4685_v1  ;;  %vm1686_vm10 = vmor %vm1684_vm9, %vm1685_vm8  ;;  %vm1694_vm12 = vweird.f32 %v1645_v47 }
 0x281   : > { %v1677_v53 = vsel %vm1676_vm7, %v3835_v10, %v1673_v7  ;;  %v1680_v2 = vmul.f32 %v3837_v6, %v1679_v23 }
 0x282   : > { %v1598_v39 = vsub.f32 %v1566_v14, %v1582_v57  ;;  %v1819_v4 = vmul.f32 %v1677_v53, %v1627_v9  ;;  %v1630_v57 = vsub.f32 %v4919_v50, %v5056_v38 }
 0x283   : > { %v1681_v20 = vmul.f32 0.5, %v1680_v2 }
 0x284   : > { %v1614_v3 = vmax.f32 %v1598_v39, 0.0  ;;  %1873 = vmatmul.f32.gmra.mxu2 %v1819_v4 }
 0x285   : > { %v1477_v21 = vpop.xlane.xlu0 %1476  ;;  %v1682_v25 = vsub.f32 1.5, %v1681_v20 }
 0x286   : > { %v3839_v52 = vpop.eup %3838  ;;  %v1646_v45 = vadd.f32 1e-05, %v1614_v3  ;;  %v5063_v34 = vmul.f32 %v1477_v21, %v4685_v1 }
 0x287   : > { %v1689_v29 = vmul.f32 %v3839_v52, %v1645_v47  ;;  %v1541_v13 = vpop.xlane.xlu1 %1540  ;;  %v1683_v28 = vmul.f32 %v3837_v6, %v1682_v25  ;;  %vm1695_vm11 = vweird.f32 %v3839_v52 }
 0x288   : > { %3840 = vrsqrt.f32 %v1646_v45  ;;  %v1583_v37 = vmul.f32 %v5063_v34, %v5063_v34  ;;  %v1567_v33 = vmul.f32 %v1541_v13, %v4685_v1  ;;  %vm1696_vm13 = vmor %vm1694_vm12, %vm1695_vm11  ;;  %vm1704_vm15 = vweird.f32 %v1646_v45 }
 0x289   : > { %v1687_v22 = vsel %vm1686_vm10, %v3837_v6, %v1683_v28  ;;  %v1690_v17 = vmul.f32 %v3839_v52, %v1689_v29 }
 0x28a   : > { %v1599_v40 = vsub.f32 %v1567_v33, %v1583_v37  ;;  %v1820_v49 = vmul.f32 %v1687_v22, %v1628_v46  ;;  %v1631_v46 = vsub.f32 %v4925_v56, %v5063_v34 }
 0x28b   : > { %v1691_v27 = vmul.f32 0.5, %v1690_v17 }
 0x28c   : > { %v1615_v10 = vmax.f32 %v1599_v40, 0.0  ;;  %1876 = vmatmul.f32.gmra.mxu2 %v1820_v49 }
 0x28d   : > { %v1479_v42 = vpop.xlane.xlu2 %1478  ;;  %v1692_v58 = vsub.f32 1.5, %v1691_v27 }
 0x28e   : > { %v3841_v26 = vpop.eup %3840  ;;  %v1647_v59 = vadd.f32 1e-05, %v1615_v10  ;;  %v5071_v11 = vmul.f32 %v1479_v42, %v4685_v1 }
 0x28f   : > { %v1699_v35 = vmul.f32 %v3841_v26, %v1646_v45  ;;  %v1543_v5 = vpop.xlane.xlu0 %1542  ;;  %v1693_v54 = vmul.f32 %v3839_v52, %v1692_v58  ;;  %vm1705_vm14 = vweird.f32 %v3841_v26 }
 0x290   : > { %3842 = vrsqrt.f32 %v1647_v59  ;;  %v1584_v51 = vmul.f32 %v5071_v11, %v5071_v11  ;;  %v1568_v44 = vmul.f32 %v1543_v5, %v4685_v1  ;;  %vm1706_vm0 = vmor %vm1704_vm15, %vm1705_vm14  ;;  %vm1714_vm2 = vweird.f32 %v1647_v59 }
 0x291   : > { %v1697_v61 = vsel %vm1696_vm13, %v3839_v52, %v1693_v54  ;;  %v1700_v63 = vmul.f32 %v3841_v26, %v1699_v35  ;;  %v1632_v54 = vsub.f32 %v4931_v12, %v5071_v11 }
 0x292   : > { %v1600_v43 = vsub.f32 %v1568_v44, %v1584_v51  ;;  %v1821_v62 = vmul.f32 %v1697_v61, %v1629_v55 }
 0x293   : > { %v1701_v0 = vmul.f32 0.5, %v1700_v63 }
 0x294   : > { %v1616_v19 = vmax.f32 %v1600_v43, 0.0  ;;  %1879 = vmatmul.f32.gmra.mxu2 %v1821_v62 }
 0x295   : > { %v1481_v6 = vpop.xlane.xlu1 %1480  ;;  %v1702_v23 = vsub.f32 1.5, %v1701_v0 }
 0x296   : > { %v3843_v47 = vpop.eup %3842  ;;  %v1648_v16 = vadd.f32 1e-05, %v1616_v19  ;;  %v5079_v30 = vmul.f32 %v1481_v6, %v4685_v1 }
 0x297   : > { %v1709_v41 = vmul.f32 %v3843_v47, %v1647_v59  ;;  %v1545_v7 = vpop.xlane.xlu2 %1544  ;;  %v1703_v9 = vmul.f32 %v3841_v26, %v1702_v23  ;;  %vm1715_vm1 = vweird.f32 %v3843_v47 }
 0x298   : > { %3844 = vrsqrt.f32 %v1648_v16  ;;  %v1585_v14 = vmul.f32 %v5079_v30, %v5079_v30  ;;  %v1569_v53 = vmul.f32 %v1545_v7, %v4685_v1  ;;  %vm1716_vm3 = vmor %vm1714_vm2, %vm1715_vm1  ;;  %vm1724_vm5 = vweird.f32 %v1648_v16 }
 0x299   : > { %v1707_v2 = vsel %vm1706_vm0, %v3841_v26, %v1703_v9  ;;  %v1710_v39 = vmul.f32 %v3843_v47, %v1709_v41  ;;  %v1633_v7 = vsub.f32 %v4937_v48, %v5079_v30 }
 0x29a   : > { %v1601_v4 = vsub.f32 %v1569_v53, %v1585_v14  ;;  %v1822_v20 = vmul.f32 %v1707_v2, %v1630_v57 }
 0x29b   : > { %v1711_v3 = vmul.f32 0.5, %v1710_v39 }
 0x29c   : > { %v1617_v21 = vmax.f32 %v1601_v4, 0.0  ;;  %1882 = vmatmul.f32.gmra.mxu2 %v1822_v20 }
 0x29d   : > { %v1483_v25 = vpop.xlane.xlu0 %1482  ;;  %v1712_v52 = vsub.f32 1.5, %v1711_v3 }
 0x29e   : > { %v3845_v45 = vpop.eup %3844  ;;  %v1649_v29 = vadd.f32 1e-05, %v1617_v21  ;;  %v5087_v50 = vmul.f32 %v1483_v25, %v4685_v1 }
 0x29f   : > { %v1719_v38 = vmul.f32 %v3845_v45, %v1648_v16  ;;  %v1547_v13 = vpop.xlane.xlu1 %1546  ;;  %v1713_v28 = vmul.f32 %v3843_v47, %v1712_v52  ;;  %vm1725_vm4 = vweird.f32 %v3845_v45 }
 0x2a0   : > { %3846 = vrsqrt.f32 %v1649_v29  ;;  %v1586_v37 = vmul.f32 %v5087_v50, %v5087_v50  ;;  %v1570_v33 = vmul.f32 %v1547_v13, %v4685_v1  ;;  %vm1726_vm6 = vmor %vm1724_vm5, %vm1725_vm4  ;;  %vm1734_vm8 = vweird.f32 %v1649_v29 }
 0x2a1   : > { %v1717_v22 = vsel %vm1716_vm3, %v3843_v47, %v1713_v28  ;;  %v1720_v17 = vmul.f32 %v3845_v45, %v1719_v38  ;;  %v1634_v38 = vsub.f32 %v4943_v15, %v5087_v50 }
 0x2a2   : > { %v1602_v40 = vsub.f32 %v1570_v33, %v1586_v37  ;;  %v1823_v49 = vmul.f32 %v1717_v22, %v1631_v46 }
 0x2a3   : > { %v1721_v27 = vmul.f32 0.5, %v1720_v17 }
 0x2a4   : > { %v1618_v10 = vmax.f32 %v1602_v40, 0.0  ;;  %1885 = vmatmul.f32.gmra.mxu2 %v1823_v49 }
 0x2a5   : > { %v1485_v42 = vpop.xlane.xlu2 %1484  ;;  %v1722_v58 = vsub.f32 1.5, %v1721_v27 }
 0x2a6   : > { %v3847_v26 = vpop.eup %3846  ;;  %v1650_v59 = vadd.f32 1e-05, %v1618_v10  ;;  %v5095_v56 = vmul.f32 %v1485_v42, %v4685_v1 }
 0x2a7   : > { %v1729_v34 = vmul.f32 %v3847_v26, %v1649_v29  ;;  %v1549_v35 = vpop.xlane.xlu0 %1548  ;;  %v1723_v5 = vmul.f32 %v3845_v45, %v1722_v58  ;;  %vm1735_vm7 = vweird.f32 %v3847_v26 }
 0x2a8   : > { %3848 = vrsqrt.f32 %v1650_v59  ;;  %v1587_v55 = vmul.f32 %v5095_v56, %v5095_v56  ;;  %v1571_v51 = vmul.f32 %v1549_v35, %v4685_v1  ;;  %vm1736_vm9 = vmor %vm1734_vm8, %vm1735_vm7  ;;  %vm1744_vm11 = vweird.f32 %v1650_v59 }
 0x2a9   : > { %v1727_v44 = vsel %vm1726_vm6, %v3845_v45, %v1723_v5  ;;  %v1730_v61 = vmul.f32 %v3847_v26, %v1729_v34 }
 0x2aa   : > { %v1603_v63 = vsub.f32 %v1571_v51, %v1587_v55  ;;  %v1824_v43 = vmul.f32 %v1727_v44, %v1632_v54 }
 0x2ab   : > { %v1731_v62 = vmul.f32 0.5, %v1730_v61 }
 0x2ac   : > { %v1619_v0 = vmax.f32 %v1603_v63, 0.0  ;;  %1888 = vmatmul.f32.gmra.mxu2 %v1824_v43 }
 0x2ad   : > { %v1487_v19 = vpop.xlane.xlu1 %1486  ;;  %v1732_v6 = vsub.f32 1.5, %v1731_v62 }
 0x2ae   : > { %v3849_v23 = vpop.eup %3848  ;;  %v1651_v47 = vadd.f32 1e-05, %v1619_v0  ;;  %v5103_v12 = vmul.f32 %v1487_v19, %v4685_v1 }
 0x2af   : > { %v1739_v11 = vmul.f32 %v3849_v23, %v1650_v59  ;;  %v1551_v16 = vpop.xlane.xlu2 %1550  ;;  %v1733_v41 = vmul.f32 %v3847_v26, %v1732_v6  ;;  %vm1745_vm10 = vweird.f32 %v3849_v23  ;;  %v1635_v59 = vsub.f32 %v4949_v8, %v5095_v56 }
 0x2b0   : > { %3850 = vrsqrt.f32 %v1651_v47  ;;  %v1588_v9 = vmul.f32 %v5103_v12, %v5103_v12  ;;  %v1572_v57 = vmul.f32 %v1551_v16, %v4685_v1  ;;  %vm1746_vm12 = vmor %vm1744_vm11, %vm1745_vm10  ;;  %vm1754_vm14 = vweird.f32 %v1651_v47 }
 0x2b1   : > { %v1737_v14 = vsel %vm1736_vm9, %v3847_v26, %v1733_v41  ;;  %v1740_v53 = vmul.f32 %v3849_v23, %v1739_v11 }
 0x2b2   : > { %v1604_v2 = vsub.f32 %v1572_v57, %v1588_v9  ;;  %v1825_v39 = vmul.f32 %v1737_v14, %v1633_v7 }
 0x2b3   : > { %v1741_v4 = vmul.f32 0.5, %v1740_v53 }
 0x2b4   : > { %v1620_v20 = vmax.f32 %v1604_v2, 0.0  ;;  %1891 = vmatmul.f32.gmra.mxu2 %v1825_v39 }
 0x2b5   : > { %v1489_v3 = vpop.xlane.xlu0 %1488  ;;  %v1742_v21 = vsub.f32 1.5, %v1741_v4 }
 0x2b6   : > { %v3851_v25 = vpop.eup %3850  ;;  %v1652_v52 = vadd.f32 1e-05, %v1620_v20  ;;  %v5111_v48 = vmul.f32 %v1489_v3, %v4685_v1 }
 0x2b7   : > { %v1749_v30 = vmul.f32 %v3851_v25, %v1651_v47  ;;  %v1553_v45 = vpop.xlane.xlu1 %1552  ;;  %v1743_v29 = vmul.f32 %v3849_v23, %v1742_v21  ;;  %vm1755_vm13 = vweird.f32 %v3851_v25 }
 0x2b8   : > { %3852 = vrsqrt.f32 %v1652_v52  ;;  %v1589_v13 = vmul.f32 %v5111_v48, %v5111_v48  ;;  %v1573_v28 = vmul.f32 %v1553_v45, %v4685_v1  ;;  %vm1756_vm15 = vmor %vm1754_vm14, %vm1755_vm13  ;;  %vm1764_vm1 = vweird.f32 %v1652_v52 }
 0x2b9   : > { %v1747_v46 = vsel %vm1746_vm12, %v3849_v23, %v1743_v29  ;;  %v1750_v37 = vmul.f32 %v3851_v25, %v1749_v30  ;;  %v1636_v23 = vsub.f32 %v4955_v24, %v5103_v12  ;;  %v1637_v21 = vsub.f32 %v4967_v31, %v5111_v48 }
 0x2ba   : > { %v1605_v33 = vsub.f32 %v1573_v28, %v1589_v13  ;;  %v1826_v22 = vmul.f32 %v1747_v46, %v1634_v38 }
 0x2bb   : > { %v1751_v17 = vmul.f32 0.5, %v1750_v37 }
 0x2bc   : > { %v1621_v40 = vmax.f32 %v1605_v33, 0.0  ;;  %1894 = vmatmul.f32.gmra.mxu2 %v1826_v22 }
 0x2bd   : > { %v1491_v49 = vpop.xlane.xlu2 %1490  ;;  %v1752_v27 = vsub.f32 1.5, %v1751_v17 }
 0x2be   : > { %v3853_v10 = vpop.eup %3852  ;;  %v1653_v42 = vadd.f32 1e-05, %v1621_v40  ;;  %v5119_v15 = vmul.f32 %v1491_v49, %v4685_v1 }
 0x2bf   : > { %v1759_v50 = vmul.f32 %v3853_v10, %v1652_v52  ;;  %v1555_v58 = vpop.xlane.xlu0 %1554  ;;  %v1753_v26 = vmul.f32 %v3851_v25, %v1752_v27  ;;  %vm1765_vm0 = vweird.f32 %v3853_v10 }
 0x2c0   : > { %3854 = vrsqrt.f32 %v1653_v42  ;;  %v1590_v34 = vmul.f32 %v5119_v15, %v5119_v15  ;;  %v1574_v35 = vmul.f32 %v1555_v58, %v4685_v1  ;;  %vm1766_vm2 = vmor %vm1764_vm1, %vm1765_vm0  ;;  %vm1774_vm4 = vweird.f32 %v1653_v42 }
 0x2c1   : > { %v1757_v5 = vsel %vm1756_vm15, %v3851_v25, %v1753_v26  ;;  %v1760_v54 = vmul.f32 %v3853_v10, %v1759_v50  ;;  %v1638_v49 = vsub.f32 %v4985_v36, %v5119_v15 }
 0x2c2   : > { %v1606_v55 = vsub.f32 %v1574_v35, %v1590_v34  ;;  %v1827_v51 = vmul.f32 %v1757_v5, %v1635_v59 }
 0x2c3   : > { %v1761_v44 = vmul.f32 0.5, %v1760_v54 }
 0x2c4   : > { %v1622_v61 = vmax.f32 %v1606_v55, 0.0  ;;  %1897 = vmatmul.f32.gmra.mxu2 %v1827_v51 }
 0x2c5   : > { %v1493_v63 = vpop.xlane.xlu1 %1492  ;;  %v1762_v43 = vsub.f32 1.5, %v1761_v44 }
 0x2c6   : > { %v3855_v62 = vpop.eup %3854  ;;  %v1654_v0 = vadd.f32 1e-05, %v1622_v61  ;;  %v5127_v8 = vmul.f32 %v1493_v63, %v4685_v1 }
 0x2c7   : > { %v1769_v56 = vmul.f32 %v3855_v62, %v1653_v42  ;;  %v1557_v19 = vpop.xlane.xlu2 %1556  ;;  %v1763_v6 = vmul.f32 %v3853_v10, %v1762_v43  ;;  %vm1775_vm3 = vweird.f32 %v3855_v62 }
 0x2c8   : > { %3856 = vrsqrt.f32 %v1654_v0  ;;  %v1591_v47 = vmul.f32 %v5127_v8, %v5127_v8  ;;  %v1575_v11 = vmul.f32 %v1557_v19, %v4685_v1  ;;  %vm1776_vm5 = vmor %vm1774_vm4, %vm1775_vm3  ;;  %vm1784_vm7 = vweird.f32 %v1654_v0 }
 0x2c9   : > { %v1767_v16 = vsel %vm1766_vm2, %v3853_v10, %v1763_v6  ;;  %v1770_v41 = vmul.f32 %v3855_v62, %v1769_v56  ;;  %v1639_v36 = vsub.f32 %v5003_v18, %v5127_v8 }
 0x2ca   : > { %v1607_v7 = vsub.f32 %v1575_v11, %v1591_v47  ;;  %v1828_v9 = vmul.f32 %v1767_v16, %v1636_v23 }
 0x2cb   : > { %v1771_v57 = vmul.f32 0.5, %v1770_v41 }
 0x2cc   : > { %v1623_v14 = vmax.f32 %v1607_v7, 0.0  ;;  %1900 = vmatmul.f32.gmra.mxu2 %v1828_v9 }
 0x2cd   : > { %v1495_v53 = vpop.xlane.xlu0 %1494  ;;  %v1772_v2 = vsub.f32 1.5, %v1771_v57 }
 0x2ce   : > { %v3857_v39 = vpop.eup %3856  ;;  %v1655_v4 = vadd.f32 1e-05, %v1623_v14  ;;  %v5135_v24 = vmul.f32 %v1495_v53, %v4685_v1 }
 0x2cf   : > { %v1779_v12 = vmul.f32 %v3857_v39, %v1654_v0  ;;  %v1559_v20 = vpop.xlane.xlu1 %1558  ;;  %v1773_v3 = vmul.f32 %v3855_v62, %v1772_v2  ;;  %vm1785_vm6 = vweird.f32 %v3857_v39 }
 0x2d0   : > { %3858 = vrsqrt.f32 %v1655_v4  ;;  %v1592_v25 = vmul.f32 %v5135_v24, %v5135_v24  ;;  %v1576_v52 = vmul.f32 %v1559_v20, %v4685_v1  ;;  %vm1786_vm8 = vmor %vm1784_vm7, %vm1785_vm6  ;;  %vm1794_vm10 = vweird.f32 %v1655_v4 }
 0x2d1   : > { %v1777_v30 = vsel %vm1776_vm5, %v3855_v62, %v1773_v3  ;;  %v1780_v45 = vmul.f32 %v3857_v39, %v1779_v12  ;;  %v1640_v19 = vsub.f32 %v5021_v60, %v5135_v24  ;;  %v5154_v60 = vld [vmem:[%s5738_s13] ss:$0 sm:$0xff] }
 0x2d2   : > { %v1608_v29 = vsub.f32 %v1576_v52, %v1592_v25  ;;  %v1829_v38 = vmul.f32 %v1777_v30, %v1637_v21 }
 0x2d3   : > { %v1781_v13 = vmul.f32 0.5, %v1780_v45 }
 0x2d4   : > { %v1624_v28 = vmax.f32 %v1608_v29, 0.0  ;;  %1903 = vmatmul.f32.gmra.mxu2 %v1829_v38 }
 0x2d5   : > { %v1497_v46 = vpop.xlane.xlu2 %1496  ;;  %v1782_v37 = vsub.f32 1.5, %v1781_v13 }
 0x2d6   : > { %v3859_v33 = vpop.eup %3858  ;;  %v1656_v22 = vadd.f32 1e-05, %v1624_v28  ;;  %v1513_v31 = vmul.f32 %v1497_v46, %v4685_v1 }
 0x2d7   : > { %v1789_v48 = vmul.f32 %v3859_v33, %v1655_v4  ;;  %v1561_v17 = vpop.xlane.xlu0 %1560  ;;  %v1783_v40 = vmul.f32 %v3857_v39, %v1782_v37  ;;  %vm1795_vm9 = vweird.f32 %v3859_v33 }
 0x2d8   : > { %3860 = vrsqrt.f32 %v1656_v22  ;;  %v1593_v27 = vmul.f32 %v1513_v31, %v1513_v31  ;;  %v1577_v10 = vmul.f32 %v1561_v17, %v4685_v1  ;;  %vm1796_vm11 = vmor %vm1794_vm10, %vm1795_vm9  ;;  %vm1804_vm13 = vweird.f32 %v1656_v22 }
 0x2d9   : > { %v1787_v42 = vsel %vm1786_vm8, %v3857_v39, %v1783_v40  ;;  %v1790_v50 = vmul.f32 %v3859_v33, %v1789_v48  ;;  %v1641_v16 = vsub.f32 %v5035_v32, %v1513_v31 }
 0x2da   : > { %v1609_v58 = vsub.f32 %v1577_v10, %v1593_v27  ;;  %v1830_v26 = vmul.f32 %v1787_v42, %v1638_v49 }
 0x2db   : > { %v1791_v59 = vmul.f32 0.5, %v1790_v50 }
 0x2dc   : > { %v1625_v34 = vmax.f32 %v1609_v58, 0.0  ;;  %1906 = vmatmul.f32.gmra.mxu2 %v1830_v26 }
 0x2dd   : > { %v1792_v35 = vsub.f32 1.5, %v1791_v59 }
 0x2de   : > { %v3861_v5 = vpop.eup %3860  ;;  %v1657_v54 = vadd.f32 1e-05, %v1625_v34 }
 0x2df   : > { %v1799_v55 = vmul.f32 %v3861_v5, %v1656_v22  ;;  %v1793_v51 = vmul.f32 %v3859_v33, %v1792_v35  ;;  %vm1805_vm12 = vweird.f32 %v3861_v5 }
 0x2e0   : > { %3862 = vrsqrt.f32 %v1657_v54  ;;  %vm1806_vm14 = vmor %vm1804_vm13, %vm1805_vm12  ;;  %vm1814_vm0 = vweird.f32 %v1657_v54 }
 0x2e1   : > { %v1797_v15 = vsel %vm1796_vm11, %v3859_v33, %v1793_v51  ;;  %v1800_v44 = vmul.f32 %v3861_v5, %v1799_v55 }
 0x2e2   : > { %v1831_v61 = vmul.f32 %v1797_v15, %v1639_v36 }
 0x2e3   : > { %v1801_v63 = vmul.f32 0.5, %v1800_v44 }
 0x2e4   : > { %1909 = vmatmul.f32.gmra.mxu2 %v1831_v61 }
 0x2e5   : > { %v1802_v43 = vsub.f32 1.5, %v1801_v63 }
 0x2e6   : > { %v3863_v62 = vpop.eup %3862 }
 0x2e7   : > { %v1809_v0 = vmul.f32 %v3863_v62, %v1657_v54  ;;  %v1803_v56 = vmul.f32 %v3861_v5, %v1802_v43  ;;  %vm1815_vm15 = vweird.f32 %v3863_v62  ;;  %v2350_v43 = vld [vmem:[#allocation2 + $0x78] sm:$0xff] }
 0x2e8   : > { %vm1816_vm1 = vmor %vm1814_vm0, %vm1815_vm15  ;;  %2355 = vmatpush.msrb.mxu3 %v2350_v43 }
 0x2e9   : > { %v1807_v6 = vsel %vm1806_vm14, %v3861_v5, %v1803_v56  ;;  %v1810_v23 = vmul.f32 %v3863_v62, %v1809_v0  ;;  %v2348_v56 = vld [vmem:[#allocation2 + $0x68] sm:$0xff] }
 0x2ea   : > { %v1832_v18 = vmul.f32 %v1807_v6, %v1640_v19 }
 0x2eb   : > { %v1811_v8 = vmul.f32 0.5, %v1810_v23 }
 0x2ec   : > { %1912 = vmatmul.f32.gmra.mxu2 %v1832_v18 }
 0x2ed   : > { %v1812_v47 = vsub.f32 1.5, %v1811_v8  ;;  %v2347_v8 = vld [vmem:[#allocation2 + $0x60] sm:$0xff] }
 0x2ef   : > { %v1813_v11 = vmul.f32 %v3863_v62, %v1812_v47  ;;  %v2346_v47 = vld [vmem:[#allocation2 + $0x58] sm:$0xff] }
 0x2f1   : > { %v1817_v41 = vsel %vm1816_vm1, %v3863_v62, %v1813_v11  ;;  %v2349_v62 = vld [vmem:[#allocation2 + $0x70] sm:$0xff] }
 0x2f2   : > { %v1833_v7 = vmul.f32 %v1817_v41, %v1641_v16  ;;  %2356 = vmatpush.msrb.mxu3 %v2349_v62  ;;  %v2345_v41 = vld [vmem:[#allocation2 + $0x50] sm:$0xff] }
 0x2f4   : > { %1915 = vmatmul.f32.gmra.mxu2 %v1833_v7  ;;  %2357 = vmatpush.msrb.mxu3 %v2348_v56 }
 0x2f6   : > { %2358 = vmatpush.msrb.mxu3 %v2347_v8 }
 0x2f8   : > { %2359 = vmatpush.msrb.mxu3 %v2346_v47 }
 0x2fa   : > { %2360 = vmatpush.msrb.mxu3 %v2345_v41 }
 0x2ff   : > { %v1871_v9 = vpop.f32.mrf.mxu2 }
 0x300   : > { %v1872_v57 = vadd.f32 %v5154_v60, %v1871_v9 }
 0x302   : > { %v1935_v14 = vmul.f32 0.01, %v1872_v57  ;;  %vm1919_vm2 = vcmp.gt.f32.partialorder %v1872_v57, 0.0 }
 0x304   : > { %v5157_v53 = vsel %vm1919_vm2, %v1872_v57, %v1935_v14  ;;  %v2344_v14 = vld [vmem:[#allocation2 + $0x48] sm:$0xff] }
 0x305   : > { %1967 = vadd.xlane.f32.xlu1 %v5157_v53  ;;  %v2015_v32 = vmul.f32 %v5157_v53, %v5157_v53  ;;  %2361 = vmatpush.msrb.mxu3 %v2344_v14 }
 0x307   : > { %v1874_v2 = vpop.f32.mrf.mxu2  ;;  %2031 = vadd.xlane.f32.xlu2 %v2015_v32 }
 0x308   : > { %v1875_v39 = vadd.f32 %v5154_v60, %v1874_v2 }
 0x30a   : > { %v1936_v4 = vmul.f32 0.01, %v1875_v39  ;;  %vm1920_vm3 = vcmp.gt.f32.partialorder %v1875_v39, 0.0 }
 0x30c   : > { %v5163_v24 = vsel %vm1920_vm3, %v1875_v39, %v1936_v4 }
 0x30d   : > { %1969 = vadd.xlane.f32.xlu0 %v5163_v24  ;;  %v2016_v12 = vmul.f32 %v5163_v24, %v5163_v24 }
 0x30f   : > { %2033 = vadd.xlane.f32.xlu1 %v2016_v12  ;;  %v1877_v20 = vpop.f32.mrf.mxu2 }
 0x310   : > { %v1878_v3 = vadd.f32 %v5154_v60, %v1877_v20 }
 0x312   : > { %v1937_v21 = vmul.f32 0.01, %v1878_v3  ;;  %vm1921_vm4 = vcmp.gt.f32.partialorder %v1878_v3, 0.0 }
 0x314   : > { %v5169_v25 = vsel %vm1921_vm4, %v1878_v3, %v1937_v21  ;;  %v2343_v21 = vld [vmem:[#allocation2 + $0x40] sm:$0xff] }
 0x315   : > { %1971 = vadd.xlane.f32.xlu2 %v5169_v25  ;;  %v2017_v52 = vmul.f32 %v5169_v25, %v5169_v25  ;;  %2362 = vmatpush.msrb.mxu3 %v2343_v21 }
 0x317   : > { %2035 = vadd.xlane.f32.xlu0 %v2017_v52  ;;  %v1880_v30 = vpop.f32.mrf.mxu2 }
 0x318   : > { %v1881_v45 = vadd.f32 %v5154_v60, %v1880_v30 }
 0x31a   : > { %v1938_v29 = vmul.f32 0.01, %v1881_v45  ;;  %vm1922_vm5 = vcmp.gt.f32.partialorder %v1881_v45, 0.0 }
 0x31c   : > { %v5175_v38 = vsel %vm1922_vm5, %v1881_v45, %v1938_v29  ;;  %v2342_v45 = vld [vmem:[#allocation2 + $0x38] sm:$0xff] }
 0x31d   : > { %1973 = vadd.xlane.f32.xlu1 %v5175_v38  ;;  %v2018_v13 = vmul.f32 %v5175_v38, %v5175_v38  ;;  %2363 = vmatpush.msrb.mxu3 %v2342_v45 }
 0x31f   : > { %v1883_v28 = vpop.f32.mrf.mxu2  ;;  %2037 = vadd.xlane.f32.xlu2 %v2018_v13  ;;  %v2341_v13 = vld [vmem:[#allocation2 + $0x30] sm:$0xff] }
 0x320   : > { %v1884_v46 = vadd.f32 %v5154_v60, %v1883_v28  ;;  %2364 = vmatpush.msrb.mxu3 %v2341_v13 }
 0x322   : > { %v1939_v37 = vmul.f32 0.01, %v1884_v46  ;;  %vm1923_vm6 = vcmp.gt.f32.partialorder %v1884_v46, 0.0 }
 0x324   : > { %v5181_v33 = vsel %vm1923_vm6, %v1884_v46, %v1939_v37  ;;  %v2340_v46 = vld [vmem:[#allocation2 + $0x28] sm:$0xff] }
 0x325   : > { %1975 = vadd.xlane.f32.xlu0 %v5181_v33  ;;  %v2019_v22 = vmul.f32 %v5181_v33, %v5181_v33  ;;  %2365 = vmatpush.msrb.mxu3 %v2340_v46 }
 0x327   : > { %2039 = vadd.xlane.f32.xlu1 %v2019_v22  ;;  %v1886_v31 = vpop.f32.mrf.mxu2  ;;  %v2339_v22 = vld [vmem:[#allocation2 + $0x20] sm:$0xff] }
 0x328   : > { %v1887_v48 = vadd.f32 %v5154_v60, %v1886_v31  ;;  %2366 = vmatpush.msrb.mxu3 %v2339_v22 }
 0x32a   : > { %v1940_v17 = vmul.f32 0.01, %v1887_v48  ;;  %vm1924_vm7 = vcmp.gt.f32.partialorder %v1887_v48, 0.0 }
 0x32c   : > { %v5187_v40 = vsel %vm1924_vm7, %v1887_v48, %v1940_v17  ;;  %v2338_v17 = vld [vmem:[#allocation2 + $0x18] sm:$0xff] }
 0x32d   : > { %1977 = vadd.xlane.f32.xlu2 %v5187_v40  ;;  %v2020_v49 = vmul.f32 %v5187_v40, %v5187_v40  ;;  %2367 = vmatpush.msrb.mxu3 %v2338_v17 }
 0x32f   : > { %2041 = vadd.xlane.f32.xlu0 %v2020_v49  ;;  %v1889_v27 = vpop.f32.mrf.mxu2 }
 0x330   : > { %v1890_v10 = vadd.f32 %v5154_v60, %v1889_v27  ;;  %v2337_v27 = vld [vmem:[#allocation2 + $0x10] sm:$0xff] }
 0x331   : > { %2368 = vmatpush.msrb.mxu3 %v2337_v27 }
 0x332   : > { %v1941_v42 = vmul.f32 0.01, %v1890_v10  ;;  %vm1925_vm8 = vcmp.gt.f32.partialorder %v1890_v10, 0.0 }
 0x334   : > { %v5193_v50 = vsel %vm1925_vm8, %v1890_v10, %v1941_v42  ;;  %v2336_v42 = vld [vmem:[#allocation2 + $0x8] sm:$0xff] }
 0x335   : > { %1979 = vadd.xlane.f32.xlu1 %v5193_v50  ;;  %v2021_v58 = vmul.f32 %v5193_v50, %v5193_v50  ;;  %2369 = vmatpush.msrb.mxu3 %v2336_v42 }
 0x337   : > { %v1892_v26 = vpop.f32.mrf.mxu2  ;;  %2043 = vadd.xlane.f32.xlu2 %v2021_v58 }
 0x338   : > { %v1893_v59 = vadd.f32 %v5154_v60, %v1892_v26  ;;  %v2335_v26 = vld [vmem:[#allocation2] sm:$0xff] }
 0x339   : > { %2370 = vmatpush.msrb.mxu3 %v2335_v26 }
 0x33a   : > { %v1942_v34 = vmul.f32 0.01, %v1893_v59  ;;  %vm1926_vm9 = vcmp.gt.f32.partialorder %v1893_v59, 0.0 }
 0x33c   : > { %v5199_v35 = vsel %vm1926_vm9, %v1893_v59, %v1942_v34 }
 0x33d   : > { %1981 = vadd.xlane.f32.xlu0 %v5199_v35  ;;  %v2022_v5 = vmul.f32 %v5199_v35, %v5199_v35 }
 0x33f   : > { %2045 = vadd.xlane.f32.xlu1 %v2022_v5  ;;  %v1895_v54 = vpop.f32.mrf.mxu2 }
 0x340   : > { %v1896_v55 = vadd.f32 %v5154_v60, %v1895_v54 }
 0x342   : > { %v1943_v51 = vmul.f32 0.01, %v1896_v55  ;;  %vm1927_vm10 = vcmp.gt.f32.partialorder %v1896_v55, 0.0 }
 0x344   : > { %v5205_v36 = vsel %vm1927_vm10, %v1896_v55, %v1943_v51 }
 0x345   : > { %1983 = vadd.xlane.f32.xlu2 %v5205_v36  ;;  %v2023_v15 = vmul.f32 %v5205_v36, %v5205_v36 }
 0x347   : > { %2047 = vadd.xlane.f32.xlu0 %v2023_v15  ;;  %v1898_v44 = vpop.f32.mrf.mxu2 }
 0x348   : > { %v1899_v61 = vadd.f32 %v5154_v60, %v1898_v44 }
 0x34a   : > { %v1944_v63 = vmul.f32 0.01, %v1899_v61  ;;  %vm1928_vm11 = vcmp.gt.f32.partialorder %v1899_v61, 0.0 }
 0x34c   : > { %v5211_v0 = vsel %vm1928_vm11, %v1899_v61, %v1944_v63 }
 0x34d   : > { %1985 = vadd.xlane.f32.xlu1 %v5211_v0  ;;  %v2024_v19 = vmul.f32 %v5211_v0, %v5211_v0 }
 0x34f   : > { %v1901_v6 = vpop.f32.mrf.mxu2  ;;  %2049 = vadd.xlane.f32.xlu2 %v2024_v19 }
 0x350   : > { %v1902_v23 = vadd.f32 %v5154_v60, %v1901_v6 }
 0x352   : > { %v1945_v18 = vmul.f32 0.01, %v1902_v23  ;;  %vm1929_vm12 = vcmp.gt.f32.partialorder %v1902_v23, 0.0 }
 0x354   : > { %v5217_v11 = vsel %vm1929_vm12, %v1902_v23, %v1945_v18 }
 0x355   : > { %1987 = vadd.xlane.f32.xlu0 %v5217_v11  ;;  %v2025_v16 = vmul.f32 %v5217_v11, %v5217_v11 }
 0x357   : > { %2051 = vadd.xlane.f32.xlu1 %v2025_v16  ;;  %v1904_v7 = vpop.f32.mrf.mxu2 }
 0x358   : > { %v1905_v9 = vadd.f32 %v5154_v60, %v1904_v7 }
 0x35a   : > { %v1946_v57 = vmul.f32 0.01, %v1905_v9  ;;  %vm1930_vm13 = vcmp.gt.f32.partialorder %v1905_v9, 0.0 }
 0x35c   : > { %v5223_v32 = vsel %vm1930_vm13, %v1905_v9, %v1946_v57 }
 0x35d   : > { %1989 = vadd.xlane.f32.xlu2 %v5223_v32  ;;  %v2026_v2 = vmul.f32 %v5223_v32, %v5223_v32 }
 0x35f   : > { %2053 = vadd.xlane.f32.xlu0 %v2026_v2  ;;  %v1907_v39 = vpop.f32.mrf.mxu2 }
 0x360   : > { %v1908_v4 = vadd.f32 %v5154_v60, %v1907_v39 }
 0x362   : > { %v1947_v12 = vmul.f32 0.01, %v1908_v4  ;;  %vm1931_vm14 = vcmp.gt.f32.partialorder %v1908_v4, 0.0 }
 0x364   : > { %v5229_v20 = vsel %vm1931_vm14, %v1908_v4, %v1947_v12 }
 0x365   : > { %1991 = vadd.xlane.f32.xlu1 %v5229_v20  ;;  %v2027_v3 = vmul.f32 %v5229_v20, %v5229_v20 }
 0x367   : > { %v1910_v52 = vpop.f32.mrf.mxu2  ;;  %2055 = vadd.xlane.f32.xlu2 %v2027_v3 }
 0x368   : > { %v1911_v30 = vadd.f32 %v5154_v60, %v1910_v52 }
 0x36a   : > { %v1948_v29 = vmul.f32 0.01, %v1911_v30  ;;  %vm1932_vm15 = vcmp.gt.f32.partialorder %v1911_v30, 0.0 }
 0x36c   : > { %v5235_v28 = vsel %vm1932_vm15, %v1911_v30, %v1948_v29 }
 0x36d   : > { %1993 = vadd.xlane.f32.xlu0 %v5235_v28  ;;  %v2028_v37 = vmul.f32 %v5235_v28, %v5235_v28 }
 0x36f   : > { %2057 = vadd.xlane.f32.xlu1 %v2028_v37  ;;  %v1913_v31 = vpop.f32.mrf.mxu2 }
 0x370   : > { %v1914_v48 = vadd.f32 %v5154_v60, %v1913_v31 }
 0x372   : > { %v1949_v49 = vmul.f32 0.01, %v1914_v48  ;;  %vm1933_vm0 = vcmp.gt.f32.partialorder %v1914_v48, 0.0 }
 0x374   : > { %v5241_v10 = vsel %vm1933_vm0, %v1914_v48, %v1949_v49 }
 0x375   : > { %1995 = vadd.xlane.f32.xlu2 %v5241_v10  ;;  %v2029_v58 = vmul.f32 %v5241_v10, %v5241_v10 }
 0x377   : > { %2059 = vadd.xlane.f32.xlu0 %v2029_v58  ;;  %v1916_v59 = vpop.f32.mrf.mxu2 }
 0x378   : > { %v1917_v34 = vadd.f32 %v5154_v60, %v1916_v59  ;;  %v1968_v5 = vpop.xlane.xlu1 %1967 }
 0x379   : > { %v1999_v54 = vmul.f32 %v1968_v5, %v4685_v1 }
 0x37a   : > { %v1950_v55 = vmul.f32 0.01, %v1917_v34  ;;  %v2032_v51 = vpop.xlane.xlu2 %2031  ;;  %vm1934_vm1 = vcmp.gt.f32.partialorder %v1917_v34, 0.0 }
 0x37b   : > { %v2079_v15 = vmul.f32 %v1999_v54, %v1999_v54  ;;  %v2063_v44 = vmul.f32 %v2032_v51, %v4685_v1  ;;  %v2127_v22 = vsub.f32 %v5157_v53, %v1999_v54 }
 0x37c   : > { %v5249_v61 = vsel %vm1934_vm1, %v1917_v34, %v1950_v55 }
 0x37d   : > { %v2095_v63 = vsub.f32 %v2063_v44, %v2079_v15  ;;  %1997 = vadd.xlane.f32.xlu1 %v5249_v61  ;;  %v2030_v43 = vmul.f32 %v5249_v61, %v5249_v61 }
 0x37f   : > { %v2111_v62 = vmax.f32 %v2095_v63, 0.0  ;;  %2061 = vadd.xlane.f32.xlu2 %v2030_v43 }
 0x380   : > { %v1970_v60 = vpop.xlane.xlu0 %1969 }
 0x381   : > { %v2143_v56 = vadd.f32 1e-05, %v2111_v62  ;;  %v2000_v19 = vmul.f32 %v1970_v60, %v4685_v1 }
 0x382   : > { %v2034_v6 = vpop.xlane.xlu1 %2033 }
 0x383   : > { %3864 = vrsqrt.f32 %v2143_v56  ;;  %v2080_v23 = vmul.f32 %v2000_v19, %v2000_v19  ;;  %v2064_v18 = vmul.f32 %v2034_v6, %v4685_v1  ;;  %vm2165_vm3 = vweird.f32 %v2143_v56 }
 0x384   : > { %v2128_v62 = vsub.f32 %v5163_v24, %v2000_v19 }
 0x385   : > { %v2096_v8 = vsub.f32 %v2064_v18, %v2080_v23 }
 0x387   : > { %v2112_v47 = vmax.f32 %v2096_v8, 0.0 }
 0x388   : > { %v1972_v16 = vpop.xlane.xlu2 %1971 }
 0x389   : > { %v3865_v41 = vpop.eup %3864  ;;  %v5257_v7 = vmul.f32 %v1972_v16, %v4685_v1  ;;  %v2144_v57 = vadd.f32 1e-05, %v2112_v47 }
 0x38a   : > { %v2160_v9 = vmul.f32 %v3865_v41, %v2143_v56  ;;  %v2036_v14 = vpop.xlane.xlu0 %2035  ;;  %vm2166_vm2 = vweird.f32 %v3865_v41 }
 0x38b   : > { %v2081_v2 = vmul.f32 %v5257_v7, %v5257_v7  ;;  %v2065_v39 = vmul.f32 %v2036_v14, %v4685_v1  ;;  %3866 = vrsqrt.f32 %v2144_v57  ;;  %vm2167_vm4 = vmor %vm2165_vm3, %vm2166_vm2  ;;  %vm2175_vm6 = vweird.f32 %v2144_v57 }
 0x38c   : > { %v2161_v4 = vmul.f32 %v3865_v41, %v2160_v9  ;;  %v2129_v24 = vsub.f32 %v5169_v25, %v5257_v7 }
 0x38d   : > { %v2097_v12 = vsub.f32 %v2065_v39, %v2081_v2 }
 0x38e   : > { %v2162_v3 = vmul.f32 0.5, %v2161_v4 }
 0x38f   : > { %v2113_v21 = vmax.f32 %v2097_v12, 0.0 }
 0x390   : > { %v2163_v52 = vsub.f32 1.5, %v2162_v3  ;;  %v1974_v30 = vpop.xlane.xlu1 %1973 }
 0x391   : > { %v2145_v45 = vadd.f32 1e-05, %v2113_v21  ;;  %v5263_v29 = vmul.f32 %v1974_v30, %v4685_v1  ;;  %v3867_v13 = vpop.eup %3866 }
 0x392   : > { %v2038_v46 = vpop.xlane.xlu2 %2037  ;;  %v2164_v37 = vmul.f32 %v3865_v41, %v2163_v52  ;;  %v2170_v31 = vmul.f32 %v3867_v13, %v2144_v57  ;;  %vm2176_vm5 = vweird.f32 %v3867_v13 }
 0x393   : > { %3868 = vrsqrt.f32 %v2145_v45  ;;  %v2082_v48 = vmul.f32 %v5263_v29, %v5263_v29  ;;  %v2066_v17 = vmul.f32 %v2038_v46, %v4685_v1  ;;  %vm2177_vm7 = vmor %vm2175_vm6, %vm2176_vm5  ;;  %vm2185_vm9 = vweird.f32 %v2145_v45 }
 0x394   : > { %v2168_v49 = vsel %vm2167_vm4, %v3865_v41, %v2164_v37  ;;  %v2171_v42 = vmul.f32 %v3867_v13, %v2170_v31 }
 0x395   : > { %v2319_v27 = vmul.f32 %v2168_v49, %v2127_v22  ;;  %v2098_v58 = vsub.f32 %v2066_v17, %v2082_v48 }
 0x396   : > { %v2172_v26 = vmul.f32 0.5, %v2171_v42 }
 0x397   : > { %2371 = vmatmul.f32.vlgmr.msrb.gmra.mxu3 %v2319_v27  ;;  %v2114_v59 = vmax.f32 %v2098_v58, 0.0  ;;  %v2130_v27 = vsub.f32 %v5175_v38, %v5263_v29 }
 0x398   : > { %v1976_v34 = vpop.xlane.xlu0 %1975  ;;  %v2173_v53 = vsub.f32 1.5, %v2172_v26 }
 0x399   : > { %v3869_v5 = vpop.eup %3868  ;;  %v5270_v55 = vmul.f32 %v1976_v34, %v4685_v1  ;;  %v2146_v51 = vadd.f32 1e-05, %v2114_v59 }
 0x39a   : > { %v2180_v54 = vmul.f32 %v3869_v5, %v2145_v45  ;;  %v2040_v15 = vpop.xlane.xlu1 %2039  ;;  %v2174_v43 = vmul.f32 %v3867_v13, %v2173_v53  ;;  %vm2186_vm8 = vweird.f32 %v3869_v5 }
 0x39b   : > { %v2083_v44 = vmul.f32 %v5270_v55, %v5270_v55  ;;  %v2067_v63 = vmul.f32 %v2040_v15, %v4685_v1  ;;  %3870 = vrsqrt.f32 %v2146_v51  ;;  %vm2187_vm10 = vmor %vm2185_vm9, %vm2186_vm8  ;;  %vm2195_vm12 = vweird.f32 %v2146_v51 }
 0x39c   : > { %v2181_v60 = vmul.f32 %v3869_v5, %v2180_v54  ;;  %v2178_v6 = vsel %vm2177_vm7, %v3867_v13, %v2174_v43  ;;  %v2131_v38 = vsub.f32 %v5181_v33, %v5270_v55 }
 0x39d   : > { %v2099_v56 = vsub.f32 %v2067_v63, %v2083_v44  ;;  %v2320_v23 = vmul.f32 %v2178_v6, %v2128_v62 }
 0x39e   : > { %v2182_v18 = vmul.f32 0.5, %v2181_v60 }
 0x39f   : > { %v2115_v8 = vmax.f32 %v2099_v56, 0.0  ;;  %2374 = vmatmul.f32.gmra.mxu3 %v2320_v23 }
 0x3a0   : > { %v1978_v47 = vpop.xlane.xlu2 %1977  ;;  %v2183_v16 = vsub.f32 1.5, %v2182_v18 }
 0x3a1   : > { %v2147_v41 = vadd.f32 1e-05, %v2115_v8  ;;  %v5277_v9 = vmul.f32 %v1978_v47, %v4685_v1  ;;  %v3871_v14 = vpop.eup %3870 }
 0x3a2   : > { %v2042_v57 = vpop.xlane.xlu0 %2041  ;;  %v2184_v2 = vmul.f32 %v3869_v5, %v2183_v16  ;;  %v2190_v19 = vmul.f32 %v3871_v14, %v2146_v51  ;;  %vm2196_vm11 = vweird.f32 %v3871_v14 }
 0x3a3   : > { %3872 = vrsqrt.f32 %v2147_v41  ;;  %v2084_v39 = vmul.f32 %v5277_v9, %v5277_v9  ;;  %v2068_v4 = vmul.f32 %v2042_v57, %v4685_v1  ;;  %vm2197_vm13 = vmor %vm2195_vm12, %vm2196_vm11  ;;  %vm2205_vm15 = vweird.f32 %v2147_v41 }
 0x3a4   : > { %v2188_v12 = vsel %vm2187_vm10, %v3869_v5, %v2184_v2  ;;  %v2191_v21 = vmul.f32 %v3871_v14, %v2190_v19 }
 0x3a5   : > { %v2321_v3 = vmul.f32 %v2188_v12, %v2129_v24  ;;  %v2100_v52 = vsub.f32 %v2068_v4, %v2084_v39  ;;  %v2132_v4 = vsub.f32 %v5187_v40, %v5277_v9 }
 0x3a6   : > { %v2192_v30 = vmul.f32 0.5, %v2191_v21 }
 0x3a7   : > { %v2116_v13 = vmax.f32 %v2100_v52, 0.0  ;;  %2377 = vmatmul.f32.gmra.mxu3 %v2321_v3 }
 0x3a8   : > { %v1980_v46 = vpop.xlane.xlu1 %1979  ;;  %v2193_v25 = vsub.f32 1.5, %v2192_v30 }
 0x3a9   : > { %v3873_v45 = vpop.eup %3872  ;;  %v5285_v37 = vmul.f32 %v1980_v46, %v4685_v1  ;;  %v2148_v22 = vadd.f32 1e-05, %v2116_v13 }
 0x3aa   : > { %v2200_v7 = vmul.f32 %v3873_v45, %v2147_v41  ;;  %v2044_v31 = vpop.xlane.xlu2 %2043  ;;  %v2194_v49 = vmul.f32 %v3871_v14, %v2193_v25  ;;  %vm2206_vm14 = vweird.f32 %v3873_v45 }
 0x3ab   : > { %v2085_v48 = vmul.f32 %v5285_v37, %v5285_v37  ;;  %v2069_v17 = vmul.f32 %v2044_v31, %v4685_v1  ;;  %3874 = vrsqrt.f32 %v2148_v22  ;;  %vm2207_vm0 = vmor %vm2205_vm15, %vm2206_vm14  ;;  %vm2215_vm2 = vweird.f32 %v2148_v22 }
 0x3ac   : > { %v2201_v42 = vmul.f32 %v3873_v45, %v2200_v7  ;;  %v2198_v26 = vsel %vm2197_vm13, %v3871_v14, %v2194_v49  ;;  %v2133_v40 = vsub.f32 %v5193_v50, %v5285_v37 }
 0x3ad   : > { %v2101_v58 = vsub.f32 %v2069_v17, %v2085_v48  ;;  %v2322_v59 = vmul.f32 %v2198_v26, %v2130_v27 }
 0x3ae   : > { %v2202_v34 = vmul.f32 0.5, %v2201_v42 }
 0x3af   : > { %v2117_v5 = vmax.f32 %v2101_v58, 0.0  ;;  %2380 = vmatmul.f32.gmra.mxu3 %v2322_v59 }
 0x3b0   : > { %v1982_v53 = vpop.xlane.xlu0 %1981  ;;  %v2203_v54 = vsub.f32 1.5, %v2202_v34 }
 0x3b1   : > { %v2149_v15 = vadd.f32 1e-05, %v2117_v5  ;;  %v5293_v44 = vmul.f32 %v1982_v53, %v4685_v1  ;;  %v3875_v51 = vpop.eup %3874 }
 0x3b2   : > { %v2046_v63 = vpop.xlane.xlu1 %2045  ;;  %v2204_v43 = vmul.f32 %v3873_v45, %v2203_v54  ;;  %v2210_v29 = vmul.f32 %v3875_v51, %v2148_v22  ;;  %vm2216_vm1 = vweird.f32 %v3875_v51 }
 0x3b3   : > { %3876 = vrsqrt.f32 %v2149_v15  ;;  %v2086_v62 = vmul.f32 %v5293_v44, %v5293_v44  ;;  %v2070_v60 = vmul.f32 %v2046_v63, %v4685_v1  ;;  %vm2217_vm3 = vmor %vm2215_vm2, %vm2216_vm1  ;;  %vm2225_vm5 = vweird.f32 %v2149_v15 }
 0x3b4   : > { %v2208_v56 = vsel %vm2207_vm0, %v3873_v45, %v2204_v43  ;;  %v2211_v23 = vmul.f32 %v3875_v51, %v2210_v29  ;;  %v2134_v29 = vsub.f32 %v5199_v35, %v5293_v44 }
 0x3b5   : > { %v2323_v6 = vmul.f32 %v2208_v56, %v2131_v38  ;;  %v2102_v18 = vsub.f32 %v2070_v60, %v2086_v62 }
 0x3b6   : > { %v2212_v8 = vmul.f32 0.5, %v2211_v23 }
 0x3b7   : > { %v2118_v47 = vmax.f32 %v2102_v18, 0.0  ;;  %2383 = vmatmul.f32.gmra.mxu3 %v2323_v6 }
 0x3b8   : > { %v1984_v16 = vpop.xlane.xlu2 %1983  ;;  %v2213_v33 = vsub.f32 1.5, %v2212_v8 }
 0x3b9   : > { %v3877_v41 = vpop.eup %3876  ;;  %v5301_v14 = vmul.f32 %v1984_v16, %v4685_v1  ;;  %v2150_v57 = vadd.f32 1e-05, %v2118_v47 }
 0x3ba   : > { %v2220_v55 = vmul.f32 %v3877_v41, %v2149_v15  ;;  %v2048_v2 = vpop.xlane.xlu0 %2047  ;;  %v2214_v39 = vmul.f32 %v3875_v51, %v2213_v33  ;;  %vm2226_vm4 = vweird.f32 %v3877_v41 }
 0x3bb   : > { %v2087_v24 = vmul.f32 %v5301_v14, %v5301_v14  ;;  %v2071_v19 = vmul.f32 %v2048_v2, %v4685_v1  ;;  %3878 = vrsqrt.f32 %v2150_v57  ;;  %vm2227_vm6 = vmor %vm2225_vm5, %vm2226_vm4  ;;  %vm2235_vm8 = vweird.f32 %v2150_v57 }
 0x3bc   : > { %v2221_v12 = vmul.f32 %v3877_v41, %v2220_v55  ;;  %v2218_v21 = vsel %vm2217_vm3, %v3875_v51, %v2214_v39  ;;  %v2135_v35 = vsub.f32 %v5205_v36, %v5301_v14 }
 0x3bd   : > { %v2103_v3 = vsub.f32 %v2071_v19, %v2087_v24  ;;  %v2324_v52 = vmul.f32 %v2218_v21, %v2132_v4 }
 0x3be   : > { %v2222_v30 = vmul.f32 0.5, %v2221_v12 }
 0x3bf   : > { %v2119_v13 = vmax.f32 %v2103_v3, 0.0  ;;  %2386 = vmatmul.f32.gmra.mxu3 %v2324_v52 }
 0x3c0   : > { %v1986_v46 = vpop.xlane.xlu1 %1985  ;;  %v2223_v45 = vsub.f32 1.5, %v2222_v30 }
 0x3c1   : > { %v2151_v25 = vadd.f32 1e-05, %v2119_v13  ;;  %v5309_v7 = vmul.f32 %v1986_v46, %v4685_v1  ;;  %v3879_v22 = vpop.eup %3878 }
 0x3c2   : > { %v2050_v31 = vpop.xlane.xlu2 %2049  ;;  %v2224_v48 = vmul.f32 %v3877_v41, %v2223_v45  ;;  %v2230_v9 = vmul.f32 %v3879_v22, %v2150_v57  ;;  %vm2236_vm7 = vweird.f32 %v3879_v22 }
 0x3c3   : > { %3880 = vrsqrt.f32 %v2151_v25  ;;  %v2088_v17 = vmul.f32 %v5309_v7, %v5309_v7  ;;  %v2072_v49 = vmul.f32 %v2050_v31, %v4685_v1  ;;  %vm2237_vm9 = vmor %vm2235_vm8, %vm2236_vm7  ;;  %vm2245_vm11 = vweird.f32 %v2151_v25 }
 0x3c4   : > { %v2228_v27 = vsel %vm2227_vm6, %v3877_v41, %v2224_v48  ;;  %v2231_v58 = vmul.f32 %v3879_v22, %v2230_v9  ;;  %v2136_v48 = vsub.f32 %v5211_v0, %v5309_v7 }
 0x3c5   : > { %v2325_v42 = vmul.f32 %v2228_v27, %v2133_v40  ;;  %v2104_v26 = vsub.f32 %v2072_v49, %v2088_v17 }
 0x3c6   : > { %v2232_v59 = vmul.f32 0.5, %v2231_v58 }
 0x3c7   : > { %v2120_v34 = vmax.f32 %v2104_v26, 0.0  ;;  %2389 = vmatmul.f32.gmra.mxu3 %v2325_v42 }
 0x3c8   : > { %v1988_v5 = vpop.xlane.xlu0 %1987  ;;  %v2233_v50 = vsub.f32 1.5, %v2232_v59 }
 0x3c9   : > { %v3881_v53 = vpop.eup %3880  ;;  %v5317_v54 = vmul.f32 %v1988_v5, %v4685_v1  ;;  %v2152_v15 = vadd.f32 1e-05, %v2120_v34 }
 0x3ca   : > { %v2240_v37 = vmul.f32 %v3881_v53, %v2151_v25  ;;  %v2052_v51 = vpop.xlane.xlu1 %2051  ;;  %v2234_v38 = vmul.f32 %v3879_v22, %v2233_v50  ;;  %vm2246_vm10 = vweird.f32 %v3881_v53 }
 0x3cb   : > { %v2089_v63 = vmul.f32 %v5317_v54, %v5317_v54  ;;  %v2073_v43 = vmul.f32 %v2052_v51, %v4685_v1  ;;  %3882 = vrsqrt.f32 %v2152_v15  ;;  %vm2247_vm12 = vmor %vm2245_vm11, %vm2246_vm10  ;;  %vm2255_vm14 = vweird.f32 %v2152_v15 }
 0x3cc   : > { %v2241_v62 = vmul.f32 %v3881_v53, %v2240_v37  ;;  %v2238_v56 = vsel %vm2237_vm9, %v3879_v22, %v2234_v38  ;;  %v2137_v0 = vsub.f32 %v5217_v11, %v5317_v54 }
 0x3cd   : > { %v2105_v60 = vsub.f32 %v2073_v43, %v2089_v63  ;;  %v2326_v6 = vmul.f32 %v2238_v56, %v2134_v29 }
 0x3ce   : > { %v2242_v23 = vmul.f32 0.5, %v2241_v62 }
 0x3cf   : > { %v2121_v18 = vmax.f32 %v2105_v60, 0.0  ;;  %2392 = vmatmul.f32.gmra.mxu3 %v2326_v6 }
 0x3d0   : > { %v1990_v8 = vpop.xlane.xlu2 %1989  ;;  %v2243_v47 = vsub.f32 1.5, %v2242_v23 }
 0x3d1   : > { %v2153_v16 = vadd.f32 1e-05, %v2121_v18  ;;  %v5325_v41 = vmul.f32 %v1990_v8, %v4685_v1  ;;  %v3883_v33 = vpop.eup %3882 }
 0x3d2   : > { %v2054_v55 = vpop.xlane.xlu0 %2053  ;;  %v2244_v57 = vmul.f32 %v3881_v53, %v2243_v47  ;;  %v2250_v44 = vmul.f32 %v3883_v33, %v2152_v15  ;;  %vm2256_vm13 = vweird.f32 %v3883_v33 }
 0x3d3   : > { %3884 = vrsqrt.f32 %v2153_v16  ;;  %v2090_v2 = vmul.f32 %v5325_v41, %v5325_v41  ;;  %v2074_v24 = vmul.f32 %v2054_v55, %v4685_v1  ;;  %vm2257_vm15 = vmor %vm2255_vm14, %vm2256_vm13  ;;  %vm2265_vm1 = vweird.f32 %v2153_v16 }
 0x3d4   : > { %v2248_v19 = vsel %vm2247_vm12, %v3881_v53, %v2244_v57  ;;  %v2251_v4 = vmul.f32 %v3883_v33, %v2250_v44 }
 0x3d5   : > { %v2327_v39 = vmul.f32 %v2248_v19, %v2135_v35  ;;  %v2106_v12 = vsub.f32 %v2074_v24, %v2090_v2 }
 0x3d6   : > { %v2252_v3 = vmul.f32 0.5, %v2251_v4 }
 0x3d7   : > { %v2122_v21 = vmax.f32 %v2106_v12, 0.0  ;;  %2395 = vmatmul.f32.gmra.mxu3 %v2327_v39 }
 0x3d8   : > { %v1992_v52 = vpop.xlane.xlu1 %1991  ;;  %v2253_v36 = vsub.f32 1.5, %v2252_v3 }
 0x3d9   : > { %v3885_v30 = vpop.eup %3884  ;;  %v5333_v13 = vmul.f32 %v1992_v52, %v4685_v1  ;;  %v2154_v46 = vadd.f32 1e-05, %v2122_v21 }
 0x3da   : > { %v2260_v14 = vmul.f32 %v3885_v30, %v2153_v16  ;;  %v2056_v45 = vpop.xlane.xlu2 %2055  ;;  %v2254_v31 = vmul.f32 %v3883_v33, %v2253_v36  ;;  %vm2266_vm0 = vweird.f32 %v3885_v30 }
 0x3db   : > { %v2091_v25 = vmul.f32 %v5333_v13, %v5333_v13  ;;  %v2075_v22 = vmul.f32 %v2056_v45, %v4685_v1  ;;  %3886 = vrsqrt.f32 %v2154_v46  ;;  %vm2267_vm2 = vmor %vm2265_vm1, %vm2266_vm0  ;;  %vm2275_vm4 = vweird.f32 %v2154_v46 }
 0x3dc   : > { %v2261_v40 = vmul.f32 %v3885_v30, %v2260_v14  ;;  %v2258_v17 = vsel %vm2257_vm15, %v3883_v33, %v2254_v31  ;;  %v2138_v33 = vsub.f32 %v5223_v32, %v5325_v41  ;;  %v2139_v32 = vsub.f32 %v5229_v20, %v5333_v13 }
 0x3dd   : > { %v2107_v9 = vsub.f32 %v2075_v22, %v2091_v25  ;;  %v2328_v49 = vmul.f32 %v2258_v17, %v2136_v48 }
 0x3de   : > { %v2262_v27 = vmul.f32 0.5, %v2261_v40 }
 0x3df   : > { %v2123_v42 = vmax.f32 %v2107_v9, 0.0  ;;  %2398 = vmatmul.f32.gmra.mxu3 %v2328_v49 }
 0x3e0   : > { %v1994_v58 = vpop.xlane.xlu0 %1993  ;;  %v2263_v26 = vsub.f32 1.5, %v2262_v27 }
 0x3e1   : > { %v2155_v59 = vadd.f32 1e-05, %v2123_v42  ;;  %v5341_v34 = vmul.f32 %v1994_v58, %v4685_v1  ;;  %v3887_v5 = vpop.eup %3886 }
 0x3e2   : > { %v2058_v53 = vpop.xlane.xlu1 %2057  ;;  %v2264_v50 = vmul.f32 %v3885_v30, %v2263_v26  ;;  %v2270_v7 = vmul.f32 %v3887_v5, %v2154_v46  ;;  %vm2276_vm3 = vweird.f32 %v3887_v5 }
 0x3e3   : > { %3888 = vrsqrt.f32 %v2155_v59  ;;  %v2092_v37 = vmul.f32 %v5341_v34, %v5341_v34  ;;  %v2076_v15 = vmul.f32 %v2058_v53, %v4685_v1  ;;  %vm2277_vm5 = vmor %vm2275_vm4, %vm2276_vm3  ;;  %vm2285_vm7 = vweird.f32 %v2155_v59 }
 0x3e4   : > { %v2268_v51 = vsel %vm2267_vm2, %v3885_v30, %v2264_v50  ;;  %v2271_v43 = vmul.f32 %v3887_v5, %v2270_v7  ;;  %v2140_v20 = vsub.f32 %v5235_v28, %v5341_v34 }
 0x3e5   : > { %v2329_v63 = vmul.f32 %v2268_v51, %v2137_v0  ;;  %v2108_v38 = vsub.f32 %v2076_v15, %v2092_v37 }
 0x3e6   : > { %v2272_v29 = vmul.f32 0.5, %v2271_v43 }
 0x3e7   : > { %v2124_v62 = vmax.f32 %v2108_v38, 0.0  ;;  %2401 = vmatmul.f32.gmra.mxu3 %v2329_v63 }
 0x3e8   : > { %v1996_v60 = vpop.xlane.xlu2 %1995  ;;  %v2273_v11 = vsub.f32 1.5, %v2272_v29 }
 0x3e9   : > { %v3889_v56 = vpop.eup %3888  ;;  %v5349_v6 = vmul.f32 %v1996_v60, %v4685_v1  ;;  %v2156_v23 = vadd.f32 1e-05, %v2124_v62 }
 0x3ea   : > { %v2280_v54 = vmul.f32 %v3889_v56, %v2155_v59  ;;  %v2060_v18 = vpop.xlane.xlu0 %2059  ;;  %v2274_v16 = vmul.f32 %v3887_v5, %v2273_v11  ;;  %vm2286_vm6 = vweird.f32 %v3889_v56 }
 0x3eb   : > { %v2093_v8 = vmul.f32 %v5349_v6, %v5349_v6  ;;  %v2077_v47 = vmul.f32 %v2060_v18, %v4685_v1  ;;  %3890 = vrsqrt.f32 %v2156_v23  ;;  %vm2287_vm8 = vmor %vm2285_vm7, %vm2286_vm6  ;;  %vm2295_vm10 = vweird.f32 %v2156_v23 }
 0x3ec   : > { %v2281_v55 = vmul.f32 %v3889_v56, %v2280_v54  ;;  %v2278_v35 = vsel %vm2277_vm5, %v3887_v5, %v2274_v16  ;;  %v2141_v53 = vsub.f32 %v5241_v10, %v5349_v6  ;;  %v5368_v10 = vld [vmem:[%s5739_s14] ss:$0 sm:$0xff] }
 0x3ed   : > { %v2109_v57 = vsub.f32 %v2077_v47, %v2093_v8  ;;  %v2330_v44 = vmul.f32 %v2278_v35, %v2138_v33 }
 0x3ee   : > { %v2282_v2 = vmul.f32 0.5, %v2281_v55 }
 0x3ef   : > { %v2125_v24 = vmax.f32 %v2109_v57, 0.0  ;;  %2404 = vmatmul.f32.gmra.mxu3 %v2330_v44 }
 0x3f0   : > { %v1998_v19 = vpop.xlane.xlu1 %1997  ;;  %v2283_v39 = vsub.f32 1.5, %v2282_v2 }
 0x3f1   : > { %v2157_v4 = vadd.f32 1e-05, %v2125_v24  ;;  %v2014_v12 = vmul.f32 %v1998_v19, %v4685_v1  ;;  %v3891_v3 = vpop.eup %3890 }
 0x3f2   : > { %v2062_v21 = vpop.xlane.xlu2 %2061  ;;  %v2284_v52 = vmul.f32 %v3889_v56, %v2283_v39  ;;  %v2290_v41 = vmul.f32 %v3891_v3, %v2156_v23  ;;  %vm2296_vm9 = vweird.f32 %v3891_v3 }
 0x3f3   : > { %3892 = vrsqrt.f32 %v2157_v4  ;;  %v2094_v30 = vmul.f32 %v2014_v12, %v2014_v12  ;;  %v2078_v36 = vmul.f32 %v2062_v21, %v4685_v1  ;;  %vm2297_vm11 = vmor %vm2295_vm10, %vm2296_vm9  ;;  %vm2305_vm13 = vweird.f32 %v2157_v4 }
 0x3f4   : > { %v2288_v14 = vsel %vm2287_vm8, %v3889_v56, %v2284_v52  ;;  %v2291_v45 = vmul.f32 %v3891_v3, %v2290_v41  ;;  %v2142_v51 = vsub.f32 %v5249_v61, %v2014_v12  ;;  %v2850_v41 = vld [vmem:[#allocation5 + $0x70] sm:$0xff] }
 0x3f5   : > { %v2331_v46 = vmul.f32 %v2288_v14, %v2139_v32  ;;  %v2110_v25 = vsub.f32 %v2078_v36, %v2094_v30  ;;  %v2851_v32 = vld [vmem:[#allocation5 + $0x78] sm:$0xff] }
 0x3f6   : > { %v2292_v22 = vmul.f32 0.5, %v2291_v45  ;;  %2856 = vmatpush.msrb.mxu0 %v2851_v32 }
 0x3f7   : > { %v2126_v31 = vmax.f32 %v2110_v25, 0.0  ;;  %2407 = vmatmul.f32.gmra.mxu3 %v2331_v46  ;;  %v2849_v25 = vld [vmem:[#allocation5 + $0x68] sm:$0xff] }
 0x3f8   : > { %v2293_v40 = vsub.f32 1.5, %v2292_v22  ;;  %2857 = vmatpush.msrb.mxu0 %v2850_v41  ;;  %v2838_v41 = vld [vmem:[#allocation5 + $0x10] sm:$0xff] }
 0x3f9   : > { %v3893_v48 = vpop.eup %3892  ;;  %v2158_v17 = vadd.f32 1e-05, %v2126_v31 }
 0x3fa   : > { %v2300_v9 = vmul.f32 %v3893_v48, %v2157_v4  ;;  %v2294_v49 = vmul.f32 %v3891_v3, %v2293_v40  ;;  %vm2306_vm12 = vweird.f32 %v3893_v48  ;;  %2858 = vmatpush.msrb.mxu0 %v2849_v25 }
 0x3fb   : > { %3894 = vrsqrt.f32 %v2158_v17  ;;  %vm2307_vm14 = vmor %vm2305_vm13, %vm2306_vm12  ;;  %vm2315_vm0 = vweird.f32 %v2158_v17 }
 0x3fc   : > { %v2301_v13 = vmul.f32 %v3893_v48, %v2300_v9  ;;  %v2298_v27 = vsel %vm2297_vm11, %v3891_v3, %v2294_v49  ;;  %v2847_v49 = vld [vmem:[#allocation5 + $0x58] sm:$0xff] }
 0x3fd   : > { %v2332_v42 = vmul.f32 %v2298_v27, %v2140_v20 }
 0x3fe   : > { %v2302_v58 = vmul.f32 0.5, %v2301_v13 }
 0x3ff   : > { %2410 = vmatmul.f32.gmra.mxu3 %v2332_v42 }
 0x400   : > { %v2303_v26 = vsub.f32 1.5, %v2302_v58 }
 0x401   : > { %v3895_v59 = vpop.eup %3894 }
 0x402   : > { %v2304_v5 = vmul.f32 %v3893_v48, %v2303_v26  ;;  %v2310_v50 = vmul.f32 %v3895_v59, %v2158_v17  ;;  %vm2316_vm15 = vweird.f32 %v3895_v59  ;;  %v2846_v26 = vld [vmem:[#allocation5 + $0x50] sm:$0xff] }
 0x403   : > { %vm2317_vm1 = vmor %vm2315_vm0, %vm2316_vm15 }
 0x404   : > { %v2308_v0 = vsel %vm2307_vm14, %v3893_v48, %v2304_v5  ;;  %v2311_v28 = vmul.f32 %v3895_v59, %v2310_v50  ;;  %v2848_v48 = vld [vmem:[#allocation5 + $0x60] sm:$0xff] }
 0x405   : > { %v2333_v7 = vmul.f32 %v2308_v0, %v2141_v53  ;;  %2859 = vmatpush.msrb.mxu0 %v2848_v48 }
 0x406   : > { %v2312_v34 = vmul.f32 0.5, %v2311_v28  ;;  %v2844_v28 = vld [vmem:[#allocation5 + $0x40] sm:$0xff] }
 0x407   : > { %2413 = vmatmul.f32.gmra.mxu3 %v2333_v7  ;;  %2860 = vmatpush.msrb.mxu0 %v2847_v49 }
 0x408   : > { %v2313_v37 = vsub.f32 1.5, %v2312_v34 }
 0x409   : > { %2861 = vmatpush.msrb.mxu0 %v2846_v26 }
 0x40a   : > { %v2314_v15 = vmul.f32 %v3895_v59, %v2313_v37 }
 0x40c   : > { %v2318_v63 = vsel %vm2317_vm1, %v3895_v59, %v2314_v15  ;;  %v2845_v59 = vld [vmem:[#allocation5 + $0x48] sm:$0xff]  ;;  %v2843_v15 = vld [vmem:[#allocation5 + $0x38] sm:$0xff] }
 0x40d   : > { %v2334_v43 = vmul.f32 %v2318_v63, %v2142_v51  ;;  %2862 = vmatpush.msrb.mxu0 %v2845_v59 }
 0x40f   : > { %2416 = vmatmul.f32.gmra.mxu3 %v2334_v43  ;;  %2863 = vmatpush.msrb.mxu0 %v2844_v28 }
 0x411   : > { %2864 = vmatpush.msrb.mxu0 %v2843_v15 }
 0x41a   : > { %v2372_v38 = vpop.f32.mrf.mxu3 }
 0x41b   : > { %v2373_v29 = vadd.f32 %v5368_v10, %v2372_v38  ;;  %v2842_v38 = vld [vmem:[#allocation5 + $0x30] sm:$0xff] }
 0x41c   : > { %2865 = vmatpush.msrb.mxu0 %v2842_v38 }
 0x41d   : > { %v2436_v62 = vmul.f32 0.01, %v2373_v29  ;;  %vm2420_vm2 = vcmp.gt.f32.partialorder %v2373_v29, 0.0 }
 0x41f   : > { %v5371_v60 = vsel %vm2420_vm2, %v2373_v29, %v2436_v62 }
 0x420   : > { %2468 = vadd.xlane.f32.xlu0 %v5371_v60  ;;  %v2516_v61 = vmul.f32 %v5371_v60, %v5371_v60 }
 0x422   : > { %2532 = vadd.xlane.f32.xlu1 %v2516_v61  ;;  %v2375_v56 = vpop.f32.mrf.mxu3 }
 0x423   : > { %v2376_v6 = vadd.f32 %v5368_v10, %v2375_v56 }
 0x425   : > { %v2437_v11 = vmul.f32 0.01, %v2376_v6  ;;  %vm2421_vm3 = vcmp.gt.f32.partialorder %v2376_v6, 0.0 }
 0x427   : > { %v5377_v54 = vsel %vm2421_vm3, %v2376_v6, %v2437_v11  ;;  %v2841_v11 = vld [vmem:[#allocation5 + $0x28] sm:$0xff] }
 0x428   : > { %2470 = vadd.xlane.f32.xlu2 %v5377_v54  ;;  %v2517_v23 = vmul.f32 %v5377_v54, %v5377_v54  ;;  %2866 = vmatpush.msrb.mxu0 %v2841_v11 }
 0x42a   : > { %2534 = vadd.xlane.f32.xlu0 %v2517_v23  ;;  %v2378_v18 = vpop.f32.mrf.mxu3 }
 0x42b   : > { %v2379_v8 = vadd.f32 %v5368_v10, %v2378_v18 }
 0x42d   : > { %v2438_v47 = vmul.f32 0.01, %v2379_v8  ;;  %vm2422_vm4 = vcmp.gt.f32.partialorder %v2379_v8, 0.0 }
 0x42f   : > { %v5383_v16 = vsel %vm2422_vm4, %v2379_v8, %v2438_v47 }
 0x430   : > { %2472 = vadd.xlane.f32.xlu1 %v5383_v16  ;;  %v2518_v33 = vmul.f32 %v5383_v16, %v5383_v16 }
 0x432   : > { %v2381_v55 = vpop.f32.mrf.mxu3  ;;  %2536 = vadd.xlane.f32.xlu2 %v2518_v33 }
 0x433   : > { %v2382_v57 = vadd.f32 %v5368_v10, %v2381_v55 }
 0x435   : > { %v2439_v35 = vmul.f32 0.01, %v2382_v57  ;;  %vm2423_vm5 = vcmp.gt.f32.partialorder %v2382_v57, 0.0 }
 0x437   : > { %v5389_v44 = vsel %vm2423_vm5, %v2382_v57, %v2439_v35 }
 0x438   : > { %2474 = vadd.xlane.f32.xlu0 %v5389_v44  ;;  %v2519_v2 = vmul.f32 %v5389_v44, %v5389_v44 }
 0x43a   : > { %2538 = vadd.xlane.f32.xlu1 %v2519_v2  ;;  %v2384_v24 = vpop.f32.mrf.mxu3 }
 0x43b   : > { %v2385_v19 = vadd.f32 %v5368_v10, %v2384_v24 }
 0x43d   : > { %v2440_v39 = vmul.f32 0.01, %v2385_v19  ;;  %vm2424_vm6 = vcmp.gt.f32.partialorder %v2385_v19, 0.0 }
 0x43f   : > { %v5395_v4 = vsel %vm2424_vm6, %v2385_v19, %v2440_v39 }
 0x440   : > { %2476 = vadd.xlane.f32.xlu2 %v5395_v4  ;;  %v2520_v12 = vmul.f32 %v5395_v4, %v5395_v4 }
 0x442   : > { %2540 = vadd.xlane.f32.xlu0 %v2520_v12  ;;  %v2387_v3 = vpop.f32.mrf.mxu3  ;;  %v2840_v12 = vld [vmem:[#allocation5 + $0x20] sm:$0xff] }
 0x443   : > { %v2388_v21 = vadd.f32 %v5368_v10, %v2387_v3  ;;  %2867 = vmatpush.msrb.mxu0 %v2840_v12 }
 0x445   : > { %v2441_v52 = vmul.f32 0.01, %v2388_v21  ;;  %vm2425_vm7 = vcmp.gt.f32.partialorder %v2388_v21, 0.0 }
 0x447   : > { %v5401_v30 = vsel %vm2425_vm7, %v2388_v21, %v2441_v52  ;;  %v2839_v52 = vld [vmem:[#allocation5 + $0x18] sm:$0xff] }
 0x448   : > { %2478 = vadd.xlane.f32.xlu1 %v5401_v30  ;;  %v2521_v36 = vmul.f32 %v5401_v30, %v5401_v30  ;;  %2868 = vmatpush.msrb.mxu0 %v2839_v52 }
 0x44a   : > { %v2390_v14 = vpop.f32.mrf.mxu3  ;;  %2542 = vadd.xlane.f32.xlu2 %v2521_v36  ;;  %2869 = vmatpush.msrb.mxu0 %v2838_v41 }
 0x44b   : > { %v2391_v46 = vadd.f32 %v5368_v10, %v2390_v14  ;;  %v2837_v14 = vld [vmem:[#allocation5 + $0x8] sm:$0xff] }
 0x44c   : > { %2870 = vmatpush.msrb.mxu0 %v2837_v14 }
 0x44d   : > { %v2442_v45 = vmul.f32 0.01, %v2391_v46  ;;  %vm2426_vm8 = vcmp.gt.f32.partialorder %v2391_v46, 0.0 }
 0x44f   : > { %v5407_v22 = vsel %vm2426_vm8, %v2391_v46, %v2442_v45  ;;  %v2836_v45 = vld [vmem:[#allocation5] sm:$0xff] }
 0x450   : > { %2480 = vadd.xlane.f32.xlu0 %v5407_v22  ;;  %v2522_v31 = vmul.f32 %v5407_v22, %v5407_v22  ;;  %2871 = vmatpush.msrb.mxu0 %v2836_v45 }
 0x452   : > { %2544 = vadd.xlane.f32.xlu1 %v2522_v31  ;;  %v2393_v40 = vpop.f32.mrf.mxu3 }
 0x453   : > { %v2394_v9 = vadd.f32 %v5368_v10, %v2393_v40 }
 0x455   : > { %v2443_v17 = vmul.f32 0.01, %v2394_v9  ;;  %vm2427_vm9 = vcmp.gt.f32.partialorder %v2394_v9, 0.0 }
 0x457   : > { %v5413_v20 = vsel %vm2427_vm9, %v2394_v9, %v2443_v17 }
 0x458   : > { %2482 = vadd.xlane.f32.xlu2 %v5413_v20  ;;  %v2523_v13 = vmul.f32 %v5413_v20, %v5413_v20 }
 0x45a   : > { %2546 = vadd.xlane.f32.xlu0 %v2523_v13  ;;  %v2396_v27 = vpop.f32.mrf.mxu3 }
 0x45b   : > { %v2397_v42 = vadd.f32 %v5368_v10, %v2396_v27 }
 0x45d   : > { %v2444_v58 = vmul.f32 0.01, %v2397_v42  ;;  %vm2428_vm10 = vcmp.gt.f32.partialorder %v2397_v42, 0.0 }
 0x45f   : > { %v5419_v5 = vsel %vm2428_vm10, %v2397_v42, %v2444_v58 }
 0x460   : > { %2484 = vadd.xlane.f32.xlu1 %v5419_v5  ;;  %v2524_v53 = vmul.f32 %v5419_v5, %v5419_v5 }
 0x462   : > { %v2399_v50 = vpop.f32.mrf.mxu3  ;;  %2548 = vadd.xlane.f32.xlu2 %v2524_v53 }
 0x463   : > { %v2400_v0 = vadd.f32 %v5368_v10, %v2399_v50 }
 0x465   : > { %v2445_v7 = vmul.f32 0.01, %v2400_v0  ;;  %vm2429_vm11 = vcmp.gt.f32.partialorder %v2400_v0, 0.0 }
 0x467   : > { %v5425_v34 = vsel %vm2429_vm11, %v2400_v0, %v2445_v7 }
 0x468   : > { %2486 = vadd.xlane.f32.xlu0 %v5425_v34  ;;  %v2525_v37 = vmul.f32 %v5425_v34, %v5425_v34 }
 0x46a   : > { %2550 = vadd.xlane.f32.xlu1 %v2525_v37  ;;  %v2402_v51 = vpop.f32.mrf.mxu3 }
 0x46b   : > { %v2403_v63 = vadd.f32 %v5368_v10, %v2402_v51 }
 0x46d   : > { %v2446_v43 = vmul.f32 0.01, %v2403_v63  ;;  %vm2430_vm12 = vcmp.gt.f32.partialorder %v2403_v63, 0.0 }
 0x46f   : > { %v5431_v29 = vsel %vm2430_vm12, %v2403_v63, %v2446_v43 }
 0x470   : > { %2488 = vadd.xlane.f32.xlu2 %v5431_v29  ;;  %v2526_v62 = vmul.f32 %v5431_v29, %v5431_v29 }
 0x472   : > { %2552 = vadd.xlane.f32.xlu0 %v2526_v62  ;;  %v2405_v61 = vpop.f32.mrf.mxu3 }
 0x473   : > { %v2406_v56 = vadd.f32 %v5368_v10, %v2405_v61 }
 0x475   : > { %v2447_v6 = vmul.f32 0.01, %v2406_v56  ;;  %vm2431_vm13 = vcmp.gt.f32.partialorder %v2406_v56, 0.0 }
 0x477   : > { %v5437_v23 = vsel %vm2431_vm13, %v2406_v56, %v2447_v6 }
 0x478   : > { %2490 = vadd.xlane.f32.xlu1 %v5437_v23  ;;  %v2527_v18 = vmul.f32 %v5437_v23, %v5437_v23 }
 0x47a   : > { %v2408_v8 = vpop.f32.mrf.mxu3  ;;  %2554 = vadd.xlane.f32.xlu2 %v2527_v18 }
 0x47b   : > { %v2409_v47 = vadd.f32 %v5368_v10, %v2408_v8 }
 0x47d   : > { %v2448_v33 = vmul.f32 0.01, %v2409_v47  ;;  %vm2432_vm14 = vcmp.gt.f32.partialorder %v2409_v47, 0.0 }
 0x47f   : > { %v5443_v55 = vsel %vm2432_vm14, %v2409_v47, %v2448_v33 }
 0x480   : > { %2492 = vadd.xlane.f32.xlu0 %v5443_v55  ;;  %v2528_v57 = vmul.f32 %v5443_v55, %v5443_v55 }
 0x482   : > { %2556 = vadd.xlane.f32.xlu1 %v2528_v57  ;;  %v2411_v35 = vpop.f32.mrf.mxu3 }
 0x483   : > { %v2412_v2 = vadd.f32 %v5368_v10, %v2411_v35 }
 0x485   : > { %v2449_v24 = vmul.f32 0.01, %v2412_v2  ;;  %vm2433_vm15 = vcmp.gt.f32.partialorder %v2412_v2, 0.0 }
 0x487   : > { %v5449_v19 = vsel %vm2433_vm15, %v2412_v2, %v2449_v24 }
 0x488   : > { %2494 = vadd.xlane.f32.xlu2 %v5449_v19  ;;  %v2529_v39 = vmul.f32 %v5449_v19, %v5449_v19 }
 0x48a   : > { %2558 = vadd.xlane.f32.xlu0 %v2529_v39  ;;  %v2414_v3 = vpop.f32.mrf.mxu3 }
 0x48b   : > { %v2415_v21 = vadd.f32 %v5368_v10, %v2414_v3 }
 0x48d   : > { %v2450_v32 = vmul.f32 0.01, %v2415_v21  ;;  %vm2434_vm0 = vcmp.gt.f32.partialorder %v2415_v21, 0.0 }
 0x48f   : > { %v5455_v36 = vsel %vm2434_vm0, %v2415_v21, %v2450_v32 }
 0x490   : > { %2496 = vadd.xlane.f32.xlu1 %v5455_v36  ;;  %v2530_v46 = vmul.f32 %v5455_v36, %v5455_v36 }
 0x492   : > { %v2417_v25 = vpop.f32.mrf.mxu3  ;;  %2560 = vadd.xlane.f32.xlu2 %v2530_v46 }
 0x493   : > { %v2469_v31 = vpop.xlane.xlu0 %2468  ;;  %v2418_v48 = vadd.f32 %v5368_v10, %v2417_v25 }
 0x494   : > { %v2500_v40 = vmul.f32 %v2469_v31, %v4685_v1 }
 0x495   : > { %v2533_v9 = vpop.xlane.xlu1 %2532  ;;  %v2451_v17 = vmul.f32 0.01, %v2418_v48  ;;  %vm2435_vm1 = vcmp.gt.f32.partialorder %v2418_v48, 0.0 }
 0x496   : > { %v2580_v49 = vmul.f32 %v2500_v40, %v2500_v40  ;;  %v2564_v13 = vmul.f32 %v2533_v9, %v4685_v1  ;;  %v2628_v24 = vsub.f32 %v5371_v60, %v2500_v40 }
 0x497   : > { %v5463_v42 = vsel %vm2435_vm1, %v2418_v48, %v2451_v17 }
 0x498   : > { %v2596_v27 = vsub.f32 %v2564_v13, %v2580_v49  ;;  %2498 = vadd.xlane.f32.xlu0 %v5463_v42  ;;  %v2531_v58 = vmul.f32 %v5463_v42, %v5463_v42 }
 0x49a   : > { %v2612_v26 = vmax.f32 %v2596_v27, 0.0  ;;  %2562 = vadd.xlane.f32.xlu1 %v2531_v58 }
 0x49b   : > { %v2471_v10 = vpop.xlane.xlu2 %2470 }
 0x49c   : > { %v2644_v59 = vadd.f32 1e-05, %v2612_v26  ;;  %v2501_v53 = vmul.f32 %v2471_v10, %v4685_v1 }
 0x49d   : > { %v2535_v50 = vpop.xlane.xlu0 %2534 }
 0x49e   : > { %3896 = vrsqrt.f32 %v2644_v59  ;;  %v2581_v0 = vmul.f32 %v2501_v53, %v2501_v53  ;;  %v2565_v7 = vmul.f32 %v2535_v50, %v4685_v1  ;;  %vm2666_vm3 = vweird.f32 %v2644_v59 }
 0x49f   : > { %v2629_v13 = vsub.f32 %v5377_v54, %v2501_v53 }
 0x4a0   : > { %v2597_v28 = vsub.f32 %v2565_v7, %v2581_v0 }
 0x4a2   : > { %v2613_v37 = vmax.f32 %v2597_v28, 0.0 }
 0x4a3   : > { %v2473_v51 = vpop.xlane.xlu1 %2472 }
 0x4a4   : > { %v3897_v15 = vpop.eup %3896  ;;  %v2645_v43 = vadd.f32 1e-05, %v2613_v37  ;;  %v5471_v38 = vmul.f32 %v2473_v51, %v4685_v1 }
 0x4a5   : > { %v2661_v63 = vmul.f32 %v3897_v15, %v2644_v59  ;;  %v2537_v62 = vpop.xlane.xlu2 %2536  ;;  %vm2667_vm2 = vweird.f32 %v3897_v15 }
 0x4a6   : > { %3898 = vrsqrt.f32 %v2645_v43  ;;  %v2582_v56 = vmul.f32 %v5471_v38, %v5471_v38  ;;  %v2566_v6 = vmul.f32 %v2537_v62, %v4685_v1  ;;  %vm2668_vm4 = vmor %vm2666_vm3, %vm2667_vm2  ;;  %vm2676_vm6 = vweird.f32 %v2645_v43 }
 0x4a7   : > { %v2662_v61 = vmul.f32 %v3897_v15, %v2661_v63 }
 0x4a8   : > { %v2598_v18 = vsub.f32 %v2566_v6, %v2582_v56  ;;  %v2630_v6 = vsub.f32 %v5383_v16, %v5471_v38 }
 0x4a9   : > { %v2663_v11 = vmul.f32 0.5, %v2662_v61 }
 0x4aa   : > { %v2614_v47 = vmax.f32 %v2598_v18, 0.0 }
 0x4ab   : > { %v2664_v8 = vsub.f32 1.5, %v2663_v11  ;;  %v2475_v33 = vpop.xlane.xlu0 %2474 }
 0x4ac   : > { %v3899_v57 = vpop.eup %3898  ;;  %v5477_v35 = vmul.f32 %v2475_v33, %v4685_v1  ;;  %v2646_v12 = vadd.f32 1e-05, %v2614_v47 }
 0x4ad   : > { %v2665_v2 = vmul.f32 %v3897_v15, %v2664_v8  ;;  %v2671_v39 = vmul.f32 %v3899_v57, %v2645_v43  ;;  %v2539_v3 = vpop.xlane.xlu1 %2538  ;;  %vm2677_vm5 = vweird.f32 %v3899_v57 }
 0x4ae   : > { %v2583_v21 = vmul.f32 %v5477_v35, %v5477_v35  ;;  %v2567_v52 = vmul.f32 %v2539_v3, %v4685_v1  ;;  %3900 = vrsqrt.f32 %v2646_v12  ;;  %vm2678_vm7 = vmor %vm2676_vm6, %vm2677_vm5  ;;  %vm2686_vm9 = vweird.f32 %v2646_v12 }
 0x4af   : > { %v2669_v32 = vsel %vm2668_vm4, %v3897_v15, %v2665_v2  ;;  %v2672_v14 = vmul.f32 %v3899_v57, %v2671_v39  ;;  %v2631_v16 = vsub.f32 %v5389_v44, %v5477_v35 }
 0x4b0   : > { %v2820_v41 = vmul.f32 %v2669_v32, %v2628_v24  ;;  %v2599_v46 = vsub.f32 %v2567_v52, %v2583_v21 }
 0x4b1   : > { %v2673_v45 = vmul.f32 0.5, %v2672_v14 }
 0x4b2   : > { %2872 = vmatmul.f32.vlgmr.msrb.gmra.mxu0 %v2820_v41  ;;  %v2615_v25 = vmax.f32 %v2599_v46, 0.0 }
 0x4b3   : > { %v2477_v31 = vpop.xlane.xlu2 %2476  ;;  %v2674_v48 = vsub.f32 1.5, %v2673_v45 }
 0x4b4   : > { %v2647_v60 = vadd.f32 1e-05, %v2615_v25  ;;  %v5484_v40 = vmul.f32 %v2477_v31, %v4685_v1  ;;  %v3901_v9 = vpop.eup %3900 }
 0x4b5   : > { %v2541_v17 = vpop.xlane.xlu0 %2540  ;;  %v2675_v49 = vmul.f32 %v3899_v57, %v2674_v48  ;;  %v2681_v27 = vmul.f32 %v3901_v9, %v2646_v12  ;;  %vm2687_vm8 = vweird.f32 %v3901_v9 }
 0x4b6   : > { %3902 = vrsqrt.f32 %v2647_v60  ;;  %v2584_v58 = vmul.f32 %v5484_v40, %v5484_v40  ;;  %v2568_v26 = vmul.f32 %v2541_v17, %v4685_v1  ;;  %vm2688_vm10 = vmor %vm2686_vm9, %vm2687_vm8  ;;  %vm2696_vm12 = vweird.f32 %v2647_v60 }
 0x4b7   : > { %v2679_v59 = vsel %vm2678_vm7, %v3899_v57, %v2675_v49  ;;  %v2682_v50 = vmul.f32 %v3901_v9, %v2681_v27 }
 0x4b8   : > { %v2821_v10 = vmul.f32 %v2679_v59, %v2629_v13  ;;  %v2600_v0 = vsub.f32 %v2568_v26, %v2584_v58  ;;  %v2632_v59 = vsub.f32 %v5395_v4, %v5484_v40 }
 0x4b9   : > { %v2683_v7 = vmul.f32 0.5, %v2682_v50 }
 0x4ba   : > { %2875 = vmatmul.f32.gmra.mxu0 %v2821_v10  ;;  %v2616_v28 = vmax.f32 %v2600_v0, 0.0 }
 0x4bb   : > { %v2479_v37 = vpop.xlane.xlu1 %2478  ;;  %v2684_v54 = vsub.f32 1.5, %v2683_v7 }
 0x4bc   : > { %v3903_v15 = vpop.eup %3902  ;;  %v5491_v51 = vmul.f32 %v2479_v37, %v4685_v1  ;;  %v2648_v63 = vadd.f32 1e-05, %v2616_v28 }
 0x4bd   : > { %v2691_v53 = vmul.f32 %v3903_v15, %v2647_v60  ;;  %v2543_v43 = vpop.xlane.xlu2 %2542  ;;  %v2685_v56 = vmul.f32 %v3901_v9, %v2684_v54  ;;  %vm2697_vm11 = vweird.f32 %v3903_v15 }
 0x4be   : > { %v2585_v62 = vmul.f32 %v5491_v51, %v5491_v51  ;;  %v2569_v61 = vmul.f32 %v2543_v43, %v4685_v1  ;;  %3904 = vrsqrt.f32 %v2648_v63  ;;  %vm2698_vm13 = vmor %vm2696_vm12, %vm2697_vm11  ;;  %vm2706_vm15 = vweird.f32 %v2648_v63 }
 0x4bf   : > { %v2692_v11 = vmul.f32 %v3903_v15, %v2691_v53  ;;  %v2689_v8 = vsel %vm2688_vm10, %v3901_v9, %v2685_v56  ;;  %v2633_v4 = vsub.f32 %v5401_v30, %v5491_v51 }
 0x4c0   : > { %v2601_v18 = vsub.f32 %v2569_v61, %v2585_v62  ;;  %v2822_v47 = vmul.f32 %v2689_v8, %v2630_v6 }
 0x4c1   : > { %v2693_v33 = vmul.f32 0.5, %v2692_v11 }
 0x4c2   : > { %v2617_v57 = vmax.f32 %v2601_v18, 0.0  ;;  %2878 = vmatmul.f32.gmra.mxu0 %v2822_v47 }
 0x4c3   : > { %v2481_v2 = vpop.xlane.xlu0 %2480  ;;  %v2694_v24 = vsub.f32 1.5, %v2693_v33 }
 0x4c4   : > { %v2649_v39 = vadd.f32 1e-05, %v2617_v57  ;;  %v5499_v3 = vmul.f32 %v2481_v2, %v4685_v1  ;;  %v3905_v12 = vpop.eup %3904 }
 0x4c5   : > { %v2545_v21 = vpop.xlane.xlu1 %2544  ;;  %v2695_v52 = vmul.f32 %v3903_v15, %v2694_v24  ;;  %v2701_v38 = vmul.f32 %v3905_v12, %v2648_v63  ;;  %vm2707_vm14 = vweird.f32 %v3905_v12 }
 0x4c6   : > { %3906 = vrsqrt.f32 %v2649_v39  ;;  %v2586_v32 = vmul.f32 %v5499_v3, %v5499_v3  ;;  %v2570_v41 = vmul.f32 %v2545_v21, %v4685_v1  ;;  %vm2708_vm0 = vmor %vm2706_vm15, %vm2707_vm14  ;;  %vm2716_vm2 = vweird.f32 %v2649_v39 }
 0x4c7   : > { %v2699_v14 = vsel %vm2698_vm13, %v3903_v15, %v2695_v52  ;;  %v2702_v45 = vmul.f32 %v3905_v12, %v2701_v38 }
 0x4c8   : > { %v2823_v46 = vmul.f32 %v2699_v14, %v2631_v16  ;;  %v2602_v25 = vsub.f32 %v2570_v41, %v2586_v32  ;;  %v2634_v32 = vsub.f32 %v5407_v22, %v5499_v3 }
 0x4c9   : > { %v2703_v31 = vmul.f32 0.5, %v2702_v45 }
 0x4ca   : > { %v2618_v48 = vmax.f32 %v2602_v25, 0.0  ;;  %2881 = vmatmul.f32.gmra.mxu0 %v2823_v46 }
 0x4cb   : > { %v2483_v9 = vpop.xlane.xlu2 %2482  ;;  %v2704_v44 = vsub.f32 1.5, %v2703_v31 }
 0x4cc   : > { %v3907_v60 = vpop.eup %3906  ;;  %v5507_v17 = vmul.f32 %v2483_v9, %v4685_v1  ;;  %v2650_v49 = vadd.f32 1e-05, %v2618_v48 }
 0x4cd   : > { %v2711_v35 = vmul.f32 %v3907_v60, %v2649_v39  ;;  %v2547_v13 = vpop.xlane.xlu0 %2546  ;;  %v2705_v26 = vmul.f32 %v3905_v12, %v2704_v44  ;;  %vm2717_vm1 = vweird.f32 %v3907_v60 }
 0x4ce   : > { %v2587_v27 = vmul.f32 %v5507_v17, %v5507_v17  ;;  %v2571_v58 = vmul.f32 %v2547_v13, %v4685_v1  ;;  %3908 = vrsqrt.f32 %v2650_v49  ;;  %vm2718_vm3 = vmor %vm2716_vm2, %vm2717_vm1  ;;  %vm2726_vm5 = vweird.f32 %v2650_v49 }
 0x4cf   : > { %v2712_v10 = vmul.f32 %v3907_v60, %v2711_v35  ;;  %v2709_v0 = vsel %vm2708_vm0, %v3905_v12, %v2705_v26  ;;  %v2635_v22 = vsub.f32 %v5413_v20, %v5507_v17 }
 0x4d0   : > { %v2603_v50 = vsub.f32 %v2571_v58, %v2587_v27  ;;  %v2824_v7 = vmul.f32 %v2709_v0, %v2632_v59 }
 0x4d1   : > { %v2713_v28 = vmul.f32 0.5, %v2712_v10 }
 0x4d2   : > { %v2619_v37 = vmax.f32 %v2603_v50, 0.0  ;;  %2884 = vmatmul.f32.gmra.mxu0 %v2824_v7 }
 0x4d3   : > { %v2485_v15 = vpop.xlane.xlu1 %2484  ;;  %v2714_v54 = vsub.f32 1.5, %v2713_v28 }
 0x4d4   : > { %v2651_v53 = vadd.f32 1e-05, %v2619_v37  ;;  %v5515_v43 = vmul.f32 %v2485_v15, %v4685_v1  ;;  %v3909_v63 = vpop.eup %3908 }
 0x4d5   : > { %v2549_v62 = vpop.xlane.xlu2 %2548  ;;  %v2715_v61 = vmul.f32 %v3907_v60, %v2714_v54  ;;  %v2721_v40 = vmul.f32 %v3909_v63, %v2650_v49  ;;  %vm2727_vm4 = vweird.f32 %v3909_v63 }
 0x4d6   : > { %3910 = vrsqrt.f32 %v2651_v53  ;;  %v2588_v56 = vmul.f32 %v5515_v43, %v5515_v43  ;;  %v2572_v6 = vmul.f32 %v2549_v62, %v4685_v1  ;;  %vm2728_vm6 = vmor %vm2726_vm5, %vm2727_vm4  ;;  %vm2736_vm8 = vweird.f32 %v2651_v53 }
 0x4d7   : > { %v2719_v11 = vsel %vm2718_vm3, %v3907_v60, %v2715_v61  ;;  %v2722_v8 = vmul.f32 %v3909_v63, %v2721_v40 }
 0x4d8   : > { %v2825_v18 = vmul.f32 %v2719_v11, %v2633_v4  ;;  %v2604_v47 = vsub.f32 %v2572_v6, %v2588_v56  ;;  %v2636_v4 = vsub.f32 %v5419_v5, %v5515_v43 }
 0x4d9   : > { %v2723_v33 = vmul.f32 0.5, %v2722_v8 }
 0x4da   : > { %v2620_v57 = vmax.f32 %v2604_v47, 0.0  ;;  %2887 = vmatmul.f32.gmra.mxu0 %v2825_v18 }
 0x4db   : > { %v2487_v2 = vpop.xlane.xlu0 %2486  ;;  %v2724_v30 = vsub.f32 1.5, %v2723_v33 }
 0x4dc   : > { %v3911_v24 = vpop.eup %3910  ;;  %v5523_v39 = vmul.f32 %v2487_v2, %v4685_v1  ;;  %v2652_v12 = vadd.f32 1e-05, %v2620_v57 }
 0x4dd   : > { %v2731_v51 = vmul.f32 %v3911_v24, %v2651_v53  ;;  %v2551_v21 = vpop.xlane.xlu1 %2550  ;;  %v2725_v38 = vmul.f32 %v3909_v63, %v2724_v30  ;;  %vm2737_vm7 = vweird.f32 %v3911_v24 }
 0x4de   : > { %v2589_v52 = vmul.f32 %v5523_v39, %v5523_v39  ;;  %v2573_v16 = vmul.f32 %v2551_v21, %v4685_v1  ;;  %3912 = vrsqrt.f32 %v2652_v12  ;;  %vm2738_vm9 = vmor %vm2736_vm8, %vm2737_vm7  ;;  %vm2746_vm11 = vweird.f32 %v2652_v12 }
 0x4df   : > { %v2732_v41 = vmul.f32 %v3911_v24, %v2731_v51  ;;  %v2729_v46 = vsel %vm2728_vm6, %v3909_v63, %v2725_v38  ;;  %v2637_v5 = vsub.f32 %v5425_v34, %v5523_v39 }
 0x4e0   : > { %v2605_v14 = vsub.f32 %v2573_v16, %v2589_v52  ;;  %v2826_v45 = vmul.f32 %v2729_v46, %v2634_v32 }
 0x4e1   : > { %v2733_v25 = vmul.f32 0.5, %v2732_v41 }
 0x4e2   : > { %v2621_v31 = vmax.f32 %v2605_v14, 0.0  ;;  %2890 = vmatmul.f32.gmra.mxu0 %v2826_v45 }
 0x4e3   : > { %v2489_v48 = vpop.xlane.xlu2 %2488  ;;  %v2734_v9 = vsub.f32 1.5, %v2733_v25 }
 0x4e4   : > { %v2653_v60 = vadd.f32 1e-05, %v2621_v31  ;;  %v5531_v44 = vmul.f32 %v2489_v48, %v4685_v1  ;;  %v3913_v35 = vpop.eup %3912 }
 0x4e5   : > { %v2553_v49 = vpop.xlane.xlu0 %2552  ;;  %v2735_v13 = vmul.f32 %v3911_v24, %v2734_v9  ;;  %v2741_v3 = vmul.f32 %v3913_v35, %v2652_v12  ;;  %vm2747_vm10 = vweird.f32 %v3913_v35 }
 0x4e6   : > { %3914 = vrsqrt.f32 %v2653_v60  ;;  %v2590_v27 = vmul.f32 %v5531_v44, %v5531_v44  ;;  %v2574_v58 = vmul.f32 %v2553_v49, %v4685_v1  ;;  %vm2748_vm12 = vmor %vm2746_vm11, %vm2747_vm10  ;;  %vm2756_vm14 = vweird.f32 %v2653_v60 }
 0x4e7   : > { %v2739_v26 = vsel %vm2738_vm9, %v3911_v24, %v2735_v13  ;;  %v2742_v10 = vmul.f32 %v3913_v35, %v2741_v3  ;;  %v2638_v49 = vsub.f32 %v5431_v29, %v5531_v44 }
 0x4e8   : > { %v2827_v59 = vmul.f32 %v2739_v26, %v2635_v22  ;;  %v2606_v50 = vsub.f32 %v2574_v58, %v2590_v27 }
 0x4e9   : > { %v2743_v0 = vmul.f32 0.5, %v2742_v10 }
 0x4ea   : > { %v2622_v7 = vmax.f32 %v2606_v50, 0.0  ;;  %2893 = vmatmul.f32.gmra.mxu0 %v2827_v59 }
 0x4eb   : > { %v2491_v28 = vpop.xlane.xlu1 %2490  ;;  %v2744_v20 = vsub.f32 1.5, %v2743_v0 }
 0x4ec   : > { %v3915_v37 = vpop.eup %3914  ;;  %v5539_v15 = vmul.f32 %v2491_v28, %v4685_v1  ;;  %v2654_v54 = vadd.f32 1e-05, %v2622_v7 }
 0x4ed   : > { %v2751_v17 = vmul.f32 %v3915_v37, %v2653_v60  ;;  %v2555_v53 = vpop.xlane.xlu2 %2554  ;;  %v2745_v61 = vmul.f32 %v3913_v35, %v2744_v20  ;;  %vm2757_vm13 = vweird.f32 %v3915_v37 }
 0x4ee   : > { %v2591_v63 = vmul.f32 %v5539_v15, %v5539_v15  ;;  %v2575_v62 = vmul.f32 %v2555_v53, %v4685_v1  ;;  %3916 = vrsqrt.f32 %v2654_v54  ;;  %vm2758_vm15 = vmor %vm2756_vm14, %vm2757_vm13  ;;  %vm2766_vm1 = vweird.f32 %v2654_v54 }
 0x4ef   : > { %v2752_v40 = vmul.f32 %v3915_v37, %v2751_v17  ;;  %v2749_v6 = vsel %vm2748_vm12, %v3913_v35, %v2745_v61  ;;  %v2639_v29 = vsub.f32 %v5437_v23, %v5539_v15 }
 0x4f0   : > { %v2607_v56 = vsub.f32 %v2575_v62, %v2591_v63  ;;  %v2828_v11 = vmul.f32 %v2749_v6, %v2636_v4 }
 0x4f1   : > { %v2753_v18 = vmul.f32 0.5, %v2752_v40 }
 0x4f2   : > { %v2623_v8 = vmax.f32 %v2607_v56, 0.0  ;;  %2896 = vmatmul.f32.gmra.mxu0 %v2828_v11 }
 0x4f3   : > { %v2493_v47 = vpop.xlane.xlu0 %2492  ;;  %v2754_v33 = vsub.f32 1.5, %v2753_v18 }
 0x4f4   : > { %v2655_v57 = vadd.f32 1e-05, %v2623_v8  ;;  %v5547_v2 = vmul.f32 %v2493_v47, %v4685_v1  ;;  %v3917_v24 = vpop.eup %3916 }
 0x4f5   : > { %v2557_v30 = vpop.xlane.xlu1 %2556  ;;  %v2755_v51 = vmul.f32 %v3915_v37, %v2754_v33  ;;  %v2761_v43 = vmul.f32 %v3917_v24, %v2654_v54  ;;  %vm2767_vm0 = vweird.f32 %v3917_v24 }
 0x4f6   : > { %3918 = vrsqrt.f32 %v2655_v57  ;;  %v2592_v12 = vmul.f32 %v5547_v2, %v5547_v2  ;;  %v2576_v21 = vmul.f32 %v2557_v30, %v4685_v1  ;;  %vm2768_vm2 = vmor %vm2766_vm1, %vm2767_vm0  ;;  %vm2776_vm4 = vweird.f32 %v2655_v57 }
 0x4f7   : > { %v2759_v52 = vsel %vm2758_vm15, %v3915_v37, %v2755_v51  ;;  %v2762_v38 = vmul.f32 %v3917_v24, %v2761_v43 }
 0x4f8   : > { %v2829_v16 = vmul.f32 %v2759_v52, %v2637_v5  ;;  %v2608_v32 = vsub.f32 %v2576_v21, %v2592_v12 }
 0x4f9   : > { %v2763_v41 = vmul.f32 0.5, %v2762_v38 }
 0x4fa   : > { %v2624_v14 = vmax.f32 %v2608_v32, 0.0  ;;  %2899 = vmatmul.f32.gmra.mxu0 %v2829_v16 }
 0x4fb   : > { %v2495_v46 = vpop.xlane.xlu2 %2494  ;;  %v2764_v34 = vsub.f32 1.5, %v2763_v41 }
 0x4fc   : > { %v3919_v45 = vpop.eup %3918  ;;  %v5555_v25 = vmul.f32 %v2495_v46, %v4685_v1  ;;  %v2656_v31 = vadd.f32 1e-05, %v2624_v14 }
 0x4fd   : > { %v2771_v39 = vmul.f32 %v3919_v45, %v2655_v57  ;;  %v2559_v48 = vpop.xlane.xlu0 %2558  ;;  %v2765_v35 = vmul.f32 %v3917_v24, %v2764_v34  ;;  %vm2777_vm3 = vweird.f32 %v3919_v45  ;;  %v2640_v57 = vsub.f32 %v5443_v55, %v5547_v2 }
 0x4fe   : > { %v2593_v9 = vmul.f32 %v5555_v25, %v5555_v25  ;;  %v2577_v60 = vmul.f32 %v2559_v48, %v4685_v1  ;;  %3920 = vrsqrt.f32 %v2656_v31  ;;  %vm2778_vm5 = vmor %vm2776_vm4, %vm2777_vm3  ;;  %vm2786_vm7 = vweird.f32 %v2656_v31 }
 0x4ff   : > { %v2772_v13 = vmul.f32 %v3919_v45, %v2771_v39  ;;  %v2769_v3 = vsel %vm2768_vm2, %v3917_v24, %v2765_v35  ;;  %v2641_v32 = vsub.f32 %v5449_v19, %v5555_v25  ;;  %vm3053_vm2 = vcmask 1041409  }
 0x500   : > { %v2609_v22 = vsub.f32 %v2577_v60, %v2593_v9  ;;  %v2830_v27 = vmul.f32 %v2769_v3, %v2638_v49  ;;  %v3031_v3 = vld [vmem:[#allocation7 + $0x70] sm:$0xff]  ;;  %vm3055_vm3 = vcmask 1042434   ;;  %vm3057_vm4 = vcmask 1043459  }
 0x501   : > { %v2773_v58 = vmul.f32 0.5, %v2772_v13 }
 0x502   : > { %v2625_v26 = vmax.f32 %v2609_v22, 0.0  ;;  %2902 = vmatmul.f32.gmra.mxu0 %v2830_v27 }
 0x503   : > { %v2497_v59 = vpop.xlane.xlu1 %2496  ;;  %v2774_v10 = vsub.f32 1.5, %v2773_v58 }
 0x504   : > { %v2657_v50 = vadd.f32 1e-05, %v2625_v26  ;;  %v5563_v0 = vmul.f32 %v2497_v59, %v4685_v1  ;;  %v3921_v7 = vpop.eup %3920  ;;  %v3029_v59 = vld [vmem:[#allocation7 + $0x60] sm:$0xff] }
 0x505   : > { %v2561_v28 = vpop.xlane.xlu2 %2560  ;;  %v2775_v37 = vmul.f32 %v3919_v45, %v2774_v10  ;;  %v2781_v44 = vmul.f32 %v3921_v7, %v2656_v31  ;;  %vm2787_vm6 = vweird.f32 %v3921_v7 }
 0x506   : > { %3922 = vrsqrt.f32 %v2657_v50  ;;  %v2594_v20 = vmul.f32 %v5563_v0, %v5563_v0  ;;  %v2578_v17 = vmul.f32 %v2561_v28, %v4685_v1  ;;  %vm2788_vm8 = vmor %vm2786_vm7, %vm2787_vm6  ;;  %vm2796_vm10 = vweird.f32 %v2657_v50  ;;  %v3026_v28 = vld [vmem:[#allocation7 + $0x48] sm:$0xff] }
 0x507   : > { %v2779_v54 = vsel %vm2778_vm5, %v3919_v45, %v2775_v37  ;;  %v2782_v63 = vmul.f32 %v3921_v7, %v2781_v44  ;;  %v3032_v45 = vld [vmem:[#allocation7 + $0x78] sm:$0xff]  ;;  %v2642_v9 = vsub.f32 %v5455_v36, %v5563_v0  ;;  %v3030_v36 = vld [vmem:[#allocation7 + $0x68] sm:$0xff]  ;;  %v3023_v44 = vld [vmem:[#allocation7 + $0x30] sm:$0xff]  ;;  %vm3059_vm5 = vcmask 1044484  }
 0x508   : > { %v2831_v53 = vmul.f32 %v2779_v54, %v2639_v29  ;;  %v2610_v62 = vsub.f32 %v2578_v17, %v2594_v20  ;;  %3076 = vmatpush.msrb.mxu1 %v3032_v45  ;;  %v3024_v29 = vld [vmem:[#allocation7 + $0x38] sm:$0xff]  ;;  %v3022_v20 = vld [vmem:[#allocation7 + $0x28] sm:$0xff]  ;;  %v3021_v17 = vld [vmem:[#allocation7 + $0x20] sm:$0xff]  ;;  %vm3061_vm6 = vcmask 1045509   ;;  %vm3063_vm7 = vcmask 1046534  }
 0x509   : > { %v2783_v61 = vmul.f32 0.5, %v2782_v63  ;;  %v5582_v63 = vld [vmem:[%s5740_s15] ss:$0 sm:$0xff] }
 0x50a   : > { %v2626_v4 = vmax.f32 %v2610_v62, 0.0  ;;  %2905 = vmatmul.f32.gmra.mxu0 %v2831_v53  ;;  %3077 = vmatpush.msrb.mxu1 %v3031_v3  ;;  %v3020_v53 = vld [vmem:[#allocation7 + $0x18] sm:$0xff]  ;;  %v3019_v62 = vld [vmem:[#allocation7 + $0x10] sm:$0xff] }
 0x50b   : > { %v2499_v40 = vpop.xlane.xlu0 %2498  ;;  %v2784_v23 = vsub.f32 1.5, %v2783_v61 }
 0x50c   : > { %v3923_v56 = vpop.eup %3922  ;;  %v2515_v6 = vmul.f32 %v2499_v40, %v4685_v1  ;;  %v2658_v11 = vadd.f32 1e-05, %v2626_v4  ;;  %3078 = vmatpush.msrb.mxu1 %v3030_v36  ;;  %v3018_v4 = vld [vmem:[#allocation7 + $0x8] sm:$0xff] }
 0x50d   : > { %v2791_v15 = vmul.f32 %v3923_v56, %v2657_v50  ;;  %v2563_v18 = vpop.xlane.xlu1 %2562  ;;  %v2785_v33 = vmul.f32 %v3921_v7, %v2784_v23  ;;  %vm2797_vm9 = vweird.f32 %v3923_v56  ;;  %v3028_v50 = vld [vmem:[#allocation7 + $0x58] sm:$0xff]  ;;  %v3017_v23 = vld [vmem:[#allocation7] sm:$0xff] }
 0x50e   : > { %v2595_v8 = vmul.f32 %v2515_v6, %v2515_v6  ;;  %v2579_v47 = vmul.f32 %v2563_v18, %v4685_v1  ;;  %3924 = vrsqrt.f32 %v2658_v11  ;;  %vm2798_vm11 = vmor %vm2796_vm10, %vm2797_vm9  ;;  %vm2806_vm13 = vweird.f32 %v2658_v11  ;;  %3079 = vmatpush.msrb.mxu1 %v3029_v59 }
 0x50f   : > { %v2792_v24 = vmul.f32 %v3923_v56, %v2791_v15  ;;  %v2789_v51 = vsel %vm2788_vm8, %v3921_v7, %v2785_v33  ;;  %v2643_v22 = vsub.f32 %v5463_v42, %v2515_v6  ;;  %v3027_v7 = vld [vmem:[#allocation7 + $0x50] sm:$0xff]  ;;  %v3025_v42 = vld [vmem:[#allocation7 + $0x40] sm:$0xff]  ;;  %vm3065_vm8 = vcmask 1047559  }
 0x510   : > { %v2611_v30 = vsub.f32 %v2579_v47, %v2595_v8  ;;  %v2832_v5 = vmul.f32 %v2789_v51, %v2640_v57  ;;  %3080 = vmatpush.msrb.mxu1 %v3028_v50 }
 0x511   : > { %v2793_v43 = vmul.f32 0.5, %v2792_v24 }
 0x512   : > { %v2627_v12 = vmax.f32 %v2611_v30, 0.0  ;;  %2908 = vmatmul.f32.gmra.mxu0 %v2832_v5  ;;  %3081 = vmatpush.msrb.mxu1 %v3027_v7 }
 0x513   : > { %v2794_v21 = vsub.f32 1.5, %v2793_v43 }
 0x514   : > { %v2659_v52 = vadd.f32 1e-05, %v2627_v12  ;;  %v3925_v16 = vpop.eup %3924  ;;  %3082 = vmatpush.msrb.mxu1 %v3026_v28 }
 0x515   : > { %v2795_v38 = vmul.f32 %v3923_v56, %v2794_v21  ;;  %v2801_v41 = vmul.f32 %v3925_v16, %v2658_v11  ;;  %vm2807_vm12 = vweird.f32 %v3925_v16 }
 0x516   : > { %3926 = vrsqrt.f32 %v2659_v52  ;;  %vm2808_vm14 = vmor %vm2806_vm13, %vm2807_vm12  ;;  %vm2816_vm0 = vweird.f32 %v2659_v52  ;;  %3083 = vmatpush.msrb.mxu1 %v3025_v42 }
 0x517   : > { %v2799_v55 = vsel %vm2798_vm11, %v3923_v56, %v2795_v38  ;;  %v2802_v2 = vmul.f32 %v3925_v16, %v2801_v41 }
 0x518   : > { %v2833_v14 = vmul.f32 %v2799_v55, %v2641_v32  ;;  %3084 = vmatpush.msrb.mxu1 %v3024_v29 }
 0x519   : > { %v2803_v46 = vmul.f32 0.5, %v2802_v2 }
 0x51a   : > { %2911 = vmatmul.f32.gmra.mxu0 %v2833_v14  ;;  %3085 = vmatpush.msrb.mxu1 %v3023_v44 }
 0x51b   : > { %v2804_v39 = vsub.f32 1.5, %v2803_v46 }
 0x51c   : > { %v3927_v34 = vpop.eup %3926  ;;  %3086 = vmatpush.msrb.mxu1 %v3022_v20 }
 0x51d   : > { %v2811_v31 = vmul.f32 %v3927_v34, %v2659_v52  ;;  %v2805_v48 = vmul.f32 %v3925_v16, %v2804_v39  ;;  %vm2817_vm15 = vweird.f32 %v3927_v34 }
 0x51e   : > { %vm2818_vm1 = vmor %vm2816_vm0, %vm2817_vm15  ;;  %3087 = vmatpush.msrb.mxu1 %v3021_v17 }
 0x51f   : > { %v2812_v19 = vmul.f32 %v3927_v34, %v2811_v31  ;;  %v2809_v25 = vsel %vm2808_vm14, %v3925_v16, %v2805_v48 }
 0x520   : > { %v2834_v35 = vmul.f32 %v2809_v25, %v2642_v9  ;;  %3088 = vmatpush.msrb.mxu1 %v3020_v53 }
 0x521   : > { %v2813_v60 = vmul.f32 0.5, %v2812_v19 }
 0x522   : > { %2914 = vmatmul.f32.gmra.mxu0 %v2834_v35  ;;  %3089 = vmatpush.msrb.mxu1 %v3019_v62 }
 0x523   : > { %v2814_v49 = vsub.f32 1.5, %v2813_v60 }
 0x524   : > { %3090 = vmatpush.msrb.mxu1 %v3018_v4 }
 0x525   : > { %v2815_v13 = vmul.f32 %v3927_v34, %v2814_v49 }
 0x526   : > { %3091 = vmatpush.msrb.mxu1 %v3017_v23 }
 0x527   : > { %v2819_v27 = vsel %vm2818_vm1, %v3927_v34, %v2815_v13 }
 0x528   : > { %v2835_v58 = vmul.f32 %v2819_v27, %v2643_v22 }
 0x52a   : > { %2917 = vmatmul.f32.gmra.mxu0 %v2835_v58 }
 0x52f   : > { %v2873_v26 = vpop.f32.mrf.mxu0 }
 0x530   : > { %v2874_v56 = vadd.f32 %v5582_v63, %v2873_v26 }
 0x532   : > { %v2921_v33 = vrot.slane %v2874_v56, 4 }
 0x534   : > { %v2922_v43 = vadd.f32 %v2921_v33, %v2874_v56 }
 0x536   : > { %v2923_v55 = vrot.slane %v2922_v43, 2 }
 0x537   : > { %v2876_v10 = vpop.f32.mrf.mxu0 }
 0x538   : > { %v2877_v61 = vadd.f32 %v5582_v63, %v2876_v10  ;;  %v2924_v48 = vadd.f32 %v2923_v55, %v2922_v43 }
 0x53a   : > { %v2927_v18 = vrot.slane %v2877_v61, 4  ;;  %v2925_v27 = vrot.slane %v2924_v48, 1 }
 0x53c   : > { %v2928_v30 = vadd.f32 %v2927_v18, %v2877_v61  ;;  %v2926_v28 = vadd.f32 %v2925_v27, %v2924_v48 }
 0x53e   : > { %v2929_v16 = vrot.slane %v2928_v30, 2 }
 0x53f   : > { %v2879_v0 = vpop.f32.mrf.mxu0 }
 0x540   : > { %v2880_v40 = vadd.f32 %v5582_v63, %v2879_v0  ;;  %v2930_v45 = vadd.f32 %v2929_v16, %v2928_v30 }
 0x542   : > { %v2933_v47 = vrot.slane %v2880_v40, 4  ;;  %v2931_v35 = vrot.slane %v2930_v45, 1 }
 0x544   : > { %v2934_v5 = vadd.f32 %v2933_v47, %v2880_v40  ;;  %v2932_v59 = vadd.f32 %v2931_v35, %v2930_v45 }
 0x546   : > { %v2935_v41 = vrot.slane %v2934_v5, 2  ;;  %v3054_v20 = vsel %vm3053_vm2, %v2932_v59, %v2926_v28 }
 0x547   : > { %v2882_v37 = vpop.f32.mrf.mxu0 }
 0x548   : > { %v2883_v6 = vadd.f32 %v5582_v63, %v2882_v37  ;;  %v2936_v31 = vadd.f32 %v2935_v41, %v2934_v5 }
 0x54a   : > { %v2939_v57 = vrot.slane %v2883_v6, 4  ;;  %v2937_v22 = vrot.slane %v2936_v31, 1 }
 0x54c   : > { %v2940_v12 = vadd.f32 %v2939_v57, %v2883_v6  ;;  %v2938_v0 = vadd.f32 %v2937_v22, %v2936_v31 }
 0x54e   : > { %v2941_v2 = vrot.slane %v2940_v12, 2  ;;  %v3056_v53 = vsel %vm3055_vm3, %v2938_v0, %v3054_v20 }
 0x54f   : > { %v2885_v54 = vpop.f32.mrf.mxu0 }
 0x550   : > { %v2886_v15 = vadd.f32 %v5582_v63, %v2885_v54  ;;  %v2942_v9 = vadd.f32 %v2941_v2, %v2940_v12 }
 0x552   : > { %v2945_v24 = vrot.slane %v2886_v15, 4  ;;  %v2943_v58 = vrot.slane %v2942_v9, 1 }
 0x554   : > { %v2946_v21 = vadd.f32 %v2945_v24, %v2886_v15  ;;  %v2944_v42 = vadd.f32 %v2943_v58, %v2942_v9 }
 0x556   : > { %v2947_v46 = vrot.slane %v2946_v21, 2  ;;  %v3058_v4 = vsel %vm3057_vm4, %v2944_v42, %v3056_v53 }
 0x557   : > { %v2888_v11 = vpop.f32.mrf.mxu0 }
 0x558   : > { %v2889_v8 = vadd.f32 %v5582_v63, %v2888_v11  ;;  %v2948_v25 = vadd.f32 %v2947_v46, %v2946_v21 }
 0x55a   : > { %v2951_v51 = vrot.slane %v2889_v8, 4  ;;  %v2949_v36 = vrot.slane %v2948_v25, 1 }
 0x55c   : > { %v2952_v38 = vadd.f32 %v2951_v51, %v2889_v8  ;;  %v2950_v29 = vadd.f32 %v2949_v36, %v2948_v25 }
 0x55e   : > { %v2953_v34 = vrot.slane %v2952_v38, 2  ;;  %v3060_v56 = vsel %vm3059_vm5, %v2950_v29, %v3058_v4 }
 0x55f   : > { %v2891_v52 = vpop.f32.mrf.mxu0 }
 0x560   : > { %v2892_v32 = vadd.f32 %v5582_v63, %v2891_v52  ;;  %v2954_v49 = vadd.f32 %v2953_v34, %v2952_v38 }
 0x562   : > { %v2957_v14 = vrot.slane %v2892_v32, 4  ;;  %v2955_v10 = vrot.slane %v2954_v49, 1 }
 0x564   : > { %v2958_v39 = vadd.f32 %v2957_v14, %v2892_v32  ;;  %v2956_v17 = vadd.f32 %v2955_v10, %v2954_v49 }
 0x566   : > { %v2959_v19 = vrot.slane %v2958_v39, 2  ;;  %v3062_v23 = vsel %vm3061_vm6, %v2956_v17, %v3060_v56 }
 0x567   : > { %v2894_v60 = vpop.f32.mrf.mxu0 }
 0x568   : > { %v2895_v13 = vadd.f32 %v5582_v63, %v2894_v60  ;;  %v2960_v3 = vadd.f32 %v2959_v19, %v2958_v39 }
 0x56a   : > { %v2963_v26 = vrot.slane %v2895_v13, 4  ;;  %v2961_v7 = vrot.slane %v2960_v3, 1 }
 0x56c   : > { %v2964_v50 = vadd.f32 %v2963_v26, %v2895_v13  ;;  %v2962_v62 = vadd.f32 %v2961_v7, %v2960_v3 }
 0x56e   : > { %v2965_v37 = vrot.slane %v2964_v50, 2  ;;  %v3064_v15 = vsel %vm3063_vm7, %v2962_v62, %v3062_v23 }
 0x56f   : > { %v2897_v44 = vpop.f32.mrf.mxu0 }
 0x570   : > { %v2966_v54 = vadd.f32 %v2965_v37, %v2964_v50  ;;  %v2898_v40 = vadd.f32 %v5582_v63, %v2897_v44 }
 0x572   : > { %v2967_v61 = vrot.slane %v2966_v54, 1  ;;  %v2969_v18 = vrot.slane %v2898_v40, 4 }
 0x574   : > { %v2968_v6 = vadd.f32 %v2967_v61, %v2966_v54  ;;  %v2970_v57 = vadd.f32 %v2969_v18, %v2898_v40 }
 0x576   : > { %v3066_v11 = vsel %vm3065_vm8, %v2968_v6, %v3064_v15  ;;  %v2971_v51 = vrot.slane %v2970_v57, 2 }
 0x577   : > { %v2900_v8 = vpop.f32.mrf.mxu0  ;;  %3092 = vmatmul.f32.vlgmr.msrb.gmra.mxu1 %v3066_v11 }
 0x578   : > { %v2901_v47 = vadd.f32 %v5582_v63, %v2900_v8  ;;  %v2972_v52 = vadd.f32 %v2971_v51, %v2970_v57  ;;  %v3793_v51 = vld [vmem:[%s5741_s16] ss:$0 sm:$0xff] }
 0x57a   : > { %v2975_v33 = vrot.slane %v2901_v47, 4  ;;  %v2973_v41 = vrot.slane %v2972_v52, 1 }
 0x57c   : > { %v2976_v24 = vadd.f32 %v2975_v33, %v2901_v47  ;;  %v2974_v39 = vadd.f32 %v2973_v41, %v2972_v52  ;;  %v3166_v52 = vld [vmem:[#allocation8 + $0x78] sm:$0xff] }
 0x57d   : > { %3171 = vmatpush.msrb.mxu2 %v3166_v52  ;;  %v3162_v41 = vld [vmem:[#allocation8 + $0x58] sm:$0xff]  ;;  %v3259_v52 = vld [vmem:[#allocation10 + $0x68] sm:$0xff] }
 0x57e   : > { %v2977_v30 = vrot.slane %v2976_v24, 2 }
 0x57f   : > { %v2903_v5 = vpop.f32.mrf.mxu0 }
 0x580   : > { %v2904_v43 = vadd.f32 %v5582_v63, %v2903_v5  ;;  %v2978_v12 = vadd.f32 %v2977_v30, %v2976_v24 }
 0x582   : > { %v2981_v21 = vrot.slane %v2904_v43, 4  ;;  %v2979_v38 = vrot.slane %v2978_v12, 1 }
 0x584   : > { %v2982_v16 = vadd.f32 %v2981_v21, %v2904_v43  ;;  %v2980_v46 = vadd.f32 %v2979_v38, %v2978_v12  ;;  %v3164_v38 = vld [vmem:[#allocation8 + $0x68] sm:$0xff] }
 0x586   : > { %v2983_v32 = vrot.slane %v2982_v16, 2  ;;  %v3067_v9 = vsel %vm3053_vm2, %v2980_v46, %v2974_v39  ;;  %v3160_v39 = vld [vmem:[#allocation8 + $0x48] sm:$0xff] }
 0x587   : > { %v2906_v55 = vpop.f32.mrf.mxu0 }
 0x588   : > { %v2984_v2 = vadd.f32 %v2983_v32, %v2982_v16  ;;  %v2907_v14 = vadd.f32 %v5582_v63, %v2906_v55  ;;  %v3165_v16 = vld [vmem:[#allocation8 + $0x70] sm:$0xff]  ;;  %v3163_v32 = vld [vmem:[#allocation8 + $0x60] sm:$0xff] }
 0x589   : > { %3172 = vmatpush.msrb.mxu2 %v3165_v16  ;;  %v3161_v55 = vld [vmem:[#allocation8 + $0x50] sm:$0xff]  ;;  %v3258_v16 = vld [vmem:[#allocation10 + $0x60] sm:$0xff] }
 0x58a   : > { %v2985_v45 = vrot.slane %v2984_v2, 1  ;;  %v2987_v34 = vrot.slane %v2907_v14, 4 }
 0x58b   : > { %3173 = vmatpush.msrb.mxu2 %v3164_v38  ;;  %v3257_v38 = vld [vmem:[#allocation10 + $0x58] sm:$0xff] }
 0x58c   : > { %v2986_v31 = vadd.f32 %v2985_v45, %v2984_v2  ;;  %v2988_v48 = vadd.f32 %v2987_v34, %v2907_v14 }
 0x58d   : > { %3174 = vmatpush.msrb.mxu2 %v3163_v32  ;;  %v3256_v32 = vld [vmem:[#allocation10 + $0x50] sm:$0xff] }
 0x58e   : > { %v3068_v19 = vsel %vm3055_vm3, %v2986_v31, %v3067_v9  ;;  %v2989_v25 = vrot.slane %v2988_v48, 2  ;;  %v3159_v31 = vld [vmem:[#allocation8 + $0x40] sm:$0xff]  ;;  %v3157_v9 = vld [vmem:[#allocation8 + $0x30] sm:$0xff] }
 0x58f   : > { %v2909_v60 = vpop.f32.mrf.mxu0  ;;  %3175 = vmatpush.msrb.mxu2 %v3162_v41 }
 0x590   : > { %v2990_v35 = vadd.f32 %v2989_v25, %v2988_v48  ;;  %v2910_v49 = vadd.f32 %v5582_v63, %v2909_v60  ;;  %v3158_v48 = vld [vmem:[#allocation8 + $0x38] sm:$0xff]  ;;  %v3155_v25 = vld [vmem:[#allocation8 + $0x20] sm:$0xff] }
 0x591   : > { %3176 = vmatpush.msrb.mxu2 %v3161_v55  ;;  %v3154_v60 = vld [vmem:[#allocation8 + $0x18] sm:$0xff] }
 0x592   : > { %v2991_v13 = vrot.slane %v2990_v35, 1  ;;  %v2993_v22 = vrot.slane %v2910_v49, 4 }
 0x593   : > { %3177 = vmatpush.msrb.mxu2 %v3160_v39  ;;  %v3253_v39 = vld [vmem:[#allocation10 + $0x38] sm:$0xff] }
 0x594   : > { %v2992_v3 = vadd.f32 %v2991_v13, %v2990_v35  ;;  %v2994_v27 = vadd.f32 %v2993_v22, %v2910_v49  ;;  %v3153_v35 = vld [vmem:[#allocation8 + $0x10] sm:$0xff]  ;;  %v3152_v49 = vld [vmem:[#allocation8 + $0x8] sm:$0xff]  ;;  %v3151_v13 = vld [vmem:[#allocation8] sm:$0xff] }
 0x595   : > { %3178 = vmatpush.msrb.mxu2 %v3159_v31  ;;  %v3252_v31 = vld [vmem:[#allocation10 + $0x30] sm:$0xff] }
 0x596   : > { %v2995_v58 = vrot.slane %v2994_v27, 2  ;;  %v3069_v26 = vsel %vm3057_vm4, %v2992_v3, %v3068_v19  ;;  %v3156_v19 = vld [vmem:[#allocation8 + $0x28] sm:$0xff] }
 0x597   : > { %v2912_v36 = vpop.f32.mrf.mxu0  ;;  %3179 = vmatpush.msrb.mxu2 %v3158_v48  ;;  %v3251_v48 = vld [vmem:[#allocation10 + $0x28] sm:$0xff] }
 0x598   : > { %v2996_v59 = vadd.f32 %v2995_v58, %v2994_v27  ;;  %v2913_v10 = vadd.f32 %v5582_v63, %v2912_v36 }
 0x599   : > { %3180 = vmatpush.msrb.mxu2 %v3157_v9  ;;  %v3250_v9 = vld [vmem:[#allocation10 + $0x20] sm:$0xff] }
 0x59a   : > { %v2997_v50 = vrot.slane %v2996_v59, 1  ;;  %v2999_v0 = vrot.slane %v2913_v10, 4 }
 0x59b   : > { %3181 = vmatpush.msrb.mxu2 %v3156_v19  ;;  %v3249_v19 = vld [vmem:[#allocation10 + $0x18] sm:$0xff] }
 0x59c   : > { %v2998_v7 = vadd.f32 %v2997_v50, %v2996_v59  ;;  %v3000_v28 = vadd.f32 %v2999_v0, %v2913_v10 }
 0x59d   : > { %3182 = vmatpush.msrb.mxu2 %v3155_v25  ;;  %v3248_v25 = vld [vmem:[#allocation10 + $0x10] sm:$0xff] }
 0x59e   : > { %v3001_v42 = vrot.slane %v3000_v28, 2  ;;  %v3070_v37 = vsel %vm3059_vm5, %v2998_v7, %v3069_v26 }
 0x59f   : > { %v2915_v29 = vpop.f32.mrf.mxu0  ;;  %3183 = vmatpush.msrb.mxu2 %v3154_v60  ;;  %v3247_v60 = vld [vmem:[#allocation10 + $0x8] sm:$0xff] }
 0x5a0   : > { %v3002_v44 = vadd.f32 %v3001_v42, %v3000_v28  ;;  %v2916_v20 = vadd.f32 %v5582_v63, %v2915_v29 }
 0x5a1   : > { %3184 = vmatpush.msrb.mxu2 %v3153_v35  ;;  %v3246_v35 = vld [vmem:[#allocation10] sm:$0xff] }
 0x5a2   : > { %v3003_v17 = vrot.slane %v3002_v44, 1  ;;  %v3005_v54 = vrot.slane %v2916_v20, 4 }
 0x5a3   : > { %3185 = vmatpush.msrb.mxu2 %v3152_v49 }
 0x5a4   : > { %v3004_v53 = vadd.f32 %v3003_v17, %v3002_v44  ;;  %v3006_v62 = vadd.f32 %v3005_v54, %v2916_v20 }
 0x5a5   : > { %3186 = vmatpush.msrb.mxu2 %v3151_v13 }
 0x5a6   : > { %v3007_v61 = vrot.slane %v3006_v62, 2  ;;  %v3071_v4 = vsel %vm3061_vm6, %v3004_v53, %v3070_v37 }
 0x5a7   : > { %v2918_v40 = vpop.f32.mrf.mxu0 }
 0x5a8   : > { %v3008_v56 = vadd.f32 %v3007_v61, %v3006_v62  ;;  %v2919_v6 = vadd.f32 %v5582_v63, %v2918_v40 }
 0x5aa   : > { %v3009_v23 = vrot.slane %v3008_v56, 1  ;;  %v3011_v15 = vrot.slane %v2919_v6, 4 }
 0x5ac   : > { %v3010_v11 = vadd.f32 %v3009_v23, %v3008_v56  ;;  %v3012_v18 = vadd.f32 %v3011_v15, %v2919_v6 }
 0x5ae   : > { %v3013_v8 = vrot.slane %v3012_v18, 2  ;;  %v3072_v47 = vsel %vm3063_vm7, %v3010_v11, %v3071_v4 }
 0x5b0   : > { %v3014_v33 = vadd.f32 %v3013_v8, %v3012_v18 }
 0x5b2   : > { %v3015_v57 = vrot.slane %v3014_v33, 1 }
 0x5b4   : > { %v3016_v24 = vadd.f32 %v3015_v57, %v3014_v33 }
 0x5b6   : > { %v3073_v30 = vsel %vm3065_vm8, %v3016_v24, %v3072_v47  ;;  %v3794_v24 = vld [vmem:[%s5742_s17] ss:$0 sm:$0xff] }
 0x5b7   : > { %3095 = vmatmul.f32.gmra.mxu1 %v3073_v30 }
 0x5f4   : > { %v3093_v5 = vpop.f32.mrf.mxu1 }
 0x5f5   : > { %v3094_v43 = vadd.f32 %v3793_v51, %v3093_v5 }
 0x5f7   : > { %v3101_v63 = vmul.f32 0.01, %v3094_v43  ;;  %vm3099_vm9 = vcmp.gt.f32.partialorder %v3094_v43, 0.0 }
 0x5f9   : > { %v5617_v12 = vsel %vm3099_vm9, %v3094_v43, %v3101_v63 }
 0x5fa   : > { %3105 = vadd.xlane.f32.xlu2 %v5617_v12  ;;  %v3111_v21 = vmul.f32 %v5617_v12, %v5617_v12 }
 0x5fc   : > { %3113 = vadd.xlane.f32.xlu0 %v3111_v21  ;;  %v3260_v21 = vld [vmem:[#allocation10 + $0x70] sm:$0xff] }
 0x634   : > { %v3096_v2 = vpop.f32.mrf.mxu1 }
 0x635   : > { %v3097_v14 = vadd.f32 %v3793_v51, %v3096_v2 }
 0x637   : > { %v3102_v46 = vmul.f32 0.01, %v3097_v14  ;;  %vm3100_vm10 = vcmp.gt.f32.partialorder %v3097_v14, 0.0 }
 0x639   : > { %v5622_v45 = vsel %vm3100_vm10, %v3097_v14, %v3102_v46 }
 0x63a   : > { %3107 = vadd.xlane.f32.xlu1 %v5622_v45  ;;  %v3112_v34 = vmul.f32 %v5622_v45, %v5622_v45 }
 0x63c   : > { %3115 = vadd.xlane.f32.xlu2 %v3112_v34  ;;  %v3254_v34 = vld [vmem:[#allocation10 + $0x40] sm:$0xff] }
 0x66d   : > { %v3106_v22 = vpop.xlane.xlu2 %3105 }
 0x66e   : > { %v3109_v3 = vmul.f32 %v3106_v22, %v4685_v1 }
 0x66f   : > { %v3114_v27 = vpop.xlane.xlu0 %3113 }
 0x670   : > { %v3119_v58 = vmul.f32 %v3109_v3, %v3109_v3  ;;  %v3117_v26 = vmul.f32 %v3114_v27, %v4685_v1  ;;  %v3125_v29 = vsub.f32 %v5617_v12, %v3109_v3  ;;  %v3261_v12 = vld [vmem:[#allocation10 + $0x78] sm:$0xff] }
 0x671   : > { %3266 = vmatpush.msra.mxu3 %v3261_v12 }
 0x672   : > { %v3121_v36 = vsub.f32 %v3117_v26, %v3119_v58 }
 0x673   : > { %3267 = vmatpush.msra.mxu3 %v3260_v21 }
 0x674   : > { %v3123_v59 = vmax.f32 %v3121_v36, 0.0 }
 0x675   : > { %3268 = vmatpush.msra.mxu3 %v3259_v52 }
 0x676   : > { %v3127_v10 = vadd.f32 1e-05, %v3123_v59 }
 0x677   : > { %3269 = vmatpush.msra.mxu3 %v3258_v16 }
 0x678   : > { %3928 = vrsqrt.f32 %v3127_v10  ;;  %vm3135_vm12 = vweird.f32 %v3127_v10 }
 0x679   : > { %3270 = vmatpush.msra.mxu3 %v3257_v38  ;;  %v3355_v38 = vld [vmem:[#allocation11 + $0x70] sm:$0xff] }
 0x67b   : > { %3271 = vmatpush.msra.mxu3 %v3256_v32  ;;  %v3354_v32 = vld [vmem:[#allocation11 + $0x68] sm:$0xff] }
 0x67e   : > { %v3929_v50 = vpop.eup %3928 }
 0x67f   : > { %v3130_v0 = vmul.f32 %v3929_v50, %v3127_v10  ;;  %vm3136_vm11 = vweird.f32 %v3929_v50 }
 0x680   : > { %vm3137_vm13 = vmor %vm3135_vm12, %vm3136_vm11 }
 0x681   : > { %v3131_v7 = vmul.f32 %v3929_v50, %v3130_v0 }
 0x683   : > { %v3132_v28 = vmul.f32 0.5, %v3131_v7 }
 0x685   : > { %v3133_v42 = vsub.f32 1.5, %v3132_v28 }
 0x687   : > { %v3134_v37 = vmul.f32 %v3929_v50, %v3133_v42 }
 0x689   : > { %v3138_v44 = vsel %vm3137_vm13, %v3929_v50, %v3134_v37 }
 0x68a   : > { %v3149_v20 = vmul.f32 %v3138_v44, %v3125_v29 }
 0x68c   : > { %3187 = vmatmul.f32.vlgmr.msrb.gmra.mxu2 %v3149_v20 }
 0x6ad   : > { %v3108_v17 = vpop.xlane.xlu1 %3107 }
 0x6ae   : > { %v3110_v54 = vmul.f32 %v3108_v17, %v4685_v1 }
 0x6af   : > { %v3116_v53 = vpop.xlane.xlu2 %3115 }
 0x6b0   : > { %v3120_v62 = vmul.f32 %v3110_v54, %v3110_v54  ;;  %v3118_v61 = vmul.f32 %v3116_v53, %v4685_v1  ;;  %v3126_v47 = vsub.f32 %v5622_v45, %v3110_v54  ;;  %v3255_v45 = vld [vmem:[#allocation10 + $0x48] sm:$0xff] }
 0x6b1   : > { %3272 = vmatpush.msra.mxu3 %v3255_v45  ;;  %v3348_v45 = vld [vmem:[#allocation11 + $0x38] sm:$0xff] }
 0x6b2   : > { %v3122_v4 = vsub.f32 %v3118_v61, %v3120_v62 }
 0x6b3   : > { %3273 = vmatpush.msra.mxu3 %v3254_v34  ;;  %v3347_v34 = vld [vmem:[#allocation11 + $0x30] sm:$0xff] }
 0x6b4   : > { %v3124_v40 = vmax.f32 %v3122_v4, 0.0 }
 0x6b5   : > { %3274 = vmatpush.msra.mxu3 %v3253_v39  ;;  %v3346_v39 = vld [vmem:[#allocation11 + $0x28] sm:$0xff] }
 0x6b6   : > { %v3128_v56 = vadd.f32 1e-05, %v3124_v40 }
 0x6b7   : > { %3275 = vmatpush.msra.mxu3 %v3252_v31  ;;  %v3345_v31 = vld [vmem:[#allocation11 + $0x20] sm:$0xff] }
 0x6b8   : > { %3930 = vrsqrt.f32 %v3128_v56  ;;  %vm3145_vm15 = vweird.f32 %v3128_v56 }
 0x6b9   : > { %3276 = vmatpush.msra.mxu3 %v3251_v48  ;;  %v3344_v48 = vld [vmem:[#allocation11 + $0x18] sm:$0xff] }
 0x6bb   : > { %3277 = vmatpush.msra.mxu3 %v3250_v9  ;;  %v3343_v9 = vld [vmem:[#allocation11 + $0x10] sm:$0xff] }
 0x6bd   : > { %3278 = vmatpush.msra.mxu3 %v3249_v19  ;;  %v3342_v19 = vld [vmem:[#allocation11 + $0x8] sm:$0xff] }
 0x6be   : > { %v3931_v6 = vpop.eup %3930 }
 0x6bf   : > { %v3140_v23 = vmul.f32 %v3931_v6, %v3128_v56  ;;  %vm3146_vm14 = vweird.f32 %v3931_v6  ;;  %3279 = vmatpush.msra.mxu3 %v3248_v25  ;;  %v3341_v25 = vld [vmem:[#allocation11] sm:$0xff] }
 0x6c0   : > { %vm3147_vm0 = vmor %vm3145_vm15, %vm3146_vm14 }
 0x6c1   : > { %v3141_v15 = vmul.f32 %v3931_v6, %v3140_v23  ;;  %3280 = vmatpush.msra.mxu3 %v3247_v60 }
 0x6c3   : > { %v3142_v11 = vmul.f32 0.5, %v3141_v15  ;;  %3281 = vmatpush.msra.mxu3 %v3246_v35 }
 0x6c5   : > { %v3143_v18 = vsub.f32 1.5, %v3142_v11 }
 0x6c7   : > { %v3144_v8 = vmul.f32 %v3931_v6, %v3143_v18 }
 0x6c9   : > { %v3148_v33 = vsel %vm3147_vm0, %v3931_v6, %v3144_v8 }
 0x6ca   : > { %v3150_v57 = vmul.f32 %v3148_v33, %v3126_v47  ;;  %v3795_v33 = vld [vmem:[%s5743_s18] ss:$0 sm:$0xff] }
 0x6cc   : > { %3190 = vmatmul.f32.gmra.mxu2 %v3150_v57 }
 0x70f   : > { %v3188_v30 = vpop.f32.mrf.mxu2 }
 0x710   : > { %v3189_v51 = vadd.f32 %v3794_v24, %v3188_v30 }
 0x712   : > { %v3196_v5 = vmul.f32 0.01, %v3189_v51  ;;  %vm3194_vm1 = vcmp.gt.f32.partialorder %v3189_v51, 0.0 }
 0x714   : > { %v5636_v43 = vsel %vm3194_vm1, %v3189_v51, %v3196_v5 }
 0x715   : > { %3200 = vadd.xlane.f32.xlu0 %v5636_v43  ;;  %v3206_v63 = vmul.f32 %v5636_v43, %v5636_v43 }
 0x717   : > { %3208 = vadd.xlane.f32.xlu1 %v3206_v63 }
 0x74f   : > { %v3191_v41 = vpop.f32.mrf.mxu2 }
 0x750   : > { %v3192_v55 = vadd.f32 %v3794_v24, %v3191_v41  ;;  %v3353_v41 = vld [vmem:[#allocation11 + $0x60] sm:$0xff] }
 0x752   : > { %v3197_v2 = vmul.f32 0.01, %v3192_v55  ;;  %vm3195_vm2 = vcmp.gt.f32.partialorder %v3192_v55, 0.0 }
 0x754   : > { %v5641_v14 = vsel %vm3195_vm2, %v3192_v55, %v3197_v2  ;;  %v3352_v55 = vld [vmem:[#allocation11 + $0x58] sm:$0xff]  ;;  %v3351_v2 = vld [vmem:[#allocation11 + $0x50] sm:$0xff] }
 0x755   : > { %3202 = vadd.xlane.f32.xlu2 %v5641_v14  ;;  %v3207_v46 = vmul.f32 %v5641_v14, %v5641_v14 }
 0x757   : > { %3210 = vadd.xlane.f32.xlu0 %v3207_v46  ;;  %v3349_v46 = vld [vmem:[#allocation11 + $0x40] sm:$0xff] }
 0x788   : > { %v3201_v49 = vpop.xlane.xlu0 %3200 }
 0x789   : > { %v3204_v13 = vmul.f32 %v3201_v49, %v4685_v1 }
 0x78a   : > { %v3209_v22 = vpop.xlane.xlu1 %3208 }
 0x78b   : > { %v3214_v3 = vmul.f32 %v3204_v13, %v3204_v13  ;;  %v3212_v27 = vmul.f32 %v3209_v22, %v4685_v1  ;;  %v3220_v42 = vsub.f32 %v5636_v43, %v3204_v13  ;;  %v3356_v43 = vld [vmem:[#allocation11 + $0x78] sm:$0xff] }
 0x78c   : > { %3361 = vmatpush.msra.mxu1 %v3356_v43 }
 0x78d   : > { %v3216_v58 = vsub.f32 %v3212_v27, %v3214_v3 }
 0x78e   : > { %3362 = vmatpush.msra.mxu1 %v3355_v38  ;;  %v3448_v38 = vld [vmem:[#allocation13 + $0x60] sm:$0xff] }
 0x78f   : > { %v3218_v26 = vmax.f32 %v3216_v58, 0.0 }
 0x790   : > { %3363 = vmatpush.msra.mxu1 %v3354_v32  ;;  %v3447_v32 = vld [vmem:[#allocation13 + $0x58] sm:$0xff] }
 0x791   : > { %v3222_v36 = vadd.f32 1e-05, %v3218_v26 }
 0x792   : > { %3364 = vmatpush.msra.mxu1 %v3353_v41  ;;  %v3446_v41 = vld [vmem:[#allocation13 + $0x50] sm:$0xff] }
 0x793   : > { %3932 = vrsqrt.f32 %v3222_v36  ;;  %vm3230_vm4 = vweird.f32 %v3222_v36 }
 0x794   : > { %3365 = vmatpush.msra.mxu1 %v3352_v55  ;;  %v3445_v55 = vld [vmem:[#allocation13 + $0x48] sm:$0xff] }
 0x796   : > { %3366 = vmatpush.msra.mxu1 %v3351_v2  ;;  %v3444_v2 = vld [vmem:[#allocation13 + $0x40] sm:$0xff] }
 0x799   : > { %v3933_v59 = vpop.eup %3932 }
 0x79a   : > { %v3225_v10 = vmul.f32 %v3933_v59, %v3222_v36  ;;  %vm3231_vm3 = vweird.f32 %v3933_v59 }
 0x79b   : > { %vm3232_vm5 = vmor %vm3230_vm4, %vm3231_vm3 }
 0x79c   : > { %v3226_v50 = vmul.f32 %v3933_v59, %v3225_v10 }
 0x79e   : > { %v3227_v0 = vmul.f32 0.5, %v3226_v50 }
 0x7a0   : > { %v3228_v7 = vsub.f32 1.5, %v3227_v0 }
 0x7a2   : > { %v3229_v28 = vmul.f32 %v3933_v59, %v3228_v7 }
 0x7a4   : > { %v3233_v37 = vsel %vm3232_vm5, %v3933_v59, %v3229_v28 }
 0x7a5   : > { %v3244_v29 = vmul.f32 %v3233_v37, %v3220_v42 }
 0x7a7   : > { %3282 = vmatmul.f32.vlgmr.msra.gmra.mxu3 %v3244_v29 }
 0x7c8   : > { %v3203_v44 = vpop.xlane.xlu2 %3202 }
 0x7c9   : > { %v3205_v20 = vmul.f32 %v3203_v44, %v4685_v1 }
 0x7ca   : > { %v3211_v17 = vpop.xlane.xlu0 %3210 }
 0x7cb   : > { %v3215_v54 = vmul.f32 %v3205_v20, %v3205_v20  ;;  %v3213_v53 = vmul.f32 %v3211_v17, %v4685_v1  ;;  %v3221_v18 = vsub.f32 %v5641_v14, %v3205_v20  ;;  %v3350_v14 = vld [vmem:[#allocation11 + $0x48] sm:$0xff] }
 0x7cc   : > { %3367 = vmatpush.msra.mxu1 %v3350_v14  ;;  %v3443_v14 = vld [vmem:[#allocation13 + $0x38] sm:$0xff] }
 0x7cd   : > { %v3217_v62 = vsub.f32 %v3213_v53, %v3215_v54 }
 0x7ce   : > { %3368 = vmatpush.msra.mxu1 %v3349_v46  ;;  %v3442_v46 = vld [vmem:[#allocation13 + $0x30] sm:$0xff] }
 0x7cf   : > { %v3219_v61 = vmax.f32 %v3217_v62, 0.0 }
 0x7d0   : > { %3369 = vmatpush.msra.mxu1 %v3348_v45  ;;  %v3441_v45 = vld [vmem:[#allocation13 + $0x28] sm:$0xff] }
 0x7d1   : > { %v3223_v4 = vadd.f32 1e-05, %v3219_v61 }
 0x7d2   : > { %3370 = vmatpush.msra.mxu1 %v3347_v34  ;;  %v3440_v34 = vld [vmem:[#allocation13 + $0x20] sm:$0xff] }
 0x7d3   : > { %3934 = vrsqrt.f32 %v3223_v4  ;;  %vm3240_vm7 = vweird.f32 %v3223_v4 }
 0x7d4   : > { %3371 = vmatpush.msra.mxu1 %v3346_v39  ;;  %v3439_v39 = vld [vmem:[#allocation13 + $0x18] sm:$0xff] }
 0x7d6   : > { %3372 = vmatpush.msra.mxu1 %v3345_v31  ;;  %v3438_v31 = vld [vmem:[#allocation13 + $0x10] sm:$0xff] }
 0x7d8   : > { %3373 = vmatpush.msra.mxu1 %v3344_v48  ;;  %v3437_v48 = vld [vmem:[#allocation13 + $0x8] sm:$0xff] }
 0x7d9   : > { %v3935_v40 = vpop.eup %3934 }
 0x7da   : > { %v3235_v56 = vmul.f32 %v3935_v40, %v3223_v4  ;;  %vm3241_vm6 = vweird.f32 %v3935_v40  ;;  %3374 = vmatpush.msra.mxu1 %v3343_v9  ;;  %v3436_v9 = vld [vmem:[#allocation13] sm:$0xff] }
 0x7db   : > { %vm3242_vm8 = vmor %vm3240_vm7, %vm3241_vm6 }
 0x7dc   : > { %v3236_v6 = vmul.f32 %v3935_v40, %v3235_v56  ;;  %3375 = vmatpush.msra.mxu1 %v3342_v19 }
 0x7de   : > { %v3237_v23 = vmul.f32 0.5, %v3236_v6  ;;  %3376 = vmatpush.msra.mxu1 %v3341_v25 }
 0x7e0   : > { %v3238_v15 = vsub.f32 1.5, %v3237_v23 }
 0x7e2   : > { %v3239_v11 = vmul.f32 %v3935_v40, %v3238_v15 }
 0x7e4   : > { %v3243_v8 = vsel %vm3242_vm8, %v3935_v40, %v3239_v11 }
 0x7e5   : > { %v3245_v47 = vmul.f32 %v3243_v8, %v3221_v18  ;;  %v3796_v8 = vld [vmem:[%s5744_s19] ss:$0 sm:$0xff] }
 0x7e7   : > { %3285 = vmatmul.f32.gmra.mxu3 %v3245_v47 }
 0x82a   : > { %v3283_v57 = vpop.f32.mrf.mxu3 }
 0x82b   : > { %v3284_v24 = vadd.f32 %v3795_v33, %v3283_v57 }
 0x82d   : > { %v3291_v30 = vmul.f32 0.01, %v3284_v24  ;;  %vm3289_vm9 = vcmp.gt.f32.partialorder %v3284_v24, 0.0 }
 0x82f   : > { %v5655_v51 = vsel %vm3289_vm9, %v3284_v24, %v3291_v30 }
 0x830   : > { %3295 = vadd.xlane.f32.xlu1 %v5655_v51  ;;  %v3301_v5 = vmul.f32 %v5655_v51, %v5655_v51 }
 0x832   : > { %3303 = vadd.xlane.f32.xlu2 %v3301_v5 }
 0x86a   : > { %v3286_v63 = vpop.f32.mrf.mxu3 }
 0x86b   : > { %v3287_v12 = vadd.f32 %v3795_v33, %v3286_v63 }
 0x86d   : > { %v3292_v21 = vmul.f32 0.01, %v3287_v12  ;;  %vm3290_vm10 = vcmp.gt.f32.partialorder %v3287_v12, 0.0 }
 0x86f   : > { %v5660_v52 = vsel %vm3290_vm10, %v3287_v12, %v3292_v21 }
 0x870   : > { %3297 = vadd.xlane.f32.xlu0 %v5660_v52  ;;  %v3302_v16 = vmul.f32 %v5660_v52, %v5660_v52 }
 0x872   : > { %3305 = vadd.xlane.f32.xlu1 %v3302_v16  ;;  %v3449_v16 = vld [vmem:[#allocation13 + $0x68] sm:$0xff] }
 0x8a3   : > { %v3296_v60 = vpop.xlane.xlu1 %3295 }
 0x8a4   : > { %v3299_v35 = vmul.f32 %v3296_v60, %v4685_v1 }
 0x8a5   : > { %v3304_v49 = vpop.xlane.xlu2 %3303 }
 0x8a6   : > { %v3309_v13 = vmul.f32 %v3299_v35, %v3299_v35  ;;  %v3307_v22 = vmul.f32 %v3304_v49, %v4685_v1  ;;  %v3315_v7 = vsub.f32 %v5655_v51, %v3299_v35  ;;  %v3451_v51 = vld [vmem:[#allocation13 + $0x78] sm:$0xff] }
 0x8a7   : > { %3456 = vmatpush.msra.mxu2 %v3451_v51 }
 0x8a8   : > { %v3311_v3 = vsub.f32 %v3307_v22, %v3309_v13 }
 0x8aa   : > { %v3313_v27 = vmax.f32 %v3311_v3, 0.0 }
 0x8ac   : > { %v3317_v58 = vadd.f32 1e-05, %v3313_v27 }
 0x8ae   : > { %3936 = vrsqrt.f32 %v3317_v58  ;;  %vm3325_vm12 = vweird.f32 %v3317_v58 }
 0x8b4   : > { %v3937_v26 = vpop.eup %3936 }
 0x8b5   : > { %v3320_v36 = vmul.f32 %v3937_v26, %v3317_v58  ;;  %vm3326_vm11 = vweird.f32 %v3937_v26 }
 0x8b6   : > { %vm3327_vm13 = vmor %vm3325_vm12, %vm3326_vm11 }
 0x8b7   : > { %v3321_v59 = vmul.f32 %v3937_v26, %v3320_v36 }
 0x8b9   : > { %v3322_v10 = vmul.f32 0.5, %v3321_v59 }
 0x8bb   : > { %v3323_v50 = vsub.f32 1.5, %v3322_v10 }
 0x8bd   : > { %v3324_v0 = vmul.f32 %v3937_v26, %v3323_v50 }
 0x8bf   : > { %v3328_v28 = vsel %vm3327_vm13, %v3937_v26, %v3324_v0 }
 0x8c0   : > { %v3339_v42 = vmul.f32 %v3328_v28, %v3315_v7 }
 0x8c2   : > { %3377 = vmatmul.f32.vlgmr.msra.gmra.mxu1 %v3339_v42 }
 0x8e3   : > { %v3298_v37 = vpop.xlane.xlu0 %3297 }
 0x8e4   : > { %v3300_v29 = vmul.f32 %v3298_v37, %v4685_v1 }
 0x8e5   : > { %v3306_v44 = vpop.xlane.xlu1 %3305 }
 0x8e6   : > { %v3310_v20 = vmul.f32 %v3300_v29, %v3300_v29  ;;  %v3308_v17 = vmul.f32 %v3306_v44, %v4685_v1  ;;  %v3316_v15 = vsub.f32 %v5660_v52, %v3300_v29  ;;  %v3450_v52 = vld [vmem:[#allocation13 + $0x70] sm:$0xff] }
 0x8e7   : > { %3457 = vmatpush.msra.mxu2 %v3450_v52 }
 0x8e8   : > { %v3312_v54 = vsub.f32 %v3308_v17, %v3310_v20 }
 0x8e9   : > { %3458 = vmatpush.msra.mxu2 %v3449_v16 }
 0x8ea   : > { %v3314_v53 = vmax.f32 %v3312_v54, 0.0 }
 0x8eb   : > { %3459 = vmatpush.msra.mxu2 %v3448_v38 }
 0x8ec   : > { %v3318_v62 = vadd.f32 1e-05, %v3314_v53 }
 0x8ed   : > { %3460 = vmatpush.msra.mxu2 %v3447_v32 }
 0x8ee   : > { %3938 = vrsqrt.f32 %v3318_v62  ;;  %vm3335_vm15 = vweird.f32 %v3318_v62 }
 0x8ef   : > { %3461 = vmatpush.msra.mxu2 %v3446_v41 }
 0x8f1   : > { %3462 = vmatpush.msra.mxu2 %v3445_v55 }
 0x8f3   : > { %3463 = vmatpush.msra.mxu2 %v3444_v2 }
 0x8f4   : > { %v3939_v61 = vpop.eup %3938 }
 0x8f5   : > { %v3330_v4 = vmul.f32 %v3939_v61, %v3318_v62  ;;  %vm3336_vm14 = vweird.f32 %v3939_v61  ;;  %3464 = vmatpush.msra.mxu2 %v3443_v14 }
 0x8f6   : > { %vm3337_vm0 = vmor %vm3335_vm15, %vm3336_vm14 }
 0x8f7   : > { %v3331_v40 = vmul.f32 %v3939_v61, %v3330_v4  ;;  %3465 = vmatpush.msra.mxu2 %v3442_v46 }
 0x8f9   : > { %v3332_v56 = vmul.f32 0.5, %v3331_v40  ;;  %3466 = vmatpush.msra.mxu2 %v3441_v45 }
 0x8fb   : > { %v3333_v6 = vsub.f32 1.5, %v3332_v56  ;;  %3467 = vmatpush.msra.mxu2 %v3440_v34 }
 0x8fd   : > { %v3334_v23 = vmul.f32 %v3939_v61, %v3333_v6  ;;  %3468 = vmatpush.msra.mxu2 %v3439_v39 }
 0x8ff   : > { %v3338_v11 = vsel %vm3337_vm0, %v3939_v61, %v3334_v23  ;;  %3469 = vmatpush.msra.mxu2 %v3438_v31 }
 0x900   : > { %v3340_v18 = vmul.f32 %v3338_v11, %v3316_v15 }
 0x901   : > { %3470 = vmatpush.msra.mxu2 %v3437_v48 }
 0x902   : > { %3380 = vmatmul.f32.gmra.mxu1 %v3340_v18 }
 0x903   : > { %3471 = vmatpush.msra.mxu2 %v3436_v9 }
 0x93f   : > { %v3378_v47 = vpop.f32.mrf.mxu1 }
 0x940   : > { %v3379_v33 = vadd.f32 %v3796_v8, %v3378_v47 }
 0x942   : > { %v3386_v57 = vmul.f32 0.01, %v3379_v33  ;;  %vm3384_vm1 = vcmp.gt.f32.partialorder %v3379_v33, 0.0 }
 0x944   : > { %v5674_v24 = vsel %vm3384_vm1, %v3379_v33, %v3386_v57 }
 0x945   : > { %3390 = vadd.xlane.f32.xlu2 %v5674_v24  ;;  %v3396_v30 = vmul.f32 %v5674_v24, %v5674_v24 }
 0x947   : > { %3398 = vadd.xlane.f32.xlu0 %v3396_v30 }
 0x97f   : > { %v3381_v5 = vpop.f32.mrf.mxu1 }
 0x980   : > { %v3382_v43 = vadd.f32 %v3796_v8, %v3381_v5 }
 0x982   : > { %v3387_v63 = vmul.f32 0.01, %v3382_v43  ;;  %vm3385_vm2 = vcmp.gt.f32.partialorder %v3382_v43, 0.0 }
 0x984   : > { %v5679_v12 = vsel %vm3385_vm2, %v3382_v43, %v3387_v63 }
 0x985   : > { %3392 = vadd.xlane.f32.xlu1 %v5679_v12  ;;  %v3397_v21 = vmul.f32 %v5679_v12, %v5679_v12 }
 0x987   : > { %3400 = vadd.xlane.f32.xlu2 %v3397_v21 }
 0x9b8   : > { %v3391_v19 = vpop.xlane.xlu2 %3390 }
 0x9b9   : > { %v3394_v25 = vmul.f32 %v3391_v19, %v4685_v1 }
 0x9ba   : > { %v3399_v60 = vpop.xlane.xlu0 %3398 }
 0x9bb   : > { %v3404_v35 = vmul.f32 %v3394_v25, %v3394_v25  ;;  %v3402_v49 = vmul.f32 %v3399_v60, %v4685_v1  ;;  %v3410_v50 = vsub.f32 %v5674_v24, %v3394_v25 }
 0x9bd   : > { %v3406_v13 = vsub.f32 %v3402_v49, %v3404_v35 }
 0x9bf   : > { %v3408_v22 = vmax.f32 %v3406_v13, 0.0 }
 0x9c1   : > { %v3412_v3 = vadd.f32 1e-05, %v3408_v22 }
 0x9c3   : > { %3940 = vrsqrt.f32 %v3412_v3  ;;  %vm3420_vm4 = vweird.f32 %v3412_v3 }
 0x9c9   : > { %v3941_v27 = vpop.eup %3940 }
 0x9ca   : > { %v3415_v58 = vmul.f32 %v3941_v27, %v3412_v3  ;;  %vm3421_vm3 = vweird.f32 %v3941_v27 }
 0x9cb   : > { %vm3422_vm5 = vmor %vm3420_vm4, %vm3421_vm3 }
 0x9cc   : > { %v3416_v26 = vmul.f32 %v3941_v27, %v3415_v58 }
 0x9ce   : > { %v3417_v36 = vmul.f32 0.5, %v3416_v26 }
 0x9d0   : > { %v3418_v59 = vsub.f32 1.5, %v3417_v36 }
 0x9d2   : > { %v3419_v10 = vmul.f32 %v3941_v27, %v3418_v59 }
 0x9d4   : > { %v3423_v0 = vsel %vm3422_vm5, %v3941_v27, %v3419_v10 }
 0x9d5   : > { %v3434_v7 = vmul.f32 %v3423_v0, %v3410_v50 }
 0x9d7   : > { %3472 = vmatmul.f32.vlgmr.msra.gmra.mxu2 %v3434_v7 }
 0x9f8   : > { %v3393_v28 = vpop.xlane.xlu1 %3392 }
 0x9f9   : > { %v3395_v42 = vmul.f32 %v3393_v28, %v4685_v1 }
 0x9fa   : > { %v3401_v37 = vpop.xlane.xlu2 %3400 }
 0x9fb   : > { %v3405_v29 = vmul.f32 %v3395_v42, %v3395_v42  ;;  %v3403_v44 = vmul.f32 %v3401_v37, %v4685_v1  ;;  %v3411_v6 = vsub.f32 %v5679_v12, %v3395_v42  ;;  %v3797_v1 = vld [vmem:[%s5793_s30] ss:$0 sm:$0xff]  ;;  %s4174_s30 = scalar_lea.hbm %s5795_s24, 32 }
 0x9fc   : > { %p4176_p4 = scmp.lt.s32.totalorder %s4174_s30, %s4170_s2 }
 0x9fd   : > { %v3407_v20 = vsub.f32 %v3403_v44, %v3405_v29 }
 0x9fe   : > { %p4177_p7 = por %p4176_p4, %p4175_p3 }
 0x9ff   : > { %v3409_v17 = vmax.f32 %v3407_v20, 0.0 }
 0xa00   : > { %p4178_p8 = pnand %p4177_p7, %p4173_p2 }
 0xa01   : > { %v3413_v54 = vadd.f32 1e-05, %v3409_v17 }
 0xa03   : > { %3942 = vrsqrt.f32 %v3413_v54  ;;  %vm3430_vm7 = vweird.f32 %v3413_v54 }
 0xa09   : > { %v3943_v53 = vpop.eup %3942 }
 0xa0a   : > { %v3425_v62 = vmul.f32 %v3943_v53, %v3413_v54  ;;  %vm3431_vm6 = vweird.f32 %v3943_v53 }
 0xa0b   : > { %vm3432_vm8 = vmor %vm3430_vm7, %vm3431_vm6 }
 0xa0c   : > { %v3426_v61 = vmul.f32 %v3943_v53, %v3425_v62 }
 0xa0e   : > { %v3427_v4 = vmul.f32 0.5, %v3426_v61 }
 0xa10   : > { %v3428_v40 = vsub.f32 1.5, %v3427_v4 }
 0xa12   : > { %v3429_v56 = vmul.f32 %v3943_v53, %v3428_v40 }
 0xa14   : > { %v3433_v23 = vsel %vm3432_vm8, %v3943_v53, %v3429_v56 }
 0xa15   : > { %v3435_v15 = vmul.f32 %v3433_v23, %v3411_v6 }
 0xa17   : > { %3475 = vmatmul.f32.gmra.mxu2 %v3435_v15 }
 0xa5a   : > { %v3473_v11 = vpop.f32.mrf.mxu2 }
 0xa5b   : > { %v3474_v18 = vadd.f32 %v3797_v1, %v3473_v11 }
 0xa5d   : > { %3479 = vst [vmem:[%s766_s4] sm:$0xff] %v3474_v18 }
 0xa9a   : > { %v3476_v8 = vpop.f32.mrf.mxu2 }
 0xa9b   : > { %v3477_v47 = vadd.f32 %v3797_v1, %v3476_v8 }
 0xa9d   : > { %3480 = vst [vmem:[%s766_s4 + $0x8] sm:$0xff] %v3477_v47 }
 0xa9e   : > { %4181 = shalt.err (!%p4178_p8)
}
 0xa9f   : > { %s4244_s3 = smov 128   ;;  %s4245_s4 = smov 8  }
 0xaa0   : > { %3701 = dma.vmem_to_hbm [thread:$0]  (%p4394_p5), %s3495_s25, 256, %s3497_s5, %s3482_s27, %s4244_s3, %s4244_s3, %s4245_s4  }
 0xaa1 PF: > { %s5796_s1 = sld [smem:[#allocation23_spill]] }
 0xaa2   : > { %s5797_s26 = sld [smem:[#allocation20_spill]] }
 0xaa7   : > { %p3743_p9 = scmp.ge.s32.totalorder %s5796_s1, 2 }
 0xaa8   : > { %s3511_s22 = sand.u32 1, %s5797_s26  }
 0xaa9   : > { %p3726_p10 = pnand %p3743_p9, %p4398_p6  ;;  %s3512_s7 = scalar_lea.sflag [#allocation4], %s3511_s22 }
 0xaab   : > { %p3727_p11 = pneg %p3726_p10 }
 0xaad   : > { %4215 = dma.done.wait (%p3727_p11), %s3512_s7, 256  }
 0xaae   : > { %4217 = vsyncadd (%p3727_p11), %s3512_s7, 4294967040  ;;  %s5799_s27 = sld [smem:[#allocation24_spill]] }
 0xaaf   : > { %s5800_s2 = sld [smem:[#allocation21_spill]] }
 0xab0   : > { %s5801_s25 = sld [smem:[#allocation22_spill]] }
 0xab1   : > { %s5802_s26 = sld [smem:[#allocation25_spill]] }
 0xab4   : > { %p35_p12 = scmp.ge.s32.totalorder %s5799_s27, 4  }
 0xab6   :  { %37 = sbr.rel (!%p35_p12) target bundleno = 18 (0x12), region = 168 }
 0xabb   :  { %3518 = vsyncpa [#allocation3], 1 }
 0xabc   :  { %3520 = vsyncpa [#allocation3 + $0x1], 1 }
 0xabd   :  { %3521 = vsyncpa [#allocation6], 1 }
 0xabe   :  { %3522 = vsyncpa [#allocation9], 1 }
 0xabf   :  { %3523 = vsyncpa [#allocation12], 1 }
 0xac0   :  { %3524 = vsyncpa [#allocation4], 1 }
 0xac1   :  { %3526 = vsyncpa [#allocation4 + $0x1], 1 }

</bundles_post_ra>
